<compile_context>
chip_gen: v5e
topology: v5e:2x2
jax: 0.10.0
libtpu: 0.0.40
codegen_flags: <defaults>
</compile_context>

<pallas_src>
import jax
import jax.numpy as jnp
from jax.experimental import pallas as pl
from jax.experimental.pallas import tpu as pltpu


# ----------------------------------------------------------------------------
# 3x3 conv kernel: per-tap accumulation from one padded NHWC block (no im2col)
# ----------------------------------------------------------------------------

def _conv3x3_kernel(xp_ref, w_ref, b_ref, o_ref):
    # xp_ref: (1, H+2, W+2, Cin)   w_ref: (3, 3, Cin, Cout)
    # b_ref:  (1, Cout)            o_ref: (1, H*W, Cout)
    _, hp, wp, cin = xp_ref.shape
    H, W = hp - 2, wp - 2
    cout = o_ref.shape[2]

    xp = xp_ref[0]                                   # one VMEM load of the tile
    acc = jnp.zeros((H * W, cout), jnp.float32)
    for ky in range(3):
        for kx in range(3):
            patch = xp[ky:ky + H, kx:kx + W, :].reshape(H * W, cin)
            wtap = w_ref[ky, kx]                     # (Cin, Cout)
            if cin == 1:
                # degenerate K=1: cheaper as a VPU broadcast-multiply
                acc = acc + patch * wtap             # (HW,1)*(1,Cout)
            else:
                acc = acc + jnp.dot(
                    patch.astype(jnp.bfloat16),
                    wtap.astype(jnp.bfloat16),
                    preferred_element_type=jnp.float32)
    o_ref[0] = acc + b_ref[...]


def conv3x3(x_nhwc, w, b):
    """3x3 conv, stride 1, pad 1.  x: (B,H,W,Cin), w: (3,3,Cin,Cout), b: (Cout,)."""
    B, H, W, Cin = x_nhwc.shape
    Cout = w.shape[-1]
    xp = jnp.pad(x_nhwc.astype(jnp.float32), ((0, 0), (1, 1), (1, 1), (0, 0)))
    out = pl.pallas_call(
        _conv3x3_kernel,
        out_shape=jax.ShapeDtypeStruct((B, H * W, Cout), jnp.float32),
        grid=(B,),
        in_specs=[
            pl.BlockSpec((1, H + 2, W + 2, Cin), lambda i: (i, 0, 0, 0)),
            pl.BlockSpec((3, 3, Cin, Cout), lambda i: (0, 0, 0, 0)),
            pl.BlockSpec((1, Cout), lambda i: (0, 0)),
        ],
        out_specs=pl.BlockSpec((1, H * W, Cout), lambda i: (i, 0, 0)),
        compiler_params=pltpu.CompilerParams(
            dimension_semantics=("parallel",),
            vmem_limit_bytes=32 * 1024 * 1024),
    )(xp, w.astype(jnp.float32), b.reshape(1, Cout).astype(jnp.float32))
    return out.reshape(B, H, W, Cout)


# ----------------------------------------------------------------------------
# Fused non-local block kernel
#   grid = (B, num_query_tiles); scratch holds the (pooled) key projections.
# ----------------------------------------------------------------------------

def _nonlocal_kernel(xq_ref, xk_ref, wt_ref, bt_ref, wg_ref, bg_ref,
                     wp_ref, bp_ref, ww_ref, bw_ref, o_ref, gk_ref, pk_ref):
    # xq_ref: (1, TQ, C)  query tile of the shallow features (also the residual)
    # xk_ref: (1, 4, Np, C) the same features, 2x2-pool-block-major (key path)
    # wt/bt: theta (C,Ci)/(1,Ci); wg/bg: g; wp/bp: phi; ww/bw: BN-folded W conv
    # o_ref: (1, TQ, C)
    # gk_ref/pk_ref: VMEM scratch (Np, Ci) bf16 -- pooled g / phi projections
    q = pl.program_id(1)

    @pl.when(q == 0)
    def _():
        # Recompute the pooled key projections once per batch element.
        _, four, np_, c = xk_ref.shape
        xk = xk_ref[0].reshape(four * np_, c).astype(jnp.bfloat16)
        g_all = (jnp.dot(xk, wg_ref[...].astype(jnp.bfloat16),
                         preferred_element_type=jnp.float32) + bg_ref[...])
        p_all = (jnp.dot(xk, wp_ref[...].astype(jnp.bfloat16),
                         preferred_element_type=jnp.float32) + bp_ref[...])

        def pool4(a):  # 2x2 max-pool: rows are grouped by pool-block position
            return jnp.maximum(
                jnp.maximum(a[0 * np_:1 * np_], a[1 * np_:2 * np_]),
                jnp.maximum(a[2 * np_:3 * np_], a[3 * np_:4 * np_]))

        gk_ref[...] = pool4(g_all).astype(jnp.bfloat16)
        pk_ref[...] = pool4(p_all).astype(jnp.bfloat16)

    xq = xq_ref[0]                                              # (TQ, C) f32
    theta = (jnp.dot(xq.astype(jnp.bfloat16),
                     wt_ref[...].astype(jnp.bfloat16),
                     preferred_element_type=jnp.float32) + bt_ref[...])

    # scores = theta @ phi_pool^T, contracted in-kernel (no host transpose).
    scores = jax.lax.dot_general(
        theta.astype(jnp.bfloat16), pk_ref[...],
        dimension_numbers=(((1,), (1,)), ((), ())),
        preferred_element_type=jnp.float32)                     # (TQ, Np)

    m = jnp.max(scores, axis=-1, keepdims=True)
    e = jnp.exp(scores - m)
    denom = jnp.sum(e, axis=-1, keepdims=True)
    y = jnp.dot(e.astype(jnp.bfloat16), gk_ref[...],
                preferred_element_type=jnp.float32)             # (TQ, Ci)
    # Normalize after P@G: divides Ci columns instead of Np; EUP reciprocal.
    y = y * pl.reciprocal(denom, approx=True)

    wy = (jnp.dot(y.astype(jnp.bfloat16),
                  ww_ref[...].astype(jnp.bfloat16),
                  preferred_element_type=jnp.float32) + bw_ref[...])
    o_ref[0] = wy + xq                                          # residual add


def nonlocal_block(xf, H, W, p):
    """Fused NONLocalBlock2D(32, sub_sample=True, bn_layer=True) on (B,N,32)."""
    B, N, C = xf.shape
    Ci = p["theta_w"].shape[1]
    Np = N // 4

    # Key-path view: (B, 4, Np, C), axis 1 = position inside each 2x2 pool block
    # so the in-kernel pool is an elementwise max over 4 row-groups.
    xk = (xf.reshape(B, H // 2, 2, W // 2, 2, C)
            .transpose(0, 2, 4, 1, 3, 5)
            .reshape(B, 4, Np, C))

    # Fold BatchNorm (eval-mode, running stats) into the W 1x1 conv.
    s = p["bn_gamma"] * jax.lax.rsqrt(p["bn_var"] + jnp.float32(1e-5))
    w_fold = p["W_w"] * s[None, :]
    b_fold = (p["W_b"] - p["bn_mean"]) * s + p["bn_beta"]

    TQ = 128 if (N % 128 == 0 and N >= 128) else N
    grid = (B, N // TQ)

    return pl.pallas_call(
        _nonlocal_kernel,
        out_shape=jax.ShapeDtypeStruct((B, N, C), jnp.float32),
        grid=grid,
        in_specs=[
            pl.BlockSpec((1, TQ, C), lambda b, q: (b, q, 0)),      # queries/res
            pl.BlockSpec((1, 4, Np, C), lambda b, q: (b, 0, 0, 0)),  # key path
            pl.BlockSpec((C, Ci), lambda b, q: (0, 0)),            # theta_w
            pl.BlockSpec((1, Ci), lambda b, q: (0, 0)),            # theta_b
            pl.BlockSpec((C, Ci), lambda b, q: (0, 0)),            # g_w
            pl.BlockSpec((1, Ci), lambda b, q: (0, 0)),            # g_b
            pl.BlockSpec((C, Ci), lambda b, q: (0, 0)),            # phi_w
            pl.BlockSpec((1, Ci), lambda b, q: (0, 0)),            # phi_b
            pl.BlockSpec((Ci, C), lambda b, q: (0, 0)),            # W (BN folded)
            pl.BlockSpec((1, C), lambda b, q: (0, 0)),             # b (BN folded)
        ],
        out_specs=pl.BlockSpec((1, TQ, C), lambda b, q: (b, q, 0)),
        scratch_shapes=[pltpu.VMEM((Np, Ci), jnp.bfloat16),
                        pltpu.VMEM((Np, Ci), jnp.bfloat16)],
        compiler_params=pltpu.CompilerParams(
            dimension_semantics=("parallel", "arbitrary"),
            vmem_limit_bytes=32 * 1024 * 1024),
    )(xf.astype(jnp.float32), xk.astype(jnp.float32),
      p["theta_w"].astype(jnp.float32),
      p["theta_b"].reshape(1, Ci).astype(jnp.float32),
      p["g_w"].astype(jnp.float32),
      p["g_b"].reshape(1, Ci).astype(jnp.float32),
      p["phi_w"].astype(jnp.float32),
      p["phi_b"].reshape(1, Ci).astype(jnp.float32),
      w_fold.astype(jnp.float32),
      b_fold.reshape(1, C).astype(jnp.float32))


# ----------------------------------------------------------------------------
# Full forward pass
# ----------------------------------------------------------------------------

@jax.jit
def attention_zbw_forward(x_nchw, p):
    x = jnp.transpose(x_nchw, (0, 2, 3, 1)).astype(jnp.float32)   # NCHW -> NHWC
    B, H, W, _ = x.shape

    shallow = conv3x3(x, p["shallow_w"], p["shallow_b"])          # (B,H,W,32)
    C = shallow.shape[-1]
    xf = shallow.reshape(B, H * W, C)

    z = nonlocal_block(xf, H, W, p)                               # (B,N,32)
    z = z.reshape(B, H, W, C)

    l1 = conv3x3(z, p["last1_w"], p["last1_b"])                   # (B,H,W,32)
    l2 = conv3x3(l1, p["last2_w"], p["last2_b"])                  # (B,H,W,1)
    return jnp.transpose(l2, (0, 3, 1, 2))                        # NCHW


# ----------------------------------------------------------------------------
# Deterministic parameter init (PyTorch-like uniform fan-in scaling)
# ----------------------------------------------------------------------------

def init_params(key):
    ks = jax.random.split(key, 14)

    def u(k, shape, fan_in):
        bound = 1.0 / jnp.sqrt(jnp.float32(fan_in))
        return jax.random.uniform(k, shape, jnp.float32, -bound, bound)

    return {
        "shallow_w": u(ks[0], (3, 3, 1, 32), 9 * 1),
        "shallow_b": u(ks[1], (32,), 9 * 1),
        "g_w": u(ks[2], (32, 16), 32),
        "g_b": u(ks[3], (16,), 32),
        "theta_w": u(ks[4], (32, 16), 32),
        "theta_b": u(ks[5], (16,), 32),
        "phi_w": u(ks[6], (32, 16), 32),
        "phi_b": u(ks[7], (16,), 32),
        "W_w": u(ks[8], (16, 32), 16),
        "W_b": u(ks[9], (32,), 16),
        # BatchNorm after W conv: weight=0, bias=0 (PyTorch __init__), default
        # running stats, eval-mode semantics.
        "bn_gamma": jnp.zeros((32,), jnp.float32),
        "bn_beta": jnp.zeros((32,), jnp.float32),
        "bn_mean": jnp.zeros((32,), jnp.float32),
        "bn_var": jnp.ones((32,), jnp.float32),
        "last1_w": u(ks[10], (3, 3, 32, 32), 9 * 32),
        "last1_b": u(ks[11], (32,), 9 * 32),
        "last2_w": u(ks[12], (3, 3, 32, 1), 9 * 32),
        "last2_b": u(ks[13], (1,), 9 * 32),
    }


# ----------------------------------------------------------------------------
# Pure-JAX reference (numerical sanity check)
# ----------------------------------------------------------------------------

def reference_forward(x_nchw, p):
    x = jnp.transpose(x_nchw, (0, 2, 3, 1)).astype(jnp.float32)

    def conv3_ref(y, w, b):
        return jax.lax.conv_general_dilated(
            y, w, (1, 1), "SAME",
            dimension_numbers=("NHWC", "HWIO", "NHWC")) + b

    def c1(y, w, b):
        return jnp.einsum("bnc,cd->bnd", y, w) + b

    def pool(y):
        B_, H_, W_, Ci = y.shape
        return y.reshape(B_, H_ // 2, 2, W_ // 2, 2, Ci).max(axis=(2, 4)).reshape(
            B_, (H_ // 2) * (W_ // 2), Ci)

    shallow = conv3_ref(x, p["shallow_w"], p["shallow_b"])
    B, H, W, C = shallow.shape
    xf = shallow.reshape(B, H * W, C)
    g_x = pool(c1(xf, p["g_w"], p["g_b"]).reshape(B, H, W, -1))
    theta_x = c1(xf, p["theta_w"], p["theta_b"])
    phi_x = pool(c1(xf, p["phi_w"], p["phi_b"]).reshape(B, H, W, -1))
    f = jnp.einsum("bnc,bmc->bnm", theta_x, phi_x)
    fdc = jax.nn.softmax(f, axis=-1)
    y = jnp.einsum("bnm,bmc->bnc", fdc, g_x)
    wy = c1(y, p["W_w"], p["W_b"])
    inv = 1.0 / jnp.sqrt(p["bn_var"] + 1e-5)
    z = (wy - p["bn_mean"]) * inv * p["bn_gamma"] + p["bn_beta"] + xf
    z = z.reshape(B, H, W, C)
    l1 = conv3_ref(z, p["last1_w"], p["last1_b"])
    l2 = conv3_ref(l1, p["last2_w"], p["last2_b"])
    return jnp.transpose(l2, (0, 3, 1, 2))


if __name__ == "__main__":
    key = jax.random.PRNGKey(0)
    k_x, k_p, k_bn = jax.random.split(key, 3)
    x = jax.random.normal(k_x, (2, 1, 16, 16), jnp.float32)   # NCHW, like PyTorch
    params = init_params(k_p)

    out = jax.block_until_ready(attention_zbw_forward(x, params))
    assert out.shape == (2, 1, 16, 16), out.shape
    ref = reference_forward(x, params)
    assert jnp.allclose(out, ref, atol=5e-2, rtol=5e-2), (
        float(jnp.max(jnp.abs(out - ref))))

    # Second check with non-trivial BN stats so the attention branch actually
    # contributes to the output (the faithful init has bn gamma=0).
    kb1, kb2, kb3 = jax.random.split(k_bn, 3)
    p2 = dict(params)
    p2["bn_gamma"] = jnp.full((32,), 0.5, jnp.float32)
    p2["bn_beta"] = 0.1 * jax.random.normal(kb1, (32,), jnp.float32)
    p2["bn_mean"] = 0.1 * jax.random.normal(kb2, (32,), jnp.float32)
    p2["bn_var"] = jnp.abs(jax.random.normal(kb3, (32,), jnp.float32)) + 0.5
    out2 = jax.block_until_ready(attention_zbw_forward(x, p2))
    ref2 = reference_forward(x, p2)
    assert jnp.allclose(out2, ref2, atol=5e-2, rtol=5e-2), (
        float(jnp.max(jnp.abs(out2 - ref2))))

    print("KERNEL_OK")
</pallas_src>

<mosaic_0001>
module attributes {stable_mosaic.version = 11 : i64} {
  func.func @_conv3x3_kernel(%arg0: i32, %arg1: memref<1x18x18x1xf32, #tpu.memory_space<vmem>>, %arg2: memref<3x3x1x32xf32, #tpu.memory_space<vmem>>, %arg3: memref<1x32xf32, #tpu.memory_space<vmem>>, %arg4: memref<1x256x32xf32, #tpu.memory_space<vmem>>) attributes {dimension_semantics = [#tpu.dimension_semantics<parallel>], iteration_bounds = array<i64: 2>, scalar_prefetch = 0 : i64, scratch_operands = 0 : i64, tpu.core_type = #tpu.core_type<tc>, window_params = [{transform_indices = @transform_0, window_bounds = array<i64: 1, 18, 18, 1>}, {pipeline_mode = #tpu.pipeline_mode<synchronous>, transform_indices = @transform_1, window_bounds = array<i64: 3, 3, 1, 32>}, {pipeline_mode = #tpu.pipeline_mode<synchronous>, transform_indices = @transform_2, window_bounds = array<i64: 1, 32>}, {transform_indices = @transform_3, window_bounds = array<i64: 1, 256, 32>}]} {
    %c0 = arith.constant 0 : index
    %c0_0 = arith.constant 0 : index
    %c0_1 = arith.constant 0 : index
    %c0_2 = arith.constant 0 : index
    %0 = vector.load %arg1[%c0, %c0_0, %c0_1, %c0_2] : memref<1x18x18x1xf32, #tpu.memory_space<vmem>>, vector<1x18x18x1xf32>
    %1 = vector.shape_cast %0 : vector<1x18x18x1xf32> to vector<18x18x1xf32>
    %cst = arith.constant 0.000000e+00 : f32
    %2 = vector.broadcast %cst : f32 to vector<256x32xf32>
    %3 = vector.extract_strided_slice %1 {offsets = [0, 0, 0], sizes = [16, 16, 1], strides = [1, 1, 1]} : vector<18x18x1xf32> to vector<16x16x1xf32>
    %4 = vector.shape_cast %3 : vector<16x16x1xf32> to vector<256x1xf32>
    %c0_3 = arith.constant 0 : index
    %c0_4 = arith.constant 0 : index
    %c0_5 = arith.constant 0 : index
    %c0_6 = arith.constant 0 : index
    %5 = vector.load %arg2[%c0_3, %c0_4, %c0_5, %c0_6] : memref<3x3x1x32xf32, #tpu.memory_space<vmem>>, vector<1x1x1x32xf32>
    %6 = vector.shape_cast %5 : vector<1x1x1x32xf32> to vector<1x32xf32>
    %7 = vector.broadcast %4 : vector<256x1xf32> to vector<256x32xf32>
    %8 = vector.broadcast %6 : vector<1x32xf32> to vector<256x32xf32>
    %9 = arith.mulf %7, %8 : vector<256x32xf32>
    %10 = arith.addf %2, %9 : vector<256x32xf32>
    %11 = vector.extract_strided_slice %1 {offsets = [0, 1, 0], sizes = [16, 16, 1], strides = [1, 1, 1]} : vector<18x18x1xf32> to vector<16x16x1xf32>
    %12 = vector.shape_cast %11 : vector<16x16x1xf32> to vector<256x1xf32>
    %c0_7 = arith.constant 0 : index
    %c1 = arith.constant 1 : index
    %c0_8 = arith.constant 0 : index
    %c0_9 = arith.constant 0 : index
    %13 = vector.load %arg2[%c0_7, %c1, %c0_8, %c0_9] : memref<3x3x1x32xf32, #tpu.memory_space<vmem>>, vector<1x1x1x32xf32>
    %14 = vector.shape_cast %13 : vector<1x1x1x32xf32> to vector<1x32xf32>
    %15 = vector.broadcast %12 : vector<256x1xf32> to vector<256x32xf32>
    %16 = vector.broadcast %14 : vector<1x32xf32> to vector<256x32xf32>
    %17 = arith.mulf %15, %16 : vector<256x32xf32>
    %18 = arith.addf %10, %17 : vector<256x32xf32>
    %19 = vector.extract_strided_slice %1 {offsets = [0, 2, 0], sizes = [16, 16, 1], strides = [1, 1, 1]} : vector<18x18x1xf32> to vector<16x16x1xf32>
    %20 = vector.shape_cast %19 : vector<16x16x1xf32> to vector<256x1xf32>
    %c0_10 = arith.constant 0 : index
    %c2 = arith.constant 2 : index
    %c0_11 = arith.constant 0 : index
    %c0_12 = arith.constant 0 : index
    %21 = vector.load %arg2[%c0_10, %c2, %c0_11, %c0_12] : memref<3x3x1x32xf32, #tpu.memory_space<vmem>>, vector<1x1x1x32xf32>
    %22 = vector.shape_cast %21 : vector<1x1x1x32xf32> to vector<1x32xf32>
    %23 = vector.broadcast %20 : vector<256x1xf32> to vector<256x32xf32>
    %24 = vector.broadcast %22 : vector<1x32xf32> to vector<256x32xf32>
    %25 = arith.mulf %23, %24 : vector<256x32xf32>
    %26 = arith.addf %18, %25 : vector<256x32xf32>
    %27 = vector.extract_strided_slice %1 {offsets = [1, 0, 0], sizes = [16, 16, 1], strides = [1, 1, 1]} : vector<18x18x1xf32> to vector<16x16x1xf32>
    %28 = vector.shape_cast %27 : vector<16x16x1xf32> to vector<256x1xf32>
    %c1_13 = arith.constant 1 : index
    %c0_14 = arith.constant 0 : index
    %c0_15 = arith.constant 0 : index
    %c0_16 = arith.constant 0 : index
    %29 = vector.load %arg2[%c1_13, %c0_14, %c0_15, %c0_16] : memref<3x3x1x32xf32, #tpu.memory_space<vmem>>, vector<1x1x1x32xf32>
    %30 = vector.shape_cast %29 : vector<1x1x1x32xf32> to vector<1x32xf32>
    %31 = vector.broadcast %28 : vector<256x1xf32> to vector<256x32xf32>
    %32 = vector.broadcast %30 : vector<1x32xf32> to vector<256x32xf32>
    %33 = arith.mulf %31, %32 : vector<256x32xf32>
    %34 = arith.addf %26, %33 : vector<256x32xf32>
    %35 = vector.extract_strided_slice %1 {offsets = [1, 1, 0], sizes = [16, 16, 1], strides = [1, 1, 1]} : vector<18x18x1xf32> to vector<16x16x1xf32>
    %36 = vector.shape_cast %35 : vector<16x16x1xf32> to vector<256x1xf32>
    %c1_17 = arith.constant 1 : index
    %c1_18 = arith.constant 1 : index
    %c0_19 = arith.constant 0 : index
    %c0_20 = arith.constant 0 : index
    %37 = vector.load %arg2[%c1_17, %c1_18, %c0_19, %c0_20] : memref<3x3x1x32xf32, #tpu.memory_space<vmem>>, vector<1x1x1x32xf32>
    %38 = vector.shape_cast %37 : vector<1x1x1x32xf32> to vector<1x32xf32>
    %39 = vector.broadcast %36 : vector<256x1xf32> to vector<256x32xf32>
    %40 = vector.broadcast %38 : vector<1x32xf32> to vector<256x32xf32>
    %41 = arith.mulf %39, %40 : vector<256x32xf32>
    %42 = arith.addf %34, %41 : vector<256x32xf32>
    %43 = vector.extract_strided_slice %1 {offsets = [1, 2, 0], sizes = [16, 16, 1], strides = [1, 1, 1]} : vector<18x18x1xf32> to vector<16x16x1xf32>
    %44 = vector.shape_cast %43 : vector<16x16x1xf32> to vector<256x1xf32>
    %c1_21 = arith.constant 1 : index
    %c2_22 = arith.constant 2 : index
    %c0_23 = arith.constant 0 : index
    %c0_24 = arith.constant 0 : index
    %45 = vector.load %arg2[%c1_21, %c2_22, %c0_23, %c0_24] : memref<3x3x1x32xf32, #tpu.memory_space<vmem>>, vector<1x1x1x32xf32>
    %46 = vector.shape_cast %45 : vector<1x1x1x32xf32> to vector<1x32xf32>
    %47 = vector.broadcast %44 : vector<256x1xf32> to vector<256x32xf32>
    %48 = vector.broadcast %46 : vector<1x32xf32> to vector<256x32xf32>
    %49 = arith.mulf %47, %48 : vector<256x32xf32>
    %50 = arith.addf %42, %49 : vector<256x32xf32>
    %51 = vector.extract_strided_slice %1 {offsets = [2, 0, 0], sizes = [16, 16, 1], strides = [1, 1, 1]} : vector<18x18x1xf32> to vector<16x16x1xf32>
    %52 = vector.shape_cast %51 : vector<16x16x1xf32> to vector<256x1xf32>
    %c2_25 = arith.constant 2 : index
    %c0_26 = arith.constant 0 : index
    %c0_27 = arith.constant 0 : index
    %c0_28 = arith.constant 0 : index
    %53 = vector.load %arg2[%c2_25, %c0_26, %c0_27, %c0_28] : memref<3x3x1x32xf32, #tpu.memory_space<vmem>>, vector<1x1x1x32xf32>
    %54 = vector.shape_cast %53 : vector<1x1x1x32xf32> to vector<1x32xf32>
    %55 = vector.broadcast %52 : vector<256x1xf32> to vector<256x32xf32>
    %56 = vector.broadcast %54 : vector<1x32xf32> to vector<256x32xf32>
    %57 = arith.mulf %55, %56 : vector<256x32xf32>
    %58 = arith.addf %50, %57 : vector<256x32xf32>
    %59 = vector.extract_strided_slice %1 {offsets = [2, 1, 0], sizes = [16, 16, 1], strides = [1, 1, 1]} : vector<18x18x1xf32> to vector<16x16x1xf32>
    %60 = vector.shape_cast %59 : vector<16x16x1xf32> to vector<256x1xf32>
    %c2_29 = arith.constant 2 : index
    %c1_30 = arith.constant 1 : index
    %c0_31 = arith.constant 0 : index
    %c0_32 = arith.constant 0 : index
    %61 = vector.load %arg2[%c2_29, %c1_30, %c0_31, %c0_32] : memref<3x3x1x32xf32, #tpu.memory_space<vmem>>, vector<1x1x1x32xf32>
    %62 = vector.shape_cast %61 : vector<1x1x1x32xf32> to vector<1x32xf32>
    %63 = vector.broadcast %60 : vector<256x1xf32> to vector<256x32xf32>
    %64 = vector.broadcast %62 : vector<1x32xf32> to vector<256x32xf32>
    %65 = arith.mulf %63, %64 : vector<256x32xf32>
    %66 = arith.addf %58, %65 : vector<256x32xf32>
    %67 = vector.extract_strided_slice %1 {offsets = [2, 2, 0], sizes = [16, 16, 1], strides = [1, 1, 1]} : vector<18x18x1xf32> to vector<16x16x1xf32>
    %68 = vector.shape_cast %67 : vector<16x16x1xf32> to vector<256x1xf32>
    %c2_33 = arith.constant 2 : index
    %c2_34 = arith.constant 2 : index
    %c0_35 = arith.constant 0 : index
    %c0_36 = arith.constant 0 : index
    %69 = vector.load %arg2[%c2_33, %c2_34, %c0_35, %c0_36] : memref<3x3x1x32xf32, #tpu.memory_space<vmem>>, vector<1x1x1x32xf32>
    %70 = vector.shape_cast %69 : vector<1x1x1x32xf32> to vector<1x32xf32>
    %71 = vector.broadcast %68 : vector<256x1xf32> to vector<256x32xf32>
    %72 = vector.broadcast %70 : vector<1x32xf32> to vector<256x32xf32>
    %73 = arith.mulf %71, %72 : vector<256x32xf32>
    %74 = arith.addf %66, %73 : vector<256x32xf32>
    %c0_37 = arith.constant 0 : index
    %c0_38 = arith.constant 0 : index
    %75 = vector.load %arg3[%c0_37, %c0_38] : memref<1x32xf32, #tpu.memory_space<vmem>>, vector<1x32xf32>
    %76 = vector.broadcast %75 : vector<1x32xf32> to vector<256x32xf32>
    %77 = arith.addf %74, %76 : vector<256x32xf32>
    %c0_39 = arith.constant 0 : index
    %c0_40 = arith.constant 0 : index
    %c0_41 = arith.constant 0 : index
    %78 = vector.load %arg4[%c0_39, %c0_40, %c0_41] : memref<1x256x32xf32, #tpu.memory_space<vmem>>, vector<1x256x32xf32>
    %79 = vector.shape_cast %78 : vector<1x256x32xf32> to vector<256x32xf32>
    %80 = vector.shape_cast %77 : vector<256x32xf32> to vector<1x256x32xf32>
    tpu.vector_store %arg4[%c0_39, %c0_40, %c0_41], %80 {strides = array<i32>} : memref<1x256x32xf32, #tpu.memory_space<vmem>>, vector<1x256x32xf32>,
    return
  }
  func.func @transform_0(%arg0: i32) -> (i32, i32, i32, i32) {
    %c0_i32 = arith.constant 0 : i32
    %c0_i32_0 = arith.constant 0 : i32
    %c0_i32_1 = arith.constant 0 : i32
    %c0_i32_2 = arith.constant 0 : i32
    return %arg0, %c0_i32, %c0_i32_0, %c0_i32_1 : i32, i32, i32, i32
  }
  func.func @transform_1(%arg0: i32) -> (i32, i32, i32, i32) {
    %c0_i32 = arith.constant 0 : i32
    %c0_i32_0 = arith.constant 0 : i32
    %c0_i32_1 = arith.constant 0 : i32
    %c0_i32_2 = arith.constant 0 : i32
    %c0_i32_3 = arith.constant 0 : i32
    return %c0_i32, %c0_i32_0, %c0_i32_1, %c0_i32_2 : i32, i32, i32, i32
  }
  func.func @transform_2(%arg0: i32) -> (i32, i32) {
    %c0_i32 = arith.constant 0 : i32
    %c0_i32_0 = arith.constant 0 : i32
    %c0_i32_1 = arith.constant 0 : i32
    return %c0_i32, %c0_i32_0 : i32, i32
  }
  func.func @transform_3(%arg0: i32) -> (i32, i32, i32) {
    %c0_i32 = arith.constant 0 : i32
    %c0_i32_0 = arith.constant 0 : i32
    %c0_i32_1 = arith.constant 0 : i32
    return %arg0, %c0_i32, %c0_i32_0 : i32, i32, i32
  }
}

module attributes {stable_mosaic.version = 11 : i64} {
  func.func @_nonlocal_kernel(%arg0: i32, %arg1: i32, %arg2: memref<1x128x32xf32, #tpu.memory_space<vmem>>, %arg3: memref<1x4x64x32xf32, #tpu.memory_space<vmem>>, %arg4: memref<32x16xf32, #tpu.memory_space<vmem>>, %arg5: memref<1x16xf32, #tpu.memory_space<vmem>>, %arg6: memref<32x16xf32, #tpu.memory_space<vmem>>, %arg7: memref<1x16xf32, #tpu.memory_space<vmem>>, %arg8: memref<32x16xf32, #tpu.memory_space<vmem>>, %arg9: memref<1x16xf32, #tpu.memory_space<vmem>>, %arg10: memref<16x32xf32, #tpu.memory_space<vmem>>, %arg11: memref<1x32xf32, #tpu.memory_space<vmem>>, %arg12: memref<1x128x32xf32, #tpu.memory_space<vmem>>, %arg13: memref<64x16xbf16, #tpu.memory_space<vmem>>, %arg14: memref<64x16xbf16, #tpu.memory_space<vmem>>) attributes {dimension_semantics = [#tpu.dimension_semantics<parallel>, #tpu.dimension_semantics<arbitrary>], iteration_bounds = array<i64: 2, 2>, scalar_prefetch = 0 : i64, scratch_operands = 2 : i64, tpu.core_type = #tpu.core_type<tc>, window_params = [{transform_indices = @transform_0, window_bounds = array<i64: 1, 128, 32>}, {transform_indices = @transform_1, window_bounds = array<i64: 1, 4, 64, 32>}, {pipeline_mode = #tpu.pipeline_mode<synchronous>, transform_indices = @transform_2, window_bounds = array<i64: 32, 16>}, {pipeline_mode = #tpu.pipeline_mode<synchronous>, transform_indices = @transform_3, window_bounds = array<i64: 1, 16>}, {pipeline_mode = #tpu.pipeline_mode<synchronous>, transform_indices = @transform_4, window_bounds = array<i64: 32, 16>}, {pipeline_mode = #tpu.pipeline_mode<synchronous>, transform_indices = @transform_5, window_bounds = array<i64: 1, 16>}, {pipeline_mode = #tpu.pipeline_mode<synchronous>, transform_indices = @transform_6, window_bounds = array<i64: 32, 16>}, {pipeline_mode = #tpu.pipeline_mode<synchronous>, transform_indices = @transform_7, window_bounds = array<i64: 1, 16>}, {pipeline_mode = #tpu.pipeline_mode<synchronous>, transform_indices = @transform_8, window_bounds = array<i64: 16, 32>}, {pipeline_mode = #tpu.pipeline_mode<synchronous>, transform_indices = @transform_9, window_bounds = array<i64: 1, 32>}, {transform_indices = @transform_10, window_bounds = array<i64: 1, 128, 32>}]} {
    %c0_i32 = arith.constant 0 : i32
    %0 = arith.cmpi eq, %arg1, %c0_i32 : i32
    %1 = arith.extui %0 : i1 to i32
    %c0_i32_0 = arith.constant 0 : i32
    %2 = arith.cmpi ne, %1, %c0_i32_0 : i32
    scf.if %2 {
      %c0_23 = arith.constant 0 : index
      %c0_24 = arith.constant 0 : index
      %c0_25 = arith.constant 0 : index
      %c0_26 = arith.constant 0 : index
      %39 = vector.load %arg3[%c0_23, %c0_24, %c0_25, %c0_26] : memref<1x4x64x32xf32, #tpu.memory_space<vmem>>, vector<1x4x64x32xf32>
      %40 = vector.shape_cast %39 : vector<1x4x64x32xf32> to vector<4x64x32xf32>
      %41 = vector.shape_cast %40 : vector<4x64x32xf32> to vector<256x32xf32>
      %42 = arith.truncf %41 : vector<256x32xf32> to vector<256x32xbf16>
      %c0_27 = arith.constant 0 : index
      %c0_28 = arith.constant 0 : index
      %43 = vector.load %arg6[%c0_27, %c0_28] : memref<32x16xf32, #tpu.memory_space<vmem>>, vector<32x16xf32>
      %44 = arith.truncf %43 : vector<32x16xf32> to vector<32x16xbf16>
      %cst_29 = arith.constant dense<0.000000e+00> : vector<256x16xf32>
      %45 = tpu.matmul %42, %44, %cst_29 {dimension_numbers = #tpu.dot_dimension_numbers<[1], [0], [0], [1], [0, 0, 1, 1], [], []>} : vector<256x32xbf16>, vector<32x16xbf16>, vector<256x16xf32> -> vector<256x16xf32>
      %c0_30 = arith.constant 0 : index
      %c0_31 = arith.constant 0 : index
      %46 = vector.load %arg7[%c0_30, %c0_31] : memref<1x16xf32, #tpu.memory_space<vmem>>, vector<1x16xf32>
      %47 = vector.broadcast %46 : vector<1x16xf32> to vector<256x16xf32>
      %48 = arith.addf %45, %47 : vector<256x16xf32>
      %c0_32 = arith.constant 0 : index
      %c0_33 = arith.constant 0 : index
      %49 = vector.load %arg8[%c0_32, %c0_33] : memref<32x16xf32, #tpu.memory_space<vmem>>, vector<32x16xf32>
      %50 = arith.truncf %49 : vector<32x16xf32> to vector<32x16xbf16>
      %cst_34 = arith.constant dense<0.000000e+00> : vector<256x16xf32>
      %51 = tpu.matmul %42, %50, %cst_34 {dimension_numbers = #tpu.dot_dimension_numbers<[1], [0], [0], [1], [0, 0, 1, 1], [], []>} : vector<256x32xbf16>, vector<32x16xbf16>, vector<256x16xf32> -> vector<256x16xf32>
      %c0_35 = arith.constant 0 : index
      %c0_36 = arith.constant 0 : index
      %52 = vector.load %arg9[%c0_35, %c0_36] : memref<1x16xf32, #tpu.memory_space<vmem>>, vector<1x16xf32>
      %53 = vector.broadcast %52 : vector<1x16xf32> to vector<256x16xf32>
      %54 = arith.addf %51, %53 : vector<256x16xf32>
      %55 = vector.extract_strided_slice %48 {offsets = [0, 0], sizes = [64, 16], strides = [1, 1]} : vector<256x16xf32> to vector<64x16xf32>
      %56 = vector.extract_strided_slice %48 {offsets = [64, 0], sizes = [64, 16], strides = [1, 1]} : vector<256x16xf32> to vector<64x16xf32>
      %57 = arith.maximumf %55, %56 : vector<64x16xf32>
      %58 = vector.extract_strided_slice %48 {offsets = [128, 0], sizes = [64, 16], strides = [1, 1]} : vector<256x16xf32> to vector<64x16xf32>
      %59 = vector.extract_strided_slice %48 {offsets = [192, 0], sizes = [64, 16], strides = [1, 1]} : vector<256x16xf32> to vector<64x16xf32>
      %60 = arith.maximumf %58, %59 : vector<64x16xf32>
      %61 = arith.maximumf %57, %60 : vector<64x16xf32>
      %62 = arith.truncf %61 : vector<64x16xf32> to vector<64x16xbf16>
      %c0_37 = arith.constant 0 : index
      %c0_38 = arith.constant 0 : index
      %63 = vector.load %arg13[%c0_37, %c0_38] : memref<64x16xbf16, #tpu.memory_space<vmem>>, vector<64x16xbf16>
      tpu.vector_store %arg13[%c0_37, %c0_38], %62 {strides = array<i32>} : memref<64x16xbf16, #tpu.memory_space<vmem>>, vector<64x16xbf16>,
      %64 = vector.extract_strided_slice %54 {offsets = [0, 0], sizes = [64, 16], strides = [1, 1]} : vector<256x16xf32> to vector<64x16xf32>
      %65 = vector.extract_strided_slice %54 {offsets = [64, 0], sizes = [64, 16], strides = [1, 1]} : vector<256x16xf32> to vector<64x16xf32>
      %66 = arith.maximumf %64, %65 : vector<64x16xf32>
      %67 = vector.extract_strided_slice %54 {offsets = [128, 0], sizes = [64, 16], strides = [1, 1]} : vector<256x16xf32> to vector<64x16xf32>
      %68 = vector.extract_strided_slice %54 {offsets = [192, 0], sizes = [64, 16], strides = [1, 1]} : vector<256x16xf32> to vector<64x16xf32>
      %69 = arith.maximumf %67, %68 : vector<64x16xf32>
      %70 = arith.maximumf %66, %69 : vector<64x16xf32>
      %71 = arith.truncf %70 : vector<64x16xf32> to vector<64x16xbf16>
      %c0_39 = arith.constant 0 : index
      %c0_40 = arith.constant 0 : index
      %72 = vector.load %arg14[%c0_39, %c0_40] : memref<64x16xbf16, #tpu.memory_space<vmem>>, vector<64x16xbf16>
      tpu.vector_store %arg14[%c0_39, %c0_40], %71 {strides = array<i32>} : memref<64x16xbf16, #tpu.memory_space<vmem>>, vector<64x16xbf16>,
    } else {
    }
    %c0 = arith.constant 0 : index
    %c0_1 = arith.constant 0 : index
    %c0_2 = arith.constant 0 : index
    %3 = vector.load %arg2[%c0, %c0_1, %c0_2] : memref<1x128x32xf32, #tpu.memory_space<vmem>>, vector<1x128x32xf32>
    %4 = vector.shape_cast %3 : vector<1x128x32xf32> to vector<128x32xf32>
    %5 = arith.truncf %4 : vector<128x32xf32> to vector<128x32xbf16>
    %c0_3 = arith.constant 0 : index
    %c0_4 = arith.constant 0 : index
    %6 = vector.load %arg4[%c0_3, %c0_4] : memref<32x16xf32, #tpu.memory_space<vmem>>, vector<32x16xf32>
    %7 = arith.truncf %6 : vector<32x16xf32> to vector<32x16xbf16>
    %cst = arith.constant dense<0.000000e+00> : vector<128x16xf32>
    %8 = tpu.matmul %5, %7, %cst {dimension_numbers = #tpu.dot_dimension_numbers<[1], [0], [0], [1], [0, 0, 1, 1], [], []>} : vector<128x32xbf16>, vector<32x16xbf16>, vector<128x16xf32> -> vector<128x16xf32>
    %c0_5 = arith.constant 0 : index
    %c0_6 = arith.constant 0 : index
    %9 = vector.load %arg5[%c0_5, %c0_6] : memref<1x16xf32, #tpu.memory_space<vmem>>, vector<1x16xf32>
    %10 = vector.broadcast %9 : vector<1x16xf32> to vector<128x16xf32>
    %11 = arith.addf %8, %10 : vector<128x16xf32>
    %12 = arith.truncf %11 : vector<128x16xf32> to vector<128x16xbf16>
    %c0_7 = arith.constant 0 : index
    %c0_8 = arith.constant 0 : index
    %13 = vector.load %arg14[%c0_7, %c0_8] : memref<64x16xbf16, #tpu.memory_space<vmem>>, vector<64x16xbf16>
    %cst_9 = arith.constant dense<0.000000e+00> : vector<128x64xf32>
    %14 = tpu.matmul %12, %13, %cst_9 {dimension_numbers = #tpu.dot_dimension_numbers<[1], [1], [0], [0], [0, 0, 1, 0], [], []>} : vector<128x16xbf16>, vector<64x16xbf16>, vector<128x64xf32> -> vector<128x64xf32>
    %cst_10 = arith.constant dense<0xFF800000> : vector<128xf32>
    %15 = vector.multi_reduction <maximumf>, %14, %cst_10 [1] : vector<128x64xf32> to vector<128xf32>
    %16 = vector.shape_cast %15 : vector<128xf32> to vector<128x1xf32>
    %17 = vector.broadcast %16 : vector<128x1xf32> to vector<128x64xf32>
    %18 = arith.subf %14, %17 : vector<128x64xf32>
    %19 = math.exp %18 : vector<128x64xf32>
    %cst_11 = arith.constant dense<0.000000e+00> : vector<128xf32>
    %20 = vector.multi_reduction <add>, %19, %cst_11 [1] : vector<128x64xf32> to vector<128xf32>
    %21 = vector.shape_cast %20 : vector<128xf32> to vector<128x1xf32>
    %22 = arith.truncf %19 : vector<128x64xf32> to vector<128x64xbf16>
    %c0_12 = arith.constant 0 : index
    %c0_13 = arith.constant 0 : index
    %23 = vector.load %arg13[%c0_12, %c0_13] : memref<64x16xbf16, #tpu.memory_space<vmem>>, vector<64x16xbf16>
    %cst_14 = arith.constant dense<0.000000e+00> : vector<128x16xf32>
    %24 = tpu.matmul %22, %23, %cst_14 {dimension_numbers = #tpu.dot_dimension_numbers<[1], [0], [0], [1], [0, 0, 1, 1], [], []>} : vector<128x64xbf16>, vector<64x16xbf16>, vector<128x16xf32> -> vector<128x16xf32>
    %25 = tpu.reciprocal %21 {approx = true} : vector<128x1xf32> -> vector<128x1xf32>
    %26 = vector.broadcast %25 : vector<128x1xf32> to vector<128x16xf32>
    %27 = arith.mulf %24, %26 : vector<128x16xf32>
    %28 = arith.truncf %27 : vector<128x16xf32> to vector<128x16xbf16>
    %c0_15 = arith.constant 0 : index
    %c0_16 = arith.constant 0 : index
    %29 = vector.load %arg10[%c0_15, %c0_16] : memref<16x32xf32, #tpu.memory_space<vmem>>, vector<16x32xf32>
    %30 = arith.truncf %29 : vector<16x32xf32> to vector<16x32xbf16>
    %cst_17 = arith.constant dense<0.000000e+00> : vector<128x32xf32>
    %31 = tpu.matmul %28, %30, %cst_17 {dimension_numbers = #tpu.dot_dimension_numbers<[1], [0], [0], [1], [0, 0, 1, 1], [], []>} : vector<128x16xbf16>, vector<16x32xbf16>, vector<128x32xf32> -> vector<128x32xf32>
    %c0_18 = arith.constant 0 : index
    %c0_19 = arith.constant 0 : index
    %32 = vector.load %arg11[%c0_18, %c0_19] : memref<1x32xf32, #tpu.memory_space<vmem>>, vector<1x32xf32>
    %33 = vector.broadcast %32 : vector<1x32xf32> to vector<128x32xf32>
    %34 = arith.addf %31, %33 : vector<128x32xf32>
    %35 = arith.addf %34, %4 : vector<128x32xf32>
    %c0_20 = arith.constant 0 : index
    %c0_21 = arith.constant 0 : index
    %c0_22 = arith.constant 0 : index
    %36 = vector.load %arg12[%c0_20, %c0_21, %c0_22] : memref<1x128x32xf32, #tpu.memory_space<vmem>>, vector<1x128x32xf32>
    %37 = vector.shape_cast %36 : vector<1x128x32xf32> to vector<128x32xf32>
    %38 = vector.shape_cast %35 : vector<128x32xf32> to vector<1x128x32xf32>
    tpu.vector_store %arg12[%c0_20, %c0_21, %c0_22], %38 {strides = array<i32>} : memref<1x128x32xf32, #tpu.memory_space<vmem>>, vector<1x128x32xf32>,
    return
  }
  func.func @transform_0(%arg0: i32, %arg1: i32) -> (i32, i32, i32) {
    %c0_i32 = arith.constant 0 : i32
    %c0_i32_0 = arith.constant 0 : i32
    return %arg0, %arg1, %c0_i32 : i32, i32, i32
  }
  func.func @transform_1(%arg0: i32, %arg1: i32) -> (i32, i32, i32, i32) {
    %c0_i32 = arith.constant 0 : i32
    %c0_i32_0 = arith.constant 0 : i32
    %c0_i32_1 = arith.constant 0 : i32
    %c0_i32_2 = arith.constant 0 : i32
    return %arg0, %c0_i32, %c0_i32_0, %c0_i32_1 : i32, i32, i32, i32
  }
  func.func @transform_2(%arg0: i32, %arg1: i32) -> (i32, i32) {
    %c0_i32 = arith.constant 0 : i32
    %c0_i32_0 = arith.constant 0 : i32
    %c0_i32_1 = arith.constant 0 : i32
    return %c0_i32, %c0_i32_0 : i32, i32
  }
  func.func @transform_3(%arg0: i32, %arg1: i32) -> (i32, i32) {
    %c0_i32 = arith.constant 0 : i32
    %c0_i32_0 = arith.constant 0 : i32
    %c0_i32_1 = arith.constant 0 : i32
    return %c0_i32, %c0_i32_0 : i32, i32
  }
  func.func @transform_4(%arg0: i32, %arg1: i32) -> (i32, i32) {
    %c0_i32 = arith.constant 0 : i32
    %c0_i32_0 = arith.constant 0 : i32
    %c0_i32_1 = arith.constant 0 : i32
    return %c0_i32, %c0_i32_0 : i32, i32
  }
  func.func @transform_5(%arg0: i32, %arg1: i32) -> (i32, i32) {
    %c0_i32 = arith.constant 0 : i32
    %c0_i32_0 = arith.constant 0 : i32
    %c0_i32_1 = arith.constant 0 : i32
    return %c0_i32, %c0_i32_0 : i32, i32
  }
  func.func @transform_6(%arg0: i32, %arg1: i32) -> (i32, i32) {
    %c0_i32 = arith.constant 0 : i32
    %c0_i32_0 = arith.constant 0 : i32
    %c0_i32_1 = arith.constant 0 : i32
    return %c0_i32, %c0_i32_0 : i32, i32
  }
  func.func @transform_7(%arg0: i32, %arg1: i32) -> (i32, i32) {
    %c0_i32 = arith.constant 0 : i32
    %c0_i32_0 = arith.constant 0 : i32
    %c0_i32_1 = arith.constant 0 : i32
    return %c0_i32, %c0_i32_0 : i32, i32
  }
  func.func @transform_8(%arg0: i32, %arg1: i32) -> (i32, i32) {
    %c0_i32 = arith.constant 0 : i32
    %c0_i32_0 = arith.constant 0 : i32
    %c0_i32_1 = arith.constant 0 : i32
    return %c0_i32, %c0_i32_0 : i32, i32
  }
  func.func @transform_9(%arg0: i32, %arg1: i32) -> (i32, i32) {
    %c0_i32 = arith.constant 0 : i32
    %c0_i32_0 = arith.constant 0 : i32
    %c0_i32_1 = arith.constant 0 : i32
    return %c0_i32, %c0_i32_0 : i32, i32
  }
  func.func @transform_10(%arg0: i32, %arg1: i32) -> (i32, i32, i32) {
    %c0_i32 = arith.constant 0 : i32
    %c0_i32_0 = arith.constant 0 : i32
    return %arg0, %arg1, %c0_i32 : i32, i32, i32
  }
}

module attributes {stable_mosaic.version = 11 : i64} {
  func.func @_conv3x3_kernel(%arg0: i32, %arg1: memref<1x18x18x32xf32, #tpu.memory_space<vmem>>, %arg2: memref<3x3x32x32xf32, #tpu.memory_space<vmem>>, %arg3: memref<1x32xf32, #tpu.memory_space<vmem>>, %arg4: memref<1x256x32xf32, #tpu.memory_space<vmem>>) attributes {dimension_semantics = [#tpu.dimension_semantics<parallel>], iteration_bounds = array<i64: 2>, scalar_prefetch = 0 : i64, scratch_operands = 0 : i64, tpu.core_type = #tpu.core_type<tc>, window_params = [{transform_indices = @transform_0, window_bounds = array<i64: 1, 18, 18, 32>}, {pipeline_mode = #tpu.pipeline_mode<synchronous>, transform_indices = @transform_1, window_bounds = array<i64: 3, 3, 32, 32>}, {pipeline_mode = #tpu.pipeline_mode<synchronous>, transform_indices = @transform_2, window_bounds = array<i64: 1, 32>}, {transform_indices = @transform_3, window_bounds = array<i64: 1, 256, 32>}]} {
    %c0 = arith.constant 0 : index
    %c0_0 = arith.constant 0 : index
    %c0_1 = arith.constant 0 : index
    %c0_2 = arith.constant 0 : index
    %0 = vector.load %arg1[%c0, %c0_0, %c0_1, %c0_2] : memref<1x18x18x32xf32, #tpu.memory_space<vmem>>, vector<1x18x18x32xf32>
    %1 = vector.shape_cast %0 : vector<1x18x18x32xf32> to vector<18x18x32xf32>
    %cst = arith.constant 0.000000e+00 : f32
    %2 = vector.broadcast %cst : f32 to vector<256x32xf32>
    %3 = vector.extract_strided_slice %1 {offsets = [0, 0, 0], sizes = [16, 16, 32], strides = [1, 1, 1]} : vector<18x18x32xf32> to vector<16x16x32xf32>
    %4 = vector.shape_cast %3 : vector<16x16x32xf32> to vector<256x32xf32>
    %c0_3 = arith.constant 0 : index
    %c0_4 = arith.constant 0 : index
    %c0_5 = arith.constant 0 : index
    %c0_6 = arith.constant 0 : index
    %5 = vector.load %arg2[%c0_3, %c0_4, %c0_5, %c0_6] : memref<3x3x32x32xf32, #tpu.memory_space<vmem>>, vector<1x1x32x32xf32>
    %6 = vector.shape_cast %5 : vector<1x1x32x32xf32> to vector<32x32xf32>
    %7 = arith.truncf %4 : vector<256x32xf32> to vector<256x32xbf16>
    %8 = arith.truncf %6 : vector<32x32xf32> to vector<32x32xbf16>
    %cst_7 = arith.constant dense<0.000000e+00> : vector<256x32xf32>
    %9 = tpu.matmul %7, %8, %cst_7 {dimension_numbers = #tpu.dot_dimension_numbers<[1], [0], [0], [1], [0, 0, 1, 1], [], []>} : vector<256x32xbf16>, vector<32x32xbf16>, vector<256x32xf32> -> vector<256x32xf32>
    %10 = arith.addf %2, %9 : vector<256x32xf32>
    %11 = vector.extract_strided_slice %1 {offsets = [0, 1, 0], sizes = [16, 16, 32], strides = [1, 1, 1]} : vector<18x18x32xf32> to vector<16x16x32xf32>
    %12 = vector.shape_cast %11 : vector<16x16x32xf32> to vector<256x32xf32>
    %c0_8 = arith.constant 0 : index
    %c1 = arith.constant 1 : index
    %c0_9 = arith.constant 0 : index
    %c0_10 = arith.constant 0 : index
    %13 = vector.load %arg2[%c0_8, %c1, %c0_9, %c0_10] : memref<3x3x32x32xf32, #tpu.memory_space<vmem>>, vector<1x1x32x32xf32>
    %14 = vector.shape_cast %13 : vector<1x1x32x32xf32> to vector<32x32xf32>
    %15 = arith.truncf %12 : vector<256x32xf32> to vector<256x32xbf16>
    %16 = arith.truncf %14 : vector<32x32xf32> to vector<32x32xbf16>
    %cst_11 = arith.constant dense<0.000000e+00> : vector<256x32xf32>
    %17 = tpu.matmul %15, %16, %cst_11 {dimension_numbers = #tpu.dot_dimension_numbers<[1], [0], [0], [1], [0, 0, 1, 1], [], []>} : vector<256x32xbf16>, vector<32x32xbf16>, vector<256x32xf32> -> vector<256x32xf32>
    %18 = arith.addf %10, %17 : vector<256x32xf32>
    %19 = vector.extract_strided_slice %1 {offsets = [0, 2, 0], sizes = [16, 16, 32], strides = [1, 1, 1]} : vector<18x18x32xf32> to vector<16x16x32xf32>
    %20 = vector.shape_cast %19 : vector<16x16x32xf32> to vector<256x32xf32>
    %c0_12 = arith.constant 0 : index
    %c2 = arith.constant 2 : index
    %c0_13 = arith.constant 0 : index
    %c0_14 = arith.constant 0 : index
    %21 = vector.load %arg2[%c0_12, %c2, %c0_13, %c0_14] : memref<3x3x32x32xf32, #tpu.memory_space<vmem>>, vector<1x1x32x32xf32>
    %22 = vector.shape_cast %21 : vector<1x1x32x32xf32> to vector<32x32xf32>
    %23 = arith.truncf %20 : vector<256x32xf32> to vector<256x32xbf16>
    %24 = arith.truncf %22 : vector<32x32xf32> to vector<32x32xbf16>
    %cst_15 = arith.constant dense<0.000000e+00> : vector<256x32xf32>
    %25 = tpu.matmul %23, %24, %cst_15 {dimension_numbers = #tpu.dot_dimension_numbers<[1], [0], [0], [1], [0, 0, 1, 1], [], []>} : vector<256x32xbf16>, vector<32x32xbf16>, vector<256x32xf32> -> vector<256x32xf32>
    %26 = arith.addf %18, %25 : vector<256x32xf32>
    %27 = vector.extract_strided_slice %1 {offsets = [1, 0, 0], sizes = [16, 16, 32], strides = [1, 1, 1]} : vector<18x18x32xf32> to vector<16x16x32xf32>
    %28 = vector.shape_cast %27 : vector<16x16x32xf32> to vector<256x32xf32>
    %c1_16 = arith.constant 1 : index
    %c0_17 = arith.constant 0 : index
    %c0_18 = arith.constant 0 : index
    %c0_19 = arith.constant 0 : index
    %29 = vector.load %arg2[%c1_16, %c0_17, %c0_18, %c0_19] : memref<3x3x32x32xf32, #tpu.memory_space<vmem>>, vector<1x1x32x32xf32>
    %30 = vector.shape_cast %29 : vector<1x1x32x32xf32> to vector<32x32xf32>
    %31 = arith.truncf %28 : vector<256x32xf32> to vector<256x32xbf16>
    %32 = arith.truncf %30 : vector<32x32xf32> to vector<32x32xbf16>
    %cst_20 = arith.constant dense<0.000000e+00> : vector<256x32xf32>
    %33 = tpu.matmul %31, %32, %cst_20 {dimension_numbers = #tpu.dot_dimension_numbers<[1], [0], [0], [1], [0, 0, 1, 1], [], []>} : vector<256x32xbf16>, vector<32x32xbf16>, vector<256x32xf32> -> vector<256x32xf32>
    %34 = arith.addf %26, %33 : vector<256x32xf32>
    %35 = vector.extract_strided_slice %1 {offsets = [1, 1, 0], sizes = [16, 16, 32], strides = [1, 1, 1]} : vector<18x18x32xf32> to vector<16x16x32xf32>
    %36 = vector.shape_cast %35 : vector<16x16x32xf32> to vector<256x32xf32>
    %c1_21 = arith.constant 1 : index
    %c1_22 = arith.constant 1 : index
    %c0_23 = arith.constant 0 : index
    %c0_24 = arith.constant 0 : index
    %37 = vector.load %arg2[%c1_21, %c1_22, %c0_23, %c0_24] : memref<3x3x32x32xf32, #tpu.memory_space<vmem>>, vector<1x1x32x32xf32>
    %38 = vector.shape_cast %37 : vector<1x1x32x32xf32> to vector<32x32xf32>
    %39 = arith.truncf %36 : vector<256x32xf32> to vector<256x32xbf16>
    %40 = arith.truncf %38 : vector<32x32xf32> to vector<32x32xbf16>
    %cst_25 = arith.constant dense<0.000000e+00> : vector<256x32xf32>
    %41 = tpu.matmul %39, %40, %cst_25 {dimension_numbers = #tpu.dot_dimension_numbers<[1], [0], [0], [1], [0, 0, 1, 1], [], []>} : vector<256x32xbf16>, vector<32x32xbf16>, vector<256x32xf32> -> vector<256x32xf32>
    %42 = arith.addf %34, %41 : vector<256x32xf32>
    %43 = vector.extract_strided_slice %1 {offsets = [1, 2, 0], sizes = [16, 16, 32], strides = [1, 1, 1]} : vector<18x18x32xf32> to vector<16x16x32xf32>
    %44 = vector.shape_cast %43 : vector<16x16x32xf32> to vector<256x32xf32>
    %c1_26 = arith.constant 1 : index
    %c2_27 = arith.constant 2 : index
    %c0_28 = arith.constant 0 : index
    %c0_29 = arith.constant 0 : index
    %45 = vector.load %arg2[%c1_26, %c2_27, %c0_28, %c0_29] : memref<3x3x32x32xf32, #tpu.memory_space<vmem>>, vector<1x1x32x32xf32>
    %46 = vector.shape_cast %45 : vector<1x1x32x32xf32> to vector<32x32xf32>
    %47 = arith.truncf %44 : vector<256x32xf32> to vector<256x32xbf16>
    %48 = arith.truncf %46 : vector<32x32xf32> to vector<32x32xbf16>
    %cst_30 = arith.constant dense<0.000000e+00> : vector<256x32xf32>
    %49 = tpu.matmul %47, %48, %cst_30 {dimension_numbers = #tpu.dot_dimension_numbers<[1], [0], [0], [1], [0, 0, 1, 1], [], []>} : vector<256x32xbf16>, vector<32x32xbf16>, vector<256x32xf32> -> vector<256x32xf32>
    %50 = arith.addf %42, %49 : vector<256x32xf32>
    %51 = vector.extract_strided_slice %1 {offsets = [2, 0, 0], sizes = [16, 16, 32], strides = [1, 1, 1]} : vector<18x18x32xf32> to vector<16x16x32xf32>
    %52 = vector.shape_cast %51 : vector<16x16x32xf32> to vector<256x32xf32>
    %c2_31 = arith.constant 2 : index
    %c0_32 = arith.constant 0 : index
    %c0_33 = arith.constant 0 : index
    %c0_34 = arith.constant 0 : index
    %53 = vector.load %arg2[%c2_31, %c0_32, %c0_33, %c0_34] : memref<3x3x32x32xf32, #tpu.memory_space<vmem>>, vector<1x1x32x32xf32>
    %54 = vector.shape_cast %53 : vector<1x1x32x32xf32> to vector<32x32xf32>
    %55 = arith.truncf %52 : vector<256x32xf32> to vector<256x32xbf16>
    %56 = arith.truncf %54 : vector<32x32xf32> to vector<32x32xbf16>
    %cst_35 = arith.constant dense<0.000000e+00> : vector<256x32xf32>
    %57 = tpu.matmul %55, %56, %cst_35 {dimension_numbers = #tpu.dot_dimension_numbers<[1], [0], [0], [1], [0, 0, 1, 1], [], []>} : vector<256x32xbf16>, vector<32x32xbf16>, vector<256x32xf32> -> vector<256x32xf32>
    %58 = arith.addf %50, %57 : vector<256x32xf32>
    %59 = vector.extract_strided_slice %1 {offsets = [2, 1, 0], sizes = [16, 16, 32], strides = [1, 1, 1]} : vector<18x18x32xf32> to vector<16x16x32xf32>
    %60 = vector.shape_cast %59 : vector<16x16x32xf32> to vector<256x32xf32>
    %c2_36 = arith.constant 2 : index
    %c1_37 = arith.constant 1 : index
    %c0_38 = arith.constant 0 : index
    %c0_39 = arith.constant 0 : index
    %61 = vector.load %arg2[%c2_36, %c1_37, %c0_38, %c0_39] : memref<3x3x32x32xf32, #tpu.memory_space<vmem>>, vector<1x1x32x32xf32>
    %62 = vector.shape_cast %61 : vector<1x1x32x32xf32> to vector<32x32xf32>
    %63 = arith.truncf %60 : vector<256x32xf32> to vector<256x32xbf16>
    %64 = arith.truncf %62 : vector<32x32xf32> to vector<32x32xbf16>
    %cst_40 = arith.constant dense<0.000000e+00> : vector<256x32xf32>
    %65 = tpu.matmul %63, %64, %cst_40 {dimension_numbers = #tpu.dot_dimension_numbers<[1], [0], [0], [1], [0, 0, 1, 1], [], []>} : vector<256x32xbf16>, vector<32x32xbf16>, vector<256x32xf32> -> vector<256x32xf32>
    %66 = arith.addf %58, %65 : vector<256x32xf32>
    %67 = vector.extract_strided_slice %1 {offsets = [2, 2, 0], sizes = [16, 16, 32], strides = [1, 1, 1]} : vector<18x18x32xf32> to vector<16x16x32xf32>
    %68 = vector.shape_cast %67 : vector<16x16x32xf32> to vector<256x32xf32>
    %c2_41 = arith.constant 2 : index
    %c2_42 = arith.constant 2 : index
    %c0_43 = arith.constant 0 : index
    %c0_44 = arith.constant 0 : index
    %69 = vector.load %arg2[%c2_41, %c2_42, %c0_43, %c0_44] : memref<3x3x32x32xf32, #tpu.memory_space<vmem>>, vector<1x1x32x32xf32>
    %70 = vector.shape_cast %69 : vector<1x1x32x32xf32> to vector<32x32xf32>
    %71 = arith.truncf %68 : vector<256x32xf32> to vector<256x32xbf16>
    %72 = arith.truncf %70 : vector<32x32xf32> to vector<32x32xbf16>
    %cst_45 = arith.constant dense<0.000000e+00> : vector<256x32xf32>
    %73 = tpu.matmul %71, %72, %cst_45 {dimension_numbers = #tpu.dot_dimension_numbers<[1], [0], [0], [1], [0, 0, 1, 1], [], []>} : vector<256x32xbf16>, vector<32x32xbf16>, vector<256x32xf32> -> vector<256x32xf32>
    %74 = arith.addf %66, %73 : vector<256x32xf32>
    %c0_46 = arith.constant 0 : index
    %c0_47 = arith.constant 0 : index
    %75 = vector.load %arg3[%c0_46, %c0_47] : memref<1x32xf32, #tpu.memory_space<vmem>>, vector<1x32xf32>
    %76 = vector.broadcast %75 : vector<1x32xf32> to vector<256x32xf32>
    %77 = arith.addf %74, %76 : vector<256x32xf32>
    %c0_48 = arith.constant 0 : index
    %c0_49 = arith.constant 0 : index
    %c0_50 = arith.constant 0 : index
    %78 = vector.load %arg4[%c0_48, %c0_49, %c0_50] : memref<1x256x32xf32, #tpu.memory_space<vmem>>, vector<1x256x32xf32>
    %79 = vector.shape_cast %78 : vector<1x256x32xf32> to vector<256x32xf32>
    %80 = vector.shape_cast %77 : vector<256x32xf32> to vector<1x256x32xf32>
    tpu.vector_store %arg4[%c0_48, %c0_49, %c0_50], %80 {strides = array<i32>} : memref<1x256x32xf32, #tpu.memory_space<vmem>>, vector<1x256x32xf32>,
    return
  }
  func.func @transform_0(%arg0: i32) -> (i32, i32, i32, i32) {
    %c0_i32 = arith.constant 0 : i32
    %c0_i32_0 = arith.constant 0 : i32
    %c0_i32_1 = arith.constant 0 : i32
    %c0_i32_2 = arith.constant 0 : i32
    return %arg0, %c0_i32, %c0_i32_0, %c0_i32_1 : i32, i32, i32, i32
  }
  func.func @transform_1(%arg0: i32) -> (i32, i32, i32, i32) {
    %c0_i32 = arith.constant 0 : i32
    %c0_i32_0 = arith.constant 0 : i32
    %c0_i32_1 = arith.constant 0 : i32
    %c0_i32_2 = arith.constant 0 : i32
    %c0_i32_3 = arith.constant 0 : i32
    return %c0_i32, %c0_i32_0, %c0_i32_1, %c0_i32_2 : i32, i32, i32, i32
  }
  func.func @transform_2(%arg0: i32) -> (i32, i32) {
    %c0_i32 = arith.constant 0 : i32
    %c0_i32_0 = arith.constant 0 : i32
    %c0_i32_1 = arith.constant 0 : i32
    return %c0_i32, %c0_i32_0 : i32, i32
  }
  func.func @transform_3(%arg0: i32) -> (i32, i32, i32) {
    %c0_i32 = arith.constant 0 : i32
    %c0_i32_0 = arith.constant 0 : i32
    %c0_i32_1 = arith.constant 0 : i32
    return %arg0, %c0_i32, %c0_i32_0 : i32, i32, i32
  }
}

module attributes {stable_mosaic.version = 11 : i64} {
  func.func @_conv3x3_kernel(%arg0: i32, %arg1: memref<1x18x18x32xf32, #tpu.memory_space<vmem>>, %arg2: memref<3x3x32x1xf32, #tpu.memory_space<vmem>>, %arg3: memref<1x1xf32, #tpu.memory_space<vmem>>, %arg4: memref<1x256x1xf32, #tpu.memory_space<vmem>>) attributes {dimension_semantics = [#tpu.dimension_semantics<parallel>], iteration_bounds = array<i64: 2>, scalar_prefetch = 0 : i64, scratch_operands = 0 : i64, tpu.core_type = #tpu.core_type<tc>, window_params = [{transform_indices = @transform_0, window_bounds = array<i64: 1, 18, 18, 32>}, {pipeline_mode = #tpu.pipeline_mode<synchronous>, transform_indices = @transform_1, window_bounds = array<i64: 3, 3, 32, 1>}, {pipeline_mode = #tpu.pipeline_mode<synchronous>, transform_indices = @transform_2, window_bounds = array<i64: 1, 1>}, {transform_indices = @transform_3, window_bounds = array<i64: 1, 256, 1>}]} {
    %c0 = arith.constant 0 : index
    %c0_0 = arith.constant 0 : index
    %c0_1 = arith.constant 0 : index
    %c0_2 = arith.constant 0 : index
    %0 = vector.load %arg1[%c0, %c0_0, %c0_1, %c0_2] : memref<1x18x18x32xf32, #tpu.memory_space<vmem>>, vector<1x18x18x32xf32>
    %1 = vector.shape_cast %0 : vector<1x18x18x32xf32> to vector<18x18x32xf32>
    %cst = arith.constant 0.000000e+00 : f32
    %2 = vector.broadcast %cst : f32 to vector<256x1xf32>
    %3 = vector.extract_strided_slice %1 {offsets = [0, 0, 0], sizes = [16, 16, 32], strides = [1, 1, 1]} : vector<18x18x32xf32> to vector<16x16x32xf32>
    %4 = vector.shape_cast %3 : vector<16x16x32xf32> to vector<256x32xf32>
    %c0_3 = arith.constant 0 : index
    %c0_4 = arith.constant 0 : index
    %c0_5 = arith.constant 0 : index
    %c0_6 = arith.constant 0 : index
    %5 = vector.load %arg2[%c0_3, %c0_4, %c0_5, %c0_6] : memref<3x3x32x1xf32, #tpu.memory_space<vmem>>, vector<1x1x32x1xf32>
    %6 = vector.shape_cast %5 : vector<1x1x32x1xf32> to vector<32x1xf32>
    %7 = arith.truncf %4 : vector<256x32xf32> to vector<256x32xbf16>
    %8 = arith.truncf %6 : vector<32x1xf32> to vector<32x1xbf16>
    %cst_7 = arith.constant dense<0.000000e+00> : vector<256x1xf32>
    %9 = tpu.matmul %7, %8, %cst_7 {dimension_numbers = #tpu.dot_dimension_numbers<[1], [0], [0], [1], [0, 0, 1, 1], [], []>} : vector<256x32xbf16>, vector<32x1xbf16>, vector<256x1xf32> -> vector<256x1xf32>
    %10 = arith.addf %2, %9 : vector<256x1xf32>
    %11 = vector.extract_strided_slice %1 {offsets = [0, 1, 0], sizes = [16, 16, 32], strides = [1, 1, 1]} : vector<18x18x32xf32> to vector<16x16x32xf32>
    %12 = vector.shape_cast %11 : vector<16x16x32xf32> to vector<256x32xf32>
    %c0_8 = arith.constant 0 : index
    %c1 = arith.constant 1 : index
    %c0_9 = arith.constant 0 : index
    %c0_10 = arith.constant 0 : index
    %13 = vector.load %arg2[%c0_8, %c1, %c0_9, %c0_10] : memref<3x3x32x1xf32, #tpu.memory_space<vmem>>, vector<1x1x32x1xf32>
    %14 = vector.shape_cast %13 : vector<1x1x32x1xf32> to vector<32x1xf32>
    %15 = arith.truncf %12 : vector<256x32xf32> to vector<256x32xbf16>
    %16 = arith.truncf %14 : vector<32x1xf32> to vector<32x1xbf16>
    %cst_11 = arith.constant dense<0.000000e+00> : vector<256x1xf32>
    %17 = tpu.matmul %15, %16, %cst_11 {dimension_numbers = #tpu.dot_dimension_numbers<[1], [0], [0], [1], [0, 0, 1, 1], [], []>} : vector<256x32xbf16>, vector<32x1xbf16>, vector<256x1xf32> -> vector<256x1xf32>
    %18 = arith.addf %10, %17 : vector<256x1xf32>
    %19 = vector.extract_strided_slice %1 {offsets = [0, 2, 0], sizes = [16, 16, 32], strides = [1, 1, 1]} : vector<18x18x32xf32> to vector<16x16x32xf32>
    %20 = vector.shape_cast %19 : vector<16x16x32xf32> to vector<256x32xf32>
    %c0_12 = arith.constant 0 : index
    %c2 = arith.constant 2 : index
    %c0_13 = arith.constant 0 : index
    %c0_14 = arith.constant 0 : index
    %21 = vector.load %arg2[%c0_12, %c2, %c0_13, %c0_14] : memref<3x3x32x1xf32, #tpu.memory_space<vmem>>, vector<1x1x32x1xf32>
    %22 = vector.shape_cast %21 : vector<1x1x32x1xf32> to vector<32x1xf32>
    %23 = arith.truncf %20 : vector<256x32xf32> to vector<256x32xbf16>
    %24 = arith.truncf %22 : vector<32x1xf32> to vector<32x1xbf16>
    %cst_15 = arith.constant dense<0.000000e+00> : vector<256x1xf32>
    %25 = tpu.matmul %23, %24, %cst_15 {dimension_numbers = #tpu.dot_dimension_numbers<[1], [0], [0], [1], [0, 0, 1, 1], [], []>} : vector<256x32xbf16>, vector<32x1xbf16>, vector<256x1xf32> -> vector<256x1xf32>
    %26 = arith.addf %18, %25 : vector<256x1xf32>
    %27 = vector.extract_strided_slice %1 {offsets = [1, 0, 0], sizes = [16, 16, 32], strides = [1, 1, 1]} : vector<18x18x32xf32> to vector<16x16x32xf32>
    %28 = vector.shape_cast %27 : vector<16x16x32xf32> to vector<256x32xf32>
    %c1_16 = arith.constant 1 : index
    %c0_17 = arith.constant 0 : index
    %c0_18 = arith.constant 0 : index
    %c0_19 = arith.constant 0 : index
    %29 = vector.load %arg2[%c1_16, %c0_17, %c0_18, %c0_19] : memref<3x3x32x1xf32, #tpu.memory_space<vmem>>, vector<1x1x32x1xf32>
    %30 = vector.shape_cast %29 : vector<1x1x32x1xf32> to vector<32x1xf32>
    %31 = arith.truncf %28 : vector<256x32xf32> to vector<256x32xbf16>
    %32 = arith.truncf %30 : vector<32x1xf32> to vector<32x1xbf16>
    %cst_20 = arith.constant dense<0.000000e+00> : vector<256x1xf32>
    %33 = tpu.matmul %31, %32, %cst_20 {dimension_numbers = #tpu.dot_dimension_numbers<[1], [0], [0], [1], [0, 0, 1, 1], [], []>} : vector<256x32xbf16>, vector<32x1xbf16>, vector<256x1xf32> -> vector<256x1xf32>
    %34 = arith.addf %26, %33 : vector<256x1xf32>
    %35 = vector.extract_strided_slice %1 {offsets = [1, 1, 0], sizes = [16, 16, 32], strides = [1, 1, 1]} : vector<18x18x32xf32> to vector<16x16x32xf32>
    %36 = vector.shape_cast %35 : vector<16x16x32xf32> to vector<256x32xf32>
    %c1_21 = arith.constant 1 : index
    %c1_22 = arith.constant 1 : index
    %c0_23 = arith.constant 0 : index
    %c0_24 = arith.constant 0 : index
    %37 = vector.load %arg2[%c1_21, %c1_22, %c0_23, %c0_24] : memref<3x3x32x1xf32, #tpu.memory_space<vmem>>, vector<1x1x32x1xf32>
    %38 = vector.shape_cast %37 : vector<1x1x32x1xf32> to vector<32x1xf32>
    %39 = arith.truncf %36 : vector<256x32xf32> to vector<256x32xbf16>
    %40 = arith.truncf %38 : vector<32x1xf32> to vector<32x1xbf16>
    %cst_25 = arith.constant dense<0.000000e+00> : vector<256x1xf32>
    %41 = tpu.matmul %39, %40, %cst_25 {dimension_numbers = #tpu.dot_dimension_numbers<[1], [0], [0], [1], [0, 0, 1, 1], [], []>} : vector<256x32xbf16>, vector<32x1xbf16>, vector<256x1xf32> -> vector<256x1xf32>
    %42 = arith.addf %34, %41 : vector<256x1xf32>
    %43 = vector.extract_strided_slice %1 {offsets = [1, 2, 0], sizes = [16, 16, 32], strides = [1, 1, 1]} : vector<18x18x32xf32> to vector<16x16x32xf32>
    %44 = vector.shape_cast %43 : vector<16x16x32xf32> to vector<256x32xf32>
    %c1_26 = arith.constant 1 : index
    %c2_27 = arith.constant 2 : index
    %c0_28 = arith.constant 0 : index
    %c0_29 = arith.constant 0 : index
    %45 = vector.load %arg2[%c1_26, %c2_27, %c0_28, %c0_29] : memref<3x3x32x1xf32, #tpu.memory_space<vmem>>, vector<1x1x32x1xf32>
    %46 = vector.shape_cast %45 : vector<1x1x32x1xf32> to vector<32x1xf32>
    %47 = arith.truncf %44 : vector<256x32xf32> to vector<256x32xbf16>
    %48 = arith.truncf %46 : vector<32x1xf32> to vector<32x1xbf16>
    %cst_30 = arith.constant dense<0.000000e+00> : vector<256x1xf32>
    %49 = tpu.matmul %47, %48, %cst_30 {dimension_numbers = #tpu.dot_dimension_numbers<[1], [0], [0], [1], [0, 0, 1, 1], [], []>} : vector<256x32xbf16>, vector<32x1xbf16>, vector<256x1xf32> -> vector<256x1xf32>
    %50 = arith.addf %42, %49 : vector<256x1xf32>
    %51 = vector.extract_strided_slice %1 {offsets = [2, 0, 0], sizes = [16, 16, 32], strides = [1, 1, 1]} : vector<18x18x32xf32> to vector<16x16x32xf32>
    %52 = vector.shape_cast %51 : vector<16x16x32xf32> to vector<256x32xf32>
    %c2_31 = arith.constant 2 : index
    %c0_32 = arith.constant 0 : index
    %c0_33 = arith.constant 0 : index
    %c0_34 = arith.constant 0 : index
    %53 = vector.load %arg2[%c2_31, %c0_32, %c0_33, %c0_34] : memref<3x3x32x1xf32, #tpu.memory_space<vmem>>, vector<1x1x32x1xf32>
    %54 = vector.shape_cast %53 : vector<1x1x32x1xf32> to vector<32x1xf32>
    %55 = arith.truncf %52 : vector<256x32xf32> to vector<256x32xbf16>
    %56 = arith.truncf %54 : vector<32x1xf32> to vector<32x1xbf16>
    %cst_35 = arith.constant dense<0.000000e+00> : vector<256x1xf32>
    %57 = tpu.matmul %55, %56, %cst_35 {dimension_numbers = #tpu.dot_dimension_numbers<[1], [0], [0], [1], [0, 0, 1, 1], [], []>} : vector<256x32xbf16>, vector<32x1xbf16>, vector<256x1xf32> -> vector<256x1xf32>
    %58 = arith.addf %50, %57 : vector<256x1xf32>
    %59 = vector.extract_strided_slice %1 {offsets = [2, 1, 0], sizes = [16, 16, 32], strides = [1, 1, 1]} : vector<18x18x32xf32> to vector<16x16x32xf32>
    %60 = vector.shape_cast %59 : vector<16x16x32xf32> to vector<256x32xf32>
    %c2_36 = arith.constant 2 : index
    %c1_37 = arith.constant 1 : index
    %c0_38 = arith.constant 0 : index
    %c0_39 = arith.constant 0 : index
    %61 = vector.load %arg2[%c2_36, %c1_37, %c0_38, %c0_39] : memref<3x3x32x1xf32, #tpu.memory_space<vmem>>, vector<1x1x32x1xf32>
    %62 = vector.shape_cast %61 : vector<1x1x32x1xf32> to vector<32x1xf32>
    %63 = arith.truncf %60 : vector<256x32xf32> to vector<256x32xbf16>
    %64 = arith.truncf %62 : vector<32x1xf32> to vector<32x1xbf16>
    %cst_40 = arith.constant dense<0.000000e+00> : vector<256x1xf32>
    %65 = tpu.matmul %63, %64, %cst_40 {dimension_numbers = #tpu.dot_dimension_numbers<[1], [0], [0], [1], [0, 0, 1, 1], [], []>} : vector<256x32xbf16>, vector<32x1xbf16>, vector<256x1xf32> -> vector<256x1xf32>
    %66 = arith.addf %58, %65 : vector<256x1xf32>
    %67 = vector.extract_strided_slice %1 {offsets = [2, 2, 0], sizes = [16, 16, 32], strides = [1, 1, 1]} : vector<18x18x32xf32> to vector<16x16x32xf32>
    %68 = vector.shape_cast %67 : vector<16x16x32xf32> to vector<256x32xf32>
    %c2_41 = arith.constant 2 : index
    %c2_42 = arith.constant 2 : index
    %c0_43 = arith.constant 0 : index
    %c0_44 = arith.constant 0 : index
    %69 = vector.load %arg2[%c2_41, %c2_42, %c0_43, %c0_44] : memref<3x3x32x1xf32, #tpu.memory_space<vmem>>, vector<1x1x32x1xf32>
    %70 = vector.shape_cast %69 : vector<1x1x32x1xf32> to vector<32x1xf32>
    %71 = arith.truncf %68 : vector<256x32xf32> to vector<256x32xbf16>
    %72 = arith.truncf %70 : vector<32x1xf32> to vector<32x1xbf16>
    %cst_45 = arith.constant dense<0.000000e+00> : vector<256x1xf32>
    %73 = tpu.matmul %71, %72, %cst_45 {dimension_numbers = #tpu.dot_dimension_numbers<[1], [0], [0], [1], [0, 0, 1, 1], [], []>} : vector<256x32xbf16>, vector<32x1xbf16>, vector<256x1xf32> -> vector<256x1xf32>
    %74 = arith.addf %66, %73 : vector<256x1xf32>
    %c0_46 = arith.constant 0 : index
    %c0_47 = arith.constant 0 : index
    %75 = vector.load %arg3[%c0_46, %c0_47] : memref<1x1xf32, #tpu.memory_space<vmem>>, vector<1x1xf32>
    %76 = vector.broadcast %75 : vector<1x1xf32> to vector<256x1xf32>
    %77 = arith.addf %74, %76 : vector<256x1xf32>
    %c0_48 = arith.constant 0 : index
    %c0_49 = arith.constant 0 : index
    %c0_50 = arith.constant 0 : index
    %78 = vector.load %arg4[%c0_48, %c0_49, %c0_50] : memref<1x256x1xf32, #tpu.memory_space<vmem>>, vector<1x256x1xf32>
    %79 = vector.shape_cast %78 : vector<1x256x1xf32> to vector<256x1xf32>
    %80 = vector.shape_cast %77 : vector<256x1xf32> to vector<1x256x1xf32>
    tpu.vector_store %arg4[%c0_48, %c0_49, %c0_50], %80 {strides = array<i32>} : memref<1x256x1xf32, #tpu.memory_space<vmem>>, vector<1x256x1xf32>,
    return
  }
  func.func @transform_0(%arg0: i32) -> (i32, i32, i32, i32) {
    %c0_i32 = arith.constant 0 : i32
    %c0_i32_0 = arith.constant 0 : i32
    %c0_i32_1 = arith.constant 0 : i32
    %c0_i32_2 = arith.constant 0 : i32
    return %arg0, %c0_i32, %c0_i32_0, %c0_i32_1 : i32, i32, i32, i32
  }
  func.func @transform_1(%arg0: i32) -> (i32, i32, i32, i32) {
    %c0_i32 = arith.constant 0 : i32
    %c0_i32_0 = arith.constant 0 : i32
    %c0_i32_1 = arith.constant 0 : i32
    %c0_i32_2 = arith.constant 0 : i32
    %c0_i32_3 = arith.constant 0 : i32
    return %c0_i32, %c0_i32_0, %c0_i32_1, %c0_i32_2 : i32, i32, i32, i32
  }
  func.func @transform_2(%arg0: i32) -> (i32, i32) {
    %c0_i32 = arith.constant 0 : i32
    %c0_i32_0 = arith.constant 0 : i32
    %c0_i32_1 = arith.constant 0 : i32
    return %c0_i32, %c0_i32_0 : i32, i32
  }
  func.func @transform_3(%arg0: i32) -> (i32, i32, i32) {
    %c0_i32 = arith.constant 0 : i32
    %c0_i32_0 = arith.constant 0 : i32
    %c0_i32_1 = arith.constant 0 : i32
    return %arg0, %c0_i32, %c0_i32_0 : i32, i32, i32
  }
}

</mosaic_0001>

<bundles_post_ra>
// kernel: attention_zbw_forward.5
= control target key start
LH: loop header
LB: loop body
LE: loop exit
PB: predicated region body
PF: predicated region fallthrough
CT: control target
= control target key end

     0   :  { %s1870_s13 = smov 0   ;;  %s1872_s14 = smov 0   ;;  %s2440_s0 = inlined_call_operand.vmem [shape: f32[2,256,32], index: 0, kind: input, shape index: {}]   ;;  %s2441_s1 = inlined_call_operand.vmem [shape: f32[2,4,64,32], index: 1, kind: input, shape index: {}]   ;;  %s2442_s2 = inlined_call_operand.vmem [shape: f32[32,16], index: 2, kind: input, shape index: {}]   ;;  %s2443_s3 = inlined_call_operand.vmem [shape: f32[1,16], index: 3, kind: input, shape index: {}]   ;;  %s2444_s4 = inlined_call_operand.vmem [shape: f32[32,16], index: 4, kind: input, shape index: {}]   ;;  %s2445_s5 = inlined_call_operand.vmem [shape: f32[1,16], index: 5, kind: input, shape index: {}]   ;;  %s2446_s6 = inlined_call_operand.vmem [shape: f32[32,16], index: 6, kind: input, shape index: {}]   ;;  %s2447_s7 = inlined_call_operand.vmem [shape: f32[1,16], index: 7, kind: input, shape index: {}]   ;;  %s2448_s8 = inlined_call_operand.vmem [shape: f32[16,32], index: 8, kind: input, shape index: {}]   ;;  %s2449_s9 = inlined_call_operand.vmem [shape: f32[1,32], index: 9, kind: input, shape index: {}]   ;;  %s2450_s10 = inlined_call_operand.vmem [shape: f32[2,256,32], index: 10, kind: output, shape index: {}]  }
   0x1   :  { %s1874_s15 = smov 0   ;;  %s1876_s16 = smov 0  }
   0x2   :  { %s1878_s17 = smov 0  }
   0x3 LB: > { %s29_s18 = sadd.s32 1, %s1805_s15  ;;  %s32_s19 = sadd.s32 1, %s1809_s16  ;;  %s1813_s17 = sphi %s1878_s17, %s20_s17   ;;  %s1809_s16 = sphi %s1876_s16, %s2456_s16   ;;  %s1805_s15 = sphi %s1874_s15, %s2455_s15   ;;  %s1801_s14 = sphi %s1872_s14, %s2454_s14   ;;  %s1797_s13 = sphi %s1870_s13, %s2453_s13  }
   0x4   : > { %p30_p0 = scmp.ge.s32.totalorder %s29_s18, 2  ;;  %p1546_p1 = scmp.ge.s32.totalorder %s1813_s17, 1 }
   0x5   : > { %p343_p2 = scmp.lt.s32.totalorder %s1813_s17, 5 }
   0x6   : > { %s2458_s18 = smov (%p30_p0, %s29_s18), 0  ;;  %s2460_s19 = smov (!%p30_p0, %s32_s19), %s1809_s16 }
   0x7   : > { %p344_p3 = pnand %p1546_p1, %p343_p2  ;;  %p34_p4 = scmp.ge.s32.totalorder %s2460_s19, 2 }
   0x8   : > { %s1547_s20 = sshll.u32 (!%p344_p3), %s1797_s13, 4  ;;  %p395_p5 = scmp.lt.s32.totalorder (!%p344_p3), %s1801_s14, 1 }
   0x9   : > { %s2462_s19 = smov (%p34_p4, %s2460_s19), 0  ;;  %347 = sbr.rel (%p344_p3) target bundleno = 1107 (0x453), region = 60 }
   0xa   : > { %2451 = sst [smem:[#allocation4_spill]] %s2462_s19  ;;  %p397_p6 = scmp.lt.s32.totalorder (!%p344_p3), %s1547_s20, 31 }
   0xb   : > { %p1555_p7 = scmp.ne.s32.totalorder (!%p344_p3), %s1797_s13, 0 }
   0xe   : > { %s2464_s14 = smov (!%p395_p5, %s1801_s14), 1  ;;  %s2466_s20 = smov (!%p397_p6, %s1547_s20), 31 }
   0xf   : > { %s1548_s21 = sshll.u32 %s2464_s14, 5  ;;  %s1654_s22 = sshll.u32 %s2464_s14, 8 }
  0x10   : > { %s400_s23 = sadd.s32 %s1548_s21, %s2466_s20  ;;  %s1903_s26 = scalar_lea.vmem %s2441_s1, %s1654_s22 }
  0x11   : > { %s1549_s27 = sshll.u32 %s400_s23, 3  ;;  %423 = sbr.rel (%p1555_p7) target bundleno = 294 (0x126), region = 64 }
  0x12   : > { %s1908_s30 = scalar_lea.vmem %s2440_s0, %s1549_s27  ;;  %s1913_s19 = scalar_lea.vmem %s2450_s10, %s1549_s27 }
  0x16   : > { %v474_v0 = vld [vmem:[%s2444_s4 + $0x10] sm:$0xff]  ;;  %v475_v1 = vld [vmem:[%s2444_s4 + $0x18] sm:$0xff]  ;;  %v472_v5 = vld [vmem:[%s2444_s4] sm:$0xff]  ;;  %vm482_vm0 = vcmask 261120   ;;  %vm751_vm1 = vcmask 125952  }
  0x17   : > { %v622_v2 = vld [vmem:[%s2446_s6 + $0x10] sm:$0xff]  ;;  %v477_v3 = vpack.c.bf16 %v475_v1, %v474_v0  ;;  %v623_v4 = vld [vmem:[%s2446_s6 + $0x18] sm:$0xff]  ;;  %v473_v6 = vld [vmem:[%s2444_s4 + $0x8] sm:$0xff] }
  0x18   : > { %v625_v7 = vpack.c.bf16 %v623_v4, %v622_v2  ;;  %v620_v8 = vld [vmem:[%s2446_s6] sm:$0xff]  ;;  %v621_v9 = vld [vmem:[%s2446_s6 + $0x8] sm:$0xff]  ;;  %v476_v11 = vpack.c.bf16 %v473_v6, %v472_v5  ;;  %v426_v18 = vld [vmem:[%s1903_s26 + $0x10] sm:$0xff] }
  0x19   : > { %v424_v10 = vld [vmem:[%s1903_s26] sm:$0xff]  ;;  %537 = vmatpush.bf16.msra.mxu0 %v477_v3  ;;  %1663 = vmatpush.bf16.msra.mxu2 %v477_v3  ;;  %v425_v12 = vld [vmem:[%s1903_s26 + $0x8] sm:$0xff]  ;;  %v624_v15 = vpack.c.bf16 %v621_v9, %v620_v8  ;;  %v427_v19 = vld [vmem:[%s1903_s26 + $0x18] sm:$0xff] }
  0x1a   : > { %v440_v13 = vld [vmem:[%s1903_s26 + $0x80] sm:$0xff]  ;;  %v441_v14 = vld [vmem:[%s1903_s26 + $0x88] sm:$0xff]  ;;  %636 = vmatpush.bf16.msra.mxu1 %v625_v7  ;;  %1665 = vmatpush.bf16.msra.mxu3 %v625_v7  ;;  %v456_v16 = vpack.c.bf16 %v425_v12, %v424_v10  ;;  %v442_v20 = vld [vmem:[%s1903_s26 + $0x90] sm:$0xff]  ;;  %v457_v22 = vpack.c.bf16 %v427_v19, %v426_v18 }
  0x1b   : > { %v464_v17 = vpack.c.bf16 %v441_v14, %v440_v13  ;;  %v443_v21 = vld [vmem:[%s1903_s26 + $0x98] sm:$0xff]  ;;  %v428_v24 = vld [vmem:[%s1903_s26 + $0x20] sm:$0xff]  ;;  %v429_v25 = vld [vmem:[%s1903_s26 + $0x28] sm:$0xff] }
  0x1c   : > { %v465_v23 = vpack.c.bf16 %v443_v21, %v442_v20  ;;  %v444_v26 = vld [vmem:[%s1903_s26 + $0xa0] sm:$0xff]  ;;  %v445_v27 = vld [vmem:[%s1903_s26 + $0xa8] sm:$0xff]  ;;  %v458_v28 = vpack.c.bf16 %v429_v25, %v428_v24  ;;  %v430_v30 = vld [vmem:[%s1903_s26 + $0x30] sm:$0xff] }
  0x1d   : > { %538 = vmatpush.bf16.msra.mxu0 %v476_v11  ;;  %1664 = vmatpush.bf16.msra.mxu2 %v476_v11  ;;  %v466_v29 = vpack.c.bf16 %v445_v27, %v444_v26  ;;  %v431_v31 = vld [vmem:[%s1903_s26 + $0x38] sm:$0xff]  ;;  %v446_v32 = vld [vmem:[%s1903_s26 + $0xb0] sm:$0xff]  ;;  %v432_v36 = vld [vmem:[%s1903_s26 + $0x40] sm:$0xff] }
  0x1e   : > { %637 = vmatpush.bf16.msra.mxu1 %v624_v15  ;;  %1666 = vmatpush.bf16.msra.mxu3 %v624_v15  ;;  %v447_v33 = vld [vmem:[%s1903_s26 + $0xb8] sm:$0xff]  ;;  %v459_v34 = vpack.c.bf16 %v431_v31, %v430_v30  ;;  %v433_v37 = vld [vmem:[%s1903_s26 + $0x48] sm:$0xff]  ;;  %v448_v38 = vld [vmem:[%s1903_s26 + $0xc0] sm:$0xff] }
  0x1f   : > { %v467_v35 = vpack.c.bf16 %v447_v33, %v446_v32  ;;  %v449_v39 = vld [vmem:[%s1903_s26 + $0xc8] sm:$0xff]  ;;  %v460_v40 = vpack.c.bf16 %v433_v37, %v432_v36  ;;  %v434_v42 = vld [vmem:[%s1903_s26 + $0x50] sm:$0xff]  ;;  %v435_v43 = vld [vmem:[%s1903_s26 + $0x58] sm:$0xff] }
  0x20   : > { %1556 = vmatmul.msk.bf16.vlgmr.msra.gmra.mxu0 %vm482_vm0, %v456_v16  ;;  %1564 = vmatmul.msk.bf16.vlgmr.msra.gmra.mxu2 %vm482_vm0, %v464_v17  ;;  %v468_v41 = vpack.c.bf16 %v449_v39, %v448_v38  ;;  %v450_v44 = vld [vmem:[%s1903_s26 + $0xd0] sm:$0xff]  ;;  %v451_v45 = vld [vmem:[%s1903_s26 + $0xd8] sm:$0xff]  ;;  %v461_v46 = vpack.c.bf16 %v435_v43, %v434_v42  ;;  %v436_v48 = vld [vmem:[%s1903_s26 + $0x60] sm:$0xff] }
  0x21   : > { %1572 = vmatmul.msk.bf16.vlgmr.msra.gmra.mxu1 %vm482_vm0, %v456_v16  ;;  %1580 = vmatmul.msk.bf16.vlgmr.msra.gmra.mxu3 %vm482_vm0, %v464_v17  ;;  %v469_v47 = vpack.c.bf16 %v451_v45, %v450_v44  ;;  %v437_v49 = vld [vmem:[%s1903_s26 + $0x68] sm:$0xff]  ;;  %v452_v50 = vld [vmem:[%s1903_s26 + $0xe0] sm:$0xff]  ;;  %v438_v54 = vld [vmem:[%s1903_s26 + $0x70] sm:$0xff] }
  0x22   : > { %v453_v51 = vld [vmem:[%s1903_s26 + $0xe8] sm:$0xff]  ;;  %v462_v52 = vpack.c.bf16 %v437_v49, %v436_v48  ;;  %v439_v55 = vld [vmem:[%s1903_s26 + $0x78] sm:$0xff]  ;;  %v454_v56 = vld [vmem:[%s1903_s26 + $0xf0] sm:$0xff] }
  0x23   : > { %v470_v53 = vpack.c.bf16 %v453_v51, %v452_v50  ;;  %v455_v57 = vld [vmem:[%s1903_s26 + $0xf8] sm:$0xff]  ;;  %v463_v58 = vpack.c.bf16 %v439_v55, %v438_v54  ;;  %v2054_v30 = vld [vmem:[%s2445_s5] ss:$0 sm:$0xff] }
  0x24   : > { %v471_v59 = vpack.c.bf16 %v455_v57, %v454_v56  ;;  %v2059_v31 = vld [vmem:[%s2447_s7] ss:$0 sm:$0xff] }
  0x30   : > { %1557 = vmatmul.msk.bf16.gmra.mxu0 %vm482_vm0, %v457_v22  ;;  %1565 = vmatmul.msk.bf16.gmra.mxu2 %vm482_vm0, %v465_v23 }
  0x31   : > { %1573 = vmatmul.msk.bf16.gmra.mxu1 %vm482_vm0, %v457_v22  ;;  %1581 = vmatmul.msk.bf16.gmra.mxu3 %vm482_vm0, %v465_v23 }
  0x40   : > { %1558 = vmatmul.msk.bf16.gmra.mxu0 %vm482_vm0, %v458_v28  ;;  %1566 = vmatmul.msk.bf16.gmra.mxu2 %vm482_vm0, %v466_v29 }
  0x41   : > { %1574 = vmatmul.msk.bf16.gmra.mxu1 %vm482_vm0, %v458_v28  ;;  %1582 = vmatmul.msk.bf16.gmra.mxu3 %vm482_vm0, %v466_v29 }
  0x50   : > { %1559 = vmatmul.msk.bf16.gmra.mxu0 %vm482_vm0, %v459_v34  ;;  %1567 = vmatmul.msk.bf16.gmra.mxu2 %vm482_vm0, %v467_v35 }
  0x51   : > { %1575 = vmatmul.msk.bf16.gmra.mxu1 %vm482_vm0, %v459_v34  ;;  %1583 = vmatmul.msk.bf16.gmra.mxu3 %vm482_vm0, %v467_v35 }
  0x60   : > { %1560 = vmatmul.msk.bf16.gmra.mxu0 %vm482_vm0, %v460_v40  ;;  %1568 = vmatmul.msk.bf16.gmra.mxu2 %vm482_vm0, %v468_v41 }
  0x61   : > { %1576 = vmatmul.msk.bf16.gmra.mxu1 %vm482_vm0, %v460_v40  ;;  %1584 = vmatmul.msk.bf16.gmra.mxu3 %vm482_vm0, %v468_v41 }
  0x70   : > { %1561 = vmatmul.msk.bf16.gmra.mxu0 %vm482_vm0, %v461_v46  ;;  %1569 = vmatmul.msk.bf16.gmra.mxu2 %vm482_vm0, %v469_v47 }
  0x71   : > { %1577 = vmatmul.msk.bf16.gmra.mxu1 %vm482_vm0, %v461_v46  ;;  %1585 = vmatmul.msk.bf16.gmra.mxu3 %vm482_vm0, %v469_v47 }
  0x80   : > { %1562 = vmatmul.msk.bf16.gmra.mxu0 %vm482_vm0, %v462_v52  ;;  %1570 = vmatmul.msk.bf16.gmra.mxu2 %vm482_vm0, %v470_v53 }
  0x81   : > { %1578 = vmatmul.msk.bf16.gmra.mxu1 %vm482_vm0, %v462_v52  ;;  %1586 = vmatmul.msk.bf16.gmra.mxu3 %vm482_vm0, %v470_v53 }
  0x90   : > { %1563 = vmatmul.msk.bf16.gmra.mxu0 %vm482_vm0, %v463_v58  ;;  %1571 = vmatmul.msk.bf16.gmra.mxu2 %vm482_vm0, %v471_v59 }
  0x91   : > { %1579 = vmatmul.msk.bf16.gmra.mxu1 %vm482_vm0, %v463_v58  ;;  %1587 = vmatmul.msk.bf16.gmra.mxu3 %vm482_vm0, %v471_v59 }
  0x9d   : > { %v540_v60 = vpop.f32.mrf.mxu0 }
  0x9e   : > { %v639_v61 = vpop.f32.mrf.mxu1  ;;  %v541_v35 = vadd.f32 %v2054_v30, %v540_v60 }
  0x9f   : > { %v640_v39 = vadd.f32 %v2059_v31, %v639_v61 }
  0xa3   : > { %v580_v62 = vpop.f32.mrf.mxu2 }
  0xa4   : > { %v679_v63 = vpop.f32.mrf.mxu3  ;;  %v581_v36 = vadd.f32 %v2054_v30, %v580_v62 }
  0xa5   : > { %v542_v0 = vpop.f32.mrf.mxu0  ;;  %v680_v40 = vadd.f32 %v2059_v31, %v679_v63 }
  0xa6   : > { %v641_v1 = vpop.f32.mrf.mxu1  ;;  %v543_v55 = vadd.f32 %v2054_v30, %v542_v0 }
  0xa7   : > { %v642_v59 = vadd.f32 %v2059_v31, %v641_v1 }
  0xab   : > { %v582_v2 = vpop.f32.mrf.mxu2 }
  0xac   : > { %v681_v3 = vpop.f32.mrf.mxu3  ;;  %v583_v56 = vadd.f32 %v2054_v30, %v582_v2 }
  0xad   : > { %v2003_v4 = vpop.f32.mrf.mxu0  ;;  %v682_v60 = vadd.f32 %v2059_v31, %v681_v3 }
  0xae   : > { %v2005_v5 = vpop.f32.mrf.mxu1  ;;  %v546_v3 = vadd.f32 %v2054_v30, %v2003_v4 }
  0xb3   : > { %v2007_v6 = vpop.f32.mrf.mxu2 }
  0xb4   : > { %v2009_v7 = vpop.f32.mrf.mxu3 }
  0xb5   : > { %v2011_v8 = vpop.f32.mrf.mxu0 }
  0xb6   : > { %v2013_v9 = vpop.f32.mrf.mxu1 }
  0xbb   : > { %v2015_v10 = vpop.f32.mrf.mxu2 }
  0xbc   : > { %v2017_v11 = vpop.f32.mrf.mxu3 }
  0xbd   : > { %v2019_v12 = vpop.f32.mrf.mxu0 }
  0xbe   : > { %v2021_v13 = vpop.f32.mrf.mxu1 }
  0xc3   : > { %v2023_v14 = vpop.f32.mrf.mxu2 }
  0xc4   : > { %v2025_v15 = vpop.f32.mrf.mxu3 }
  0xc5   : > { %v2027_v16 = vpop.f32.mrf.mxu0 }
  0xc6   : > { %v2029_v17 = vpop.f32.mrf.mxu1 }
  0xcb   : > { %v2031_v18 = vpop.f32.mrf.mxu2 }
  0xcc   : > { %v2033_v19 = vpop.f32.mrf.mxu3 }
  0xcd   : > { %v2035_v20 = vpop.f32.mrf.mxu0 }
  0xce   : > { %v2037_v21 = vpop.f32.mrf.mxu1 }
  0xd3   : > { %v2039_v22 = vpop.f32.mrf.mxu2 }
  0xd4   : > { %v2041_v23 = vpop.f32.mrf.mxu3 }
  0xd5   : > { %v2043_v24 = vpop.f32.mrf.mxu0 }
  0xd6   : > { %v2045_v25 = vpop.f32.mrf.mxu1 }
  0xdb   : > { %v2047_v26 = vpop.f32.mrf.mxu2 }
  0xdc   : > { %v2049_v27 = vpop.f32.mrf.mxu3 }
  0xdd   : > { %v560_v28 = vpop.f32.mrf.mxu0 }
  0xde   : > { %v659_v29 = vpop.f32.mrf.mxu1  ;;  %v561_v32 = vadd.f32 %v2054_v30, %v560_v28 }
  0xdf   : > { %v660_v33 = vadd.f32 %v2059_v31, %v659_v29 }
  0xe0   : > { %v719_v43 = vmax.f32 %v541_v35, %v561_v32 }
  0xe1   : > { %v760_v46 = vmax.f32 %v640_v39, %v660_v33 }
  0xe3   : > { %v600_v34 = vpop.f32.mrf.mxu2 }
  0xe4   : > { %v601_v37 = vadd.f32 %v2054_v30, %v600_v34  ;;  %v699_v38 = vpop.f32.mrf.mxu3 }
  0xe5   : > { %v700_v41 = vadd.f32 %v2059_v31, %v699_v38  ;;  %v562_v42 = vpop.f32.mrf.mxu0  ;;  %v586_v38 = vadd.f32 %v2054_v30, %v2007_v6 }
  0xe6   : > { %v727_v44 = vmax.f32 %v581_v36, %v601_v37  ;;  %v661_v45 = vpop.f32.mrf.mxu1  ;;  %v563_v51 = vadd.f32 %v2054_v30, %v562_v42  ;;  %v685_v42 = vadd.f32 %v2059_v31, %v2009_v7  ;;  %v548_v7 = vadd.f32 %v2054_v30, %v2011_v8 }
  0xe7   : > { %v768_v47 = vmax.f32 %v680_v40, %v700_v41  ;;  %v662_v53 = vadd.f32 %v2059_v31, %v661_v45  ;;  %v645_v41 = vadd.f32 %v2059_v31, %v2005_v5 }
  0xe8   : > { %v735_v48 = vmax.f32 %v719_v43, %v727_v44  ;;  %v720_v63 = vmax.f32 %v543_v55, %v563_v51 }
  0xe9   : > { %v776_v49 = vmax.f32 %v760_v46, %v768_v47  ;;  %v761_v0 = vmax.f32 %v642_v59, %v662_v53 }
  0xea   : > { %v743_v50 = vpack.c.bf16 %v735_v48, %v735_v48 }
  0xeb   : > { %v784_v52 = vpack.c.bf16 %v776_v49, %v776_v49  ;;  %v602_v54 = vpop.f32.mrf.mxu2 }
  0xec   : > { %752 = vst.msk [vmem:[#allocation2] sm:$0xf] %vm751_vm1, %v743_v50  ;;  %v603_v57 = vadd.f32 %v2054_v30, %v602_v54  ;;  %v701_v58 = vpop.f32.mrf.mxu3  ;;  %v588_v54 = vadd.f32 %v2054_v30, %v2015_v10 }
  0xed   : > { %792 = vst.msk [vmem:[#allocation3] sm:$0xf] %vm751_vm1, %v784_v52  ;;  %v702_v61 = vadd.f32 %v2059_v31, %v701_v58  ;;  %v565_v62 = vpop.f32.mrf.mxu0  ;;  %v687_v58 = vadd.f32 %v2059_v31, %v2017_v11  ;;  %v551_v11 = vadd.f32 %v2054_v30, %v2019_v12 }
  0xee   : > { %v728_v28 = vmax.f32 %v583_v56, %v603_v57  ;;  %v664_v29 = vpop.f32.mrf.mxu1  ;;  %v566_v35 = vadd.f32 %v2054_v30, %v565_v62  ;;  %v647_v57 = vadd.f32 %v2059_v31, %v2013_v9 }
  0xef   : > { %v769_v32 = vmax.f32 %v682_v60, %v702_v61  ;;  %v665_v1 = vadd.f32 %v2059_v31, %v664_v29 }
  0xf0   : > { %v736_v2 = vmax.f32 %v720_v63, %v728_v28  ;;  %v721_v4 = vmax.f32 %v546_v3, %v566_v35 }
  0xf1   : > { %v777_v33 = vmax.f32 %v761_v0, %v769_v32  ;;  %v762_v6 = vmax.f32 %v645_v41, %v665_v1  ;;  %v650_v1 = vadd.f32 %v2059_v31, %v2021_v13 }
  0xf2   : > { %v744_v34 = vpack.c.bf16 %v736_v2, %v736_v2 }
  0xf3   : > { %v785_v36 = vpack.c.bf16 %v777_v33, %v777_v33  ;;  %v605_v37 = vpop.f32.mrf.mxu2 }
  0xf4   : > { %753 = vst.msk [vmem:[#allocation2 + $0x4] sm:$0xf] %vm751_vm1, %v744_v34  ;;  %v606_v39 = vadd.f32 %v2054_v30, %v605_v37  ;;  %v704_v40 = vpop.f32.mrf.mxu3  ;;  %v591_v34 = vadd.f32 %v2054_v30, %v2023_v14  ;;  %v690_v37 = vadd.f32 %v2059_v31, %v2025_v15  ;;  %v553_v15 = vadd.f32 %v2054_v30, %v2027_v16 }
  0xf5   : > { %793 = vst.msk [vmem:[#allocation3 + $0x4] sm:$0xf] %vm751_vm1, %v785_v36  ;;  %v705_v43 = vadd.f32 %v2059_v31, %v704_v40  ;;  %v567_v44 = vpop.f32.mrf.mxu0 }
  0xf6   : > { %v729_v45 = vmax.f32 %v586_v38, %v606_v39  ;;  %v666_v46 = vpop.f32.mrf.mxu1  ;;  %v568_v51 = vadd.f32 %v2054_v30, %v567_v44 }
  0xf7   : > { %v770_v47 = vmax.f32 %v685_v42, %v705_v43  ;;  %v667_v5 = vadd.f32 %v2059_v31, %v666_v46 }
  0xf8   : > { %v737_v48 = vmax.f32 %v721_v4, %v729_v45  ;;  %v722_v8 = vmax.f32 %v548_v7, %v568_v51 }
  0xf9   : > { %v778_v49 = vmax.f32 %v762_v6, %v770_v47  ;;  %v763_v10 = vmax.f32 %v647_v57, %v667_v5  ;;  %v593_v6 = vadd.f32 %v2054_v30, %v2031_v18 }
  0xfa   : > { %v745_v50 = vpack.c.bf16 %v737_v48, %v737_v48 }
  0xfb   : > { %v786_v52 = vpack.c.bf16 %v778_v49, %v778_v49  ;;  %v607_v53 = vpop.f32.mrf.mxu2  ;;  %v652_v49 = vadd.f32 %v2059_v31, %v2029_v17 }
  0xfc   : > { %754 = vst.msk [vmem:[#allocation2 + $0x8] sm:$0xf] %vm751_vm1, %v745_v50  ;;  %v608_v55 = vadd.f32 %v2054_v30, %v607_v53  ;;  %v706_v56 = vpop.f32.mrf.mxu3  ;;  %v692_v50 = vadd.f32 %v2059_v31, %v2033_v19  ;;  %v556_v19 = vadd.f32 %v2054_v30, %v2035_v20 }
  0xfd   : > { %794 = vst.msk [vmem:[#allocation3 + $0x8] sm:$0xf] %vm751_vm1, %v786_v52  ;;  %v707_v59 = vadd.f32 %v2059_v31, %v706_v56  ;;  %v570_v60 = vpop.f32.mrf.mxu0 }
  0xfe   : > { %v730_v61 = vmax.f32 %v588_v54, %v608_v55  ;;  %v669_v62 = vpop.f32.mrf.mxu1  ;;  %v571_v32 = vadd.f32 %v2054_v30, %v570_v60  ;;  %v596_v60 = vadd.f32 %v2054_v30, %v2039_v22 }
  0xff   : > { %v771_v63 = vmax.f32 %v687_v58, %v707_v59  ;;  %v670_v9 = vadd.f32 %v2059_v31, %v669_v62  ;;  %v655_v62 = vadd.f32 %v2059_v31, %v2037_v21 }
 0x100   : > { %v738_v28 = vmax.f32 %v722_v8, %v730_v61  ;;  %v723_v12 = vmax.f32 %v551_v11, %v571_v32 }
 0x101   : > { %v779_v29 = vmax.f32 %v763_v10, %v771_v63  ;;  %v764_v14 = vmax.f32 %v650_v1, %v670_v9  ;;  %v695_v10 = vadd.f32 %v2059_v31, %v2041_v23  ;;  %v558_v23 = vadd.f32 %v2054_v30, %v2043_v24 }
 0x102   : > { %v746_v0 = vpack.c.bf16 %v738_v28, %v738_v28 }
 0x103   : > { %v787_v2 = vpack.c.bf16 %v779_v29, %v779_v29  ;;  %v610_v33 = vpop.f32.mrf.mxu2 }
 0x104   : > { %755 = vst.msk [vmem:[#allocation2 + $0xc] sm:$0xf] %vm751_vm1, %v746_v0  ;;  %v611_v35 = vadd.f32 %v2054_v30, %v610_v33  ;;  %v709_v36 = vpop.f32.mrf.mxu3 }
 0x105   : > { %795 = vst.msk [vmem:[#allocation3 + $0xc] sm:$0xf] %vm751_vm1, %v787_v2  ;;  %v710_v3 = vadd.f32 %v2059_v31, %v709_v36  ;;  %v572_v38 = vpop.f32.mrf.mxu0  ;;  %v598_v36 = vadd.f32 %v2054_v30, %v2047_v26 }
 0x106   : > { %v731_v39 = vmax.f32 %v591_v34, %v611_v35  ;;  %v671_v40 = vpop.f32.mrf.mxu1  ;;  %v573_v4 = vadd.f32 %v2054_v30, %v572_v38  ;;  %v697_v38 = vadd.f32 %v2059_v31, %v2049_v27 }
 0x107   : > { %v772_v41 = vmax.f32 %v690_v37, %v710_v3  ;;  %v672_v13 = vadd.f32 %v2059_v31, %v671_v40  ;;  %v657_v3 = vadd.f32 %v2059_v31, %v2045_v25 }
 0x108   : > { %v739_v42 = vmax.f32 %v723_v12, %v731_v39  ;;  %v724_v16 = vmax.f32 %v553_v15, %v573_v4 }
 0x109   : > { %v780_v43 = vmax.f32 %v764_v14, %v772_v41  ;;  %v765_v18 = vmax.f32 %v652_v49, %v672_v13 }
 0x10a   : > { %v747_v44 = vpack.c.bf16 %v739_v42, %v739_v42 }
 0x10b   : > { %v788_v45 = vpack.c.bf16 %v780_v43, %v780_v43  ;;  %v612_v46 = vpop.f32.mrf.mxu2 }
 0x10c   : > { %756 = vst.msk [vmem:[#allocation2 + $0x10] sm:$0xf] %vm751_vm1, %v747_v44  ;;  %v613_v47 = vadd.f32 %v2054_v30, %v612_v46  ;;  %v711_v48 = vpop.f32.mrf.mxu3 }
 0x10d   : > { %796 = vst.msk [vmem:[#allocation3 + $0x10] sm:$0xf] %vm751_vm1, %v788_v45  ;;  %v712_v51 = vadd.f32 %v2059_v31, %v711_v48  ;;  %v575_v52 = vpop.f32.mrf.mxu0 }
 0x10e   : > { %v732_v5 = vmax.f32 %v593_v6, %v613_v47  ;;  %v674_v53 = vpop.f32.mrf.mxu1  ;;  %v576_v57 = vadd.f32 %v2054_v30, %v575_v52 }
 0x10f   : > { %v773_v7 = vmax.f32 %v692_v50, %v712_v51  ;;  %v675_v17 = vadd.f32 %v2059_v31, %v674_v53 }
 0x110   : > { %v740_v54 = vmax.f32 %v724_v16, %v732_v5  ;;  %v725_v28 = vmax.f32 %v556_v19, %v576_v57 }
 0x111   : > { %v781_v55 = vmax.f32 %v765_v18, %v773_v7  ;;  %v766_v29 = vmax.f32 %v655_v62, %v675_v17 }
 0x112   : > { %v748_v56 = vpack.c.bf16 %v740_v54, %v740_v54 }
 0x113   : > { %v789_v58 = vpack.c.bf16 %v781_v55, %v781_v55  ;;  %v615_v59 = vpop.f32.mrf.mxu2 }
 0x114   : > { %757 = vst.msk [vmem:[#allocation2 + $0x14] sm:$0xf] %vm751_vm1, %v748_v56  ;;  %v616_v8 = vadd.f32 %v2054_v30, %v615_v59  ;;  %v714_v61 = vpop.f32.mrf.mxu3 }
 0x115   : > { %797 = vst.msk [vmem:[#allocation3 + $0x14] sm:$0xf] %vm751_vm1, %v789_v58  ;;  %v715_v63 = vadd.f32 %v2059_v31, %v714_v61  ;;  %v577_v22 = vpop.f32.mrf.mxu0 }
 0x116   : > { %v733_v20 = vmax.f32 %v596_v60, %v616_v8  ;;  %v676_v2 = vpop.f32.mrf.mxu1  ;;  %v578_v11 = vadd.f32 %v2054_v30, %v577_v22 }
 0x117   : > { %v774_v0 = vmax.f32 %v695_v10, %v715_v63  ;;  %v677_v21 = vadd.f32 %v2059_v31, %v676_v2 }
 0x118   : > { %v741_v32 = vmax.f32 %v725_v28, %v733_v20  ;;  %v726_v39 = vmax.f32 %v558_v23, %v578_v11 }
 0x119   : > { %v782_v9 = vmax.f32 %v766_v29, %v774_v0  ;;  %v767_v40 = vmax.f32 %v657_v3, %v677_v21 }
 0x11a   : > { %v749_v33 = vpack.c.bf16 %v741_v32, %v741_v32 }
 0x11b   : > { %v790_v34 = vpack.c.bf16 %v782_v9, %v782_v9  ;;  %v617_v35 = vpop.f32.mrf.mxu2 }
 0x11c   : > { %758 = vst.msk [vmem:[#allocation2 + $0x18] sm:$0xf] %vm751_vm1, %v749_v33  ;;  %v618_v1 = vadd.f32 %v2054_v30, %v617_v35  ;;  %v716_v37 = vpop.f32.mrf.mxu3 }
 0x11d   : > { %798 = vst.msk [vmem:[#allocation3 + $0x18] sm:$0xf] %vm751_vm1, %v790_v34  ;;  %v717_v12 = vadd.f32 %v2059_v31, %v716_v37 }
 0x11e   : > { %v734_v24 = vmax.f32 %v598_v36, %v618_v1 }
 0x11f   : > { %v775_v14 = vmax.f32 %v697_v38, %v717_v12 }
 0x120   : > { %v742_v26 = vmax.f32 %v726_v39, %v734_v24 }
 0x121   : > { %v783_v41 = vmax.f32 %v767_v40, %v775_v14 }
 0x122   : > { %v750_v42 = vpack.c.bf16 %v742_v26, %v742_v26 }
 0x123   : > { %v791_v43 = vpack.c.bf16 %v783_v41, %v783_v41 }
 0x124   : > { %759 = vst.msk [vmem:[#allocation2 + $0x1c] sm:$0xf] %vm751_vm1, %v750_v42 }
 0x125   : > { %799 = vst.msk [vmem:[#allocation3 + $0x1c] sm:$0xf] %vm751_vm1, %v791_v43 }
 0x126 PF: > { %v826_v25 = vld [vmem:[%s2442_s2 + $0x10] sm:$0xff]  ;;  %v827_v27 = vld [vmem:[%s2442_s2 + $0x18] sm:$0xff]  ;;  %v824_v30 = vld [vmem:[%s2442_s2] sm:$0xff]  ;;  %vm834_vm2 = vcmask 261120   ;;  %vm944_vm3 = vcmask 130048   ;;  %vm1030_vm4 = vcmask 523264  }
 0x127   : > { %v829_v31 = vpack.c.bf16 %v827_v27, %v826_v25  ;;  %v825_v44 = vld [vmem:[%s2442_s2 + $0x8] sm:$0xff]  ;;  %v2178_v4 = vld [vmem:[%s1908_s30] sm:$0xff]  ;;  %v2187_v15 = vld [vmem:[%s1908_s30 + $0x10] sm:$0xff] }
 0x128   : > { %v828_v45 = vpack.c.bf16 %v825_v44, %v824_v30  ;;  %v2181_v13 = vld [vmem:[%s1908_s30 + $0x8] sm:$0xff]  ;;  %v2190_v6 = vld [vmem:[%s1908_s30 + $0x18] sm:$0xff]  ;;  %v2196_v48 = vld [vmem:[%s1908_s30 + $0x20] sm:$0xff] }
 0x129   : > { %865 = vmatpush.bf16.msra.mxu0 %v829_v31  ;;  %v816_v46 = vpack.c.bf16 %v2181_v13, %v2178_v4  ;;  %v817_v47 = vpack.c.bf16 %v2190_v6, %v2187_v15  ;;  %v2199_v49 = vld [vmem:[%s1908_s30 + $0x28] sm:$0xff]  ;;  %v2205_v51 = vld [vmem:[%s1908_s30 + $0x30] sm:$0xff]  ;;  %v2208_v52 = vld [vmem:[%s1908_s30 + $0x38] sm:$0xff] }
 0x12a   : > { %v818_v50 = vpack.c.bf16 %v2199_v49, %v2196_v48  ;;  %v819_v16 = vpack.c.bf16 %v2208_v52, %v2205_v51  ;;  %v2214_v5 = vld [vmem:[%s1908_s30 + $0x40] sm:$0xff]  ;;  %v2217_v53 = vld [vmem:[%s1908_s30 + $0x48] sm:$0xff]  ;;  %v2224_v55 = vld [vmem:[%s1908_s30 + $0x50] sm:$0xff] }
 0x12b   : > { %v820_v18 = vpack.c.bf16 %v2217_v53, %v2214_v5  ;;  %v2227_v56 = vld [vmem:[%s1908_s30 + $0x58] sm:$0xff]  ;;  %v1657_v58 = vld [vmem:[#allocation3 + $0x10] sm:$0xff]  ;;  %v1656_v59 = vld [vmem:[#allocation3 + $0x8] sm:$0xff] }
 0x12c   : > { %v1658_v7 = vld [vmem:[#allocation3 + $0x18] sm:$0xff]  ;;  %v821_v57 = vpack.c.bf16 %v2227_v56, %v2224_v55  ;;  %v976_v17 = vsel %vm944_vm3, %v1657_v58, 0  ;;  %v973_v19 = vsel %vm944_vm3, %v1656_v59, 0  ;;  %v2235_v60 = vld [vmem:[%s1908_s30 + $0x60] sm:$0xff]  ;;  %v2238_v8 = vld [vmem:[%s1908_s30 + $0x68] sm:$0xff] }
 0x12d   : > { %866 = vmatpush.bf16.msra.mxu0 %v828_v45  ;;  %v979_v54 = vsel %vm944_vm3, %v1658_v7, 0  ;;  %v822_v61 = vpack.c.bf16 %v2238_v8, %v2235_v60  ;;  %v1655_v62 = vld [vmem:[#allocation3] sm:$0xff]  ;;  %v2245_v63 = vld [vmem:[%s1908_s30 + $0x70] sm:$0xff]  ;;  %v2248_v28 = vld [vmem:[%s1908_s30 + $0x78] sm:$0xff] }
 0x12e   : > { %985 = vmatpush.bf16.xpose.msra.mxu1 %v979_v54  ;;  %v970_v10 = vsel %vm944_vm3, %v1655_v62, 0  ;;  %v823_v20 = vpack.c.bf16 %v2248_v28, %v2245_v63  ;;  %v1709_v0 = vld [vmem:[%s2443_s3] ss:$0 sm:$0xff] }
 0x130   : > { %1588 = vmatmul.msk.bf16.vlgmr.msra.gmra.mxu0 %vm834_vm2, %v816_v46 }
 0x136   : > { %986 = vmatpush.bf16.xpose.msra.mxu1 %v976_v17 }
 0x13e   : > { %987 = vmatpush.bf16.xpose.msra.mxu1 %v973_v19 }
 0x140   : > { %1589 = vmatmul.msk.bf16.gmra.mxu0 %vm834_vm2, %v817_v47 }
 0x146   : > { %988 = vmatpush.bf16.xpose.msra.mxu1 %v970_v10 }
 0x150   : > { %1590 = vmatmul.msk.bf16.gmra.mxu0 %vm834_vm2, %v818_v50 }
 0x160   : > { %1591 = vmatmul.msk.bf16.gmra.mxu0 %vm834_vm2, %v819_v16 }
 0x170   : > { %1592 = vmatmul.msk.bf16.gmra.mxu0 %vm834_vm2, %v820_v18 }
 0x180   : > { %1593 = vmatmul.msk.bf16.gmra.mxu0 %vm834_vm2, %v821_v57 }
 0x190   : > { %1594 = vmatmul.msk.bf16.gmra.mxu0 %vm834_vm2, %v822_v61 }
 0x1a0   : > { %1595 = vmatmul.msk.bf16.gmra.mxu0 %vm834_vm2, %v823_v20 }
 0x1ad   : > { %v868_v29 = vpop.f32.mrf.mxu0 }
 0x1ae   : > { %v869_v32 = vadd.f32 %v1709_v0, %v868_v29 }
 0x1b5   : > { %v870_v22 = vpop.f32.mrf.mxu0 }
 0x1b6   : > { %v871_v2 = vadd.f32 %v1709_v0, %v870_v22 }
 0x1b8   : > { %v908_v9 = vpack.c.bf16 %v871_v2, %v869_v32 }
 0x1ba   : > { %1612 = vmatmul.msk.bf16.vlgmr.msra.gmra.mxu1 %vm944_vm3, %v908_v9 }
 0x1bd   : > { %v873_v33 = vpop.f32.mrf.mxu0 }
 0x1be   : > { %v874_v34 = vadd.f32 %v1709_v0, %v873_v33 }
 0x1c5   : > { %v875_v11 = vpop.f32.mrf.mxu0 }
 0x1c6   : > { %v876_v21 = vadd.f32 %v1709_v0, %v875_v11 }
 0x1c8   : > { %v909_v35 = vpack.c.bf16 %v876_v21, %v874_v34 }
 0x1ca   : > { %1613 = vmatmul.msk.bf16.gmra.mxu1 %vm944_vm3, %v909_v35 }
 0x1cd   : > { %v878_v23 = vpop.f32.mrf.mxu0 }
 0x1ce   : > { %v879_v1 = vadd.f32 %v1709_v0, %v878_v23 }
 0x1d5   : > { %v880_v36 = vpop.f32.mrf.mxu0 }
 0x1d6   : > { %v881_v37 = vadd.f32 %v1709_v0, %v880_v36 }
 0x1d8   : > { %v910_v3 = vpack.c.bf16 %v881_v37, %v879_v1 }
 0x1da   : > { %1614 = vmatmul.msk.bf16.gmra.mxu1 %vm944_vm3, %v910_v3 }
 0x1dd   : > { %v883_v38 = vpop.f32.mrf.mxu0 }
 0x1de   : > { %v884_v39 = vadd.f32 %v1709_v0, %v883_v38 }
 0x1e5   : > { %v885_v12 = vpop.f32.mrf.mxu0 }
 0x1e6   : > { %v886_v24 = vadd.f32 %v1709_v0, %v885_v12  ;;  %v1662_v12 = vld [vmem:[#allocation2 + $0x18] sm:$0xff] }
 0x1e7   : > { %1243 = vmatpush.bf16.msra.mxu2 %v1662_v12 }
 0x1e8   : > { %v911_v40 = vpack.c.bf16 %v886_v24, %v884_v39  ;;  %v1661_v39 = vld [vmem:[#allocation2 + $0x10] sm:$0xff] }
 0x1ea   : > { %1615 = vmatmul.msk.bf16.gmra.mxu1 %vm944_vm3, %v911_v40 }
 0x1eb   : > { %1244 = vmatpush.bf16.msra.mxu2 %v1661_v39 }
 0x1ed   : > { %v888_v14 = vpop.f32.mrf.mxu0 }
 0x1ee   : > { %v889_v41 = vadd.f32 %v1709_v0, %v888_v14  ;;  %v1660_v14 = vld [vmem:[#allocation2 + $0x8] sm:$0xff] }
 0x1ef   : > { %1245 = vmatpush.bf16.msra.mxu2 %v1660_v14 }
 0x1f5   : > { %v890_v26 = vpop.f32.mrf.mxu0 }
 0x1f6   : > { %v891_v42 = vadd.f32 %v1709_v0, %v890_v26  ;;  %v1659_v26 = vld [vmem:[#allocation2] sm:$0xff] }
 0x1f7   : > { %1246 = vmatpush.bf16.msra.mxu2 %v1659_v26 }
 0x1f8   : > { %v912_v43 = vpack.c.bf16 %v891_v42, %v889_v41 }
 0x1fa   : > { %1616 = vmatmul.msk.bf16.gmra.mxu1 %vm944_vm3, %v912_v43 }
 0x1fd   : > { %v893_v25 = vpop.f32.mrf.mxu0 }
 0x1fe   : > { %v894_v30 = vadd.f32 %v1709_v0, %v893_v25 }
 0x205   : > { %v895_v27 = vpop.f32.mrf.mxu0 }
 0x206   : > { %v896_v31 = vadd.f32 %v1709_v0, %v895_v27 }
 0x208   : > { %v913_v44 = vpack.c.bf16 %v896_v31, %v894_v30 }
 0x20a   : > { %1617 = vmatmul.msk.bf16.gmra.mxu1 %vm944_vm3, %v913_v44 }
 0x20d   : > { %v898_v45 = vpop.f32.mrf.mxu0 }
 0x20e   : > { %v899_v47 = vadd.f32 %v1709_v0, %v898_v45 }
 0x215   : > { %v900_v46 = vpop.f32.mrf.mxu0 }
 0x216   : > { %v901_v50 = vadd.f32 %v1709_v0, %v900_v46 }
 0x218   : > { %v914_v16 = vpack.c.bf16 %v901_v50, %v899_v47 }
 0x21a   : > { %1618 = vmatmul.msk.bf16.gmra.mxu1 %vm944_vm3, %v914_v16 }
 0x21d   : > { %v903_v18 = vpop.f32.mrf.mxu0 }
 0x21e   : > { %v904_v54 = vadd.f32 %v1709_v0, %v903_v18 }
 0x225   : > { %v905_v7 = vpop.f32.mrf.mxu0 }
 0x226   : > { %v906_v57 = vadd.f32 %v1709_v0, %v905_v7 }
 0x228   : > { %v915_v58 = vpack.c.bf16 %v906_v57, %v904_v54 }
 0x22a   : > { %1619 = vmatmul.msk.bf16.gmra.mxu1 %vm944_vm3, %v915_v58 }
 0x237   : > { %v990_v17 = vpop.f32.mrf.mxu1 }
 0x238   : > { %v1031_v59 = vsel %vm1030_vm4, %v990_v17, -inf }
 0x239   : > { %1032 = vmax.xlane.f32.xlu0 %v1031_v59 }
 0x23f   : > { %v992_v19 = vpop.f32.mrf.mxu1 }
 0x240   : > { %v1034_v61 = vsel %vm1030_vm4, %v992_v19, -inf }
 0x241   : > { %1035 = vmax.xlane.f32.xlu0 %v1034_v61 }
 0x247   : > { %v2266_v62 = vpop.f32.mrf.mxu1 }
 0x248   : > { %v1037_v10 = vsel %vm1030_vm4, %v2266_v62, -inf }
 0x249   : > { %1038 = vmax.xlane.f32.xlu1 %v1037_v10 }
 0x24f   : > { %v2270_v20 = vpop.f32.mrf.mxu1 }
 0x250   : > { %v1040_v29 = vsel %vm1030_vm4, %v2270_v20, -inf }
 0x251   : > { %1041 = vmax.xlane.f32.xlu1 %v1040_v29 }
 0x257   : > { %v2274_v0 = vpop.f32.mrf.mxu1 }
 0x258   : > { %v1043_v22 = vsel %vm1030_vm4, %v2274_v0, -inf }
 0x259   : > { %1044 = vmax.xlane.f32.xlu2 %v1043_v22 }
 0x25f   : > { %v2278_v32 = vpop.f32.mrf.mxu1 }
 0x260   : > { %v1046_v2 = vsel %vm1030_vm4, %v2278_v32, -inf }
 0x261   : > { %1047 = vmax.xlane.f32.xlu2 %v1046_v2 }
 0x267   : > { %v2282_v9 = vpop.f32.mrf.mxu1 }
 0x268   : > { %v1049_v33 = vsel %vm1030_vm4, %v2282_v9, -inf }
 0x269   : > { %1050 = vmax.xlane.f32.xlu0 %v1049_v33 }
 0x26f   : > { %v2286_v11 = vpop.f32.mrf.mxu1 }
 0x270   : > { %v1052_v34 = vsel %vm1030_vm4, %v2286_v11, -inf }
 0x271   : > { %1053 = vmax.xlane.f32.xlu1 %v1052_v34 }
 0x277   : > { %v2290_v21 = vpop.f32.mrf.mxu1 }
 0x278   : > { %v1055_v35 = vsel %vm1030_vm4, %v2290_v21, -inf }
 0x279   : > { %1056 = vmax.xlane.f32.xlu2 %v1055_v35 }
 0x27f   : > { %v2294_v23 = vpop.f32.mrf.mxu1 }
 0x280   : > { %v1058_v36 = vsel %vm1030_vm4, %v2294_v23, -inf }
 0x281   : > { %1059 = vmax.xlane.f32.xlu0 %v1058_v36 }
 0x287   : > { %v2298_v1 = vpop.f32.mrf.mxu1 }
 0x288   : > { %v1061_v37 = vsel %vm1030_vm4, %v2298_v1, -inf }
 0x289   : > { %1062 = vmax.xlane.f32.xlu1 %v1061_v37 }
 0x28f   : > { %v2302_v3 = vpop.f32.mrf.mxu1 }
 0x290   : > { %v1064_v38 = vsel %vm1030_vm4, %v2302_v3, -inf }
 0x291   : > { %1065 = vmax.xlane.f32.xlu2 %v1064_v38 }
 0x297   : > { %v2306_v24 = vpop.f32.mrf.mxu1 }
 0x298   : > { %v1067_v40 = vsel %vm1030_vm4, %v2306_v24, -inf }
 0x299   : > { %1068 = vmax.xlane.f32.xlu0 %v1067_v40 }
 0x29f   : > { %v2310_v41 = vpop.f32.mrf.mxu1 }
 0x2a0   : > { %v1070_v42 = vsel %vm1030_vm4, %v2310_v41, -inf }
 0x2a1   : > { %1071 = vmax.xlane.f32.xlu1 %v1070_v42 }
 0x2a7   : > { %v2314_v43 = vpop.f32.mrf.mxu1 }
 0x2a8   : > { %v1073_v25 = vsel %vm1030_vm4, %v2314_v43, -inf }
 0x2a9   : > { %1074 = vmax.xlane.f32.xlu2 %v1073_v25 }
 0x2ac   : > { %v1033_v27 = vpop.xlane.xlu0 %1032 }
 0x2ad   : > { %v1079_v30 = vsub.f32 %v990_v17, %v1033_v27 }
 0x2af   : > { %v1095_v31 = vmul.f32 1.442695, %v1079_v30  ;;  %v2318_v44 = vpop.f32.mrf.mxu1 }
 0x2b0   : > { %v1076_v45 = vsel %vm1030_vm4, %v2318_v44, -inf }
 0x2b1   : > { %1711 = vpow2.f32 %v1095_v31  ;;  %1077 = vmax.xlane.f32.xlu0 %v1076_v45 }
 0x2b4   : > { %v1036_v46 = vpop.xlane.xlu0 %1035 }
 0x2b5   : > { %v1080_v47 = vsub.f32 %v992_v19, %v1036_v46 }
 0x2b7   : > { %v1712_v50 = vpop.eup %1711  ;;  %v1097_v16 = vmul.f32 1.442695, %v1080_v47 }
 0x2b8   : > { %v1127_v18 = vsel %vm1030_vm4, %v1712_v50, 0.0 }
 0x2b9   : > { %1713 = vpow2.f32 %v1097_v16  ;;  %1128 = vadd.xlane.f32.xlu1 %v1127_v18 }
 0x2bc   : > { %v1039_v7 = vpop.xlane.xlu1 %1038 }
 0x2bd   : > { %v1081_v54 = vsub.f32 %v2266_v62, %v1039_v7 }
 0x2bf   : > { %v1714_v57 = vpop.eup %1713  ;;  %v1099_v58 = vmul.f32 1.442695, %v1081_v54 }
 0x2c0   : > { %v1130_v17 = vsel %vm1030_vm4, %v1714_v57, 0.0  ;;  %v1175_v59 = vpack.c.bf16 %v1714_v57, %v1712_v50 }
 0x2c1   : > { %1715 = vpow2.f32 %v1099_v58  ;;  %1131 = vadd.xlane.f32.xlu2 %v1130_v17 }
 0x2c2   : > { %1636 = vmatmul.msk.bf16.vlgmr.msra.gmra.mxu2 %vm1030_vm4, %v1175_v59 }
 0x2c4   : > { %v1042_v61 = vpop.xlane.xlu1 %1041 }
 0x2c5   : > { %v1082_v19 = vsub.f32 %v2270_v20, %v1042_v61 }
 0x2c7   : > { %v1716_v10 = vpop.eup %1715  ;;  %v1101_v29 = vmul.f32 1.442695, %v1082_v19 }
 0x2c8   : > { %v1133_v22 = vsel %vm1030_vm4, %v1716_v10, 0.0 }
 0x2c9   : > { %1717 = vpow2.f32 %v1101_v29  ;;  %1134 = vadd.xlane.f32.xlu0 %v1133_v22 }
 0x2cc   : > { %v1045_v2 = vpop.xlane.xlu2 %1044 }
 0x2cd   : > { %v1083_v62 = vsub.f32 %v2274_v0, %v1045_v2 }
 0x2cf   : > { %v1718_v33 = vpop.eup %1717  ;;  %v1103_v34 = vmul.f32 1.442695, %v1083_v62 }
 0x2d0   : > { %v1136_v35 = vsel %vm1030_vm4, %v1718_v33, 0.0  ;;  %v1176_v36 = vpack.c.bf16 %v1718_v33, %v1716_v10 }
 0x2d1   : > { %1719 = vpow2.f32 %v1103_v34  ;;  %1137 = vadd.xlane.f32.xlu1 %v1136_v35 }
 0x2d2   : > { %1637 = vmatmul.msk.bf16.gmra.mxu2 %vm1030_vm4, %v1176_v36 }
 0x2d4   : > { %v1048_v37 = vpop.xlane.xlu2 %1047 }
 0x2d5   : > { %v1084_v20 = vsub.f32 %v2278_v32, %v1048_v37 }
 0x2d7   : > { %v1720_v38 = vpop.eup %1719  ;;  %v1105_v12 = vmul.f32 1.442695, %v1084_v20 }
 0x2d8   : > { %v1139_v39 = vsel %vm1030_vm4, %v1720_v38, 0.0 }
 0x2d9   : > { %1721 = vpow2.f32 %v1105_v12  ;;  %1140 = vadd.xlane.f32.xlu2 %v1139_v39 }
 0x2dc   : > { %v1051_v40 = vpop.xlane.xlu0 %1050 }
 0x2dd   : > { %v1085_v0 = vsub.f32 %v2282_v9, %v1051_v40 }
 0x2df   : > { %v1722_v14 = vpop.eup %1721  ;;  %v1107_v26 = vmul.f32 1.442695, %v1085_v0 }
 0x2e0   : > { %v1142_v42 = vsel %vm1030_vm4, %v1722_v14, 0.0  ;;  %v1177_v25 = vpack.c.bf16 %v1722_v14, %v1720_v38 }
 0x2e1   : > { %1723 = vpow2.f32 %v1107_v26  ;;  %1143 = vadd.xlane.f32.xlu0 %v1142_v42 }
 0x2e2   : > { %1638 = vmatmul.msk.bf16.gmra.mxu2 %vm1030_vm4, %v1177_v25 }
 0x2e4   : > { %v1054_v27 = vpop.xlane.xlu1 %1053 }
 0x2e5   : > { %v1086_v32 = vsub.f32 %v2286_v11, %v1054_v27 }
 0x2e7   : > { %v1724_v30 = vpop.eup %1723  ;;  %v1109_v31 = vmul.f32 1.442695, %v1086_v32 }
 0x2e8   : > { %v1145_v45 = vsel %vm1030_vm4, %v1724_v30, 0.0 }
 0x2e9   : > { %1725 = vpow2.f32 %v1109_v31  ;;  %1146 = vadd.xlane.f32.xlu1 %v1145_v45  ;;  %v1329_v31 = vld [vmem:[%s2448_s8 + $0x8] sm:$0xff] }
 0x2ec   : > { %v1057_v46 = vpop.xlane.xlu2 %1056 }
 0x2ed   : > { %v1087_v9 = vsub.f32 %v2290_v21, %v1057_v46 }
 0x2ef   : > { %v1726_v47 = vpop.eup %1725  ;;  %v1111_v50 = vmul.f32 1.442695, %v1087_v9 }
 0x2f0   : > { %v1148_v16 = vsel %vm1030_vm4, %v1726_v47, 0.0  ;;  %v1178_v18 = vpack.c.bf16 %v1726_v47, %v1724_v30 }
 0x2f1   : > { %1727 = vpow2.f32 %v1111_v50  ;;  %1149 = vadd.xlane.f32.xlu2 %v1148_v16 }
 0x2f2   : > { %1639 = vmatmul.msk.bf16.gmra.mxu2 %vm1030_vm4, %v1178_v18 }
 0x2f4   : > { %v1060_v7 = vpop.xlane.xlu0 %1059 }
 0x2f5   : > { %v1088_v11 = vsub.f32 %v2294_v23, %v1060_v7 }
 0x2f7   : > { %v1728_v54 = vpop.eup %1727  ;;  %v1113_v57 = vmul.f32 1.442695, %v1088_v11 }
 0x2f8   : > { %v1151_v58 = vsel %vm1030_vm4, %v1728_v54, 0.0 }
 0x2f9   : > { %1729 = vpow2.f32 %v1113_v57  ;;  %1152 = vadd.xlane.f32.xlu0 %v1151_v58 }
 0x2fc   : > { %v1063_v17 = vpop.xlane.xlu1 %1062 }
 0x2fd   : > { %v1089_v21 = vsub.f32 %v2298_v1, %v1063_v17 }
 0x2ff   : > { %v1730_v59 = vpop.eup %1729  ;;  %v1115_v61 = vmul.f32 1.442695, %v1089_v21 }
 0x300   : > { %v1154_v19 = vsel %vm1030_vm4, %v1730_v59, 0.0  ;;  %v1179_v10 = vpack.c.bf16 %v1730_v59, %v1728_v54 }
 0x301   : > { %1731 = vpow2.f32 %v1115_v61  ;;  %1155 = vadd.xlane.f32.xlu1 %v1154_v19 }
 0x302   : > { %1640 = vmatmul.msk.bf16.gmra.mxu2 %vm1030_vm4, %v1179_v10 }
 0x304   : > { %v1066_v29 = vpop.xlane.xlu2 %1065 }
 0x305   : > { %v1090_v23 = vsub.f32 %v2302_v3, %v1066_v29 }
 0x307   : > { %v1732_v22 = vpop.eup %1731  ;;  %v1117_v2 = vmul.f32 1.442695, %v1090_v23 }
 0x308   : > { %v1157_v62 = vsel %vm1030_vm4, %v1732_v22, 0.0 }
 0x309   : > { %1733 = vpow2.f32 %v1117_v2  ;;  %1158 = vadd.xlane.f32.xlu2 %v1157_v62 }
 0x30c   : > { %v1069_v33 = vpop.xlane.xlu0 %1068 }
 0x30d   : > { %v1091_v1 = vsub.f32 %v2306_v24, %v1069_v33 }
 0x30f   : > { %v1734_v34 = vpop.eup %1733  ;;  %v1119_v35 = vmul.f32 1.442695, %v1091_v1 }
 0x310   : > { %v1160_v36 = vsel %vm1030_vm4, %v1734_v34, 0.0  ;;  %v1180_v37 = vpack.c.bf16 %v1734_v34, %v1732_v22 }
 0x311   : > { %1735 = vpow2.f32 %v1119_v35  ;;  %1161 = vadd.xlane.f32.xlu0 %v1160_v36 }
 0x312   : > { %1641 = vmatmul.msk.bf16.gmra.mxu2 %vm1030_vm4, %v1180_v37 }
 0x314   : > { %v1072_v20 = vpop.xlane.xlu1 %1071 }
 0x315   : > { %v1092_v3 = vsub.f32 %v2310_v41, %v1072_v20 }
 0x317   : > { %v1736_v38 = vpop.eup %1735  ;;  %v1121_v12 = vmul.f32 1.442695, %v1092_v3 }
 0x318   : > { %v1163_v39 = vsel %vm1030_vm4, %v1736_v38, 0.0 }
 0x319   : > { %1737 = vpow2.f32 %v1121_v12  ;;  %1164 = vadd.xlane.f32.xlu1 %v1163_v39 }
 0x31c   : > { %v1075_v40 = vpop.xlane.xlu2 %1074 }
 0x31d   : > { %v1093_v24 = vsub.f32 %v2314_v43, %v1075_v40  ;;  %v1328_v43 = vld [vmem:[%s2448_s8] sm:$0xff] }
 0x31e   : > { %v1330_v45 = vpack.c.bf16 %v1329_v31, %v1328_v43 }
 0x31f   : > { %v1738_v0 = vpop.eup %1737  ;;  %v1123_v14 = vmul.f32 1.442695, %v1093_v24 }
 0x320   : > { %v1166_v26 = vsel %vm1030_vm4, %v1738_v0, 0.0  ;;  %v1181_v42 = vpack.c.bf16 %v1738_v0, %v1736_v38  ;;  %1366 = vmatpush.bf16.msra.mxu3 %v1330_v45 }
 0x321   : > { %1739 = vpow2.f32 %v1123_v14  ;;  %1167 = vadd.xlane.f32.xlu2 %v1166_v26 }
 0x322   : > { %1642 = vmatmul.msk.bf16.gmra.mxu2 %vm1030_vm4, %v1181_v42 }
 0x324   : > { %v1078_v25 = vpop.xlane.xlu0 %1077 }
 0x325   : > { %v1094_v41 = vsub.f32 %v2318_v44, %v1078_v25 }
 0x327   : > { %v1740_v27 = vpop.eup %1739  ;;  %v1125_v32 = vmul.f32 1.442695, %v1094_v41 }
 0x328   : > { %v1169_v30 = vsel %vm1030_vm4, %v1740_v27, 0.0 }
 0x329   : > { %1741 = vpow2.f32 %v1125_v32  ;;  %1170 = vadd.xlane.f32.xlu0 %v1169_v30 }
 0x32c   : > { %v1129_v47 = vpop.xlane.xlu1 %1128 }
 0x32d   : > { %1743 = vrcp.f32 %v1129_v47 }
 0x32f   : > { %v1742_v46 = vpop.eup %1741 }
 0x330   : > { %v1172_v9 = vsel %vm1030_vm4, %v1742_v46, 0.0  ;;  %v1182_v44 = vpack.c.bf16 %v1742_v46, %v1740_v27 }
 0x331   : > { %1173 = vadd.xlane.f32.xlu1 %v1172_v9 }
 0x332   : > { %1643 = vmatmul.msk.bf16.gmra.mxu2 %vm1030_vm4, %v1182_v44 }
 0x333   : > { %v1744_v18 = vpop.eup %1743 }
 0x334   : > { %v1132_v50 = vpop.xlane.xlu2 %1131 }
 0x335   : > { %1745 = vrcp.f32 %v1132_v50 }
 0x33b   : > { %v1746_v7 = vpop.eup %1745 }
 0x33c   : > { %v1135_v17 = vpop.xlane.xlu0 %1134 }
 0x33d   : > { %1747 = vrcp.f32 %v1135_v17 }
 0x343   : > { %v1748_v61 = vpop.eup %1747 }
 0x344   : > { %v1138_v21 = vpop.xlane.xlu1 %1137 }
 0x345   : > { %v1248_v16 = vpop.f32.mrf.mxu2  ;;  %1749 = vrcp.f32 %v1138_v21 }
 0x346   : > { %v1304_v54 = vmul.f32 %v1744_v18, %v1248_v16 }
 0x34b   : > { %v1750_v19 = vpop.eup %1749 }
 0x34c   : > { %v1141_v2 = vpop.xlane.xlu2 %1140 }
 0x34d   : > { %v1250_v11 = vpop.f32.mrf.mxu2  ;;  %1751 = vrcp.f32 %v1141_v2 }
 0x34e   : > { %v1305_v57 = vmul.f32 %v1746_v7, %v1250_v11 }
 0x350   : > { %v1320_v58 = vpack.c.bf16 %v1305_v57, %v1304_v54 }
 0x352   : > { %1644 = vmatmul.msk.bf16.vlgmr.msra.gmra.mxu3 %vm944_vm3, %v1320_v58 }
 0x353   : > { %v1752_v1 = vpop.eup %1751 }
 0x354   : > { %v1144_v62 = vpop.xlane.xlu0 %1143 }
 0x355   : > { %v1253_v59 = vpop.f32.mrf.mxu2  ;;  %1753 = vrcp.f32 %v1144_v62 }
 0x356   : > { %v1306_v29 = vmul.f32 %v1748_v61, %v1253_v59 }
 0x35b   : > { %v1754_v34 = vpop.eup %1753 }
 0x35c   : > { %v1147_v3 = vpop.xlane.xlu1 %1146 }
 0x35d   : > { %v1255_v10 = vpop.f32.mrf.mxu2  ;;  %1755 = vrcp.f32 %v1147_v3 }
 0x35e   : > { %v1307_v23 = vmul.f32 %v1750_v19, %v1255_v10 }
 0x360   : > { %v1321_v22 = vpack.c.bf16 %v1307_v23, %v1306_v29 }
 0x362   : > { %1645 = vmatmul.msk.bf16.gmra.mxu3 %vm944_vm3, %v1321_v22 }
 0x363   : > { %v1756_v39 = vpop.eup %1755 }
 0x364   : > { %v1150_v38 = vpop.xlane.xlu2 %1149 }
 0x365   : > { %v1258_v33 = vpop.f32.mrf.mxu2  ;;  %1757 = vrcp.f32 %v1150_v38 }
 0x366   : > { %v1308_v36 = vmul.f32 %v1752_v1, %v1258_v33 }
 0x36b   : > { %v1758_v40 = vpop.eup %1757 }
 0x36c   : > { %v1153_v42 = vpop.xlane.xlu0 %1152 }
 0x36d   : > { %v1260_v35 = vpop.f32.mrf.mxu2  ;;  %1759 = vrcp.f32 %v1153_v42 }
 0x36e   : > { %v1309_v37 = vmul.f32 %v1754_v34, %v1260_v35 }
 0x370   : > { %v1322_v20 = vpack.c.bf16 %v1309_v37, %v1308_v36  ;;  %v1710_v36 = vld [vmem:[%s2449_s9] ss:$0 sm:$0xff] }
 0x372   : > { %1646 = vmatmul.msk.bf16.gmra.mxu3 %vm944_vm3, %v1322_v20 }
 0x373   : > { %v1760_v27 = vpop.eup %1759 }
 0x374   : > { %v1156_v25 = vpop.xlane.xlu1 %1155 }
 0x375   : > { %v1263_v12 = vpop.f32.mrf.mxu2  ;;  %1761 = vrcp.f32 %v1156_v25 }
 0x376   : > { %v1310_v0 = vmul.f32 %v1756_v39, %v1263_v12 }
 0x37b   : > { %v1762_v32 = vpop.eup %1761 }
 0x37c   : > { %v1159_v46 = vpop.xlane.xlu2 %1158 }
 0x37d   : > { %v1265_v24 = vpop.f32.mrf.mxu2  ;;  %1763 = vrcp.f32 %v1159_v46 }
 0x37e   : > { %v1311_v14 = vmul.f32 %v1758_v40, %v1265_v24 }
 0x380   : > { %v1323_v26 = vpack.c.bf16 %v1311_v14, %v1310_v0 }
 0x382   : > { %1647 = vmatmul.msk.bf16.gmra.mxu3 %vm944_vm3, %v1323_v26 }
 0x383   : > { %v1764_v47 = vpop.eup %1763 }
 0x384   : > { %v1162_v9 = vpop.xlane.xlu0 %1161 }
 0x385   : > { %v1268_v41 = vpop.f32.mrf.mxu2  ;;  %1765 = vrcp.f32 %v1162_v9 }
 0x386   : > { %v1312_v43 = vmul.f32 %v1760_v27, %v1268_v41 }
 0x38b   : > { %v1766_v50 = vpop.eup %1765 }
 0x38c   : > { %v1165_v54 = vpop.xlane.xlu1 %1164 }
 0x38d   : > { %v1270_v30 = vpop.f32.mrf.mxu2  ;;  %1767 = vrcp.f32 %v1165_v54 }
 0x38e   : > { %v1313_v31 = vmul.f32 %v1762_v32, %v1270_v30 }
 0x390   : > { %v1324_v45 = vpack.c.bf16 %v1313_v31, %v1312_v43 }
 0x392   : > { %1648 = vmatmul.msk.bf16.gmra.mxu3 %vm944_vm3, %v1324_v45 }
 0x393   : > { %v1768_v17 = vpop.eup %1767 }
 0x394   : > { %v1168_v57 = vpop.xlane.xlu2 %1167 }
 0x395   : > { %v1273_v44 = vpop.f32.mrf.mxu2  ;;  %1769 = vrcp.f32 %v1168_v57 }
 0x396   : > { %v1314_v18 = vmul.f32 %v1764_v47, %v1273_v44 }
 0x39b   : > { %v1770_v21 = vpop.eup %1769 }
 0x39c   : > { %v1171_v29 = vpop.xlane.xlu0 %1170 }
 0x39d   : > { %v1275_v16 = vpop.f32.mrf.mxu2  ;;  %1771 = vrcp.f32 %v1171_v29 }
 0x39e   : > { %v1315_v7 = vmul.f32 %v1766_v50, %v1275_v16 }
 0x3a0   : > { %v1325_v11 = vpack.c.bf16 %v1315_v7, %v1314_v18 }
 0x3a2   : > { %1649 = vmatmul.msk.bf16.gmra.mxu3 %vm944_vm3, %v1325_v11 }
 0x3a3   : > { %v1772_v2 = vpop.eup %1771 }
 0x3a4   : > { %v1174_v23 = vpop.xlane.xlu1 %1173 }
 0x3a5   : > { %v1278_v58 = vpop.f32.mrf.mxu2  ;;  %1773 = vrcp.f32 %v1174_v23 }
 0x3a6   : > { %v1316_v61 = vmul.f32 %v1768_v17, %v1278_v58 }
 0x3ab   : > { %v1774_v62 = vpop.eup %1773 }
 0x3ad   : > { %v1280_v59 = vpop.f32.mrf.mxu2 }
 0x3ae   : > { %v1317_v19 = vmul.f32 %v1770_v21, %v1280_v59 }
 0x3b0   : > { %v1326_v10 = vpack.c.bf16 %v1317_v19, %v1316_v61 }
 0x3b2   : > { %1650 = vmatmul.msk.bf16.gmra.mxu3 %vm944_vm3, %v1326_v10 }
 0x3b5   : > { %v1283_v22 = vpop.f32.mrf.mxu2 }
 0x3b6   : > { %v1318_v1 = vmul.f32 %v1772_v2, %v1283_v22 }
 0x3bd   : > { %v1285_v33 = vpop.f32.mrf.mxu2 }
 0x3be   : > { %v1319_v34 = vmul.f32 %v1774_v62, %v1285_v33 }
 0x3c0   : > { %v1327_v35 = vpack.c.bf16 %v1319_v34, %v1318_v1 }
 0x3c2   : > { %1651 = vmatmul.msk.bf16.gmra.mxu3 %vm944_vm3, %v1327_v35 }
 0x3d5   : > { %v1368_v37 = vpop.f32.mrf.mxu3 }
 0x3d6   : > { %v1369_v20 = vadd.f32 %v1710_v36, %v1368_v37 }
 0x3d8   : > { %v1408_v3 = vadd.f32 %v1369_v20, %v2178_v4 }
 0x3da   : > { %1424 = vst.msk [vmem:[%s1913_s19] sm:$0xff] %vm834_vm2, %v1408_v3 }
 0x3dd   : > { %v1370_v38 = vpop.f32.mrf.mxu3 }
 0x3de   : > { %v1371_v12 = vadd.f32 %v1710_v36, %v1370_v38 }
 0x3e0   : > { %v1409_v39 = vadd.f32 %v1371_v12, %v2181_v13 }
 0x3e2   : > { %1425 = vst.msk [vmem:[%s1913_s19 + $0x8] sm:$0xff] %vm834_vm2, %v1409_v39 }
 0x3e5   : > { %v1373_v40 = vpop.f32.mrf.mxu3 }
 0x3e6   : > { %v1374_v24 = vadd.f32 %v1710_v36, %v1373_v40 }
 0x3e8   : > { %v1410_v0 = vadd.f32 %v1374_v24, %v2187_v15 }
 0x3ea   : > { %1426 = vst.msk [vmem:[%s1913_s19 + $0x10] sm:$0xff] %vm834_vm2, %v1410_v0 }
 0x3ed   : > { %v1375_v14 = vpop.f32.mrf.mxu3 }
 0x3ee   : > { %v1376_v26 = vadd.f32 %v1710_v36, %v1375_v14 }
 0x3f0   : > { %v1411_v4 = vadd.f32 %v1376_v26, %v2190_v6 }
 0x3f2   : > { %1427 = vst.msk [vmem:[%s1913_s19 + $0x18] sm:$0xff] %vm834_vm2, %v1411_v4 }
 0x3f5   : > { %v1378_v42 = vpop.f32.mrf.mxu3 }
 0x3f6   : > { %v1379_v25 = vadd.f32 %v1710_v36, %v1378_v42 }
 0x3f8   : > { %v1412_v13 = vadd.f32 %v1379_v25, %v2196_v48 }
 0x3fa   : > { %1428 = vst.msk [vmem:[%s1913_s19 + $0x20] sm:$0xff] %vm834_vm2, %v1412_v13 }
 0x3fd   : > { %v1380_v41 = vpop.f32.mrf.mxu3 }
 0x3fe   : > { %v1381_v27 = vadd.f32 %v1710_v36, %v1380_v41 }
 0x400   : > { %v1413_v15 = vadd.f32 %v1381_v27, %v2199_v49 }
 0x402   : > { %1429 = vst.msk [vmem:[%s1913_s19 + $0x28] sm:$0xff] %vm834_vm2, %v1413_v15 }
 0x405   : > { %v1383_v32 = vpop.f32.mrf.mxu3 }
 0x406   : > { %v1384_v30 = vadd.f32 %v1710_v36, %v1383_v32 }
 0x408   : > { %v1414_v6 = vadd.f32 %v1384_v30, %v2205_v51 }
 0x40a   : > { %1430 = vst.msk [vmem:[%s1913_s19 + $0x30] sm:$0xff] %vm834_vm2, %v1414_v6 }
 0x40d   : > { %v1385_v43 = vpop.f32.mrf.mxu3 }
 0x40e   : > { %v1386_v31 = vadd.f32 %v1710_v36, %v1385_v43 }
 0x410   : > { %v1415_v48 = vadd.f32 %v1386_v31, %v2208_v52 }
 0x412   : > { %1431 = vst.msk [vmem:[%s1913_s19 + $0x38] sm:$0xff] %vm834_vm2, %v1415_v48 }
 0x415   : > { %v1388_v45 = vpop.f32.mrf.mxu3 }
 0x416   : > { %v1389_v46 = vadd.f32 %v1710_v36, %v1388_v45 }
 0x418   : > { %v1416_v49 = vadd.f32 %v1389_v46, %v2214_v5 }
 0x41a   : > { %1432 = vst.msk [vmem:[%s1913_s19 + $0x40] sm:$0xff] %vm834_vm2, %v1416_v49 }
 0x41d   : > { %v1390_v9 = vpop.f32.mrf.mxu3 }
 0x41e   : > { %v1391_v44 = vadd.f32 %v1710_v36, %v1390_v9 }
 0x420   : > { %v1417_v51 = vadd.f32 %v1391_v44, %v2217_v53 }
 0x422   : > { %1433 = vst.msk [vmem:[%s1913_s19 + $0x48] sm:$0xff] %vm834_vm2, %v1417_v51 }
 0x425   : > { %v1393_v47 = vpop.f32.mrf.mxu3 }
 0x426   : > { %v1394_v50 = vadd.f32 %v1710_v36, %v1393_v47 }
 0x428   : > { %v1418_v52 = vadd.f32 %v1394_v50, %v2224_v55 }
 0x42a   : > { %1434 = vst.msk [vmem:[%s1913_s19 + $0x50] sm:$0xff] %vm834_vm2, %v1418_v52 }
 0x42d   : > { %v1395_v16 = vpop.f32.mrf.mxu3 }
 0x42e   : > { %v1396_v18 = vadd.f32 %v1710_v36, %v1395_v16 }
 0x430   : > { %v1419_v5 = vadd.f32 %v1396_v18, %v2227_v56 }
 0x432   : > { %1435 = vst.msk [vmem:[%s1913_s19 + $0x58] sm:$0xff] %vm834_vm2, %v1419_v5 }
 0x435   : > { %v1398_v7 = vpop.f32.mrf.mxu3 }
 0x436   : > { %v1399_v11 = vadd.f32 %v1710_v36, %v1398_v7 }
 0x438   : > { %v1420_v53 = vadd.f32 %v1399_v11, %v2235_v60 }
 0x43a   : > { %1436 = vst.msk [vmem:[%s1913_s19 + $0x60] sm:$0xff] %vm834_vm2, %v1420_v53 }
 0x43d   : > { %v1400_v54 = vpop.f32.mrf.mxu3 }
 0x43e   : > { %v1401_v57 = vadd.f32 %v1710_v36, %v1400_v54 }
 0x440   : > { %v1421_v55 = vadd.f32 %v1401_v57, %v2238_v8 }
 0x442   : > { %1437 = vst.msk [vmem:[%s1913_s19 + $0x68] sm:$0xff] %vm834_vm2, %v1421_v55 }
 0x445   : > { %v1403_v58 = vpop.f32.mrf.mxu3 }
 0x446   : > { %v1404_v17 = vadd.f32 %v1710_v36, %v1403_v58 }
 0x448   : > { %v1422_v21 = vadd.f32 %v1404_v17, %v2245_v63 }
 0x44a   : > { %1438 = vst.msk [vmem:[%s1913_s19 + $0x70] sm:$0xff] %vm834_vm2, %v1422_v21 }
 0x44d   : > { %v1405_v56 = vpop.f32.mrf.mxu3 }
 0x44e   : > { %v1406_v59 = vadd.f32 %v1710_v36, %v1405_v56 }
 0x450   : > { %v1423_v61 = vadd.f32 %v1406_v59, %v2248_v28 }
 0x452   : > { %1439 = vst.msk [vmem:[%s1913_s19 + $0x78] sm:$0xff] %vm834_vm2, %v1423_v61 }
 0x453 PF: > { %s20_s17 = sadd.s32 1, %s1813_s17   ;;  %s2452_s27 = sld [smem:[#allocation4_spill]] }
 0x454   : > { %p17_p8 = scmp.ge.s32.totalorder %s20_s17, 6   ;;  %s2453_s13 = smov %s1805_s15 }
 0x455   : > { %s2454_s14 = smov %s1809_s16  ;;  %s2455_s15 = smov %s2458_s18 }
 0x456   :  { %19 = sbr.rel (!%p17_p8) target bundleno = 3 (0x3), region = 97 }
 0x459   : > { %s2456_s16 = smov %s2452_s27 }

// kernel: attention_zbw_forward.4
= control target key start
LH: loop header
LB: loop body
LE: loop exit
PB: predicated region body
PF: predicated region fallthrough
CT: control target
= control target key end

     0   :  { %s1713_s12 = smov 0   ;;  %s3483_s0 = inlined_call_operand.vmem [shape: f32[2,18,18,1], index: 0, kind: input, shape index: {}]   ;;  %s3484_s1 = inlined_call_operand.vmem [shape: f32[3,3,1,32], index: 1, kind: input, shape index: {}]   ;;  %s3485_s2 = inlined_call_operand.vmem [shape: f32[1,32], index: 2, kind: input, shape index: {}]   ;;  %s3486_s3 = inlined_call_operand.vmem [shape: f32[2,256,32], index: 3, kind: output, shape index: {}]  }
   0x1 LB: > { %s1637_s13 = sadd.s32 4294967295, %s1690_s12   ;;  %p1641_p0 = scmp.ge.s32.totalorder %s1690_s12, 1  ;;  %s1690_s12 = sphi %s1713_s12, %s13_s12  }
   0x2   : > { %p137_p1 = scmp.lt.s32.totalorder %s1690_s12, 3 }
   0x4   : > { %p138_p2 = pnand %p1641_p0, %p137_p1 }
   0x6   : > { %141 = sbr.rel (%p138_p2) target bundleno = 448 (0x1c0), region = 32 }
   0xb   : > { %p161_p3 = scmp.lt.s32.totalorder %s1637_s13, 1  ;;  %v1692_v0 = vmov 0   ;;  %vm469_vm0 = vcmask 1046528   ;;  %vm747_vm1 = vcmask 1045504   ;;  %vm1549_vm2 = vcmask 261120  }
   0xc   : > { %1668 = vset.pattern.permute.xlu2 %v1692_v0  ;;  %1667 = vset.pattern.permute.xlu1 %v1692_v0 }
   0xd   : > { %1666 = vset.pattern.permute.xlu0 %v1692_v0  ;;  %s3844_s13 = smov (!%p161_p3, %s1637_s13), 1 }
   0xe   : > { %s1656_s14 = smul.u32 432, %s3844_s13  ;;  %s1655_s9 = sshll.u32 %s3844_s13, 8 }
   0xf   : > { %s3089_s15 = scalar_lea.vmem %s3486_s3, %s1655_s9 }
  0x10   : > { %s1727_s17 = scalar_lea.vmem %s3483_s0, %s1656_s14 }
  0x11   : > { %v1730_v1 = vld [vmem:[%s1727_s17 + $0x30] sm:$0xff]  ;;  %v1733_v2 = vld [vmem:[%s1727_s17 + $0x18] sm:$0xff]  ;;  %v1736_v3 = vld [vmem:[%s1727_s17] sm:$0xff] }
  0x12   : > { %248 = vperm.xlu2 %1668, %v1730_v1   ;;  %238 = vperm.xlu1 %1667, %v1733_v2   ;;  %v1742_v4 = vld [vmem:[%s1727_s17 + $0x38] sm:$0xff]  ;;  %v1745_v5 = vld [vmem:[%s1727_s17 + $0x20] sm:$0xff]  ;;  %v1748_v6 = vld [vmem:[%s1727_s17 + $0x8] sm:$0xff]  ;;  %v470_v19 = vrot.slane %v1736_v3, 1  ;;  %v475_v21 = vrot.slane %v1733_v2, 1  ;;  %v480_v31 = vrot.slane %v1730_v1, 1 }
  0x13   : > { %228 = vperm.xlu0 %1666, %v1736_v3   ;;  %v1754_v7 = vld [vmem:[%s1727_s17 + $0x60] sm:$0xff]  ;;  %v1757_v8 = vld [vmem:[%s1727_s17 + $0x50] sm:$0xff]  ;;  %v1760_v9 = vld [vmem:[%s1727_s17 + $0x48] sm:$0xff]  ;;  %v471_v20 = vrot.slane %v1748_v6, 1  ;;  %v476_v22 = vrot.slane %v1745_v5, 1  ;;  %v481_v32 = vrot.slane %v1742_v4, 1 }
  0x14   : > { %v1766_v10 = vld [vmem:[%s1727_s17 + $0x80] sm:$0xff]  ;;  %v1769_v11 = vld [vmem:[%s1727_s17 + $0x78] sm:$0xff]  ;;  %v1772_v12 = vld [vmem:[%s1727_s17 + $0x68] sm:$0xff]  ;;  %v486_v33 = vrot.slane %v1757_v8, 1  ;;  %v485_v34 = vrot.slane %v1760_v9, 1  ;;  %v490_v38 = vrot.slane %v1754_v7, 1 }
  0x15   : > { %v1778_v13 = vld [vmem:[%s1727_s17 + $0xa8] sm:$0xff]  ;;  %v1781_v14 = vld [vmem:[%s1727_s17 + $0x98] sm:$0xff]  ;;  %v1784_v15 = vld [vmem:[%s1727_s17 + $0x90] sm:$0xff]  ;;  %v472_v26 = vsel %vm469_vm0, %v470_v19, %v471_v20  ;;  %v477_v27 = vsel %vm469_vm0, %v475_v21, %v476_v22  ;;  %v491_v39 = vrot.slane %v1772_v12, 1  ;;  %v482_v40 = vsel %vm469_vm0, %v480_v31, %v481_v32 }
  0x16   : > { %v1790_v16 = vld [vmem:[%s1727_s17 + $0xc8] sm:$0xff]  ;;  %v1793_v17 = vld [vmem:[%s1727_s17 + $0xc0] sm:$0xff]  ;;  %v1796_v18 = vld [vmem:[%s1727_s17 + $0xb0] sm:$0xff]  ;;  %v487_v41 = vsel %vm469_vm0, %v485_v34, %v486_v33  ;;  %v496_v46 = vrot.slane %v1766_v10, 1  ;;  %v495_v47 = vrot.slane %v1769_v11, 1  ;;  %v501_v48 = vrot.slane %v1781_v14, 1 }
  0x17   : > { %v1806_v23 = vld [vmem:[%s1727_s17 + $0xf0] sm:$0xff]  ;;  %v1809_v24 = vld [vmem:[%s1727_s17 + $0xe0] sm:$0xff]  ;;  %v1812_v25 = vld [vmem:[%s1727_s17 + $0xd8] sm:$0xff]  ;;  %v492_v42 = vsel %vm469_vm0, %v490_v38, %v491_v39  ;;  %v500_v49 = vrot.slane %v1784_v15, 1  ;;  %v505_v54 = vrot.slane %v1778_v13, 1  ;;  %v506_v55 = vrot.slane %v1796_v18, 1 }
  0x18   : > { %v1820_v28 = vld [vmem:[%s1727_s17 + $0x110] sm:$0xff]  ;;  %v1823_v29 = vld [vmem:[%s1727_s17 + $0x108] sm:$0xff]  ;;  %v1826_v30 = vld [vmem:[%s1727_s17 + $0xf8] sm:$0xff]  ;;  %v497_v56 = vsel %vm469_vm0, %v495_v47, %v496_v46  ;;  %v511_v21 = vrot.slane %v1790_v16, 1  ;;  %v3487_v31 = vrot.slane %v1809_v24, 1  ;;  %v515_v34 = vrot.slane %v1812_v25, 1 }
  0x19   : > { %v1836_v35 = vld [vmem:[%s1727_s17 + $0x138] sm:$0xff]  ;;  %v1839_v36 = vld [vmem:[%s1727_s17 + $0x128] sm:$0xff]  ;;  %v1842_v37 = vld [vmem:[%s1727_s17 + $0x120] sm:$0xff]  ;;  %v502_v57 = vsel %vm469_vm0, %v500_v49, %v501_v48  ;;  %v507_v60 = vsel %vm469_vm0, %v505_v54, %v506_v55  ;;  %v520_v49 = vrot.slane %v1806_v23, 1  ;;  %v3488_v54 = vrot.slane %v1826_v30, 1 }
  0x1a   : > { %253 = vperm.xlu2 %1668, %v1742_v4   ;;  %243 = vperm.xlu1 %1667, %v1745_v5   ;;  %v1855_v43 = vld [vmem:[%s1727_s17 + $0x158] sm:$0xff]  ;;  %v1858_v44 = vld [vmem:[%s1727_s17 + $0x150] sm:$0xff]  ;;  %v1861_v45 = vld [vmem:[%s1727_s17 + $0x140] sm:$0xff]  ;;  %v517_v47 = vsel %vm469_vm0, %v515_v34, %v3487_v31  ;;  %v3490_v34 = vrot.slane %v1820_v28, 1 }
  0x1b   : > { %233 = vperm.xlu0 %1666, %v1748_v6   ;;  %v1871_v50 = vld [vmem:[%s1727_s17 + $0x170] sm:$0xff]  ;;  %v1874_v51 = vld [vmem:[%s1727_s17 + $0x168] sm:$0xff]  ;;  %v1898_v63 = vld [vmem:[%s1727_s17 + $0x40] sm:$0x3] }
  0x1c   : > { %3557 = vst [vmem:[#allocation2_spill] sm:$0xff] %v1874_v51  ;;  %v1877_v52 = vld [vmem:[%s1727_s17 + $0x28] sm:$0x3]  ;;  %v1880_v53 = vld [vmem:[%s1727_s17 + $0x10] sm:$0x3]  ;;  %v483_v0 = vrot.slane %v1898_v63, 1 }
  0x1d   : > { %v478_v58 = vrot.slane %v1877_v52, 1  ;;  %v473_v59 = vrot.slane %v1880_v53, 1 }
  0x1f   : > { %v479_v61 = vsel %vm469_vm0, %v476_v22, %v478_v58  ;;  %v474_v62 = vsel %vm469_vm0, %v471_v20, %v473_v59  ;;  %v484_v22 = vsel %vm469_vm0, %v481_v32, %v483_v0  ;;  %v1909_v20 = vld [vmem:[%s1727_s17 + $0x70] sm:$0x3]  ;;  %v1932_v0 = vld [vmem:[%s1727_s17 + $0x88] sm:$0x3] }
  0x20   : > { %v493_v32 = vrot.slane %v1909_v20, 1 }
  0x22   : > { %268 = vperm.xlu2 %1668, %v1754_v7   ;;  %263 = vperm.xlu1 %1667, %v1757_v8  }
  0x23   : > { %258 = vperm.xlu0 %1666, %v1760_v9  }
  0x2a   : > { %283 = vperm.xlu2 %1668, %v1766_v10   ;;  %278 = vperm.xlu1 %1667, %v1769_v11  }
  0x2b   : > { %273 = vperm.xlu0 %1666, %v1772_v12  }
  0x32   : > { %298 = vperm.xlu2 %1668, %v1778_v13   ;;  %293 = vperm.xlu1 %1667, %v1781_v14  }
  0x33   : > { %288 = vperm.xlu0 %1666, %v1784_v15  }
  0x3a   : > { %313 = vperm.xlu2 %1668, %v1790_v16   ;;  %308 = vperm.xlu1 %1667, %v1793_v17  }
  0x3b   : > { %303 = vperm.xlu0 %1666, %v1796_v18  }
  0x42   : > { %328 = vperm.xlu2 %1668, %v1806_v23   ;;  %323 = vperm.xlu1 %1667, %v1809_v24  }
  0x43   : > { %318 = vperm.xlu0 %1666, %v1812_v25  }
  0x4a   : > { %343 = vperm.xlu2 %1668, %v1820_v28   ;;  %338 = vperm.xlu1 %1667, %v1823_v29  }
  0x4b   : > { %333 = vperm.xlu0 %1666, %v1826_v30  }
  0x52   : > { %358 = vperm.xlu2 %1668, %v1836_v35   ;;  %353 = vperm.xlu1 %1667, %v1839_v36  }
  0x53   : > { %348 = vperm.xlu0 %1666, %v1842_v37  }
  0x5a   : > { %373 = vperm.xlu2 %1668, %v1855_v43   ;;  %368 = vperm.xlu1 %1667, %v1858_v44  }
  0x5b   : > { %363 = vperm.xlu0 %1666, %v1861_v45  }
  0x62   : > { %383 = vperm.xlu1 %1667, %v1871_v50   ;;  %553 = vperm.xlu2 %1668, %v472_v26   ;;  %v510_v26 = vrot.slane %v1793_v17, 1 }
  0x63   : > { %378 = vperm.xlu0 %1666, %v1874_v51  }
  0x64   : > { %v512_v38 = vsel %vm469_vm0, %v510_v26, %v511_v21 }
  0x6a   : > { %561 = vperm.xlu1 %1667, %v477_v27   ;;  %565 = vperm.xlu2 %1668, %v479_v61   ;;  %v1912_v27 = vld [vmem:[%s1727_s17 + $0x58] sm:$0x3]  ;;  %v522_v61 = vsel %vm469_vm0, %v520_v49, %v3488_v54  ;;  %v530_v49 = vrot.slane %v1842_v37, 1 }
  0x6b   : > { %557 = vperm.xlu0 %1666, %v474_v62   ;;  %v488_v59 = vrot.slane %v1912_v27, 1 }
  0x6c   : > { %v1901_v19 = vpop.permute.xlu2 %248 }
  0x6d   : > { %3558 = vst [vmem:[#allocation3_spill] sm:$0xff] %v1901_v19  ;;  %v489_v62 = vsel %vm469_vm0, %v486_v33, %v488_v59  ;;  %v1943_v33 = vld [vmem:[%s1727_s17 + $0xb8] sm:$0x3]  ;;  %v1946_v59 = vld [vmem:[%s1727_s17 + $0xa0] sm:$0x3] }
  0x6e   : > { %v508_v31 = vrot.slane %v1943_v33, 1 }
  0x72   : > { %573 = vperm.xlu1 %1667, %v484_v22   ;;  %577 = vperm.xlu2 %1668, %v487_v41   ;;  %v494_v41 = vsel %vm469_vm0, %v491_v39, %v493_v32  ;;  %v525_v39 = vrot.slane %v1823_v29, 1  ;;  %v3489_v22 = vrot.slane %v1839_v36, 1 }
  0x73   : > { %569 = vperm.xlu0 %1666, %v482_v40   ;;  %v498_v40 = vrot.slane %v1932_v0, 1 }
  0x74   : > { %v1921_v58 = vpop.permute.xlu2 %253 }
  0x75   : > { %3559 = vst [vmem:[#allocation4_spill] sm:$0xff] %v1921_v58  ;;  %v499_v32 = vsel %vm469_vm0, %v496_v46, %v498_v40  ;;  %v532_v46 = vsel %vm469_vm0, %v530_v49, %v3489_v22  ;;  %v1976_v22 = vld [vmem:[%s1727_s17 + $0xd0] sm:$0x3] }
  0x7a   : > { %585 = vperm.xlu1 %1667, %v492_v42   ;;  %589 = vperm.xlu2 %1668, %v494_v41   ;;  %v527_v42 = vsel %vm469_vm0, %v525_v39, %v3490_v34  ;;  %v535_v41 = vrot.slane %v1836_v35, 1  ;;  %v509_v39 = vsel %vm469_vm0, %v506_v55, %v508_v31  ;;  %v513_v34 = vrot.slane %v1976_v22, 1 }
  0x7b   : > { %581 = vperm.xlu0 %1666, %v489_v62   ;;  %v3492_v62 = vrot.slane %v1861_v45, 1 }
  0x7c   : > { %v1935_v26 = vpop.permute.xlu2 %268 }
  0x7d   : > { %3560 = vst [vmem:[#allocation5_spill] sm:$0xff] %v1935_v26  ;;  %v3499_v26 = vrot.slane %v1871_v50, 1 }
  0x82   : > { %597 = vperm.xlu1 %1667, %v499_v32   ;;  %601 = vperm.xlu2 %1668, %v502_v57   ;;  %v503_v57 = vrot.slane %v1946_v59, 1 }
  0x83   : > { %593 = vperm.xlu0 %1666, %v497_v56   ;;  %v1970_v56 = vsel %vm469_vm0, %v535_v41, %v3492_v62  ;;  %v3498_v41 = vrot.slane %v1855_v43, 1  ;;  %v540_v62 = vrot.slane %v1858_v44, 1 }
  0x84   : > { %v1957_v40 = vpop.permute.xlu2 %283  ;;  %v1959_v54 = vpop.permute.xlu1 %238  ;;  %v504_v49 = vsel %vm469_vm0, %v501_v48, %v503_v57  ;;  %v545_v48 = vrot.slane %v1874_v51, 1  ;;  %v1991_v57 = vld [vmem:[%s1727_s17 + $0x100] sm:$0x3] }
  0x85   : > { %3561 = vst [vmem:[#allocation6_spill] sm:$0xff] %v1957_v40  ;;  %v1962_v32 = vpop.permute.xlu0 %228 }
  0x86   : > { %v547_v51 = vsel %vm469_vm0, %v545_v48, %v3499_v26  ;;  %v2019_v26 = vld [vmem:[%s1727_s17 + $0x118] sm:$0x3] }
  0x87   : > { %3567 = vst [vmem:[#allocation10_spill] sm:$0xff] %v2019_v26 }
  0x8a   : > { %609 = vperm.xlu1 %1667, %v507_v60   ;;  %613 = vperm.xlu2 %1668, %v509_v39   ;;  %v514_v60 = vsel %vm469_vm0, %v511_v21, %v513_v34  ;;  %v1994_v39 = vld [vmem:[%s1727_s17 + $0xe8] sm:$0x3] }
  0x8b   : > { %605 = vperm.xlu0 %1666, %v504_v49   ;;  %v542_v49 = vsel %vm469_vm0, %v540_v62, %v3498_v41  ;;  %v518_v34 = vrot.slane %v1994_v39, 1  ;;  %v3566_v41 = vrot.slane %v1809_v24, 1 }
  0x8c   : > { %v1979_v40 = vpop.permute.xlu2 %298  ;;  %v1981_v55 = vpop.permute.xlu1 %243 }
  0x8d   : > { %3562 = vst [vmem:[#allocation7_spill] sm:$0xff] %v1979_v40  ;;  %v1983_v31 = vpop.permute.xlu0 %233  ;;  %v523_v40 = vrot.slane %v1991_v57, 1  ;;  %v519_v48 = vsel %vm469_vm0, %v3566_v41, %v518_v34  ;;  %v3507_v34 = vrot.slane %v1742_v4, 2 }
  0x92   : > { %621 = vperm.xlu1 %1667, %v514_v60   ;;  %625 = vperm.xlu2 %1668, %v517_v47   ;;  %v748_v47 = vrot.slane %v1736_v3, 2  ;;  %v749_v60 = vrot.slane %v1748_v6, 2  ;;  %v3504_v3 = vrot.slane %v1745_v5, 2  ;;  %v528_v6 = vrot.slane %v2019_v26, 1 }
  0x93   : > { %617 = vperm.xlu0 %1666, %v512_v38   ;;  %v3565_v38 = vrot.slane %v1826_v30, 1  ;;  %v3514_v26 = vrot.slane %v1772_v12, 2 }
  0x94   : > { %v2003_v19 = vpop.permute.xlu2 %313  ;;  %v2005_v21 = vpop.permute.xlu1 %263 }
  0x95   : > { %3563 = vst [vmem:[#allocation8_spill] sm:$0xff] %v2003_v19  ;;  %v2008_v58 = vpop.permute.xlu0 %258  ;;  %v524_v62 = vsel %vm469_vm0, %v3565_v38, %v523_v40  ;;  %v753_v19 = vrot.slane %v1733_v2, 2  ;;  %v750_v40 = vsel %vm747_vm1, %v748_v47, %v749_v60  ;;  %v2042_v47 = vld [vmem:[%s1727_s17 + $0x148] sm:$0x3] }
  0x96   : > { %3564 = vst [vmem:[#allocation9_spill] sm:$0xff] %v2005_v21 }
  0x97   : > { %3571 = vst [vmem:[#allocation13_spill] sm:$0xff] %v2042_v47 }
  0x9a   : > { %633 = vperm.xlu1 %1667, %v522_v61   ;;  %637 = vperm.xlu2 %1668, %v524_v62   ;;  %v758_v61 = vrot.slane %v1730_v1, 2  ;;  %v3570_v62 = vrot.slane %v1820_v28, 1  ;;  %v538_v1 = vrot.slane %v2042_v47, 1  ;;  %v3575_v47 = vrot.slane %v1839_v36, 1 }
  0x9b   : > { %629 = vperm.xlu0 %1666, %v519_v48   ;;  %v2039_v48 = vsel %vm747_vm1, %v753_v19, %v3504_v3 }
  0x9c   : > { %v2025_v38 = vpop.permute.xlu2 %328  ;;  %v2027_v21 = vpop.permute.xlu1 %278  ;;  %v529_v2 = vsel %vm469_vm0, %v3570_v62, %v528_v6 }
  0x9d   : > { %3568 = vst [vmem:[#allocation11_spill] sm:$0xff] %v2025_v38  ;;  %v2029_v41 = vpop.permute.xlu0 %273  ;;  %v2045_v38 = vld [vmem:[%s1727_s17 + $0x130] sm:$0x3] }
  0x9e   : > { %3569 = vst [vmem:[#allocation12_spill] sm:$0xff] %v2027_v21  ;;  %v760_v21 = vsel %vm747_vm1, %v758_v61, %v3507_v34  ;;  %v533_v19 = vrot.slane %v2045_v38, 1  ;;  %v2067_v34 = vld [vmem:[%s1727_s17 + $0x160] sm:$0x3] }
  0x9f   : > { %3576 = vst [vmem:[#allocation16_spill] sm:$0xff] %v2067_v34 }
  0xa0   : > { %v534_v61 = vsel %vm469_vm0, %v3575_v47, %v533_v19 }
  0xa2   : > { %645 = vperm.xlu1 %1667, %v529_v2   ;;  %649 = vperm.xlu2 %1668, %v532_v46   ;;  %v763_v2 = vrot.slane %v1760_v9, 2  ;;  %v543_v9 = vrot.slane %v2067_v34, 1 }
  0xa3   : > { %641 = vperm.xlu0 %1666, %v527_v42   ;;  %v3574_v42 = vrot.slane %v1861_v45, 1 }
  0xa4   : > { %v2051_v6 = vpop.permute.xlu2 %343  ;;  %v2053_v62 = vpop.permute.xlu1 %293 }
  0xa5   : > { %3572 = vst [vmem:[#allocation14_spill] sm:$0xff] %v2051_v6  ;;  %v2056_v3 = vpop.permute.xlu0 %288  ;;  %v539_v46 = vsel %vm469_vm0, %v3574_v42, %v538_v1  ;;  %v768_v6 = vrot.slane %v1754_v7, 2  ;;  %v3580_v7 = vrot.slane %v1855_v43, 1 }
  0xa6   : > { %3573 = vst [vmem:[#allocation15_spill] sm:$0xff] %v2053_v62  ;;  %v3577_v62 = vrot.slane %v1757_v8, 2 }
  0xa7   : > { %v2090_v34 = vsel %vm747_vm1, %v768_v6, %v3514_v26  ;;  %v3516_v6 = vrot.slane %v1781_v14, 2 }
  0xa8   : > { %v765_v1 = vsel %vm747_vm1, %v763_v2, %v3577_v62  ;;  %v2093_v62 = vld [vmem:[%s1727_s17 + $0x178] sm:$0x3]  ;;  %v751_v2 = vrot.slane %v1880_v53, 2  ;;  %v3582_v53 = vrot.slane %v1871_v50, 1 }
  0xaa   : > { %657 = vperm.xlu1 %1667, %v1970_v56   ;;  %661 = vperm.xlu2 %1668, %v539_v46   ;;  %v3513_v56 = vrot.slane %v1766_v10, 2  ;;  %v773_v46 = vrot.slane %v1769_v11, 2 }
  0xab   : > { %653 = vperm.xlu0 %1666, %v534_v61   ;;  %v544_v61 = vsel %vm469_vm0, %v3580_v7, %v543_v9  ;;  %v548_v9 = vrot.slane %v2093_v62, 1 }
  0xac   : > { %v2076_v42 = vpop.permute.xlu2 %358  ;;  %v2078_v47 = vpop.permute.xlu1 %308  ;;  %v775_v11 = vsel %vm747_vm1, %v773_v46, %v3513_v56  ;;  %v2115_v46 = vld [vmem:[%s3484_s1] ss:$0 sm:$0xff]  ;;  %v2120_v56 = vld [vmem:[%s3484_s1 + $0x1] ss:$0 sm:$0xff] }
  0xad   : > { %3578 = vst [vmem:[#allocation17_spill] sm:$0xff] %v2076_v42  ;;  %v2080_v19 = vpop.permute.xlu0 %303 }
  0xae   : > { %3579 = vst [vmem:[#allocation18_spill] sm:$0xff] %v2078_v47 }
  0xb2   : > { %669 = vperm.xlu1 %1667, %v544_v61   ;;  %673 = vperm.xlu2 %1668, %v547_v51   ;;  %v778_v61 = vrot.slane %v1784_v15, 2  ;;  %v752_v51 = vsel %vm747_vm1, %v749_v60, %v751_v2  ;;  %v756_v15 = vrot.slane %v1877_v52, 2  ;;  %v783_v2 = vrot.slane %v1778_v13, 2 }
  0xb3   : > { %665 = vperm.xlu0 %1666, %v542_v49   ;;  %v549_v49 = vsel %vm469_vm0, %v3582_v53, %v548_v9  ;;  %v3519_v9 = vrot.slane %v1796_v18, 2  ;;  %v3518_v52 = vrot.slane %v1790_v16, 2  ;;  %v3585_v13 = vrot.slane %v1745_v5, 2 }
  0xb4   : > { %v2099_v42 = vpop.permute.xlu2 %373  ;;  %v2101_v47 = vpop.permute.xlu1 %323  ;;  %v2126_v60 = vsel %vm747_vm1, %v778_v61, %v3516_v6 }
  0xb5   : > { %3581 = vst [vmem:[#allocation19_spill] sm:$0xff] %v2099_v42  ;;  %v2104_v7 = vpop.permute.xlu0 %318  ;;  %v389_v42 = vmul.f32 %v2115_v46, %v1962_v32  ;;  %v757_v6 = vsel %vm747_vm1, %v3585_v13, %v756_v15  ;;  %v392_v15 = vmul.f32 %v2115_v46, %v1981_v55 }
  0xba   : > { %831 = vperm.xlu1 %1667, %v750_v40   ;;  %835 = vperm.xlu2 %1668, %v752_v51  }
  0xbb   : > { %677 = vperm.xlu0 %1666, %v549_v49   ;;  %v788_v49 = vrot.slane %v1793_v17, 2 }
  0xbc   : > { %v2130_v53 = vpop.permute.xlu1 %338  ;;  %v554_v26 = vpop.permute.xlu2 %553 }
  0xbd   : > { %3583 = vst [vmem:[#allocation20_spill] sm:$0xff] %v2130_v53  ;;  %v2134_v40 = vpop.permute.xlu0 %333  ;;  %v683_v51 = vmul.f32 %v2120_v56, %v554_v26  ;;  %v2147_v53 = vsel %vm747_vm1, %v783_v2, %v3519_v9  ;;  %v766_v26 = vrot.slane %v1912_v27, 2  ;;  %v2154_v17 = vsel %vm747_vm1, %v788_v49, %v3518_v52 }
  0xbe   : > { %v3523_v27 = vrot.slane %v1809_v24, 2  ;;  %v771_v52 = vrot.slane %v1909_v20, 2 }
  0xbf   : > { %v2139_v61 = vadd.f32 %v683_v51, %v389_v42  ;;  %v761_v42 = vrot.slane %v1898_v63, 2  ;;  %v3587_v51 = vrot.slane %v1757_v8, 2  ;;  %v3588_v63 = vrot.slane %v1742_v4, 2 }
  0xc0   : > { %v3522_v8 = vrot.slane %v1826_v30, 2  ;;  %v395_v4 = vmul.f32 %v2115_v46, %v2008_v58 }
  0xc1   : > { %3584 = vst [vmem:[#allocation21_spill] sm:$0xff] %v2139_v61  ;;  %v767_v49 = vsel %vm747_vm1, %v3587_v51, %v766_v26  ;;  %v762_v13 = vsel %vm747_vm1, %v3588_v63, %v761_v42  ;;  %v3520_v42 = vrot.slane %v1820_v28, 2  ;;  %v781_v63 = vrot.slane %v1946_v59, 2 }
  0xc2   : > { %843 = vperm.xlu1 %1667, %v757_v6   ;;  %847 = vperm.xlu2 %1668, %v760_v21   ;;  %v3521_v59 = vrot.slane %v1839_v36, 2  ;;  %v3623_v61 = vrot.slane %v1820_v28, 2 }
  0xc3   : > { %839 = vperm.xlu0 %1666, %v2039_v48   ;;  %v793_v48 = vrot.slane %v1812_v25, 2  ;;  %v798_v25 = vrot.slane %v1806_v23, 2  ;;  %v3590_v23 = vrot.slane %v1772_v12, 2 }
  0xc4   : > { %v2156_v32 = vpop.permute.xlu1 %353  ;;  %v2158_v5 = vpop.permute.xlu2 %565 }
  0xc5   : > { %v2163_v6 = vpop.permute.xlu0 %348  ;;  %v686_v21 = vmul.f32 %v2120_v56, %v2158_v5  ;;  %v2181_v9 = vsel %vm747_vm1, %v793_v48, %v3523_v27  ;;  %v772_v51 = vsel %vm747_vm1, %v3590_v23, %v771_v52  ;;  %v776_v52 = vrot.slane %v1932_v0, 2 }
  0xc6   : > { %v3595_v0 = vrot.slane %v1766_v10, 2 }
  0xc7   : > { %v2169_v2 = vadd.f32 %v686_v21, %v392_v15  ;;  %v803_v21 = vrot.slane %v1823_v29, 2 }
  0xc9   : > { %3586 = vst [vmem:[#allocation22_spill] sm:$0xff] %v2169_v2  ;;  %v2212_v29 = vsel %vm747_vm1, %v803_v21, %v3520_v42  ;;  %v3594_v21 = vrot.slane %v1781_v14, 2  ;;  %v786_v42 = vrot.slane %v1943_v33, 2 }
  0xca   : > { %855 = vperm.xlu1 %1667, %v765_v1   ;;  %859 = vperm.xlu2 %1668, %v767_v49   ;;  %v2205_v49 = vsel %vm747_vm1, %v798_v25, %v3522_v8  ;;  %v398_v25 = vmul.f32 %v2115_v46, %v2029_v41  ;;  %v3598_v8 = vrot.slane %v1796_v18, 2 }
  0xcb   : > { %851 = vperm.xlu0 %1666, %v762_v13   ;;  %v782_v23 = vsel %vm747_vm1, %v3594_v21, %v781_v63  ;;  %v390_v21 = vmul.f32 %v2115_v46, %v1983_v31  ;;  %v3600_v31 = vrot.slane %v1855_v43, 2 }
  0xcc   : > { %v2185_v15 = vpop.permute.xlu1 %368  ;;  %v2187_v26 = vpop.permute.xlu2 %577  ;;  %v787_v27 = vsel %vm747_vm1, %v3598_v8, %v786_v42 }
  0xcd   : > { %v2191_v1 = vpop.permute.xlu0 %363  ;;  %v689_v20 = vmul.f32 %v2120_v56, %v2187_v26 }
  0xcf   : > { %v2197_v48 = vadd.f32 %v689_v20, %v395_v4 }
  0xd1   : > { %3589 = vst [vmem:[#allocation23_spill] sm:$0xff] %v2197_v48 }
  0xd2   : > { %867 = vperm.xlu1 %1667, %v772_v51   ;;  %871 = vperm.xlu2 %1668, %v775_v11   ;;  %v808_v11 = vrot.slane %v1842_v37, 2  ;;  %v777_v51 = vsel %vm747_vm1, %v3595_v0, %v776_v52  ;;  %v401_v52 = vmul.f32 %v2115_v46, %v2056_v3  ;;  %v818_v0 = vrot.slane %v1858_v44, 2 }
  0xd3   : > { %863 = vperm.xlu0 %1666, %v2090_v34   ;;  %v796_v44 = vrot.slane %v1994_v39, 2 }
  0xd4   : > { %v2214_v13 = vpop.permute.xlu1 %383  ;;  %v2216_v12 = vpop.permute.xlu2 %589  ;;  %v2240_v37 = vsel %vm747_vm1, %v808_v11, %v3521_v59  ;;  %v2281_v18 = vsel %vm747_vm1, %v818_v0, %v3600_v31  ;;  %v3606_v31 = vrot.slane %v1809_v24, 2 }
  0xd5   : > { %3591 = vst [vmem:[#allocation24_spill] sm:$0xff] %v2214_v13  ;;  %v2221_v4 = vpop.permute.xlu0 %378  ;;  %v692_v34 = vmul.f32 %v2120_v56, %v2216_v12 }
  0xd6   : > { %3592 = vst [vmem:[#allocation25_spill] sm:$0xff] %v2221_v4 }
  0xd7   : > { %v2227_v20 = vadd.f32 %v692_v34, %v398_v25  ;;  %v813_v25 = vrot.slane %v1836_v35, 2 }
  0xd9   : > { %3593 = vst [vmem:[#allocation26_spill] sm:$0xff] %v2227_v20  ;;  %v3599_v20 = vrot.slane %v1861_v45, 2 }
  0xda   : > { %879 = vperm.xlu1 %1667, %v2126_v60   ;;  %883 = vperm.xlu2 %1668, %v782_v23   ;;  %v391_v60 = vmul.f32 %v2115_v46, %v1959_v54 }
  0xdb   : > { %875 = vperm.xlu0 %1666, %v777_v51   ;;  %v2273_v35 = vsel %vm747_vm1, %v813_v25, %v3599_v20  ;;  %v3601_v20 = vld [vmem:[#allocation4_spill] sm:$0xff] }
  0xdc   : > { %v2244_v63 = vpop.permute.xlu1 %561  ;;  %v2246_v10 = vpop.permute.xlu2 %601 }
  0xdd   : > { %v685_v33 = vmul.f32 %v2120_v56, %v2244_v63  ;;  %v558_v34 = vpop.permute.xlu0 %557  ;;  %v695_v11 = vmul.f32 %v2120_v56, %v2246_v10 }
  0xde   : > { %v684_v23 = vmul.f32 %v2120_v56, %v558_v34 }
  0xdf   : > { %v2261_v51 = vadd.f32 %v685_v33, %v391_v60  ;;  %v2263_v59 = vadd.f32 %v695_v11, %v401_v52  ;;  %v791_v60 = vrot.slane %v1976_v22, 2  ;;  %v3602_v33 = vld [vmem:[#allocation3_spill] sm:$0xff]  ;;  %v3603_v11 = vld [vmem:[#allocation2_spill] sm:$0xff]  ;;  %v3607_v52 = vrot.slane %v1790_v16, 2 }
  0xe0   : > { %v2268_v14 = vadd.f32 %v684_v23, %v390_v21  ;;  %v393_v34 = vmul.f32 %v2115_v46, %v3602_v33  ;;  %v823_v21 = vrot.slane %v3603_v11, 2  ;;  %v801_v11 = vrot.slane %v1991_v57, 2 }
  0xe1   : > { %3596 = vst [vmem:[#allocation27_spill] sm:$0xff] %v2261_v51  ;;  %v792_v51 = vsel %vm747_vm1, %v3607_v52, %v791_v60  ;;  %v407_v60 = vmul.f32 %v2115_v46, %v2104_v7 }
  0xe2   : > { %3597 = vst [vmem:[#allocation28_spill] sm:$0xff] %v2263_v59  ;;  %891 = vperm.xlu1 %1667, %v787_v27   ;;  %895 = vperm.xlu2 %1668, %v2154_v17   ;;  %v394_v27 = vmul.f32 %v2115_v46, %v3601_v20  ;;  %v404_v17 = vmul.f32 %v2115_v46, %v2080_v19 }
  0xe3   : > { %887 = vperm.xlu0 %1666, %v2147_v53   ;;  %v797_v59 = vsel %vm747_vm1, %v3606_v31, %v796_v44 }
  0xe4   : > { %v2283_v8 = vpop.permute.xlu1 %573  ;;  %v2285_v42 = vpop.permute.xlu2 %613 }
  0xe5   : > { %v688_v39 = vmul.f32 %v2120_v56, %v2283_v8  ;;  %v2294_v53 = vpop.permute.xlu0 %569  ;;  %v698_v25 = vmul.f32 %v2120_v56, %v2285_v42 }
  0xe6   : > { %v687_v22 = vmul.f32 %v2120_v56, %v2294_v53 }
  0xe7   : > { %v2304_v23 = vadd.f32 %v688_v39, %v394_v27  ;;  %v2306_v0 = vadd.f32 %v698_v25, %v404_v17  ;;  %v3608_v27 = vrot.slane %v1871_v50, 2  ;;  %v3609_v39 = vld [vmem:[#allocation5_spill] sm:$0xff] }
  0xe8   : > { %v2311_v48 = vadd.f32 %v687_v22, %v393_v34  ;;  %v397_v16 = vmul.f32 %v2115_v46, %v3609_v39 }
  0xe9   : > { %3604 = vst [vmem:[#allocation4_spill] sm:$0xff] %v2304_v23  ;;  %v2321_v17 = vsel %vm747_vm1, %v823_v21, %v3608_v27  ;;  %v3613_v21 = vrot.slane %v1826_v30, 2 }
  0xea   : > { %3605 = vst [vmem:[#allocation3_spill] sm:$0xff] %v2306_v0  ;;  %903 = vperm.xlu1 %1667, %v2181_v9   ;;  %907 = vperm.xlu2 %1668, %v797_v59   ;;  %v811_v0 = vrot.slane %v2045_v38, 2 }
  0xeb   : > { %899 = vperm.xlu0 %1666, %v792_v51   ;;  %v3610_v51 = vld [vmem:[#allocation9_spill] sm:$0xff]  ;;  %v802_v31 = vsel %vm747_vm1, %v3613_v21, %v801_v11  ;;  %v410_v11 = vmul.f32 %v2115_v46, %v2134_v40 }
  0xec   : > { %v2323_v24 = vpop.permute.xlu1 %585  ;;  %v2325_v44 = vpop.permute.xlu2 %625  ;;  %v396_v25 = vmul.f32 %v2115_v46, %v3610_v51 }
  0xed   : > { %v691_v9 = vmul.f32 %v2120_v56, %v2323_v24  ;;  %v2333_v59 = vpop.permute.xlu0 %581  ;;  %v701_v57 = vmul.f32 %v2120_v56, %v2325_v44 }
  0xee   : > { %v690_v52 = vmul.f32 %v2120_v56, %v2333_v59 }
  0xef   : > { %v2341_v34 = vadd.f32 %v691_v9, %v397_v16  ;;  %v2343_v22 = vadd.f32 %v701_v57, %v407_v60  ;;  %v3616_v16 = vld [vmem:[#allocation10_spill] sm:$0xff] }
  0xf0   : > { %v2348_v27 = vadd.f32 %v690_v52, %v396_v25  ;;  %v806_v60 = vrot.slane %v3616_v16, 2  ;;  %v3617_v9 = vld [vmem:[#allocation6_spill] sm:$0xff]  ;;  %v3622_v16 = vrot.slane %v1839_v36, 2 }
  0xf1   : > { %3611 = vst [vmem:[#allocation2_spill] sm:$0xff] %v2341_v34  ;;  %v400_v30 = vmul.f32 %v2115_v46, %v3617_v9 }
  0xf2   : > { %3612 = vst [vmem:[#allocation5_spill] sm:$0xff] %v2343_v22  ;;  %915 = vperm.xlu1 %1667, %v802_v31   ;;  %919 = vperm.xlu2 %1668, %v2212_v29   ;;  %v812_v22 = vsel %vm747_vm1, %v3622_v16, %v811_v0  ;;  %v413_v0 = vmul.f32 %v2115_v46, %v2163_v6 }
  0xf3   : > { %911 = vperm.xlu0 %1666, %v2205_v49   ;;  %v3619_v49 = vld [vmem:[#allocation12_spill] sm:$0xff] }
  0xf4   : > { %v2353_v23 = vpop.permute.xlu1 %597  ;;  %v2355_v2 = vpop.permute.xlu2 %637  ;;  %v399_v25 = vmul.f32 %v2115_v46, %v3619_v49 }
  0xf5   : > { %3614 = vst [vmem:[#allocation9_spill] sm:$0xff] %v2353_v23  ;;  %v694_v57 = vmul.f32 %v2120_v56, %v2353_v23  ;;  %v2364_v29 = vpop.permute.xlu0 %593  ;;  %v704_v38 = vmul.f32 %v2120_v56, %v2355_v2  ;;  %v3624_v23 = vld [vmem:[#allocation13_spill] sm:$0xff] }
  0xf6   : > { %3615 = vst [vmem:[#allocation29_spill] sm:$0xff] %v2355_v2  ;;  %v693_v52 = vmul.f32 %v2120_v56, %v2364_v29  ;;  %v807_v2 = vsel %vm747_vm1, %v3623_v61, %v806_v60 }
  0xf7   : > { %3618 = vst [vmem:[#allocation10_spill] sm:$0xff] %v2364_v29  ;;  %v2372_v21 = vadd.f32 %v694_v57, %v400_v30  ;;  %v2374_v31 = vadd.f32 %v704_v38, %v410_v11  ;;  %v816_v29 = vrot.slane %v3624_v23, 2  ;;  %v3627_v57 = vld [vmem:[#allocation7_spill] sm:$0xff] }
  0xf8   : > { %v2379_v34 = vadd.f32 %v693_v52, %v399_v25  ;;  %v403_v36 = vmul.f32 %v2115_v46, %v3627_v57  ;;  %v3632_v25 = vrot.slane %v1861_v45, 2 }
  0xf9   : > { %3620 = vst [vmem:[#allocation6_spill] sm:$0xff] %v2372_v21 }
  0xfa   : > { %3621 = vst [vmem:[#allocation12_spill] sm:$0xff] %v2374_v31  ;;  %927 = vperm.xlu1 %1667, %v2240_v37   ;;  %931 = vperm.xlu2 %1668, %v812_v22   ;;  %v3629_v37 = vld [vmem:[#allocation15_spill] sm:$0xff]  ;;  %v817_v52 = vsel %vm747_vm1, %v3632_v25, %v816_v29  ;;  %v826_v31 = vrot.slane %v2093_v62, 2  ;;  %v416_v29 = vmul.f32 %v2115_v46, %v2191_v1 }
  0xfb   : > { %923 = vperm.xlu0 %1666, %v807_v2   ;;  %v402_v23 = vmul.f32 %v2115_v46, %v3629_v37 }
  0xfc   : > { %v2386_v30 = vpop.permute.xlu1 %609  ;;  %v2388_v11 = vpop.permute.xlu2 %649 }
  0xfd   : > { %3625 = vst [vmem:[#allocation13_spill] sm:$0xff] %v2386_v30  ;;  %v697_v28 = vmul.f32 %v2120_v56, %v2386_v30  ;;  %v2396_v61 = vpop.permute.xlu0 %605  ;;  %v707_v2 = vmul.f32 %v2120_v56, %v2388_v11  ;;  %v2461_v30 = vld [vmem:[%s1727_s17 + $0x188] sm:$0xff] }
  0xfe   : > { %3626 = vst [vmem:[#allocation30_spill] sm:$0xff] %v2388_v11  ;;  %v696_v22 = vmul.f32 %v2120_v56, %v2396_v61 }
  0xff   : > { %3628 = vst [vmem:[#allocation7_spill] sm:$0xff] %v2396_v61  ;;  %v2404_v60 = vadd.f32 %v697_v28, %v403_v36  ;;  %v2406_v38 = vadd.f32 %v707_v2, %v413_v0  ;;  %v3636_v36 = vld [vmem:[#allocation16_spill] sm:$0xff]  ;;  %v2434_v2 = vld [vmem:[%s3484_s1 + $0x3] ss:$0 sm:$0xff] }
 0x100   : > { %v2411_v16 = vadd.f32 %v696_v22, %v402_v23  ;;  %v821_v0 = vrot.slane %v3636_v36, 2  ;;  %v3637_v28 = vld [vmem:[#allocation8_spill] sm:$0xff]  ;;  %v3639_v23 = vld [vmem:[#allocation18_spill] sm:$0xff] }
 0x101   : > { %3630 = vst [vmem:[#allocation15_spill] sm:$0xff] %v2404_v60  ;;  %v406_v45 = vmul.f32 %v2115_v46, %v3637_v28  ;;  %v405_v22 = vmul.f32 %v2115_v46, %v3639_v23  ;;  %v3642_v60 = vrot.slane %v1871_v50, 2 }
 0x102   : > { %3631 = vst [vmem:[#allocation31_spill] sm:$0xff] %v2406_v38  ;;  %939 = vperm.xlu1 %1667, %v817_v52   ;;  %943 = vperm.xlu2 %1668, %v2281_v18   ;;  %v2443_v52 = vld [vmem:[%s3484_s1 + $0x6] ss:$0 sm:$0xff] }
 0x103   : > { %3633 = vst [vmem:[#allocation32_spill] sm:$0xff] %v2411_v16  ;;  %935 = vperm.xlu0 %1666, %v2273_v35   ;;  %v827_v16 = vsel %vm747_vm1, %v3642_v60, %v826_v31  ;;  %v2470_v50 = vmul.f32 %v2443_v52, %v3602_v33  ;;  %v2480_v60 = vmul.f32 %v2443_v52, %v3601_v20 }
 0x104   : > { %v2416_v21 = vpop.permute.xlu1 %621  ;;  %v2418_v11 = vpop.permute.xlu2 %661  ;;  %v2514_v31 = vmul.f32 %v2434_v2, %v1959_v54  ;;  %v2533_v54 = vmul.f32 %v2443_v52, %v3627_v57 }
 0x105   : > { %3634 = vst [vmem:[#allocation33_spill] sm:$0xff] %v2416_v21  ;;  %v700_v18 = vmul.f32 %v2120_v56, %v2416_v21  ;;  %v2427_v35 = vpop.permute.xlu0 %617  ;;  %v710_v62 = vmul.f32 %v2120_v56, %v2418_v11  ;;  %v3644_v21 = vrot.slane %v1855_v43, 2  ;;  %v2474_v43 = vmul.f32 %v2434_v2, %v3601_v20 }
 0x106   : > { %3635 = vst [vmem:[#allocation34_spill] sm:$0xff] %v2418_v11  ;;  %v699_v25 = vmul.f32 %v2120_v56, %v2427_v35 }
 0x107   : > { %3638 = vst [vmem:[#allocation16_spill] sm:$0xff] %v2427_v35  ;;  %v2445_v36 = vadd.f32 %v700_v18, %v406_v45  ;;  %v2447_v38 = vadd.f32 %v710_v62, %v416_v29  ;;  %v822_v61 = vsel %vm747_vm1, %v3644_v21, %v821_v0  ;;  %v2458_v35 = vld [vmem:[%s1727_s17 + $0x180] sm:$0xff]  ;;  %v2465_v45 = vmul.f32 %v2434_v2, %v3602_v33  ;;  %v3651_v29 = vld [vmem:[#allocation11_spill] sm:$0xff] }
 0x108   : > { %v2452_v11 = vadd.f32 %v699_v25, %v405_v22  ;;  %3646 = vst [vmem:[#allocation37_spill] sm:$0xff] %v2470_v50  ;;  %v1105_v21 = vrot.slane %v2458_v35, 1  ;;  %v2488_v33 = vmul.f32 %v2443_v52, %v3609_v39  ;;  %v409_v20 = vmul.f32 %v2115_v46, %v3651_v29 }
 0x109   : > { %3640 = vst [vmem:[#allocation8_spill] sm:$0xff] %v2445_v36  ;;  %v419_v18 = vmul.f32 %v2115_v46, %v2221_v4  ;;  %v2510_v25 = vmul.f32 %v2443_v52, %v3617_v9  ;;  %v2539_v50 = vmul.f32 %v2434_v2, %v3637_v28 }
 0x10a   : > { %3641 = vst [vmem:[#allocation18_spill] sm:$0xff] %v2447_v38  ;;  %951 = vperm.xlu1 %1667, %v2321_v17   ;;  %955 = vperm.xlu2 %1668, %v827_v16   ;;  %v2484_v17 = vmul.f32 %v2434_v2, %v3609_v39  ;;  %v2492_v16 = vmul.f32 %v2434_v2, %v3617_v9  ;;  %v3656_v9 = vrot.slane %v2461_v30, 1 }
 0x10b   : > { %3643 = vst [vmem:[#allocation35_spill] sm:$0xff] %v2452_v11  ;;  %947 = vperm.xlu0 %1666, %v822_v61   ;;  %v408_v38 = vmul.f32 %v2115_v46, %v2101_v47  ;;  %v1041_v11 = vmul.f32 %v2434_v2, %v1981_v55  ;;  %v2558_v55 = vmul.f32 %v2434_v2, %v2008_v58 }
 0x10c   : > { %3645 = vst [vmem:[#allocation36_spill] sm:$0xff] %v2465_v45  ;;  %v2494_v61 = vpop.permute.xlu1 %633  ;;  %v2496_v0 = vpop.permute.xlu2 %673  ;;  %v3676_v45 = vrot.slane %v2461_v30, 1 }
 0x10d   : > { %3647 = vst [vmem:[#allocation38_spill] sm:$0xff] %v2484_v17  ;;  %v703_v62 = vmul.f32 %v2120_v56, %v2494_v61  ;;  %v2504_v39 = vpop.permute.xlu0 %629  ;;  %v713_v22 = vmul.f32 %v2120_v56, %v2496_v0 }
 0x10e   : > { %3648 = vst [vmem:[#allocation39_spill] sm:$0xff] %v2488_v33  ;;  %v702_v36 = vmul.f32 %v2120_v56, %v2504_v39 }
 0x10f   : > { %3649 = vst [vmem:[#allocation40_spill] sm:$0xff] %v2492_v16  ;;  %v2522_v16 = vmul.f32 %v2434_v2, %v3627_v57  ;;  %v2524_v33 = vadd.f32 %v703_v62, %v409_v20  ;;  %v2526_v17 = vadd.f32 %v713_v22, %v419_v18  ;;  %v221_v20 = vld [vmem:[%s1727_s17 + $0x190] sm:$0x3]  ;;  %v2546_v18 = vmul.f32 %v2443_v52, %v3637_v28 }
 0x110   : > { %3650 = vst [vmem:[#allocation41_spill] sm:$0xff] %v2496_v0  ;;  %v2554_v57 = vmul.f32 %v2443_v52, %v3610_v51  ;;  %v2567_v28 = vmul.f32 %v2443_v52, %v2008_v58  ;;  %v2580_v62 = vmul.f32 %v2434_v2, %v3619_v49  ;;  %v1187_v22 = vrot.slane %v2458_v35, 2 }
 0x111   : > { %3652 = vst [vmem:[#allocation11_spill] sm:$0xff] %v2510_v25  ;;  %v1107_v25 = vsel %vm469_vm0, %v1105_v21, %v3656_v9  ;;  %v2550_v21 = vmul.f32 %v2434_v2, %v3610_v51  ;;  %v2575_v51 = vmul.f32 %v2443_v52, %v3651_v29  ;;  %v1188_v58 = vrot.slane %v2461_v30, 2 }
 0x112   : > { %3653 = vst [vmem:[#allocation42_spill] sm:$0xff] %v2522_v16  ;;  %v2541_v16 = vadd.f32 %v702_v36, %v408_v38  ;;  %v2563_v38 = vld [vmem:[%s3484_s1 + $0x2] ss:$0 sm:$0xff]  ;;  %v2571_v36 = vmul.f32 %v2434_v2, %v3651_v29  ;;  %1034 = vperm.xlu1 %1667, %v2461_v30   ;;  %1113 = vperm.xlu2 %1668, %v1107_v25   ;;  %v1190_v9 = vrot.slane %v221_v20, 2 }
 0x113   : > { %3654 = vst [vmem:[#allocation43_spill] sm:$0xff] %v2524_v33  ;;  %1029 = vperm.xlu0 %1666, %v2458_v35   ;;  %v2591_v29 = vmul.f32 %v2434_v2, %v2029_v41  ;;  %v2595_v25 = vmul.f32 %v2443_v52, %v2029_v41  ;;  %v3669_v35 = vld [vmem:[#allocation14_spill] sm:$0xff] }
 0x114   : > { %3655 = vst [vmem:[#allocation44_spill] sm:$0xff] %v2526_v17  ;;  %v2587_v17 = vmul.f32 %v2443_v52, %v3619_v49  ;;  %v2597_v33 = vpop.permute.xlu1 %645  ;;  %v2608_v49 = vld [vmem:[%s3484_s1 + $0x4] ss:$0 sm:$0xff] }
 0x115   : > { %3657 = vst [vmem:[#allocation45_spill] sm:$0xff] %v2533_v54  ;;  %v706_v41 = vmul.f32 %v2120_v56, %v2597_v33  ;;  %v2612_v54 = vpop.permute.xlu0 %641 }
 0x116   : > { %3658 = vst [vmem:[#allocation46_spill] sm:$0xff] %v2539_v50  ;;  %v2603_v50 = vmul.f32 %v2434_v2, %v3669_v35 }
 0x117   : > { %3659 = vst [vmem:[#allocation47_spill] sm:$0xff] %v2541_v16  ;;  %v705_v16 = vmul.f32 %v2120_v56, %v2612_v54 }
 0x118   : > { %3660 = vst [vmem:[#allocation48_spill] sm:$0xff] %v2546_v18  ;;  %v412_v18 = vmul.f32 %v2115_v46, %v3669_v35 }
 0x119   : > { %3661 = vst [vmem:[#allocation49_spill] sm:$0xff] %v2550_v21 }
 0x11a   : > { %3662 = vst [vmem:[#allocation50_spill] sm:$0xff] %v2554_v57  ;;  %v2627_v57 = vadd.f32 %v706_v41, %v412_v18  ;;  %v2646_v41 = vld [vmem:[%s1727_s17 + $0x198] sm:$0xff] }
 0x11b   : > { %3663 = vst [vmem:[#allocation51_spill] sm:$0xff] %v2567_v28  ;;  %v1191_v28 = vsel %vm747_vm1, %v1188_v58, %v1190_v9  ;;  %v1124_v9 = vmul.f32 %v2608_v49, %v2158_v5  ;;  %v1349_v5 = vrot.slane %v2646_v41, 1 }
 0x11c   : > { %3664 = vst [vmem:[#allocation52_spill] sm:$0xff] %v2571_v36  ;;  %v1108_v36 = vrot.slane %v221_v20, 1  ;;  %1199 = vperm.xlu2 %1668, %v1191_v28   ;;  %v3683_v28 = vld [vmem:[#allocation19_spill] sm:$0xff] }
 0x11d   : > { %3665 = vst [vmem:[#allocation53_spill] sm:$0xff] %v2575_v51  ;;  %v836_v51 = vpop.permute.xlu2 %835 }
 0x11e   : > { %3666 = vst [vmem:[#allocation54_spill] sm:$0xff] %v2580_v62  ;;  %v962_v20 = vmul.f32 %v2563_v38, %v836_v51  ;;  %v3674_v62 = vld [vmem:[#allocation20_spill] sm:$0xff]  ;;  %v1189_v51 = vsel %vm747_vm1, %v1187_v22, %v1188_v58  ;;  %v1109_v18 = vsel %vm469_vm0, %v3676_v45, %v1108_v36  ;;  %v2653_v22 = vmul.f32 %v2443_v52, %v2056_v3 }
 0x11f   : > { %3667 = vst [vmem:[#allocation55_spill] sm:$0xff] %v2587_v17  ;;  %v2617_v17 = vmul.f32 %v2443_v52, %v3669_v35  ;;  %v2634_v35 = vmul.f32 %v2443_v52, %v3629_v37  ;;  %v2669_v36 = vmul.f32 %v2434_v2, %v3639_v23  ;;  %1195 = vperm.xlu1 %1667, %v1189_v51  }
 0x120   : > { %3668 = vst [vmem:[#allocation56_spill] sm:$0xff] %v2595_v25  ;;  %v411_v25 = vmul.f32 %v2115_v46, %v3674_v62  ;;  %v994_v21 = vadd.f32 %v962_v20, %v2268_v14  ;;  %v2649_v14 = vld [vmem:[%s1727_s17 + $0x1a0] sm:$0xff]  ;;  %1117 = vperm.xlu0 %1666, %v1109_v18   ;;  %v2685_v20 = vmul.f32 %v2443_v52, %v2080_v19  ;;  %v2693_v18 = vpop.permute.xlu1 %657 }
 0x121   : > { %3670 = vst [vmem:[#allocation14_spill] sm:$0xff] %v2603_v50  ;;  %v2621_v50 = vmul.f32 %v2434_v2, %v3629_v37  ;;  %v3677_v37 = vld [vmem:[#allocation17_spill] sm:$0xff]  ;;  %v418_v51 = vmul.f32 %v2115_v46, %v3683_v28 }
 0x122   : > { %3671 = vst [vmem:[#allocation57_spill] sm:$0xff] %v2608_v49  ;;  %v415_v58 = vmul.f32 %v2115_v46, %v3677_v37  ;;  %v2661_v30 = vmul.f32 %v2434_v2, %v3677_v37  ;;  %v2665_v45 = vmul.f32 %v2443_v52, %v3677_v37 }
 0x123   : > { %3672 = vst [vmem:[#allocation58_spill] sm:$0xff] %v2617_v17  ;;  %v2638_v17 = vmul.f32 %v2434_v2, %v2056_v3  ;;  %v2673_v3 = vmul.f32 %v2443_v52, %v3639_v23  ;;  %v2691_v23 = vmul.f32 %v2434_v2, %v3683_v28 }
 0x124   : > { %3673 = vst [vmem:[#allocation59_spill] sm:$0xff] %v2621_v50  ;;  %v2640_v50 = vadd.f32 %v705_v16, %v411_v25  ;;  %v1073_v16 = vadd.f32 %v1041_v11, %v994_v21  ;;  %v2681_v25 = vmul.f32 %v2434_v2, %v2080_v19  ;;  %v709_v19 = vmul.f32 %v2120_v56, %v2693_v18  ;;  %v2707_v11 = vpop.permute.xlu0 %653 }
 0x125   : > { %3675 = vst [vmem:[#allocation20_spill] sm:$0xff] %v2627_v57  ;;  %v2695_v37 = vpop.permute.xlu2 %847  ;;  %v2725_v57 = vmul.f32 %v2443_v52, %v2104_v7 }
 0x126   : > { %3678 = vst [vmem:[#allocation17_spill] sm:$0xff] %v2661_v30  ;;  %v2677_v21 = vadd.f32 %v1124_v9, %v1073_v16  ;;  %v2699_v9 = vmul.f32 %v2443_v52, %v3683_v28  ;;  %v2703_v16 = vmul.f32 %v2434_v2, %v2101_v47  ;;  %v2717_v28 = vmul.f32 %v2434_v2, %v2104_v7 }
 0x127   : > { %3679 = vst [vmem:[#allocation60_spill] sm:$0xff] %v2665_v45  ;;  %v2713_v45 = vmul.f32 %v2443_v52, %v2101_v47  ;;  %v708_v30 = vmul.f32 %v2120_v56, %v2707_v11  ;;  %v3691_v47 = vrot.slane %v2649_v14, 1  ;;  %v2743_v7 = vmul.f32 %v2434_v2, %v2134_v40  ;;  %1278 = vperm.xlu1 %1667, %v2649_v14  }
 0x128   : > { %3680 = vst [vmem:[#allocation61_spill] sm:$0xff] %v2669_v36  ;;  %v2735_v36 = vmul.f32 %v2434_v2, %v3674_v62  ;;  %1273 = vperm.xlu0 %1666, %v2646_v41  }
 0x129   : > { %3681 = vst [vmem:[#allocation62_spill] sm:$0xff] %v2673_v3 }
 0x12a   : > { %3682 = vst [vmem:[#allocation63_spill] sm:$0xff] %v2685_v20  ;;  %v2739_v20 = vmul.f32 %v2443_v52, %v3674_v62 }
 0x12b   : > { %3684 = vst [vmem:[#allocation19_spill] sm:$0xff] %v2691_v23  ;;  %v965_v23 = vmul.f32 %v2563_v38, %v2695_v37 }
 0x12c   : > { %3685 = vst [vmem:[#allocation64_spill] sm:$0xff] %v2699_v9  ;;  %v414_v9 = vmul.f32 %v2115_v46, %v2156_v32 }
 0x12d   : > { %3686 = vst [vmem:[#allocation65_spill] sm:$0xff] %v2703_v16  ;;  %v2727_v16 = vadd.f32 %v709_v19, %v415_v58  ;;  %v997_v3 = vadd.f32 %v965_v23, %v2311_v48  ;;  %v224_v19 = vld [vmem:[%s1727_s17 + $0x1a8] sm:$0x3]  ;;  %v2750_v48 = vmul.f32 %v2443_v52, %v2134_v40  ;;  %v1127_v23 = vmul.f32 %v2608_v49, %v2187_v26 }
 0x12e   : > { %3687 = vst [vmem:[#allocation66_spill] sm:$0xff] %v2707_v11  ;;  %v2745_v58 = vadd.f32 %v708_v30, %v414_v9  ;;  %v2765_v30 = vmul.f32 %v2434_v2, %v2163_v6  ;;  %v2769_v40 = vmul.f32 %v2443_v52, %v2163_v6  ;;  %v2774_v9 = vld [vmem:[%s3484_s1 + $0x7] ss:$0 sm:$0xff]  ;;  %v417_v6 = vmul.f32 %v2115_v46, %v2185_v15 }
 0x12f   : > { %3688 = vst [vmem:[#allocation67_spill] sm:$0xff] %v2713_v45  ;;  %v1351_v45 = vsel %vm469_vm0, %v1349_v5, %v3691_v47  ;;  %v2754_v5 = vmul.f32 %v2434_v2, %v2156_v32  ;;  %v1076_v62 = vadd.f32 %v2558_v55, %v997_v3  ;;  %v2761_v47 = vmul.f32 %v2443_v52, %v2156_v32 }
 0x130   : > { %3689 = vst [vmem:[#allocation68_spill] sm:$0xff] %v2725_v57  ;;  %1357 = vperm.xlu2 %1668, %v1351_v45   ;;  %v1431_v55 = vrot.slane %v2646_v41, 2  ;;  %v1432_v32 = vrot.slane %v2649_v14, 2  ;;  %v1434_v3 = vrot.slane %v224_v19, 2  ;;  %v2792_v45 = vpop.permute.xlu1 %669  ;;  %v1352_v41 = vrot.slane %v224_v19, 1  ;;  %v3718_v57 = vld [vmem:[#allocation13_spill] sm:$0xff] }
 0x131   : > { %3690 = vst [vmem:[#allocation69_spill] sm:$0xff] %v2727_v16  ;;  %v2780_v16 = vadd.f32 %v1127_v23, %v1076_v62  ;;  %v2798_v23 = vmul.f32 %v2434_v2, %v2191_v1  ;;  %v2802_v62 = vmul.f32 %v2443_v52, %v2191_v1  ;;  %v420_v19 = vmul.f32 %v2115_v46, %v2214_v13  ;;  %v3715_v13 = vld [vmem:[#allocation29_spill] sm:$0xff] }
 0x132   : > { %3692 = vst [vmem:[#allocation70_spill] sm:$0xff] %v2735_v36  ;;  %v2818_v36 = vmul.f32 %v2434_v2, %v2221_v4  ;;  %v2831_v46 = vmul.f32 %v2774_v9, %v2216_v12  ;;  %v3709_v4 = vrot.slane %v2649_v14, 1  ;;  %v2853_v14 = vmul.f32 %v2774_v9, %v2283_v8 }
 0x133   : > { %3693 = vst [vmem:[#allocation71_spill] sm:$0xff] %v2739_v20  ;;  %v2806_v20 = vpop.permute.xlu0 %665 }
 0x134   : > { %3694 = vst [vmem:[#allocation72_spill] sm:$0xff] %v2745_v58  ;;  %v711_v1 = vmul.f32 %v2120_v56, %v2806_v20 }
 0x135   : > { %3695 = vst [vmem:[#allocation73_spill] sm:$0xff] %v2750_v48  ;;  %v1435_v48 = vsel %vm747_vm1, %v1432_v32, %v1434_v3  ;;  %v2875_v3 = vmul.f32 %v2608_v49, %v2323_v24 }
 0x136   : > { %3696 = vst [vmem:[#allocation74_spill] sm:$0xff] %v2754_v5  ;;  %v2790_v5 = vmul.f32 %v2443_v52, %v2185_v15 }
 0x137   : > { %3697 = vst [vmem:[#allocation75_spill] sm:$0xff] %v2761_v47  ;;  %v2786_v47 = vmul.f32 %v2434_v2, %v2185_v15  ;;  %v2833_v2 = vadd.f32 %v711_v1, %v417_v6  ;;  %v2887_v6 = vmul.f32 %v2774_v9, %v2333_v59 }
 0x138   : > { %3698 = vst [vmem:[#allocation76_spill] sm:$0xff] %v2769_v40  ;;  %v2794_v40 = vpop.permute.xlu2 %859  ;;  %1443 = vperm.xlu2 %1668, %v1435_v48   ;;  %v2879_v48 = vmul.f32 %v2774_v9, %v2323_v24 }
 0x139   : > { %3699 = vst [vmem:[#allocation77_spill] sm:$0xff] %v2774_v9  ;;  %v968_v15 = vmul.f32 %v2563_v38, %v2794_v40 }
 0x13a   : > { %3700 = vst [vmem:[#allocation78_spill] sm:$0xff] %v2786_v47  ;;  %v712_v47 = vmul.f32 %v2120_v56, %v2792_v45 }
 0x13b   : > { %3701 = vst [vmem:[#allocation79_spill] sm:$0xff] %v2790_v5  ;;  %v2812_v5 = vmul.f32 %v2774_v9, %v2187_v26  ;;  %v1130_v26 = vmul.f32 %v2608_v49, %v2216_v12  ;;  %v2849_v12 = vmul.f32 %v2608_v49, %v2283_v8  ;;  %v2899_v24 = vpop.permute.xlu0 %677 }
 0x13c   : > { %3702 = vst [vmem:[#allocation80_spill] sm:$0xff] %v2792_v45  ;;  %v2822_v52 = vadd.f32 %v712_v47, %v418_v51  ;;  %v1433_v45 = vsel %vm747_vm1, %v1431_v55, %v1432_v32  ;;  %v1353_v51 = vsel %vm469_vm0, %v3709_v4, %v1352_v41  ;;  %v1133_v47 = vmul.f32 %v2608_v49, %v2246_v10 }
 0x13d   : > { %3703 = vst [vmem:[#allocation81_spill] sm:$0xff] %v2798_v23  ;;  %v2844_v55 = vmul.f32 %v2774_v9, %v2246_v10  ;;  %v2857_v4 = vmul.f32 %v2608_v49, %v2294_v53  ;;  %1439 = vperm.xlu1 %1667, %v1433_v45   ;;  %v2865_v10 = vmul.f32 %v2608_v49, %v2285_v42 }
 0x13e   : > { %3704 = vst [vmem:[#allocation82_spill] sm:$0xff] %v2802_v62  ;;  %v1000_v62 = vadd.f32 %v968_v15, %v2348_v27  ;;  %v1123_v27 = vmul.f32 %v2608_v49, %v2244_v63  ;;  %v2861_v63 = vmul.f32 %v2774_v9, %v2294_v53  ;;  %1361 = vperm.xlu0 %1666, %v1353_v51  }
 0x13f   : > { %3705 = vst [vmem:[#allocation83_spill] sm:$0xff] %v2806_v20  ;;  %v2883_v53 = vmul.f32 %v2608_v49, %v2333_v59  ;;  %v2893_v41 = vmul.f32 %v2608_v49, %v2325_v44  ;;  %v3713_v59 = vld [vmem:[#allocation9_spill] sm:$0xff]  ;;  %v2924_v20 = vmul.f32 %v2608_v49, %v3715_v13  ;;  %v2934_v23 = vmul.f32 %v2608_v49, %v3718_v57 }
 0x140   : > { %3706 = vst [vmem:[#allocation84_spill] sm:$0xff] %v2818_v36  ;;  %v1079_v32 = vadd.f32 %v2591_v29, %v1000_v62  ;;  %v2869_v29 = vmul.f32 %v2774_v9, %v2285_v42  ;;  %v832_v42 = vpop.permute.xlu1 %831  ;;  %v2889_v45 = vpop.permute.xlu2 %871  ;;  %v2897_v62 = vmul.f32 %v2774_v9, %v2325_v44  ;;  %v2910_v51 = vmul.f32 %v2774_v9, %v3713_v59  ;;  %v3716_v36 = vld [vmem:[#allocation21_spill] sm:$0xff] }
 0x141   : > { %3707 = vst [vmem:[#allocation85_spill] sm:$0xff] %v2822_v52  ;;  %v961_v15 = vmul.f32 %v2563_v38, %v832_v42  ;;  %v971_v1 = vmul.f32 %v2563_v38, %v2889_v45  ;;  %v714_v44 = vmul.f32 %v2120_v56, %v2899_v24  ;;  %v2938_v56 = vmul.f32 %v2774_v9, %v3718_v57 }
 0x142   : > { %3708 = vst [vmem:[#allocation86_spill] sm:$0xff] %v2833_v2  ;;  %v2871_v8 = vadd.f32 %v1130_v26, %v1079_v32  ;;  %v2906_v26 = vmul.f32 %v2608_v49, %v3713_v59  ;;  %v3714_v32 = vld [vmem:[#allocation10_spill] sm:$0xff] }
 0x143   : > { %3710 = vst [vmem:[#allocation87_spill] sm:$0xff] %v2869_v29  ;;  %v2914_v52 = vmul.f32 %v2608_v49, %v3714_v32  ;;  %v2920_v42 = vmul.f32 %v2774_v9, %v3714_v32  ;;  %v993_v2 = vadd.f32 %v961_v15, %v3716_v36  ;;  %v1003_v59 = vadd.f32 %v971_v1, %v2379_v34  ;;  %v3721_v15 = vld [vmem:[#allocation30_spill] sm:$0xff] }
 0x144   : > { %3711 = vst [vmem:[#allocation88_spill] sm:$0xff] %v2897_v62  ;;  %v2930_v62 = vmul.f32 %v2774_v9, %v3715_v13  ;;  %v2940_v32 = vadd.f32 %v714_v44, %v420_v19  ;;  %v2954_v1 = vmul.f32 %v2608_v49, %v3721_v15  ;;  %v2958_v57 = vmul.f32 %v2774_v9, %v3721_v15  ;;  %v3724_v19 = vld [vmem:[#allocation33_spill] sm:$0xff] }
 0x145   : > { %3712 = vst [vmem:[#allocation89_spill] sm:$0xff] %v2899_v24  ;;  %v3720_v24 = vld [vmem:[#allocation7_spill] sm:$0xff]  ;;  %v1072_v13 = vadd.f32 %v2514_v31, %v993_v2  ;;  %v1082_v36 = vadd.f32 %v2638_v17, %v1003_v59  ;;  %v2962_v44 = vmul.f32 %v2608_v49, %v3724_v19  ;;  %v2979_v2 = vld [vmem:[%s3484_s1 + $0x5] ss:$0 sm:$0xff]  ;;  %v3024_v29 = vmul.f32 %v2608_v49, %v2597_v33 }
 0x146   : > { %3717 = vst [vmem:[#allocation9_spill] sm:$0xff] %v2930_v62  ;;  %v2944_v58 = vmul.f32 %v2608_v49, %v3720_v24  ;;  %v2948_v34 = vmul.f32 %v2774_v9, %v3720_v24  ;;  %v2966_v24 = vmul.f32 %v2774_v9, %v3724_v19  ;;  %v2997_v62 = vmul.f32 %v2774_v9, %v2494_v61 }
 0x147   : > { %3719 = vst [vmem:[#allocation10_spill] sm:$0xff] %v2940_v32  ;;  %v3727_v32 = vld [vmem:[#allocation16_spill] sm:$0xff]  ;;  %v1155_v59 = vadd.f32 %v1123_v27, %v1072_v13  ;;  %v2981_v15 = vadd.f32 %v1133_v47, %v1082_v36  ;;  %v3003_v47 = vmul.f32 %v2608_v49, %v2504_v39  ;;  %v840_v13 = vpop.permute.xlu0 %839 }
 0x148   : > { %3722 = vst [vmem:[#allocation29_spill] sm:$0xff] %v2954_v1  ;;  %v2970_v31 = vmul.f32 %v2608_v49, %v3727_v32  ;;  %v2974_v17 = vmul.f32 %v2774_v9, %v3727_v32  ;;  %v2993_v32 = vmul.f32 %v2608_v49, %v2494_v61  ;;  %v2999_v27 = vpop.permute.xlu2 %883  ;;  %v3015_v61 = vmul.f32 %v2608_v49, %v2496_v0  ;;  %v3033_v0 = vld [vmem:[%s3484_s1 + $0x8] ss:$0 sm:$0xff] }
 0x149   : > { %3723 = vst [vmem:[#allocation21_spill] sm:$0xff] %v2958_v57  ;;  %v3730_v57 = vld [vmem:[#allocation34_spill] sm:$0xff] }
 0x14a   : > { %3725 = vst [vmem:[#allocation13_spill] sm:$0xff] %v2962_v44  ;;  %v2985_v19 = vmul.f32 %v2608_v49, %v3730_v57  ;;  %v2989_v1 = vmul.f32 %v2774_v9, %v3730_v57 }
 0x14b   : > { %3726 = vst [vmem:[#allocation7_spill] sm:$0xff] %v2966_v24  ;;  %v844_v24 = vpop.permute.xlu1 %843 }
 0x14c   : > { %3728 = vst [vmem:[#allocation30_spill] sm:$0xff] %v2970_v31  ;;  %v964_v36 = vmul.f32 %v2563_v38, %v844_v24  ;;  %v1206_v57 = vmul.f32 %v2979_v2, %v844_v24  ;;  %v3738_v31 = vld [vmem:[#allocation32_spill] sm:$0xff] }
 0x14d   : > { %3729 = vst [vmem:[#allocation33_spill] sm:$0xff] %v2974_v17 }
 0x14e   : > { %3731 = vst [vmem:[#allocation16_spill] sm:$0xff] %v2985_v19  ;;  %v3011_v19 = vmul.f32 %v2774_v9, %v2504_v39  ;;  %v1238_v24 = vadd.f32 %v1206_v57, %v2677_v21  ;;  %v3028_v39 = vmul.f32 %v2774_v9, %v2597_v33  ;;  %v3038_v21 = vmul.f32 %v2608_v49, %v2612_v54 }
 0x14f   : > { %3732 = vst [vmem:[#allocation34_spill] sm:$0xff] %v2989_v1  ;;  %v974_v1 = vmul.f32 %v2563_v38, %v2999_v27  ;;  %v3049_v57 = vmul.f32 %v2608_v49, %v2693_v18 }
 0x150   : > { %3733 = vst [vmem:[#allocation90_spill] sm:$0xff] %v2993_v32  ;;  %v1205_v32 = vmul.f32 %v2979_v2, %v840_v13 }
 0x151   : > { %3734 = vst [vmem:[#allocation91_spill] sm:$0xff] %v2997_v62  ;;  %v963_v62 = vmul.f32 %v2563_v38, %v840_v13  ;;  %v1006_v44 = vadd.f32 %v974_v1, %v3738_v31  ;;  %v3741_v13 = vld [vmem:[#allocation27_spill] sm:$0xff]  ;;  %v1317_v31 = vadd.f32 %v2480_v60, %v1238_v24  ;;  %v852_v24 = vpop.permute.xlu0 %851 }
 0x152   : > { %3735 = vst [vmem:[#allocation92_spill] sm:$0xff] %v3003_v47  ;;  %v3737_v47 = vld [vmem:[#allocation22_spill] sm:$0xff] }
 0x153   : > { %3736 = vst [vmem:[#allocation93_spill] sm:$0xff] %v3015_v61  ;;  %v996_v17 = vadd.f32 %v964_v36, %v3737_v47  ;;  %v995_v61 = vadd.f32 %v963_v62, %v3741_v13  ;;  %v1237_v47 = vadd.f32 %v1205_v32, %v1155_v59  ;;  %v1085_v33 = vadd.f32 %v2681_v25, %v1006_v44  ;;  %v3745_v62 = vld [vmem:[#allocation36_spill] sm:$0xff]  ;;  %v3746_v32 = vld [vmem:[#allocation37_spill] sm:$0xff] }
 0x154   : > { %3739 = vst [vmem:[#allocation22_spill] sm:$0xff] %v3024_v29  ;;  %v3045_v36 = vmul.f32 %v2774_v9, %v2612_v54  ;;  %v1400_v60 = vadd.f32 %v2853_v14, %v1317_v31  ;;  %v1207_v54 = vmul.f32 %v2979_v2, %v2695_v37  ;;  %v1449_v44 = vmul.f32 %v3033_v0, %v2695_v37  ;;  %v856_v14 = vpop.permute.xlu1 %855  ;;  %v3753_v29 = vld [vmem:[#allocation38_spill] sm:$0xff] }
 0x155   : > { %3740 = vst [vmem:[#allocation32_spill] sm:$0xff] %v3028_v39  ;;  %v1075_v1 = vadd.f32 %v2474_v43, %v996_v17  ;;  %v1074_v59 = vadd.f32 %v3745_v62, %v995_v61  ;;  %v1316_v13 = vadd.f32 %v3746_v32, %v1237_v47  ;;  %v3055_v39 = vmul.f32 %v2774_v9, %v2693_v18  ;;  %v3070_v17 = vld [vmem:[%s3485_s2] ss:$0 sm:$0xff]  ;;  %v3074_v61 = vpop.permute.xlu2 %895  ;;  %v3754_v9 = vld [vmem:[#allocation39_spill] sm:$0xff] }
 0x156   : > { %3742 = vst [vmem:[#allocation27_spill] sm:$0xff] %v3038_v21  ;;  %v3060_v25 = vadd.f32 %v2865_v10, %v1085_v33  ;;  %v3078_v10 = vmul.f32 %v2608_v49, %v2707_v11  ;;  %v967_v37 = vmul.f32 %v2563_v38, %v856_v14  ;;  %v1209_v47 = vmul.f32 %v2979_v2, %v856_v14 }
 0x157   : > { %3743 = vst [vmem:[#allocation94_spill] sm:$0xff] %v3045_v36  ;;  %v1158_v43 = vadd.f32 %v2849_v12, %v1075_v1  ;;  %v1157_v18 = vadd.f32 %v2857_v4, %v1074_v59  ;;  %v1399_v12 = vadd.f32 %v2861_v63, %v1316_v13  ;;  %v977_v1 = vmul.f32 %v2563_v38, %v3074_v61  ;;  %v3749_v59 = vld [vmem:[#allocation23_spill] sm:$0xff] }
 0x158   : > { %3744 = vst [vmem:[#allocation95_spill] sm:$0xff] %v3049_v57  ;;  %v966_v4 = vmul.f32 %v2563_v38, %v852_v24  ;;  %v1208_v63 = vmul.f32 %v2979_v2, %v852_v24  ;;  %v1450_v62 = vmul.f32 %v3033_v0, %v852_v24  ;;  %v999_v32 = vadd.f32 %v967_v37, %v3749_v59  ;;  %v3752_v57 = vld [vmem:[#allocation51_spill] sm:$0xff]  ;;  %v3755_v37 = vld [vmem:[#allocation49_spill] sm:$0xff] }
 0x159   : > { %3747 = vst [vmem:[#allocation36_spill] sm:$0xff] %v3055_v39  ;;  %v1239_v31 = vadd.f32 %v1207_v54, %v1157_v18  ;;  %v1481_v33 = vadd.f32 %v1449_v44, %v1399_v12  ;;  %v1241_v13 = vadd.f32 %v1209_v47, %v2780_v16  ;;  %v3751_v44 = vld [vmem:[#allocation4_spill] sm:$0xff] }
 0x15a   : > { %3748 = vst [vmem:[#allocation37_spill] sm:$0xff] %v3078_v10  ;;  %v3750_v10 = vld [vmem:[#allocation35_spill] sm:$0xff]  ;;  %v998_v18 = vadd.f32 %v966_v4, %v3751_v44  ;;  %v1240_v12 = vadd.f32 %v1208_v63, %v1158_v43  ;;  %v1482_v21 = vadd.f32 %v1450_v62, %v1400_v60  ;;  %v1078_v49 = vadd.f32 %v3753_v29, %v999_v32 }
 0x15b   : > { %v1009_v39 = vadd.f32 %v977_v1, %v3750_v10  ;;  %v1517_v54 = vadd.f32 %v3070_v17, %v1481_v33  ;;  %v1318_v36 = vadd.f32 %v3752_v57, %v1239_v31  ;;  %v1320_v11 = vadd.f32 %v3754_v9, %v1241_v13  ;;  %v3756_v10 = vld [vmem:[#allocation50_spill] sm:$0xff] }
 0x15c   : > { %v1077_v16 = vadd.f32 %v3755_v37, %v998_v18  ;;  %v1319_v47 = vadd.f32 %v3756_v10, %v1240_v12  ;;  %v1451_v43 = vmul.f32 %v3033_v0, %v856_v14  ;;  %v1452_v57 = vmul.f32 %v3033_v0, %v2794_v40  ;;  %v868_v33 = vpop.permute.xlu1 %867  ;;  %v3757_v14 = vld [vmem:[#allocation26_spill] sm:$0xff]  ;;  %v3759_v18 = vld [vmem:[#allocation47_spill] sm:$0xff]  ;;  %v3760_v37 = vld [vmem:[#allocation40_spill] sm:$0xff] }
 0x15d   : > { %v1088_v24 = vadd.f32 %v2717_v28, %v1009_v39  ;;  %1550 = vst.msk [vmem:[%s3089_s15] sm:$0xff] %vm1549_vm2, %v1517_v54  ;;  %v1401_v1 = vadd.f32 %v2812_v5, %v1318_v36  ;;  %v1518_v29 = vadd.f32 %v3070_v17, %v1482_v21  ;;  %v1161_v9 = vadd.f32 %v2875_v3, %v1078_v49  ;;  %v3114_v4 = vpop.permute.xlu2 %907  ;;  %v864_v49 = vpop.permute.xlu0 %863  ;;  %v3758_v13 = vld [vmem:[#allocation2_spill] sm:$0xff]  ;;  %v3761_v10 = vld [vmem:[#allocation56_spill] sm:$0xff] }
 0x15e   : > { %v1403_v28 = vadd.f32 %v2879_v48, %v1320_v11  ;;  %v1160_v39 = vadd.f32 %v2883_v53, %v1077_v16  ;;  %v1402_v60 = vadd.f32 %v2887_v6, %v1319_v47  ;;  %v1210_v36 = vmul.f32 %v2979_v2, %v2794_v40 }
 0x15f   : > { %v1483_v31 = vadd.f32 %v1451_v43, %v1401_v1  ;;  %v3117_v5 = vadd.f32 %v2893_v41, %v1088_v24  ;;  %1551 = vst.msk [vmem:[%s3089_s15 + $0x8] sm:$0xff] %vm1549_vm2, %v1518_v29  ;;  %v970_v11 = vmul.f32 %v2563_v38, %v868_v33  ;;  %v1212_v3 = vmul.f32 %v2979_v2, %v868_v33  ;;  %v3762_v1 = vld [vmem:[#allocation11_spill] sm:$0xff] }
 0x160   : > { %v980_v48 = vmul.f32 %v2563_v38, %v3114_v4  ;;  %v1484_v53 = vadd.f32 %v1452_v57, %v1402_v60  ;;  %v969_v41 = vmul.f32 %v2563_v38, %v864_v49  ;;  %v1211_v21 = vmul.f32 %v2979_v2, %v864_v49 }
 0x161   : > { %v1519_v6 = vadd.f32 %v3070_v17, %v1483_v31  ;;  %v1453_v40 = vmul.f32 %v3033_v0, %v864_v49  ;;  %v1002_v63 = vadd.f32 %v970_v11, %v3757_v14  ;;  %v1242_v62 = vadd.f32 %v1210_v36, %v1160_v39  ;;  %v3764_v39 = vld [vmem:[#allocation55_spill] sm:$0xff] }
 0x162   : > { %v1244_v59 = vadd.f32 %v1212_v3, %v2871_v8  ;;  %v1520_v32 = vadd.f32 %v3070_v17, %v1484_v53  ;;  %v1001_v54 = vadd.f32 %v969_v41, %v3758_v13  ;;  %v1243_v44 = vadd.f32 %v1211_v21, %v1161_v9  ;;  %v3763_v8 = vld [vmem:[#allocation54_spill] sm:$0xff] }
 0x163   : > { %1552 = vst.msk [vmem:[%s3089_s15 + $0x10] sm:$0xff] %vm1549_vm2, %v1519_v6  ;;  %v1012_v12 = vadd.f32 %v980_v48, %v3759_v18  ;;  %v1485_v24 = vadd.f32 %v1453_v40, %v1403_v28  ;;  %v1081_v16 = vadd.f32 %v3760_v37, %v1002_v63  ;;  %v1321_v47 = vadd.f32 %v3761_v10, %v1242_v62  ;;  %v3767_v18 = vld [vmem:[#allocation42_spill] sm:$0xff]  ;;  %v3768_v37 = vld [vmem:[#allocation45_spill] sm:$0xff] }
 0x164   : > { %v1323_v43 = vadd.f32 %v3762_v1, %v1244_v59  ;;  %v1455_v57 = vmul.f32 %v3033_v0, %v2889_v45  ;;  %1553 = vst.msk [vmem:[%s3089_s15 + $0x18] sm:$0xff] %vm1549_vm2, %v1520_v32  ;;  %v1080_v29 = vadd.f32 %v3763_v8, %v1001_v54  ;;  %v1322_v60 = vadd.f32 %v3764_v39, %v1243_v44  ;;  %v880_v53 = vpop.permute.xlu1 %879  ;;  %v3766_v32 = vld [vmem:[#allocation6_spill] sm:$0xff] }
 0x165   : > { %v1091_v9 = vadd.f32 %v2743_v7, %v1012_v12  ;;  %v1521_v28 = vadd.f32 %v3070_v17, %v1485_v24  ;;  %v1404_v31 = vadd.f32 %v2831_v46, %v1321_v47  ;;  %v1454_v36 = vmul.f32 %v3033_v0, %v868_v33  ;;  %v3155_v6 = vpop.permute.xlu2 %919  ;;  %v3769_v47 = vld [vmem:[#allocation59_spill] sm:$0xff] }
 0x166   : > { %v1164_v49 = vadd.f32 %v2906_v26, %v1081_v16  ;;  %v1163_v11 = vadd.f32 %v2914_v52, %v1080_v29  ;;  %v1405_v3 = vadd.f32 %v2920_v42, %v1322_v60  ;;  %v1406_v48 = vadd.f32 %v2910_v51, %v1323_v43  ;;  %v876_v26 = vpop.permute.xlu0 %875 }
 0x167   : > { %v3158_v41 = vadd.f32 %v2924_v20, %v1091_v9  ;;  %v1213_v7 = vmul.f32 %v2979_v2, %v2889_v45  ;;  %1554 = vst.msk [vmem:[%s3089_s15 + $0x20] sm:$0xff] %vm1549_vm2, %v1521_v28  ;;  %v1486_v46 = vadd.f32 %v1454_v36, %v1404_v31  ;;  %v973_v52 = vmul.f32 %v2563_v38, %v880_v53  ;;  %v3765_v45 = vld [vmem:[#allocation28_spill] sm:$0xff] }
 0x168   : > { %v1215_v42 = vmul.f32 %v2979_v2, %v880_v53  ;;  %v1487_v33 = vadd.f32 %v1455_v57, %v1405_v3  ;;  %v972_v51 = vmul.f32 %v2563_v38, %v876_v26  ;;  %v1214_v21 = vmul.f32 %v2979_v2, %v876_v26 }
 0x169   : > { %v1456_v20 = vmul.f32 %v3033_v0, %v876_v26  ;;  %v1522_v40 = vadd.f32 %v3070_v17, %v1486_v46  ;;  %v1005_v14 = vadd.f32 %v973_v52, %v3765_v45  ;;  %v1245_v63 = vadd.f32 %v1213_v7, %v1163_v11  ;;  %v3771_v26 = vld [vmem:[#allocation15_spill] sm:$0xff] }
 0x16a   : > { %v1247_v62 = vadd.f32 %v1215_v42, %v2981_v15  ;;  %v1523_v59 = vadd.f32 %v3070_v17, %v1487_v33  ;;  %v1004_v13 = vadd.f32 %v972_v51, %v3766_v32  ;;  %v1246_v54 = vadd.f32 %v1214_v21, %v1164_v49  ;;  %v3772_v21 = vld [vmem:[#allocation46_spill] sm:$0xff] }
 0x16b   : > { %v1488_v44 = vadd.f32 %v1456_v20, %v1406_v48  ;;  %1555 = vst.msk [vmem:[%s3089_s15 + $0x28] sm:$0xff] %vm1549_vm2, %v1522_v40  ;;  %v1084_v12 = vadd.f32 %v3767_v18, %v1005_v14  ;;  %v1324_v24 = vadd.f32 %v2653_v22, %v1245_v63  ;;  %v983_v10 = vmul.f32 %v2563_v38, %v3155_v6  ;;  %v3770_v48 = vld [vmem:[#allocation3_spill] sm:$0xff]  ;;  %v3774_v14 = vld [vmem:[#allocation48_spill] sm:$0xff] }
 0x16c   : > { %v1326_v16 = vadd.f32 %v3768_v37, %v1247_v62  ;;  %v1216_v15 = vmul.f32 %v2979_v2, %v2999_v27  ;;  %1556 = vst.msk [vmem:[%s3089_s15 + $0x30] sm:$0xff] %vm1549_vm2, %v1523_v59  ;;  %v1083_v1 = vadd.f32 %v3769_v47, %v1004_v13  ;;  %v1325_v43 = vadd.f32 %v2634_v35, %v1246_v54  ;;  %v892_v31 = vpop.permute.xlu1 %891  ;;  %v3773_v40 = vld [vmem:[#allocation63_spill] sm:$0xff]  ;;  %v3776_v59 = vld [vmem:[#allocation62_spill] sm:$0xff]  ;;  %v3778_v37 = vld [vmem:[#allocation13_spill] sm:$0xff] }
 0x16d   : > { %v1524_v57 = vadd.f32 %v3070_v17, %v1488_v44  ;;  %v1407_v8 = vadd.f32 %v2844_v55, %v1324_v24  ;;  %v1457_v22 = vmul.f32 %v3033_v0, %v880_v53  ;;  %v1015_v29 = vadd.f32 %v983_v10, %v2640_v50  ;;  %v3199_v36 = vpop.permute.xlu2 %931  ;;  %v3777_v18 = vld [vmem:[#allocation87_spill] sm:$0xff]  ;;  %v3779_v10 = vld [vmem:[#allocation30_spill] sm:$0xff]  ;;  %v3780_v47 = vld [vmem:[#allocation33_spill] sm:$0xff] }
 0x16e   : > { %v1167_v39 = vadd.f32 %v2934_v23, %v1084_v12  ;;  %v1458_v60 = vmul.f32 %v3033_v0, %v2999_v27  ;;  %v1166_v9 = vadd.f32 %v2944_v58, %v1083_v1  ;;  %v1408_v28 = vadd.f32 %v2948_v34, %v1325_v43  ;;  %v888_v50 = vpop.permute.xlu0 %887  ;;  %v3781_v43 = vld [vmem:[#allocation72_spill] sm:$0xff] }
 0x16f   : > { %1557 = vst.msk [vmem:[%s3089_s15 + $0x38] sm:$0xff] %vm1549_vm2, %v1524_v57  ;;  %v1409_v35 = vadd.f32 %v2938_v56, %v1326_v16  ;;  %v1489_v55 = vadd.f32 %v1457_v22, %v1407_v8  ;;  %v3202_v49 = vadd.f32 %v2765_v30, %v1015_v29  ;;  %v976_v23 = vmul.f32 %v2563_v38, %v892_v31  ;;  %v3782_v8 = vld [vmem:[#allocation7_spill] sm:$0xff] }
 0x170   : > { %v1218_v27 = vmul.f32 %v2979_v2, %v892_v31  ;;  %v1490_v58 = vadd.f32 %v1458_v60, %v1408_v28  ;;  %v975_v34 = vmul.f32 %v2563_v38, %v888_v50  ;;  %v1217_v11 = vmul.f32 %v2979_v2, %v888_v50 }
 0x171   : > { %v1459_v56 = vmul.f32 %v3033_v0, %v888_v50  ;;  %v1525_v3 = vadd.f32 %v3070_v17, %v1489_v55  ;;  %v1008_v53 = vadd.f32 %v976_v23, %v3770_v48  ;;  %v1248_v30 = vadd.f32 %v1216_v15, %v1166_v9 }
 0x172   : > { %v1250_v7 = vadd.f32 %v1218_v27, %v3060_v25  ;;  %v1526_v46 = vadd.f32 %v3070_v17, %v1490_v58  ;;  %v1007_v52 = vadd.f32 %v975_v34, %v3771_v26  ;;  %v1249_v42 = vadd.f32 %v1217_v11, %v1167_v39  ;;  %v3775_v25 = vld [vmem:[#allocation61_spill] sm:$0xff] }
 0x173   : > { %v1491_v33 = vadd.f32 %v1459_v56, %v1409_v35  ;;  %v1219_v51 = vmul.f32 %v2979_v2, %v3074_v61  ;;  %1558 = vst.msk [vmem:[%s3089_s15 + $0x40] sm:$0xff] %vm1549_vm2, %v1525_v3  ;;  %v1087_v20 = vadd.f32 %v3772_v21, %v1008_v53  ;;  %v1327_v45 = vadd.f32 %v3773_v40, %v1248_v30  ;;  %v3784_v11 = vld [vmem:[#allocation5_spill] sm:$0xff]  ;;  %v3785_v53 = vld [vmem:[#allocation8_spill] sm:$0xff] }
 0x174   : > { %v1329_v63 = vadd.f32 %v3774_v14, %v1250_v7  ;;  %1559 = vst.msk [vmem:[%s3089_s15 + $0x48] sm:$0xff] %vm1549_vm2, %v1526_v46  ;;  %v1086_v62 = vadd.f32 %v3775_v25, %v1007_v52  ;;  %v1328_v32 = vadd.f32 %v3776_v59, %v1249_v42  ;;  %v986_v54 = vmul.f32 %v2563_v38, %v3199_v36  ;;  %v904_v29 = vpop.permute.xlu1 %903  ;;  %v3786_v52 = vld [vmem:[#allocation52_spill] sm:$0xff]  ;;  %v3788_v40 = vld [vmem:[#allocation65_spill] sm:$0xff]  ;;  %v3789_v14 = vld [vmem:[#allocation67_spill] sm:$0xff] }
 0x175   : > { %v1527_v13 = vadd.f32 %v3070_v17, %v1491_v33  ;;  %v1461_v44 = vmul.f32 %v3033_v0, %v3074_v61  ;;  %v1410_v12 = vadd.f32 %v3777_v18, %v1327_v45  ;;  %v1460_v24 = vmul.f32 %v3033_v0, %v892_v31  ;;  %v3783_v31 = vld [vmem:[#allocation81_spill] sm:$0xff]  ;;  %v3248_v27 = vpop.permute.xlu2 %943  ;;  %v3787_v33 = vld [vmem:[#allocation68_spill] sm:$0xff] }
 0x176   : > { %v1170_v16 = vadd.f32 %v3778_v37, %v1087_v20  ;;  %v1169_v15 = vadd.f32 %v3779_v10, %v1086_v62  ;;  %v1411_v1 = vadd.f32 %v3780_v47, %v1328_v32  ;;  %v1018_v57 = vadd.f32 %v986_v54, %v3781_v43  ;;  %v900_v60 = vpop.permute.xlu0 %899  ;;  %v3791_v59 = vld [vmem:[#allocation88_spill] sm:$0xff]  ;;  %v3792_v54 = vld [vmem:[#allocation86_spill] sm:$0xff] }
 0x177   : > { %1560 = vst.msk [vmem:[%s3089_s15 + $0x50] sm:$0xff] %vm1549_vm2, %v1527_v13  ;;  %v1412_v22 = vadd.f32 %v3782_v8, %v1329_v63  ;;  %v1222_v61 = vmul.f32 %v2979_v2, %v3114_v4  ;;  %v1492_v39 = vadd.f32 %v1460_v24, %v1410_v12  ;;  %v979_v9 = vmul.f32 %v2563_v38, %v904_v29  ;;  %v3790_v63 = vld [vmem:[#allocation53_spill] sm:$0xff]  ;;  %v3793_v18 = vld [vmem:[#allocation92_spill] sm:$0xff]  ;;  %v3794_v24 = vld [vmem:[#allocation90_spill] sm:$0xff] }
 0x178   : > { %v1221_v28 = vmul.f32 %v2979_v2, %v904_v29  ;;  %v1493_v35 = vadd.f32 %v1461_v44, %v1411_v1  ;;  %v3244_v55 = vadd.f32 %v3783_v31, %v1018_v57  ;;  %v978_v50 = vmul.f32 %v2563_v38, %v900_v60  ;;  %v3796_v1 = vld [vmem:[#allocation84_spill] sm:$0xff] }
 0x179   : > { %v1220_v23 = vmul.f32 %v2979_v2, %v900_v60  ;;  %v1528_v58 = vadd.f32 %v3070_v17, %v1492_v39  ;;  %v1462_v34 = vmul.f32 %v3033_v0, %v900_v60  ;;  %v1011_v56 = vadd.f32 %v979_v9, %v3784_v11 }
 0x17a   : > { %v1251_v3 = vadd.f32 %v1219_v51, %v1169_v15  ;;  %v1529_v48 = vadd.f32 %v3070_v17, %v1493_v35  ;;  %v1010_v30 = vadd.f32 %v978_v50, %v3785_v53  ;;  %v1253_v46 = vadd.f32 %v1221_v28, %v3117_v5  ;;  %v3797_v28 = vld [vmem:[#allocation12_spill] sm:$0xff] }
 0x17b   : > { %v1252_v7 = vadd.f32 %v1220_v23, %v1170_v16  ;;  %1561 = vst.msk [vmem:[%s3089_s15 + $0x58] sm:$0xff] %vm1549_vm2, %v1528_v58  ;;  %v1494_v26 = vadd.f32 %v1462_v34, %v1412_v22  ;;  %v1090_v42 = vadd.f32 %v3786_v52, %v1011_v56  ;;  %v989_v20 = vmul.f32 %v2563_v38, %v3248_v27  ;;  %v3795_v16 = vld [vmem:[#allocation91_spill] sm:$0xff]  ;;  %v3803_v52 = vld [vmem:[#allocation58_spill] sm:$0xff] }
 0x17c   : > { %v1330_v21 = vadd.f32 %v3787_v33, %v1251_v3  ;;  %v1464_v51 = vmul.f32 %v3033_v0, %v3114_v4  ;;  %1562 = vst.msk [vmem:[%s3089_s15 + $0x60] sm:$0xff] %vm1549_vm2, %v1529_v48  ;;  %v1089_v45 = vadd.f32 %v3788_v40, %v1010_v30  ;;  %v1332_v25 = vadd.f32 %v3790_v63, %v1253_v46  ;;  %v916_v15 = vpop.permute.xlu1 %915  ;;  %v3798_v58 = vld [vmem:[#allocation43_spill] sm:$0xff]  ;;  %v3799_v3 = vld [vmem:[#allocation66_spill] sm:$0xff]  ;;  %v3800_v48 = vld [vmem:[#allocation77_spill] sm:$0xff] }
 0x17d   : > { %v1331_v5 = vadd.f32 %v3789_v14, %v1252_v7  ;;  %v1530_v62 = vadd.f32 %v3070_v17, %v1494_v26  ;;  %v1463_v13 = vmul.f32 %v3033_v0, %v904_v29  ;;  %v1021_v44 = vadd.f32 %v989_v20, %v3792_v54  ;;  %v3801_v30 = vld [vmem:[#allocation14_spill] sm:$0xff]  ;;  %v3802_v46 = vld [vmem:[#allocation73_spill] sm:$0xff] }
 0x17e   : > { %v1413_v32 = vadd.f32 %v3791_v59, %v1330_v21  ;;  %v1172_v12 = vadd.f32 %v3793_v18, %v1089_v45  ;;  %v1173_v37 = vadd.f32 %v3794_v24, %v1090_v42  ;;  %v1415_v10 = vadd.f32 %v3795_v16, %v1332_v25  ;;  %v912_v57 = vpop.permute.xlu0 %911  ;;  %v3804_v42 = vld [vmem:[#allocation80_spill] sm:$0xff]  ;;  %v3806_v21 = vld [vmem:[#allocation70_spill] sm:$0xff] }
 0x17f   : > { %v1414_v4 = vadd.f32 %v3011_v19, %v1331_v5  ;;  %1563 = vst.msk [vmem:[%s3089_s15 + $0x68] sm:$0xff] %vm1549_vm2, %v1530_v62  ;;  %v3280_v43 = vadd.f32 %v3796_v1, %v1021_v44  ;;  %v982_v8 = vmul.f32 %v2563_v38, %v916_v15  ;;  %v1224_v22 = vmul.f32 %v2979_v2, %v916_v15  ;;  %v3808_v5 = vld [vmem:[#allocation9_spill] sm:$0xff]  ;;  %v3809_v62 = vld [vmem:[#allocation22_spill] sm:$0xff] }
 0x180   : > { %v1495_v47 = vadd.f32 %v1463_v13, %v1413_v32  ;;  %v981_v19 = vmul.f32 %v2563_v38, %v912_v57  ;;  %v1223_v39 = vmul.f32 %v2979_v2, %v912_v57  ;;  %v1465_v60 = vmul.f32 %v3033_v0, %v912_v57  ;;  %v3810_v13 = vld [vmem:[#allocation27_spill] sm:$0xff]  ;;  %v3811_v44 = vld [vmem:[#allocation94_spill] sm:$0xff] }
 0x181   : > { %v1496_v29 = vadd.f32 %v1464_v51, %v1414_v4  ;;  %v1014_v35 = vadd.f32 %v982_v8, %v3797_v28  ;;  %v1254_v31 = vadd.f32 %v1222_v61, %v1172_v12  ;;  %v1256_v50 = vadd.f32 %v1224_v22, %v3158_v41  ;;  %v3805_v41 = vld [vmem:[#allocation57_spill] sm:$0xff]  ;;  %v3807_v51 = vld [vmem:[#allocation71_spill] sm:$0xff]  ;;  %v3812_v12 = vld [vmem:[#allocation32_spill] sm:$0xff] }
 0x182   : > { %v1531_v9 = vadd.f32 %v3070_v17, %v1495_v47  ;;  %v1013_v34 = vadd.f32 %v981_v19, %v3798_v58  ;;  %v1255_v11 = vadd.f32 %v1223_v39, %v1173_v37  ;;  %v1497_v56 = vadd.f32 %v1465_v60, %v1415_v10  ;;  %v3814_v19 = vld [vmem:[#allocation31_spill] sm:$0xff]  ;;  %v3816_v58 = vld [vmem:[#allocation17_spill] sm:$0xff] }
 0x183   : > { %v1532_v23 = vadd.f32 %v3070_v17, %v1496_v29  ;;  %v1388_v53 = vmul.f32 %v3800_v48, %v3799_v3  ;;  %v1093_v7 = vadd.f32 %v3801_v30, %v1014_v35  ;;  %v1333_v26 = vadd.f32 %v3802_v46, %v1254_v31  ;;  %v3815_v35 = vld [vmem:[#allocation20_spill] sm:$0xff]  ;;  %v3819_v46 = vld [vmem:[#allocation74_spill] sm:$0xff] }
 0x184   : > { %1564 = vst.msk [vmem:[%s3089_s15 + $0x70] sm:$0xff] %vm1549_vm2, %v1531_v9  ;;  %v1335_v61 = vadd.f32 %v3803_v52, %v1256_v50  ;;  %v3301_v33 = vmul.f32 %v3805_v41, %v3804_v42  ;;  %v1092_v20 = vadd.f32 %v3806_v21, %v1013_v34  ;;  %v1334_v40 = vadd.f32 %v3807_v51, %v1255_v11  ;;  %v928_v24 = vpop.permute.xlu1 %927  ;;  %v3817_v11 = vld [vmem:[#allocation76_spill] sm:$0xff]  ;;  %v3820_v52 = vld [vmem:[#allocation75_spill] sm:$0xff]  ;;  %v3821_v21 = vld [vmem:[#allocation21_spill] sm:$0xff] }
 0x185   : > { %1565 = vst.msk [vmem:[%s3089_s15 + $0x78] sm:$0xff] %vm1549_vm2, %v1532_v23  ;;  %v1533_v45 = vadd.f32 %v3070_v17, %v1497_v56  ;;  %v1225_v14 = vmul.f32 %v2979_v2, %v3155_v6  ;;  %v1416_v63 = vadd.f32 %v3808_v5, %v1333_v26  ;;  %v1466_v25 = vmul.f32 %v3033_v0, %v916_v15  ;;  %v3813_v15 = vld [vmem:[#allocation29_spill] sm:$0xff]  ;;  %v3818_v3 = vld [vmem:[#allocation60_spill] sm:$0xff] }
 0x186   : > { %v1176_v59 = vadd.f32 %v3809_v62, %v1093_v7  ;;  %v1467_v32 = vmul.f32 %v3033_v0, %v3155_v6  ;;  %v1175_v54 = vadd.f32 %v3810_v13, %v1092_v20  ;;  %v1417_v18 = vadd.f32 %v3811_v44, %v1334_v40  ;;  %v924_v16 = vpop.permute.xlu0 %923  ;;  %v3822_v40 = vld [vmem:[#allocation95_spill] sm:$0xff] }
 0x187   : > { %1566 = vst.msk [vmem:[%s3089_s15 + $0x80] sm:$0xff] %vm1549_vm2, %v1533_v45  ;;  %v1418_v4 = vadd.f32 %v3812_v12, %v1335_v61  ;;  %v1498_v37 = vadd.f32 %v1466_v25, %v1416_v63  ;;  %v985_v10 = vmul.f32 %v2563_v38, %v928_v24  ;;  %v1177_v47 = vadd.f32 %v3813_v15, %v3202_v49  ;;  %v3824_v63 = vld [vmem:[#allocation37_spill] sm:$0xff]  ;;  %v3360_v12 = vpop.permute.xlu2 %955 }
 0x188   : > { %v1227_v1 = vmul.f32 %v2979_v2, %v928_v24  ;;  %v1499_v6 = vadd.f32 %v1467_v32, %v1417_v18  ;;  %v984_v57 = vmul.f32 %v2563_v38, %v924_v16  ;;  %v1226_v8 = vmul.f32 %v2979_v2, %v924_v16  ;;  %v3825_v32 = vld [vmem:[#allocation16_spill] sm:$0xff] }
 0x189   : > { %v1468_v22 = vmul.f32 %v3033_v0, %v924_v16  ;;  %v1534_v29 = vadd.f32 %v3070_v17, %v1498_v37  ;;  %v1017_v39 = vadd.f32 %v985_v10, %v3814_v19  ;;  %v1257_v60 = vadd.f32 %v1225_v14, %v1175_v54  ;;  %v3823_v14 = vld [vmem:[#allocation36_spill] sm:$0xff]  ;;  %v3826_v54 = vld [vmem:[#allocation93_spill] sm:$0xff] }
 0x18a   : > { %v1259_v9 = vadd.f32 %v1227_v1, %v1177_v47  ;;  %v1535_v28 = vadd.f32 %v3070_v17, %v1499_v6  ;;  %v1016_v49 = vadd.f32 %v984_v57, %v3815_v35  ;;  %v1258_v31 = vadd.f32 %v1226_v8, %v1176_v59  ;;  %v3828_v8 = vld [vmem:[#allocation69_spill] sm:$0xff] }
 0x18b   : > { %v1500_v50 = vadd.f32 %v1468_v22, %v1418_v4  ;;  %v1392_v23 = vmul.f32 %v3800_v48, %v3804_v42  ;;  %1567 = vst.msk [vmem:[%s3089_s15 + $0x88] sm:$0xff] %vm1549_vm2, %v1534_v29  ;;  %v1096_v34 = vadd.f32 %v3816_v58, %v1017_v39  ;;  %v1336_v56 = vadd.f32 %v3817_v11, %v1257_v60  ;;  %v3829_v39 = vld [vmem:[#allocation83_spill] sm:$0xff]  ;;  %v3833_v58 = vld [vmem:[#allocation78_spill] sm:$0xff] }
 0x18c   : > { %v1338_v30 = vadd.f32 %v3818_v3, %v1259_v9  ;;  %v1470_v7 = vmul.f32 %v3033_v0, %v3199_v36  ;;  %1568 = vst.msk [vmem:[%s3089_s15 + $0x90] sm:$0xff] %vm1549_vm2, %v1535_v28  ;;  %v1095_v26 = vadd.f32 %v3819_v46, %v1016_v49  ;;  %v1337_v61 = vadd.f32 %v3820_v52, %v1258_v31  ;;  %v940_v59 = vpop.permute.xlu1 %939  ;;  %v3830_v60 = vld [vmem:[#allocation19_spill] sm:$0xff]  ;;  %v3831_v28 = vld [vmem:[#allocation82_spill] sm:$0xff]  ;;  %v3832_v49 = vld [vmem:[#allocation64_spill] sm:$0xff] }
 0x18d   : > { %v1536_v42 = vadd.f32 %v3070_v17, %v1500_v50  ;;  %v1419_v20 = vadd.f32 %v3821_v21, %v1336_v56  ;;  %v1469_v51 = vmul.f32 %v3033_v0, %v928_v24  ;;  %v1179_v45 = vadd.f32 %v3822_v40, %v1096_v34  ;;  %v3834_v11 = vld [vmem:[#allocation79_spill] sm:$0xff]  ;;  %v3836_v40 = vld [vmem:[#allocation24_spill] sm:$0xff] }
 0x18e   : > { %v1421_v5 = vadd.f32 %v3823_v14, %v1338_v30  ;;  %v1178_v25 = vadd.f32 %v3824_v63, %v1095_v26  ;;  %v1420_v62 = vadd.f32 %v1388_v53, %v1337_v61  ;;  %v1180_v13 = vadd.f32 %v3825_v32, %v3244_v55  ;;  %v936_v24 = vpop.permute.xlu0 %935  ;;  %v3835_v30 = vld [vmem:[#allocation34_spill] sm:$0xff] }
 0x18f   : > { %1569 = vst.msk [vmem:[%s3089_s15 + $0x98] sm:$0xff] %vm1549_vm2, %v1536_v42  ;;  %v3356_v44 = vadd.f32 %v3826_v54, %v3280_v43  ;;  %v1228_v18 = vmul.f32 %v2979_v2, %v3199_v36  ;;  %v1501_v4 = vadd.f32 %v1469_v51, %v1419_v20  ;;  %v988_v53 = vmul.f32 %v2563_v38, %v940_v59  ;;  %v3827_v36 = vld [vmem:[#allocation18_spill] sm:$0xff] }
 0x190   : > { %v1230_v37 = vmul.f32 %v2979_v2, %v940_v59  ;;  %v1502_v16 = vadd.f32 %v1470_v7, %v1420_v62  ;;  %v987_v10 = vmul.f32 %v2563_v38, %v936_v24  ;;  %v1229_v55 = vmul.f32 %v2979_v2, %v936_v24  ;;  %v3395_v51 = vld [vmem:[%s3484_s1 + $0x3] ss:$0 sm:$0xff]  ;;  %v1680_v63 = vld [vmem:[%s3484_s1 + $0x2] ss:$0 sm:$0xff]  ;;  %v3409_v32 = vld [vmem:[%s3484_s1 + $0x6] ss:$0 sm:$0xff] }
 0x191   : > { %v1471_v43 = vmul.f32 %v3033_v0, %v936_v24  ;;  %v1537_v15 = vadd.f32 %v3070_v17, %v1501_v4  ;;  %v1020_v47 = vadd.f32 %v988_v53, %v3827_v36  ;;  %v1260_v1 = vadd.f32 %v1228_v18, %v1178_v25  ;;  %v1114_v18 = vpop.permute.xlu2 %1113  ;;  %v3840_v36 = vld [vmem:[#allocation89_spill] sm:$0xff] }
 0x192   : > { %v1262_v6 = vadd.f32 %v1230_v37, %v1180_v13  ;;  %v1538_v57 = vadd.f32 %v3070_v17, %v1502_v16  ;;  %v1019_v22 = vadd.f32 %v987_v10, %v3828_v8  ;;  %v1261_v29 = vadd.f32 %v1229_v55, %v1179_v45  ;;  %v3837_v13 = vld [vmem:[#allocation25_spill] sm:$0xff] }
 0x193   : > { %v1503_v19 = vadd.f32 %v1471_v43, %v1421_v5  ;;  %v1149_v38 = vmul.f32 %v3805_v41, %v3829_v39  ;;  %1570 = vst.msk [vmem:[%s3089_s15 + $0xa0] sm:$0xff] %vm1549_vm2, %v1537_v15  ;;  %v1099_v9 = vadd.f32 %v3830_v60, %v1020_v47  ;;  %v1339_v35 = vadd.f32 %v3831_v28, %v1260_v1  ;;  %v3838_v37 = vld [vmem:[#allocation85_spill] sm:$0xff] }
 0x194   : > { %v1341_v31 = vadd.f32 %v3832_v49, %v1262_v6  ;;  %v1391_v50 = vmul.f32 %v3800_v48, %v3829_v39  ;;  %1571 = vst.msk [vmem:[%s3089_s15 + $0xa8] sm:$0xff] %vm1549_vm2, %v1538_v57  ;;  %v1098_v34 = vadd.f32 %v3833_v58, %v1019_v22  ;;  %v1340_v56 = vadd.f32 %v3834_v11, %v1261_v29  ;;  %v952_v20 = vpop.permute.xlu1 %951  ;;  %v3839_v43 = vld [vmem:[#allocation41_spill] sm:$0xff] }
 0x195   : > { %v1539_v3 = vadd.f32 %v3070_v17, %v1503_v19  ;;  %v1422_v7 = vadd.f32 %v3835_v30, %v1339_v35  ;;  %v1472_v46 = vmul.f32 %v3033_v0, %v940_v59  ;;  %v1182_v26 = vadd.f32 %v3301_v33, %v1099_v9 }
 0x196   : > { %v1424_v52 = vadd.f32 %v1392_v23, %v1341_v31  ;;  %v1473_v61 = vmul.f32 %v3033_v0, %v3248_v27  ;;  %v1181_v42 = vadd.f32 %v1149_v38, %v1098_v34  ;;  %v1423_v21 = vadd.f32 %v1391_v50, %v1340_v56  ;;  %v948_v14 = vpop.permute.xlu0 %947 }
 0x197   : > { %1572 = vst.msk [vmem:[%s3089_s15 + $0xb0] sm:$0xff] %vm1549_vm2, %v1539_v3  ;;  %v1069_v45 = vmul.f32 %v3395_v51, %v3836_v40  ;;  %v1231_v33 = vmul.f32 %v2979_v2, %v3248_v27  ;;  %v1504_v23 = vadd.f32 %v1472_v46, %v1422_v7  ;;  %v990_v25 = vmul.f32 %v1680_v63, %v948_v14 }
 0x198   : > { %v1505_v5 = vadd.f32 %v1473_v61, %v1423_v21  ;;  %v1232_v62 = vmul.f32 %v2979_v2, %v948_v14  ;;  %v1474_v59 = vmul.f32 %v3033_v0, %v948_v14  ;;  %v1311_v27 = vmul.f32 %v3409_v32, %v3836_v40 }
 0x199   : > { %v1310_v54 = vmul.f32 %v3409_v32, %v3837_v13  ;;  %v1540_v4 = vadd.f32 %v3070_v17, %v1504_v23  ;;  %v1263_v24 = vadd.f32 %v1231_v33, %v1181_v42  ;;  %v1022_v16 = vadd.f32 %v990_v25, %v3838_v37  ;;  %v1200_v56 = vpop.permute.xlu2 %1199  ;;  %v3841_v33 = vld [vmem:[#allocation44_spill] sm:$0xff] }
 0x19a   : > { %v1541_v53 = vadd.f32 %v3070_v17, %v1505_v5  ;;  %v1264_v10 = vadd.f32 %v1232_v62, %v1182_v26  ;;  %v1506_v55 = vadd.f32 %v1474_v59, %v1424_v52  ;;  %v1393_v15 = vmul.f32 %v3800_v48, %v3839_v43 }
 0x19b   : > { %v1152_v47 = vmul.f32 %v3805_v41, %v3840_v36  ;;  %1573 = vst.msk [vmem:[%s3089_s15 + $0xb8] sm:$0xff] %vm1549_vm2, %v1540_v4  ;;  %v1342_v1 = vadd.f32 %v1310_v54, %v1263_v24  ;;  %v1394_v6 = vmul.f32 %v3800_v48, %v3840_v36  ;;  %v1101_v57 = vadd.f32 %v1069_v45, %v1022_v16  ;;  %v1682_v54 = vld [vmem:[%s3484_s1 + $0x4] ss:$0 sm:$0xff] }
 0x19c   : > { %1574 = vst.msk [vmem:[%s3089_s15 + $0xc0] sm:$0xff] %vm1549_vm2, %v1541_v53  ;;  %v1343_v8 = vadd.f32 %v1311_v27, %v1264_v10  ;;  %v1542_v22 = vadd.f32 %v3070_v17, %v1506_v55  ;;  %v1233_v29 = vmul.f32 %v2979_v2, %v952_v20  ;;  %v1475_v39 = vmul.f32 %v3033_v0, %v952_v20  ;;  %v1035_v9 = vpop.permute.xlu1 %1034 }
 0x19d   : > { %v1425_v19 = vadd.f32 %v1393_v15, %v1342_v1  ;;  %v1476_v41 = vmul.f32 %v3033_v0, %v3360_v12  ;;  %v1184_v60 = vadd.f32 %v1152_v47, %v1101_v57  ;;  %v1234_v34 = vmul.f32 %v2979_v2, %v3360_v12 }
 0x19e   : > { %v1426_v38 = vadd.f32 %v1394_v6, %v1343_v8  ;;  %1575 = vst.msk [vmem:[%s3089_s15 + $0xc8] sm:$0xff] %vm1549_vm2, %v1542_v22  ;;  %v1030_v35 = vpop.permute.xlu0 %1029  ;;  %v1265_v50 = vadd.f32 %v1233_v29, %v3356_v44  ;;  %v1313_v7 = vmul.f32 %v3409_v32, %v1035_v9  ;;  %v1395_v46 = vmul.f32 %v3800_v48, %v1114_v18 }
 0x19f   : > { %v1507_v28 = vadd.f32 %v1475_v39, %v1425_v19  ;;  %v1312_v31 = vmul.f32 %v3409_v32, %v1030_v35  ;;  %v1266_v30 = vadd.f32 %v1234_v34, %v1184_v60  ;;  %v991_v26 = vmul.f32 %v1680_v63, %v952_v20  ;;  %v1683_v60 = vld [vmem:[%s3484_s1 + $0x7] ss:$0 sm:$0xff] }
 0x1a0   : > { %v1508_v49 = vadd.f32 %v1476_v41, %v1426_v38  ;;  %v1070_v52 = vmul.f32 %v3395_v51, %v1030_v35  ;;  %v992_v5 = vmul.f32 %v1680_v63, %v3360_v12  ;;  %v1478_v25 = vmul.f32 %v3033_v0, %v1200_v56  ;;  %v3842_v12 = vld [vmem:[#allocation10_spill] sm:$0xff] }
 0x1a1   : > { %v1543_v58 = vadd.f32 %v3070_v17, %v1507_v28  ;;  %v1344_v3 = vadd.f32 %v1312_v31, %v1265_v50  ;;  %v1345_v40 = vadd.f32 %v1313_v7, %v1266_v30  ;;  %v1023_v23 = vadd.f32 %v991_v26, %v3841_v33  ;;  %v1358_v24 = vpop.permute.xlu2 %1357 }
 0x1a2   : > { %v1544_v11 = vadd.f32 %v3070_v17, %v1508_v49  ;;  %v1071_v27 = vmul.f32 %v3395_v51, %v1035_v9  ;;  %v1153_v4 = vmul.f32 %v1682_v54, %v1114_v18  ;;  %v1024_v63 = vadd.f32 %v992_v5, %v3842_v12 }
 0x1a3   : > { %1576 = vst.msk [vmem:[%s3089_s15 + $0xd0] sm:$0xff] %vm1549_vm2, %v1543_v58  ;;  %v1427_v42 = vadd.f32 %v1395_v46, %v1344_v3  ;;  %v1102_v20 = vadd.f32 %v1070_v52, %v1023_v23  ;;  %v1236_v1 = vmul.f32 %v2979_v2, %v1200_v56  ;;  %v1397_v57 = vmul.f32 %v3800_v48, %v1358_v24 }
 0x1a4   : > { %1577 = vst.msk [vmem:[%s3089_s15 + $0xd8] sm:$0xff] %vm1549_vm2, %v1544_v11  ;;  %v1196_v44 = vpop.permute.xlu1 %1195  ;;  %v1103_v51 = vadd.f32 %v1071_v27, %v1024_v63 }
 0x1a5   : > { %v1477_v21 = vmul.f32 %v3033_v0, %v1196_v44  ;;  %v1235_v53 = vmul.f32 %v2979_v2, %v1196_v44  ;;  %v1185_v55 = vadd.f32 %v1153_v4, %v1102_v20 }
 0x1a6   : > { %v1118_v61 = vpop.permute.xlu0 %1117 }
 0x1a7   : > { %v1396_v45 = vmul.f32 %v3800_v48, %v1118_v61  ;;  %v1509_v14 = vadd.f32 %v1477_v21, %v1427_v42  ;;  %v1154_v37 = vmul.f32 %v1682_v54, %v1118_v61  ;;  %v1267_v36 = vadd.f32 %v1235_v53, %v1185_v55 }
 0x1a9   : > { %v1428_v62 = vadd.f32 %v1396_v45, %v1345_v40  ;;  %v1545_v59 = vadd.f32 %v3070_v17, %v1509_v14  ;;  %v1186_v18 = vadd.f32 %v1154_v37, %v1103_v51  ;;  %v1444_v29 = vpop.permute.xlu2 %1443 }
 0x1ab   : > { %v1510_v13 = vadd.f32 %v1478_v25, %v1428_v62  ;;  %1578 = vst.msk [vmem:[%s3089_s15 + $0xe0] sm:$0xff] %vm1549_vm2, %v1545_v59  ;;  %v1268_v8 = vadd.f32 %v1236_v1, %v1186_v18 }
 0x1ac   : > { %v1279_v10 = vpop.permute.xlu1 %1278 }
 0x1ad   : > { %v1546_v16 = vadd.f32 %v3070_v17, %v1510_v13  ;;  %v1315_v6 = vmul.f32 %v3409_v32, %v1279_v10 }
 0x1ae   : > { %v1274_v43 = vpop.permute.xlu0 %1273 }
 0x1af   : > { %1579 = vst.msk [vmem:[%s3089_s15 + $0xe8] sm:$0xff] %vm1549_vm2, %v1546_v16  ;;  %v1314_v15 = vmul.f32 %v3409_v32, %v1274_v43  ;;  %v1347_v38 = vadd.f32 %v1315_v6, %v1268_v8  ;;  %v1480_v32 = vmul.f32 %v3033_v0, %v1444_v29 }
 0x1b1   : > { %v1346_v47 = vadd.f32 %v1314_v15, %v1267_v36 }
 0x1b3   : > { %v1429_v39 = vadd.f32 %v1397_v57, %v1346_v47 }
 0x1b4   : > { %v1440_v22 = vpop.permute.xlu1 %1439 }
 0x1b5   : > { %v1479_v41 = vmul.f32 %v3033_v0, %v1440_v22 }
 0x1b6   : > { %v1362_v19 = vpop.permute.xlu0 %1361 }
 0x1b7   : > { %v1398_v9 = vmul.f32 %v1683_v60, %v1362_v19  ;;  %v1511_v2 = vadd.f32 %v1479_v41, %v1429_v39 }
 0x1b9   : > { %v1430_v28 = vadd.f32 %v1398_v9, %v1347_v38  ;;  %v1547_v48 = vadd.f32 %v3070_v17, %v1511_v2 }
 0x1bb   : > { %v1512_v35 = vadd.f32 %v1480_v32, %v1430_v28  ;;  %1580 = vst.msk [vmem:[%s3089_s15 + $0xf0] sm:$0xff] %vm1549_vm2, %v1547_v48 }
 0x1bd   : > { %v1548_v49 = vadd.f32 %v3070_v17, %v1512_v35 }
 0x1bf   : > { %1581 = vst.msk [vmem:[%s3089_s15 + $0xf8] sm:$0xff] %vm1549_vm2, %v1548_v49 }
 0x1c0 PF: > { %s13_s12 = sadd.s32 1, %s1690_s12  }
 0x1c1   : > { %p10_p4 = scmp.ge.s32.totalorder %s13_s12, 4  }
 0x1c3   :  { %12 = sbr.rel (!%p10_p4) target bundleno = 1 (0x1), region = 70 }

// kernel: attention_zbw_forward.6
= control target key start
LH: loop header
LB: loop body
LE: loop exit
PB: predicated region body
PF: predicated region fallthrough
CT: control target
= control target key end

     0   :  { %s2192_s12 = smov 0   ;;  %s3356_s0 = inlined_call_operand.vmem [shape: f32[2,18,18,32], index: 0, kind: input, shape index: {}]   ;;  %s3357_s1 = inlined_call_operand.vmem [shape: f32[3,3,32,32], index: 1, kind: input, shape index: {}]   ;;  %s3358_s2 = inlined_call_operand.vmem [shape: f32[1,32], index: 2, kind: input, shape index: {}]   ;;  %s3359_s3 = inlined_call_operand.vmem [shape: f32[2,256,32], index: 3, kind: output, shape index: {}]  }
   0x1 LB: > { %s1961_s13 = sadd.s32 4294967295, %s2170_s12   ;;  %p1965_p0 = scmp.ge.s32.totalorder %s2170_s12, 1  ;;  %s2170_s12 = sphi %s2192_s12, %s13_s12  }
   0x2   : > { %p137_p1 = scmp.lt.s32.totalorder %s2170_s12, 3 }
   0x4   : > { %p138_p2 = pnand %p1965_p0, %p137_p1 }
   0x6   : > { %141 = sbr.rel (%p138_p2) target bundleno = 734 (0x2de), region = 32 }
   0xb   : > { %v1971_v0 = vld [vmem:[%s3357_s1 + $0x30] sm:$0xff]  ;;  %v1972_v1 = vld [vmem:[%s3357_s1 + $0x38] sm:$0xff]  ;;  %v1969_v2 = vld [vmem:[%s3357_s1 + $0x20] sm:$0xff]  ;;  %p161_p3 = scmp.lt.s32.totalorder %s1961_s13, 1  ;;  %vm296_vm0 = vcmask 1046528   ;;  %vm432_vm1 = vcmask 261120  }
   0xc   : > { %v431_v3 = vpack.c.bf16 %v1972_v1, %v1971_v0  ;;  %v1970_v4 = vld [vmem:[%s3357_s1 + $0x28] sm:$0xff]  ;;  %v2007_v5 = vld [vmem:[%s3357_s1 + $0x50] sm:$0xff]  ;;  %v2008_v6 = vld [vmem:[%s3357_s1 + $0x58] sm:$0xff]  ;;  %vm707_vm2 = vcmask 1045504  }
   0xd   : > { %s3500_s13 = smov (!%p161_p3, %s1961_s13), 1  ;;  %v2027_v7 = vld [vmem:[%s3357_s1 + $0x70] sm:$0xff]  ;;  %v2028_v8 = vld [vmem:[%s3357_s1 + $0x78] sm:$0xff]  ;;  %v430_v10 = vpack.c.bf16 %v1970_v4, %v1969_v2  ;;  %v842_v14 = vpack.c.bf16 %v2008_v6, %v2007_v5 }
   0xe   : > { %v228_v9 = vld [vmem:[%s3357_s1 + $0x10] sm:$0xff]  ;;  %2148 = vmatpush.bf16.msra.mxu1 %v431_v3  ;;  %2149 = vmatpush.bf16.msra.mxu2 %v431_v3  ;;  %v229_v11 = vld [vmem:[%s3357_s1 + $0x18] sm:$0xff]  ;;  %s2154_s11 = smul.u32 432, %s3500_s13  ;;  %v1019_v15 = vpack.c.bf16 %v2028_v8, %v2027_v7  ;;  %s2147_s17 = sshll.u32 %s3500_s13, 8 }
   0xf   : > { %v2047_v12 = vld [vmem:[%s3357_s1 + $0x90] sm:$0xff]  ;;  %v2048_v13 = vld [vmem:[%s3357_s1 + $0x98] sm:$0xff]  ;;  %2150 = vmatpush.bf16.msra.mxu3 %v431_v3  ;;  %487 = vmatpush.bf16.msra.mxu0 %v431_v3  ;;  %v247_v16 = vpack.c.bf16 %v229_v11, %v228_v9  ;;  %s3157_s22 = scalar_lea.vmem %s3359_s3, %s2147_s17 }
  0x10   : > { %s2242_s16 = scalar_lea.vmem %s3356_s0, %s2154_s11  ;;  %v1161_v17 = vpack.c.bf16 %v2048_v13, %v2047_v12 }
  0x11   : > { %v2245_v18 = vld [vmem:[%s2242_s16 + $0x60] sm:$0xff]  ;;  %v2248_v19 = vld [vmem:[%s2242_s16 + $0x68] sm:$0xff]  ;;  %v2251_v20 = vld [vmem:[%s2242_s16 + $0x70] sm:$0x3] }
  0x12   : > { %2151 = vmatpush.bf16.msra.mxu1 %v430_v10  ;;  %2152 = vmatpush.bf16.msra.mxu2 %v430_v10  ;;  %v317_v21 = vrot.slane %v2245_v18, 1  ;;  %v318_v22 = vrot.slane %v2248_v19, 1  ;;  %v320_v23 = vrot.slane %v2251_v20, 1  ;;  %v2257_v24 = vld [vmem:[%s2242_s16 + $0xc0] sm:$0xff]  ;;  %v2260_v25 = vld [vmem:[%s2242_s16 + $0xc8] sm:$0xff]  ;;  %v2308_v52 = vld [vmem:[%s2242_s16 + $0x78] sm:$0xff] }
  0x13   : > { %2153 = vmatpush.bf16.msra.mxu3 %v430_v10  ;;  %488 = vmatpush.bf16.msra.mxu0 %v430_v10  ;;  %v2263_v26 = vld [vmem:[%s2242_s16 + $0x120] sm:$0xff]  ;;  %v2266_v27 = vld [vmem:[%s2242_s16 + $0xd0] sm:$0x3]  ;;  %v337_v28 = vrot.slane %v2257_v24, 1  ;;  %v338_v29 = vrot.slane %v2260_v25, 1  ;;  %v2271_v30 = vld [vmem:[%s2242_s16 + $0x128] sm:$0xff] }
  0x14   : > { %3403 = vst [vmem:[#allocation2_spill] sm:$0xff] %v2263_v26  ;;  %v357_v31 = vrot.slane %v2263_v26, 1  ;;  %v319_v32 = vsel %vm296_vm0, %v317_v21, %v318_v22  ;;  %v321_v33 = vsel %vm296_vm0, %v318_v22, %v320_v23  ;;  %v340_v34 = vrot.slane %v2266_v27, 1  ;;  %v2278_v35 = vld [vmem:[%s2242_s16 + $0x130] sm:$0x3]  ;;  %v2281_v36 = vld [vmem:[%s2242_s16] sm:$0xff] }
  0x15   : > { %3404 = vst [vmem:[#allocation3_spill] sm:$0xff] %v2271_v30  ;;  %v2284_v37 = vld [vmem:[%s2242_s16 + $0x8] sm:$0xff]  ;;  %v2286_v38 = vpack.c.bf16 %v321_v33, %v319_v32  ;;  %v339_v39 = vsel %vm296_vm0, %v337_v28, %v338_v29  ;;  %v358_v40 = vrot.slane %v2271_v30, 1  ;;  %v360_v41 = vrot.slane %v2278_v35, 1  ;;  %v2292_v42 = vld [vmem:[%s2242_s16 + $0x10] sm:$0x3] }
  0x16   : > { %897 = vmatpush.bf16.msrb.mxu2 %v842_v14  ;;  %3405 = vst [vmem:[#allocation4_spill] sm:$0xff] %v2278_v35  ;;  %624 = vmatpush.bf16.msrb.mxu1 %v247_v16  ;;  %v341_v43 = vsel %vm296_vm0, %v338_v29, %v340_v34  ;;  %v297_v44 = vrot.slane %v2281_v36, 1  ;;  %v298_v45 = vrot.slane %v2284_v37, 1  ;;  %v300_v49 = vrot.slane %v2292_v42, 1  ;;  %v2311_v53 = vld [vmem:[%s2242_s16 + $0x80] sm:$0xff]  ;;  %v2320_v56 = vld [vmem:[%s2242_s16 + $0xd8] sm:$0xff] }
  0x17   : > { %1029 = vmatpush.bf16.msrb.mxu3 %v1019_v15  ;;  %1171 = vmatpush.bf16.msrb.mxu0 %v1161_v17  ;;  %v2299_v46 = vpack.c.bf16 %v341_v43, %v339_v39  ;;  %v359_v47 = vsel %vm296_vm0, %v357_v31, %v358_v40  ;;  %v361_v48 = vsel %vm296_vm0, %v358_v40, %v360_v41  ;;  %v2317_v55 = vld [vmem:[%s2242_s16 + $0x88] sm:$0x3]  ;;  %v2323_v57 = vld [vmem:[%s2242_s16 + $0xe0] sm:$0xff]  ;;  %v322_v60 = vrot.slane %v2308_v52, 1  ;;  %v2332_v61 = vld [vmem:[%s2242_s16 + $0x138] sm:$0xff] }
  0x18   : > { %1977 = vmatmul.msk.bf16.vlgmr.msra.gmra.mxu1 %vm432_vm1, %v2286_v38  ;;  %v2304_v50 = vpack.c.bf16 %v361_v48, %v359_v47  ;;  %v299_v51 = vsel %vm296_vm0, %v297_v44, %v298_v45  ;;  %v301_v54 = vsel %vm296_vm0, %v298_v45, %v300_v49  ;;  %v2328_v59 = vld [vmem:[%s2242_s16 + $0xe8] sm:$0x3]  ;;  %3408 = vst [vmem:[#allocation7_spill] sm:$0xff] %v2332_v61  ;;  %v2335_v62 = vld [vmem:[%s2242_s16 + $0x140] sm:$0xff]  ;;  %v323_v63 = vrot.slane %v2311_v53, 1  ;;  %v2347_v5 = vld [vmem:[%s2242_s16 + $0x18] sm:$0xff] }
  0x19   : > { %3406 = vst [vmem:[#allocation5_spill] sm:$0xff] %v2299_v46  ;;  %1981 = vmatmul.msk.bf16.vlgmr.msra.gmra.mxu2 %vm432_vm1, %v2299_v46  ;;  %v414_v58 = vpack.c.bf16 %v301_v54, %v299_v51  ;;  %v325_v0 = vrot.slane %v2317_v55, 1  ;;  %v342_v1 = vrot.slane %v2320_v56, 1  ;;  %v343_v2 = vrot.slane %v2323_v57, 1  ;;  %v2343_v3 = vld [vmem:[%s2242_s16 + $0x148] sm:$0x3] }
  0x1a   : > { %3407 = vst [vmem:[#allocation6_spill] sm:$0xff] %v2304_v50  ;;  %1985 = vmatmul.msk.bf16.vlgmr.msra.gmra.mxu3 %vm432_vm1, %v2304_v50  ;;  %v345_v4 = vrot.slane %v2328_v59, 1  ;;  %v2350_v6 = vld [vmem:[%s2242_s16 + $0x20] sm:$0xff]  ;;  %v2353_v7 = vld [vmem:[%s2242_s16 + $0x28] sm:$0x3]  ;;  %v362_v8 = vrot.slane %v2332_v61, 1  ;;  %v324_v11 = vsel %vm296_vm0, %v322_v60, %v323_v63 }
  0x1b   : > { %3409 = vst [vmem:[#allocation8_spill] sm:$0xff] %v2335_v62  ;;  %1973 = vmatmul.msk.bf16.vlgmr.msra.gmra.mxu0 %vm432_vm1, %v414_v58  ;;  %v363_v9 = vrot.slane %v2335_v62, 1  ;;  %v365_v10 = vrot.slane %v2343_v3, 1  ;;  %v326_v12 = vsel %vm296_vm0, %v323_v63, %v325_v0  ;;  %v344_v13 = vsel %vm296_vm0, %v342_v1, %v343_v2  ;;  %v2005_v21 = vld [vmem:[%s3357_s1 + $0x40] sm:$0xff]  ;;  %v2006_v22 = vld [vmem:[%s3357_s1 + $0x48] sm:$0xff]  ;;  %v2406_v58 = vld [vmem:[%s2242_s16 + $0x90] sm:$0xff] }
  0x1c   : > { %3410 = vst [vmem:[#allocation9_spill] sm:$0xff] %v2343_v3  ;;  %v346_v14 = vsel %vm296_vm0, %v343_v2, %v345_v4  ;;  %v302_v15 = vrot.slane %v2347_v5, 1  ;;  %v303_v16 = vrot.slane %v2350_v6, 1  ;;  %v305_v17 = vrot.slane %v2353_v7, 1  ;;  %v2025_v23 = vld [vmem:[%s3357_s1 + $0x60] sm:$0xff]  ;;  %v2026_v28 = vld [vmem:[%s3357_s1 + $0x68] sm:$0xff] }
  0x1d   : > { %v226_v29 = vld [vmem:[%s3357_s1] sm:$0xff]  ;;  %v227_v31 = vld [vmem:[%s3357_s1 + $0x8] sm:$0xff]  ;;  %v2383_v32 = vpack.c.bf16 %v326_v12, %v324_v11  ;;  %v364_v33 = vsel %vm296_vm0, %v362_v8, %v363_v9  ;;  %v366_v34 = vsel %vm296_vm0, %v363_v9, %v365_v10  ;;  %v2393_v41 = vpack.c.bf16 %v346_v14, %v344_v13  ;;  %v2409_v60 = vld [vmem:[%s2242_s16 + $0x98] sm:$0xff] }
  0x1e   : > { %v2045_v39 = vld [vmem:[%s3357_s1 + $0x80] sm:$0xff]  ;;  %v2046_v40 = vld [vmem:[%s3357_s1 + $0x88] sm:$0xff]  ;;  %v841_v43 = vpack.c.bf16 %v2006_v22, %v2005_v21  ;;  %v304_v44 = vsel %vm296_vm0, %v302_v15, %v303_v16  ;;  %v306_v45 = vsel %vm296_vm0, %v303_v16, %v305_v17  ;;  %v1018_v47 = vpack.c.bf16 %v2026_v28, %v2025_v23  ;;  %v2417_v0 = vld [vmem:[%s2242_s16 + $0xf0] sm:$0xff] }
  0x1f   : > { %3411 = vst [vmem:[#allocation10_spill] sm:$0xff] %v2393_v41  ;;  %v246_v48 = vpack.c.bf16 %v227_v31, %v226_v29  ;;  %v2397_v49 = vpack.c.bf16 %v366_v34, %v364_v33  ;;  %v1160_v51 = vpack.c.bf16 %v2046_v40, %v2045_v39  ;;  %v2401_v54 = vpack.c.bf16 %v306_v45, %v304_v44  ;;  %v2412_v63 = vld [vmem:[%s2242_s16 + $0xa0] sm:$0x3]  ;;  %v2420_v1 = vld [vmem:[%s2242_s16 + $0xf8] sm:$0xff]  ;;  %v2426_v4 = vld [vmem:[%s2242_s16 + $0x150] sm:$0xff] }
  0x20   : > { %898 = vmatpush.bf16.msrb.mxu2 %v841_v43  ;;  %1030 = vmatpush.bf16.msrb.mxu3 %v1018_v47  ;;  %v2423_v2 = vld [vmem:[%s2242_s16 + $0x100] sm:$0x3]  ;;  %3413 = vst [vmem:[#allocation12_spill] sm:$0xff] %v2426_v4  ;;  %v327_v8 = vrot.slane %v2406_v58, 1  ;;  %v328_v9 = vrot.slane %v2409_v60, 1  ;;  %v330_v10 = vrot.slane %v2412_v63, 1 }
  0x21   : > { %3412 = vst [vmem:[#allocation11_spill] sm:$0xff] %v2397_v49  ;;  %625 = vmatpush.bf16.msrb.mxu1 %v246_v48  ;;  %1172 = vmatpush.bf16.msrb.mxu0 %v1160_v51  ;;  %v2434_v11 = vld [vmem:[%s2242_s16 + $0x158] sm:$0xff]  ;;  %v2437_v12 = vld [vmem:[%s2242_s16 + $0x160] sm:$0x3]  ;;  %v2440_v13 = vld [vmem:[%s2242_s16 + $0x30] sm:$0xff]  ;;  %v347_v14 = vrot.slane %v2417_v0, 1 }
  0x22   : > { %3414 = vst [vmem:[#allocation13_spill] sm:$0xff] %v2434_v11  ;;  %v348_v15 = vrot.slane %v2420_v1, 1  ;;  %v350_v16 = vrot.slane %v2423_v2, 1  ;;  %v2446_v17 = vld [vmem:[%s2242_s16 + $0x38] sm:$0xff]  ;;  %v2449_v21 = vld [vmem:[%s2242_s16 + $0x40] sm:$0x3]  ;;  %v329_v29 = vsel %vm296_vm0, %v327_v8, %v328_v9  ;;  %v331_v31 = vsel %vm296_vm0, %v328_v9, %v330_v10 }
  0x23   : > { %3415 = vst [vmem:[#allocation14_spill] sm:$0xff] %v2437_v12  ;;  %v367_v22 = vrot.slane %v2426_v4, 1  ;;  %v368_v23 = vrot.slane %v2434_v11, 1  ;;  %v370_v28 = vrot.slane %v2437_v12, 1  ;;  %v307_v33 = vrot.slane %v2440_v13, 1  ;;  %v2127_v11 = vld [vmem:[%s3357_s1 + $0x110] sm:$0xff] }
  0x24   : > { %v308_v34 = vrot.slane %v2446_v17, 1  ;;  %v310_v39 = vrot.slane %v2449_v21, 1  ;;  %v349_v40 = vsel %vm296_vm0, %v347_v14, %v348_v15  ;;  %v351_v43 = vsel %vm296_vm0, %v348_v15, %v350_v16  ;;  %v2476_v14 = vld [vmem:[%s2242_s16 + $0xa8] sm:$0xff]  ;;  %v2479_v15 = vld [vmem:[%s2242_s16 + $0xb0] sm:$0xff]  ;;  %v2484_v16 = vld [vmem:[%s2242_s16 + $0xb8] sm:$0x3] }
  0x25   : > { %v2461_v44 = vpack.c.bf16 %v331_v31, %v329_v29  ;;  %v369_v45 = vsel %vm296_vm0, %v367_v22, %v368_v23  ;;  %v371_v47 = vsel %vm296_vm0, %v368_v23, %v370_v28  ;;  %v2465_v48 = vpack.c.bf16 %v351_v43, %v349_v40  ;;  %v2487_v22 = vld [vmem:[%s2242_s16 + $0x108] sm:$0xff]  ;;  %v2490_v23 = vld [vmem:[%s2242_s16 + $0x110] sm:$0xff]  ;;  %v2088_v31 = vld [vmem:[%s3357_s1 + $0xd8] sm:$0xff] }
  0x26   : > { %v309_v51 = vsel %vm296_vm0, %v307_v33, %v308_v34  ;;  %v311_v8 = vsel %vm296_vm0, %v308_v34, %v310_v39  ;;  %v2469_v9 = vpack.c.bf16 %v371_v47, %v369_v45  ;;  %3418 = vst [vmem:[#allocation17_spill] sm:$0xff] %v2487_v22  ;;  %v2495_v28 = vld [vmem:[%s2242_s16 + $0x168] sm:$0xff]  ;;  %v2087_v29 = vld [vmem:[%s3357_s1 + $0xd0] sm:$0xff]  ;;  %v2504_v33 = vld [vmem:[%s2242_s16 + $0x118] sm:$0x3]  ;;  %v332_v43 = vrot.slane %v2476_v14, 1 }
  0x27   : > { %3416 = vst [vmem:[#allocation15_spill] sm:$0xff] %v2461_v44  ;;  %v2473_v10 = vpack.c.bf16 %v311_v8, %v309_v51  ;;  %v2507_v34 = vld [vmem:[%s2242_s16 + $0x170] sm:$0xff]  ;;  %v2510_v39 = vld [vmem:[%s2242_s16 + $0x178] sm:$0x3]  ;;  %v1432_v40 = vpack.c.bf16 %v2088_v31, %v2087_v29  ;;  %v333_v45 = vrot.slane %v2479_v15, 1  ;;  %v335_v47 = vrot.slane %v2484_v16, 1 }
  0x28   : > { %1978 = vmatmul.msk.bf16.gmra.mxu1 %vm432_vm1, %v2383_v32  ;;  %3417 = vst [vmem:[#allocation16_spill] sm:$0xff] %v2469_v9  ;;  %v2107_v51 = vld [vmem:[%s3357_s1 + $0xf0] sm:$0xff]  ;;  %v2108_v8 = vld [vmem:[%s3357_s1 + $0xf8] sm:$0xff]  ;;  %v352_v31 = vrot.slane %v2487_v22, 1  ;;  %v353_v3 = vrot.slane %v2490_v23, 1  ;;  %v2539_v62 = vld [vmem:[%s2242_s16 + $0x48] sm:$0xff] }
  0x29   : > { %1982 = vmatmul.msk.bf16.gmra.mxu2 %vm432_vm1, %v2393_v41  ;;  %3419 = vst [vmem:[#allocation18_spill] sm:$0xff] %v2490_v23  ;;  %v2067_v29 = vld [vmem:[%s3357_s1 + $0xb0] sm:$0xff]  ;;  %v1574_v12 = vpack.c.bf16 %v2108_v8, %v2107_v51  ;;  %v2128_v4 = vld [vmem:[%s3357_s1 + $0x118] sm:$0xff]  ;;  %v372_v35 = vrot.slane %v2495_v28, 1  ;;  %v373_v50 = vrot.slane %v2507_v34, 1  ;;  %v375_v30 = vrot.slane %v2510_v39, 1 }
  0x2a   : > { %1986 = vmatmul.msk.bf16.gmra.mxu3 %vm432_vm1, %v2397_v49  ;;  %3420 = vst [vmem:[#allocation19_spill] sm:$0xff] %v2504_v33  ;;  %1442 = vmatpush.bf16.msra.mxu2 %v1432_v40  ;;  %v355_v49 = vrot.slane %v2504_v33, 1  ;;  %v2542_v40 = vld [vmem:[%s2242_s16 + $0x50] sm:$0xff]  ;;  %v2545_v51 = vld [vmem:[%s2242_s16 + $0x58] sm:$0x3]  ;;  %v1713_v61 = vpack.c.bf16 %v2128_v4, %v2127_v11  ;;  %v334_v26 = vsel %vm296_vm0, %v332_v43, %v333_v45  ;;  %v312_v33 = vrot.slane %v2539_v62, 1 }
  0x2b   : > { %1974 = vmatmul.msk.bf16.gmra.mxu0 %vm432_vm1, %v2401_v54  ;;  %3421 = vst [vmem:[#allocation20_spill] sm:$0xff] %v2510_v39  ;;  %1584 = vmatpush.bf16.msra.mxu3 %v1574_v12  ;;  %v336_v23 = vsel %vm296_vm0, %v333_v45, %v335_v47  ;;  %v313_v22 = vrot.slane %v2542_v40, 1  ;;  %v354_v4 = vsel %vm296_vm0, %v352_v31, %v353_v3 }
  0x2c   : > { %1723 = vmatpush.bf16.msra.mxu0 %v1713_v61  ;;  %v356_v11 = vsel %vm296_vm0, %v353_v3, %v355_v49  ;;  %v374_v12 = vsel %vm296_vm0, %v372_v35, %v373_v50  ;;  %v376_v43 = vsel %vm296_vm0, %v373_v50, %v375_v30  ;;  %v708_v30 = vrot.slane %v2281_v36, 2 }
  0x2d   : > { %v2561_v39 = vpack.c.bf16 %v356_v11, %v354_v4  ;;  %v314_v61 = vsel %vm296_vm0, %v312_v33, %v313_v22  ;;  %v2565_v47 = vpack.c.bf16 %v376_v43, %v374_v12  ;;  %v709_v35 = vrot.slane %v2284_v37, 2 }
  0x2e   : > { %v230_v49 = vpack.c.bf16 %v2284_v37, %v2281_v36  ;;  %v714_v33 = vrot.slane %v2350_v6, 2  ;;  %v2600_v4 = vpack.c.bf16 %v2446_v17, %v2440_v13  ;;  %v2618_v43 = vpack.c.bf16 %v2542_v40, %v2539_v62 }
  0x2f   : > { %3423 = vst [vmem:[#allocation22_spill] sm:$0xff] %v2565_v47  ;;  %v710_v50 = vsel %vm707_vm2, %v708_v30, %v709_v35  ;;  %v2637_v30 = vpack.c.bf16 %v2248_v19, %v2245_v18 }
  0x38   : > { %1979 = vmatmul.msk.bf16.gmra.mxu1 %vm432_vm1, %v2461_v44 }
  0x39   : > { %1983 = vmatmul.msk.bf16.gmra.mxu2 %vm432_vm1, %v2465_v48 }
  0x3a   : > { %1987 = vmatmul.msk.bf16.gmra.mxu3 %vm432_vm1, %v2469_v9  ;;  %v2068_v9 = vld [vmem:[%s3357_s1 + $0xb8] sm:$0xff] }
  0x3b   : > { %1975 = vmatmul.msk.bf16.gmra.mxu0 %vm432_vm1, %v2473_v10  ;;  %v1300_v8 = vpack.c.bf16 %v2068_v9, %v2067_v29  ;;  %v315_v9 = vrot.slane %v2545_v51, 1  ;;  %v2557_v29 = vpack.c.bf16 %v336_v23, %v334_v26  ;;  %v711_v26 = vrot.slane %v2292_v42, 2 }
  0x3c   : > { %v231_v23 = vpack.c.bf16 %v2350_v6, %v2347_v5  ;;  %v713_v42 = vrot.slane %v2347_v5, 2  ;;  %v718_v5 = vrot.slane %v2440_v13, 2  ;;  %v719_v6 = vrot.slane %v2446_v17, 2 }
  0x3d   : > { %1310 = vmatpush.bf16.msra.mxu1 %v1300_v8  ;;  %3422 = vst [vmem:[#allocation21_spill] sm:$0xff] %v2557_v29  ;;  %v316_v45 = vsel %vm296_vm0, %v313_v22, %v315_v9  ;;  %v712_v3 = vsel %vm707_vm2, %v709_v35, %v711_v26  ;;  %v716_v8 = vrot.slane %v2353_v7, 2  ;;  %v721_v7 = vrot.slane %v2449_v21, 2 }
  0x3e   : > { %v2569_v31 = vpack.c.bf16 %v316_v45, %v314_v61  ;;  %v825_v22 = vpack.c.bf16 %v712_v3, %v710_v50  ;;  %v715_v36 = vsel %vm707_vm2, %v713_v42, %v714_v33  ;;  %v723_v13 = vrot.slane %v2539_v62, 2 }
  0x3f   : > { %v717_v37 = vsel %vm707_vm2, %v714_v33, %v716_v8  ;;  %v722_v11 = vsel %vm707_vm2, %v719_v6, %v721_v7  ;;  %v724_v17 = vrot.slane %v2542_v40, 2  ;;  %v726_v21 = vrot.slane %v2545_v51, 2 }
  0x40   : > { %v2596_v9 = vpack.c.bf16 %v717_v37, %v715_v36  ;;  %v728_v62 = vrot.slane %v2245_v18, 2  ;;  %v729_v40 = vrot.slane %v2248_v19, 2  ;;  %v731_v51 = vrot.slane %v2251_v20, 2 }
  0x41   : > { %v725_v61 = vsel %vm707_vm2, %v723_v13, %v724_v17  ;;  %v727_v45 = vsel %vm707_vm2, %v724_v17, %v726_v21  ;;  %v733_v42 = vrot.slane %v2308_v52, 2  ;;  %v734_v33 = vrot.slane %v2311_v53, 2 }
  0x42   : > { %v2633_v26 = vpack.c.bf16 %v727_v45, %v725_v61  ;;  %v730_v35 = vsel %vm707_vm2, %v728_v62, %v729_v40  ;;  %v732_v50 = vsel %vm707_vm2, %v729_v40, %v731_v51  ;;  %v736_v8 = vrot.slane %v2317_v55, 2 }
  0x43   : > { %v735_v37 = vsel %vm707_vm2, %v733_v42, %v734_v33  ;;  %v738_v21 = vrot.slane %v2406_v58, 2  ;;  %v739_v61 = vrot.slane %v2409_v60, 2  ;;  %v741_v45 = vrot.slane %v2412_v63, 2  ;;  %v2085_v63 = vld [vmem:[%s3357_s1 + $0xc0] sm:$0xff] }
  0x45   : > { %v740_v40 = vsel %vm707_vm2, %v738_v21, %v739_v61  ;;  %v742_v51 = vsel %vm707_vm2, %v739_v61, %v741_v45  ;;  %v2105_v61 = vld [vmem:[%s3357_s1 + $0xe0] sm:$0xff]  ;;  %v2106_v45 = vld [vmem:[%s3357_s1 + $0xe8] sm:$0xff] }
  0x48   : > { %1980 = vmatmul.msk.bf16.gmra.mxu1 %vm432_vm1, %v2557_v29 }
  0x49   : > { %1984 = vmatmul.msk.bf16.gmra.mxu2 %vm432_vm1, %v2561_v39 }
  0x4a   : > { %1988 = vmatmul.msk.bf16.gmra.mxu3 %vm432_vm1, %v2565_v47 }
  0x4b   : > { %1976 = vmatmul.msk.bf16.gmra.mxu0 %vm432_vm1, %v2569_v31 }
  0x58   : > { %1989 = vmatmul.msk.bf16.vlgmr.msrb.gmra.mxu1 %vm432_vm1, %v230_v49  ;;  %v2654_v49 = vpack.c.bf16 %v732_v50, %v730_v35 }
  0x59   : > { %2009 = vmatmul.msk.bf16.vlgmr.msrb.gmra.mxu2 %vm432_vm1, %v825_v22  ;;  %v2658_v22 = vpack.c.bf16 %v2311_v53, %v2308_v52  ;;  %v2693_v52 = vpack.c.bf16 %v2409_v60, %v2406_v58  ;;  %v2728_v58 = vpack.c.bf16 %v2479_v15, %v2476_v14 }
  0x5a   : > { %2029 = vmatmul.msk.bf16.vlgmr.msrb.gmra.mxu3 %vm432_vm1, %v231_v23 }
  0x5b   : > { %2049 = vmatmul.msk.bf16.vlgmr.msrb.gmra.mxu0 %vm432_vm1, %v2401_v54  ;;  %v720_v54 = vsel %vm707_vm2, %v718_v5, %v719_v6  ;;  %v737_v5 = vsel %vm707_vm2, %v734_v33, %v736_v8  ;;  %3426 = vst [vmem:[#allocation25_spill] sm:$0xff] %v2693_v52  ;;  %v2724_v33 = vpack.c.bf16 %v742_v51, %v740_v40  ;;  %v2086_v8 = vld [vmem:[%s3357_s1 + $0xc8] sm:$0xff] }
  0x5c   : > { %v2614_v12 = vpack.c.bf16 %v722_v11, %v720_v54  ;;  %v2689_v11 = vpack.c.bf16 %v737_v5, %v735_v37  ;;  %3430 = vst [vmem:[#allocation29_spill] sm:$0xff] %v2728_v58  ;;  %v1431_v37 = vpack.c.bf16 %v2086_v8, %v2085_v63  ;;  %v1573_v51 = vpack.c.bf16 %v2106_v45, %v2105_v61 }
  0x5d   : > { %3429 = vst [vmem:[#allocation28_spill] sm:$0xff] %v2724_v33  ;;  %v743_v63 = vrot.slane %v2476_v14, 2  ;;  %v744_v8 = vrot.slane %v2479_v15, 2  ;;  %v2125_v14 = vld [vmem:[%s3357_s1 + $0x100] sm:$0xff]  ;;  %v2126_v15 = vld [vmem:[%s3357_s1 + $0x108] sm:$0xff] }
  0x5e   : > { %1443 = vmatpush.bf16.msra.mxu2 %v1431_v37  ;;  %1585 = vmatpush.bf16.msra.mxu3 %v1573_v51  ;;  %v1712_v61 = vpack.c.bf16 %v2126_v15, %v2125_v14  ;;  %v751_v14 = vrot.slane %v2266_v27, 2  ;;  %v748_v15 = vrot.slane %v2257_v24, 2 }
  0x60   : > { %1724 = vmatpush.bf16.msra.mxu0 %v1712_v61 }
  0x68   : > { %1990 = vmatmul.msk.bf16.gmra.mxu1 %vm432_vm1, %v231_v23 }
  0x69   : > { %2010 = vmatmul.msk.bf16.gmra.mxu2 %vm432_vm1, %v2596_v9 }
  0x6a   : > { %2030 = vmatmul.msk.bf16.gmra.mxu3 %vm432_vm1, %v2600_v4 }
  0x6b   : > { %2050 = vmatmul.msk.bf16.gmra.mxu0 %vm432_vm1, %v2473_v10 }
  0x78   : > { %1991 = vmatmul.msk.bf16.gmra.mxu1 %vm432_vm1, %v2600_v4 }
  0x79   : > { %2011 = vmatmul.msk.bf16.gmra.mxu2 %vm432_vm1, %v2614_v12 }
  0x7a   : > { %2031 = vmatmul.msk.bf16.gmra.mxu3 %vm432_vm1, %v2618_v43 }
  0x7b   : > { %2051 = vmatmul.msk.bf16.gmra.mxu0 %vm432_vm1, %v2569_v31 }
  0x88   : > { %1992 = vmatmul.msk.bf16.gmra.mxu1 %vm432_vm1, %v2618_v43 }
  0x89   : > { %2012 = vmatmul.msk.bf16.gmra.mxu2 %vm432_vm1, %v2633_v26 }
  0x8a   : > { %2032 = vmatmul.msk.bf16.gmra.mxu3 %vm432_vm1, %v2637_v30 }
  0x8b   : > { %2052 = vmatmul.msk.bf16.gmra.mxu0 %vm432_vm1, %v2286_v38 }
  0x95   : > { %v2652_v3 = vpop.f32.mrf.mxu1 }
  0x98   : > { %1993 = vmatmul.msk.bf16.gmra.mxu1 %vm432_vm1, %v2637_v30  ;;  %v2662_v18 = vpop.f32.mrf.mxu0 }
  0x99   : > { %2013 = vmatmul.msk.bf16.gmra.mxu2 %vm432_vm1, %v2654_v49 }
  0x9a   : > { %2033 = vmatmul.msk.bf16.gmra.mxu3 %vm432_vm1, %v2658_v22 }
  0x9b   : > { %2053 = vmatmul.msk.bf16.gmra.mxu0 %vm432_vm1, %v2383_v32 }
  0x9c   : > { %v2670_v19 = vpop.f32.mrf.mxu2 }
  0x9d   : > { %v2672_v20 = vpop.f32.mrf.mxu1  ;;  %v2674_v23 = vpop.f32.mrf.mxu3 }
  0x9e   : > { %3424 = vst [vmem:[#allocation23_spill] sm:$0xff] %v2674_v23 }
  0xa0   : > { %v2679_v36 = vpop.f32.mrf.mxu0 }
  0xa4   : > { %v2683_v6 = vpop.f32.mrf.mxu2 }
  0xa5   : > { %v2685_v7 = vpop.f32.mrf.mxu1  ;;  %v2687_v54 = vpop.f32.mrf.mxu3 }
  0xa6   : > { %3425 = vst [vmem:[#allocation24_spill] sm:$0xff] %v2687_v54 }
  0xa8   : > { %1994 = vmatmul.msk.bf16.gmra.mxu1 %vm432_vm1, %v2658_v22  ;;  %v2697_v53 = vpop.f32.mrf.mxu0 }
  0xa9   : > { %2014 = vmatmul.msk.bf16.gmra.mxu2 %vm432_vm1, %v2689_v11 }
  0xaa   : > { %2034 = vmatmul.msk.bf16.gmra.mxu3 %vm432_vm1, %v2693_v52 }
  0xab   : > { %2054 = vmatmul.msk.bf16.gmra.mxu0 %vm432_vm1, %v2461_v44 }
  0xac   : > { %v2705_v55 = vpop.f32.mrf.mxu2 }
  0xad   : > { %v2707_v13 = vpop.f32.mrf.mxu1  ;;  %v2709_v17 = vpop.f32.mrf.mxu3 }
  0xae   : > { %3427 = vst [vmem:[#allocation26_spill] sm:$0xff] %v2709_v17  ;;  %v2065_v17 = vld [vmem:[%s3357_s1 + $0xa0] sm:$0xff] }
  0xb0   : > { %v2714_v62 = vpop.f32.mrf.mxu0 }
  0xb4   : > { %v2718_v35 = vpop.f32.mrf.mxu2 }
  0xb5   : > { %v2720_v50 = vpop.f32.mrf.mxu1  ;;  %v2722_v42 = vpop.f32.mrf.mxu3 }
  0xb6   : > { %3428 = vst [vmem:[#allocation27_spill] sm:$0xff] %v2722_v42  ;;  %v746_v42 = vrot.slane %v2484_v16, 2  ;;  %v745_v16 = vsel %vm707_vm2, %v743_v63, %v744_v8 }
  0xb8   : > { %1995 = vmatmul.msk.bf16.gmra.mxu1 %vm432_vm1, %v2693_v52  ;;  %v2732_v60 = vpop.f32.mrf.mxu0  ;;  %v747_v37 = vsel %vm707_vm2, %v744_v8, %v746_v42 }
  0xb9   : > { %2015 = vmatmul.msk.bf16.gmra.mxu2 %vm432_vm1, %v2724_v33 }
  0xba   : > { %2035 = vmatmul.msk.bf16.gmra.mxu3 %vm432_vm1, %v2728_v58 }
  0xbb   : > { %2055 = vmatmul.msk.bf16.gmra.mxu0 %vm432_vm1, %v2557_v29  ;;  %v2066_v29 = vld [vmem:[%s3357_s1 + $0xa8] sm:$0xff] }
  0xbc   : > { %v2746_v5 = vpop.f32.mrf.mxu2  ;;  %v1299_v54 = vpack.c.bf16 %v2066_v29, %v2065_v17  ;;  %v2783_v17 = vpack.c.bf16 %v747_v37, %v745_v16  ;;  %v749_v16 = vrot.slane %v2260_v25, 2 }
  0xbd   : > { %v2748_v21 = vpop.f32.mrf.mxu1  ;;  %v2756_v40 = vpop.f32.mrf.mxu3 }
  0xbe   : > { %3431 = vst [vmem:[#allocation30_spill] sm:$0xff] %v2756_v40  ;;  %1311 = vmatpush.bf16.msra.mxu1 %v1299_v54  ;;  %v2787_v40 = vpack.c.bf16 %v2260_v25, %v2257_v24  ;;  %v750_v61 = vsel %vm707_vm2, %v748_v15, %v749_v16  ;;  %v2821_v24 = vpack.c.bf16 %v2323_v57, %v2320_v56  ;;  %v756_v15 = vrot.slane %v2328_v59, 2 }
  0xbf   : > { %3433 = vst [vmem:[#allocation32_spill] sm:$0xff] %v2783_v17 }
  0xc0   : > { %v2767_v33 = vpop.f32.mrf.mxu0  ;;  %3434 = vst [vmem:[#allocation33_spill] sm:$0xff] %v2787_v40 }
  0xc4   : > { %v2777_v45 = vpop.f32.mrf.mxu2 }
  0xc5   : > { %v2779_v51 = vpop.f32.mrf.mxu1  ;;  %v2781_v29 = vpop.f32.mrf.mxu3 }
  0xc6   : > { %3432 = vst [vmem:[#allocation31_spill] sm:$0xff] %v2781_v29  ;;  %v752_v29 = vsel %vm707_vm2, %v749_v16, %v751_v14  ;;  %v753_v16 = vrot.slane %v2320_v56, 2  ;;  %v2844_v56 = vpack.c.bf16 %v2420_v1, %v2417_v0 }
  0xc8   : > { %1996 = vmatmul.msk.bf16.gmra.mxu1 %vm432_vm1, %v2728_v58  ;;  %v2791_v63 = vpop.f32.mrf.mxu0 }
  0xc9   : > { %2016 = vmatmul.msk.bf16.gmra.mxu2 %vm432_vm1, %v2783_v17 }
  0xca   : > { %2036 = vmatmul.msk.bf16.gmra.mxu3 %vm432_vm1, %v2787_v40 }
  0xcb   : > { %2056 = vmatmul.msk.bf16.gmra.mxu0 %vm432_vm1, %v2299_v46 }
  0xcc   : > { %v2799_v54 = vpop.f32.mrf.mxu2 }
  0xcd   : > { %v2801_v42 = vpop.f32.mrf.mxu1  ;;  %v2803_v8 = vpop.f32.mrf.mxu3 }
  0xce   : > { %3435 = vst [vmem:[#allocation34_spill] sm:$0xff] %v2803_v8  ;;  %v2817_v8 = vpack.c.bf16 %v752_v29, %v750_v61  ;;  %v754_v61 = vrot.slane %v2323_v57, 2 }
  0xd0   : > { %v2808_v37 = vpop.f32.mrf.mxu0  ;;  %3438 = vst [vmem:[#allocation37_spill] sm:$0xff] %v2817_v8  ;;  %v755_v44 = vsel %vm707_vm2, %v753_v16, %v754_v61 }
  0xd4   : > { %v2812_v17 = vpop.f32.mrf.mxu2 }
  0xd5   : > { %3436 = vst [vmem:[#allocation35_spill] sm:$0xff] %v2812_v17  ;;  %v627_v46 = vpop.f32.mrf.mxu1  ;;  %v2814_v58 = vpop.f32.mrf.mxu3 }
  0xd6   : > { %3437 = vst [vmem:[#allocation36_spill] sm:$0xff] %v2814_v58  ;;  %v628_v23 = vadd.f32 %v627_v46, %v2662_v18 }
  0xd8   : > { %1997 = vmatmul.msk.bf16.gmra.mxu1 %vm432_vm1, %v2787_v40  ;;  %v1174_v25 = vpop.f32.mrf.mxu0 }
  0xd9   : > { %2017 = vmatmul.msk.bf16.gmra.mxu2 %vm432_vm1, %v2817_v8 }
  0xda   : > { %2037 = vmatmul.msk.bf16.gmra.mxu3 %vm432_vm1, %v2821_v24 }
  0xdb   : > { %2057 = vmatmul.msk.bf16.gmra.mxu0 %vm432_vm1, %v2393_v41  ;;  %v757_v41 = vsel %vm707_vm2, %v754_v61, %v756_v15 }
  0xdc   : > { %v900_v27 = vpop.f32.mrf.mxu2 }
  0xdd   : > { %v629_v46 = vpop.f32.mrf.mxu1  ;;  %v980_v18 = vadd.f32 %v900_v27, %v628_v23  ;;  %v1032_v29 = vpop.f32.mrf.mxu3 }
  0xde   : > { %v630_v14 = vadd.f32 %v629_v46, %v2679_v36  ;;  %v2840_v46 = vpack.c.bf16 %v757_v41, %v755_v44 }
  0xdf   : > { %v1112_v58 = vadd.f32 %v1032_v29, %v980_v18  ;;  %v758_v18 = vrot.slane %v2417_v0, 2  ;;  %v759_v29 = vrot.slane %v2420_v1, 2  ;;  %v3441_v0 = vld [vmem:[#allocation18_spill] sm:$0xff] }
  0xe0   : > { %v1176_v8 = vpop.f32.mrf.mxu0 }
  0xe1   : > { %v2835_v40 = vadd.f32 %v1174_v25, %v1112_v58  ;;  %v761_v25 = vrot.slane %v2423_v2, 2  ;;  %v760_v16 = vsel %vm707_vm2, %v758_v18, %v759_v29  ;;  %v3440_v2 = vld [vmem:[#allocation17_spill] sm:$0xff] }
  0xe3   : > { %v762_v61 = vsel %vm707_vm2, %v759_v29, %v761_v25  ;;  %v3443_v29 = vld [vmem:[#allocation19_spill] sm:$0xff] }
  0xe4   : > { %v902_v52 = vpop.f32.mrf.mxu2 }
  0xe5   : > { %v632_v17 = vpop.f32.mrf.mxu1  ;;  %v981_v23 = vadd.f32 %v902_v52, %v630_v14  ;;  %v1034_v27 = vpop.f32.mrf.mxu3 }
  0xe6   : > { %v633_v36 = vadd.f32 %v632_v17, %v2697_v53 }
  0xe7   : > { %v1113_v57 = vadd.f32 %v1034_v27, %v981_v23 }
  0xe8   : > { %1998 = vmatmul.msk.bf16.gmra.mxu1 %vm432_vm1, %v2821_v24  ;;  %v1179_v59 = vpop.f32.mrf.mxu0 }
  0xe9   : > { %2018 = vmatmul.msk.bf16.gmra.mxu2 %vm432_vm1, %v2840_v46  ;;  %v2850_v58 = vadd.f32 %v1176_v8, %v1113_v57 }
  0xea   : > { %2038 = vmatmul.msk.bf16.gmra.mxu3 %vm432_vm1, %v2844_v56 }
  0xeb   : > { %2058 = vmatmul.msk.bf16.gmra.mxu0 %vm432_vm1, %v2465_v48 }
  0xec   : > { %v905_v41 = vpop.f32.mrf.mxu2 }
  0xed   : > { %v634_v44 = vpop.f32.mrf.mxu1  ;;  %v982_v52 = vadd.f32 %v905_v41, %v633_v36  ;;  %v1037_v53 = vpop.f32.mrf.mxu3  ;;  %v2865_v41 = vpack.c.bf16 %v762_v61, %v760_v16  ;;  %v763_v16 = vrot.slane %v3440_v2, 2  ;;  %v764_v61 = vrot.slane %v3441_v0, 2 }
  0xee   : > { %v635_v17 = vadd.f32 %v634_v44, %v2714_v62  ;;  %v2869_v44 = vpack.c.bf16 %v3441_v0, %v3440_v2  ;;  %v3446_v2 = vld [vmem:[#allocation3_spill] sm:$0xff] }
  0xef   : > { %v1114_v8 = vadd.f32 %v1037_v53, %v982_v52 }
  0xf0   : > { %v1181_v14 = vpop.f32.mrf.mxu0 }
  0xf1   : > { %v2860_v15 = vadd.f32 %v1179_v59, %v1114_v8  ;;  %v766_v8 = vrot.slane %v3443_v29, 2  ;;  %v3445_v29 = vld [vmem:[#allocation2_spill] sm:$0xff] }
  0xf3   : > { %3439 = vst [vmem:[#allocation38_spill] sm:$0xff] %v2860_v15  ;;  %v2894_v15 = vpack.c.bf16 %v3446_v2, %v3445_v29 }
  0xf4   : > { %v907_v23 = vpop.f32.mrf.mxu2 }
  0xf5   : > { %v637_v27 = vpop.f32.mrf.mxu1  ;;  %v983_v36 = vadd.f32 %v907_v23, %v635_v17  ;;  %v1039_v57 = vpop.f32.mrf.mxu3 }
  0xf6   : > { %v638_v62 = vadd.f32 %v637_v27, %v2732_v60 }
  0xf7   : > { %v1115_v1 = vadd.f32 %v1039_v57, %v983_v36  ;;  %v765_v36 = vsel %vm707_vm2, %v763_v16, %v764_v61  ;;  %v767_v57 = vsel %vm707_vm2, %v764_v61, %v766_v8  ;;  %v3449_v61 = vld [vmem:[#allocation4_spill] sm:$0xff] }
  0xf8   : > { %1999 = vmatmul.msk.bf16.gmra.mxu1 %vm432_vm1, %v2844_v56  ;;  %v1184_v59 = vpop.f32.mrf.mxu0 }
  0xf9   : > { %2019 = vmatmul.msk.bf16.gmra.mxu2 %vm432_vm1, %v2865_v41  ;;  %v2875_v52 = vadd.f32 %v1181_v14, %v1115_v1 }
  0xfa   : > { %2039 = vmatmul.msk.bf16.gmra.mxu3 %vm432_vm1, %v2869_v44 }
  0xfb   : > { %3442 = vst [vmem:[#allocation17_spill] sm:$0xff] %v2875_v52  ;;  %2059 = vmatmul.msk.bf16.gmra.mxu0 %vm432_vm1, %v2561_v39 }
  0xfc   : > { %v910_v60 = vpop.f32.mrf.mxu2 }
  0xfd   : > { %v639_v53 = vpop.f32.mrf.mxu1  ;;  %v984_v17 = vadd.f32 %v910_v60, %v638_v62  ;;  %v1042_v25 = vpop.f32.mrf.mxu3 }
  0xfe   : > { %v640_v18 = vadd.f32 %v639_v53, %v2767_v33  ;;  %v2890_v53 = vpack.c.bf16 %v767_v57, %v765_v36  ;;  %v768_v36 = vrot.slane %v3445_v29, 2  ;;  %v769_v57 = vrot.slane %v3446_v2, 2 }
  0xff   : > { %v1116_v14 = vadd.f32 %v1042_v25, %v984_v17 }
 0x100   : > { %v1186_v23 = vpop.f32.mrf.mxu0 }
 0x101   : > { %v2885_v27 = vadd.f32 %v1184_v59, %v1116_v14  ;;  %v771_v14 = vrot.slane %v3449_v61, 2 }
 0x103   : > { %3444 = vst [vmem:[#allocation18_spill] sm:$0xff] %v2885_v27 }
 0x104   : > { %v912_v1 = vpop.f32.mrf.mxu2 }
 0x105   : > { %v642_v52 = vpop.f32.mrf.mxu1  ;;  %v985_v62 = vadd.f32 %v912_v1, %v640_v18  ;;  %v1044_v60 = vpop.f32.mrf.mxu3 }
 0x106   : > { %v643_v33 = vadd.f32 %v642_v52, %v2791_v63  ;;  %v3448_v63 = vld [vmem:[#allocation6_spill] sm:$0xff] }
 0x107   : > { %v1117_v0 = vadd.f32 %v1044_v60, %v985_v62  ;;  %v770_v60 = vsel %vm707_vm2, %v768_v36, %v769_v57 }
 0x108   : > { %2000 = vmatmul.msk.bf16.gmra.mxu1 %vm432_vm1, %v2869_v44  ;;  %v1189_v59 = vpop.f32.mrf.mxu0 }
 0x109   : > { %2020 = vmatmul.msk.bf16.gmra.mxu2 %vm432_vm1, %v2890_v53  ;;  %v2900_v17 = vadd.f32 %v1186_v23, %v1117_v0  ;;  %v772_v0 = vsel %vm707_vm2, %v769_v57, %v771_v14  ;;  %v3456_v57 = vld [vmem:[#allocation9_spill] sm:$0xff] }
 0x10a   : > { %2040 = vmatmul.msk.bf16.gmra.mxu3 %vm432_vm1, %v2894_v15 }
 0x10b   : > { %3447 = vst [vmem:[#allocation19_spill] sm:$0xff] %v2900_v17  ;;  %2060 = vmatmul.msk.bf16.gmra.mxu0 %vm432_vm1, %v3448_v63  ;;  %v2914_v63 = vpack.c.bf16 %v772_v0, %v770_v60 }
 0x10c   : > { %v915_v52 = vpop.f32.mrf.mxu2 }
 0x10d   : > { %v644_v25 = vpop.f32.mrf.mxu1  ;;  %v986_v18 = vadd.f32 %v915_v52, %v643_v33  ;;  %v1047_v8 = vpop.f32.mrf.mxu3  ;;  %3451 = vst [vmem:[#allocation3_spill] sm:$0xff] %v2914_v63 }
 0x10e   : > { %v645_v16 = vadd.f32 %v644_v25, %v2808_v37  ;;  %v3452_v37 = vld [vmem:[#allocation7_spill] sm:$0xff]  ;;  %v3453_v25 = vld [vmem:[#allocation8_spill] sm:$0xff] }
 0x10f   : > { %v1118_v23 = vadd.f32 %v1047_v8, %v986_v18  ;;  %v2918_v61 = vpack.c.bf16 %v3453_v25, %v3452_v37  ;;  %v3455_v18 = vld [vmem:[#allocation11_spill] sm:$0xff]  ;;  %v773_v60 = vrot.slane %v3452_v37, 2  ;;  %v774_v0 = vrot.slane %v3453_v25, 2  ;;  %v3459_v37 = vld [vmem:[#allocation13_spill] sm:$0xff] }
 0x110   : > { %v1191_v1 = vpop.f32.mrf.mxu0 }
 0x111   : > { %v2910_v62 = vadd.f32 %v1189_v59, %v1118_v23  ;;  %v776_v23 = vrot.slane %v3456_v57, 2  ;;  %v3458_v57 = vld [vmem:[#allocation12_spill] sm:$0xff] }
 0x113   : > { %3450 = vst [vmem:[#allocation2_spill] sm:$0xff] %v2910_v62 }
 0x114   : > { %v917_v17 = vpop.f32.mrf.mxu2 }
 0x115   : > { %v647_v27 = vpop.f32.mrf.mxu1  ;;  %v987_v33 = vadd.f32 %v917_v17, %v645_v16  ;;  %v1049_v52 = vpop.f32.mrf.mxu3 }
 0x116   : > { %v648_v17 = vadd.f32 %v647_v27, %v2652_v3  ;;  %v777_v3 = vsel %vm707_vm2, %v774_v0, %v776_v23 }
 0x117   : > { %v1119_v29 = vadd.f32 %v1049_v52, %v987_v33 }
 0x118   : > { %2001 = vmatmul.msk.bf16.gmra.mxu1 %vm432_vm1, %v2894_v15  ;;  %v1194_v2 = vpop.f32.mrf.mxu0 }
 0x119   : > { %2021 = vmatmul.msk.bf16.gmra.mxu2 %vm432_vm1, %v2914_v63  ;;  %v2924_v59 = vadd.f32 %v1191_v1, %v1119_v29  ;;  %v775_v29 = vsel %vm707_vm2, %v773_v60, %v774_v0  ;;  %v2943_v63 = vpack.c.bf16 %v3459_v37, %v3458_v57  ;;  %v3462_v0 = vld [vmem:[#allocation14_spill] sm:$0xff] }
 0x11a   : > { %2041 = vmatmul.msk.bf16.gmra.mxu3 %vm432_vm1, %v2918_v61 }
 0x11b   : > { %3454 = vst [vmem:[#allocation4_spill] sm:$0xff] %v2924_v59  ;;  %2061 = vmatmul.msk.bf16.gmra.mxu0 %vm432_vm1, %v3455_v18  ;;  %v2939_v18 = vpack.c.bf16 %v777_v3, %v775_v29  ;;  %v778_v29 = vrot.slane %v3458_v57, 2  ;;  %v779_v3 = vrot.slane %v3459_v37, 2  ;;  %v2968_v57 = vpack.c.bf16 %v2507_v34, %v2495_v28 }
 0x11c   : > { %v920_v8 = vpop.f32.mrf.mxu2 }
 0x11d   : > { %v649_v16 = vpop.f32.mrf.mxu1  ;;  %v988_v14 = vadd.f32 %v920_v8, %v648_v17  ;;  %v1052_v36 = vpop.f32.mrf.mxu3 }
 0x11e   : > { %v650_v27 = vadd.f32 %v649_v16, %v2672_v20 }
 0x11f   : > { %v1120_v1 = vadd.f32 %v1052_v36, %v988_v14 }
 0x120   : > { %v1196_v33 = vpop.f32.mrf.mxu0 }
 0x121   : > { %v2934_v52 = vadd.f32 %v1194_v2, %v1120_v1  ;;  %v781_v1 = vrot.slane %v3462_v0, 2  ;;  %v3465_v0 = vld [vmem:[#allocation20_spill] sm:$0xff] }
 0x123   : > { %3457 = vst [vmem:[#allocation7_spill] sm:$0xff] %v2934_v52 }
 0x124   : > { %v922_v59 = vpop.f32.mrf.mxu2 }
 0x125   : > { %v652_v62 = vpop.f32.mrf.mxu1  ;;  %v989_v17 = vadd.f32 %v922_v59, %v650_v27  ;;  %v1054_v8 = vpop.f32.mrf.mxu3  ;;  %v3461_v59 = vld [vmem:[#allocation16_spill] sm:$0xff] }
 0x126   : > { %v653_v20 = vadd.f32 %v652_v62, %v2685_v7  ;;  %v782_v7 = vsel %vm707_vm2, %v779_v3, %v781_v1  ;;  %v786_v1 = vrot.slane %v3465_v0, 2 }
 0x127   : > { %v1121_v25 = vadd.f32 %v1054_v8, %v989_v17  ;;  %v780_v8 = vsel %vm707_vm2, %v778_v29, %v779_v3 }
 0x128   : > { %2002 = vmatmul.msk.bf16.gmra.mxu1 %vm432_vm1, %v2918_v61  ;;  %v1199_v2 = vpop.f32.mrf.mxu0  ;;  %v2964_v52 = vpack.c.bf16 %v782_v7, %v780_v8  ;;  %v784_v8 = vrot.slane %v2507_v34, 2  ;;  %v2988_v7 = vld [vmem:[%s2242_s16 + $0x188] sm:$0xff] }
 0x129   : > { %2022 = vmatmul.msk.bf16.gmra.mxu2 %vm432_vm1, %v2939_v18  ;;  %v2949_v14 = vadd.f32 %v1196_v33, %v1121_v25 }
 0x12a   : > { %2042 = vmatmul.msk.bf16.gmra.mxu3 %vm432_vm1, %v2943_v63  ;;  %v787_v34 = vsel %vm707_vm2, %v784_v8, %v786_v1 }
 0x12b   : > { %3460 = vst [vmem:[#allocation8_spill] sm:$0xff] %v2949_v14  ;;  %2062 = vmatmul.msk.bf16.gmra.mxu0 %vm432_vm1, %v3461_v59 }
 0x12c   : > { %v925_v16 = vpop.f32.mrf.mxu2 }
 0x12d   : > { %v654_v36 = vpop.f32.mrf.mxu1  ;;  %v990_v23 = vadd.f32 %v925_v16, %v653_v20  ;;  %v1057_v60 = vpop.f32.mrf.mxu3 }
 0x12e   : > { %v655_v62 = vadd.f32 %v654_v36, %v2707_v13 }
 0x12f   : > { %v1122_v33 = vadd.f32 %v1057_v60, %v990_v23 }
 0x130   : > { %v1201_v27 = vpop.f32.mrf.mxu0 }
 0x131   : > { %v2959_v17 = vadd.f32 %v1199_v2, %v1122_v33  ;;  %v783_v33 = vrot.slane %v2495_v28, 2 }
 0x133   : > { %3463 = vst [vmem:[#allocation9_spill] sm:$0xff] %v2959_v17  ;;  %v785_v28 = vsel %vm707_vm2, %v783_v33, %v784_v8 }
 0x134   : > { %v927_v25 = vpop.f32.mrf.mxu2 }
 0x135   : > { %v657_v14 = vpop.f32.mrf.mxu1  ;;  %v991_v20 = vadd.f32 %v927_v25, %v655_v62  ;;  %v1059_v16 = vpop.f32.mrf.mxu3  ;;  %v2991_v62 = vld [vmem:[%s2242_s16 + $0x190] sm:$0x3] }
 0x136   : > { %v658_v36 = vadd.f32 %v657_v14, %v2720_v50 }
 0x137   : > { %v1123_v37 = vadd.f32 %v1059_v16, %v991_v20  ;;  %v1148_v20 = vrot.slane %v2988_v7, 1  ;;  %v1150_v16 = vrot.slane %v2991_v62, 1 }
 0x138   : > { %2003 = vmatmul.msk.bf16.gmra.mxu1 %vm432_vm1, %v2943_v63  ;;  %v1204_v2 = vpop.f32.mrf.mxu0 }
 0x139   : > { %2023 = vmatmul.msk.bf16.gmra.mxu2 %vm432_vm1, %v2964_v52  ;;  %v2974_v13 = vadd.f32 %v1201_v27, %v1123_v37  ;;  %v2985_v27 = vld [vmem:[%s2242_s16 + $0x180] sm:$0xff] }
 0x13a   : > { %2043 = vmatmul.msk.bf16.gmra.mxu3 %vm432_vm1, %v2968_v57  ;;  %v1147_v25 = vrot.slane %v2985_v27, 1 }
 0x13b   : > { %3464 = vst [vmem:[#allocation12_spill] sm:$0xff] %v2974_v13  ;;  %2063 = vmatmul.msk.bf16.gmra.mxu0 %vm432_vm1, %v2565_v47  ;;  %v1151_v47 = vsel %vm296_vm0, %v1148_v20, %v1150_v16 }
 0x13c   : > { %v930_v23 = vpop.f32.mrf.mxu2 }
 0x13d   : > { %v659_v60 = vpop.f32.mrf.mxu1  ;;  %v992_v29 = vadd.f32 %v930_v23, %v658_v36  ;;  %v1062_v3 = vpop.f32.mrf.mxu3 }
 0x13e   : > { %v660_v36 = vadd.f32 %v659_v60, %v2748_v21 }
 0x13f   : > { %v1124_v50 = vadd.f32 %v1062_v3, %v992_v29  ;;  %v3001_v29 = vpack.c.bf16 %v787_v34, %v785_v28  ;;  %v1149_v3 = vsel %vm296_vm0, %v1147_v25, %v1148_v20 }
 0x140   : > { %v1206_v14 = vpop.f32.mrf.mxu0  ;;  %v3011_v1 = vpack.c.bf16 %v1151_v47, %v1149_v3 }
 0x141   : > { %v2996_v37 = vadd.f32 %v1204_v2, %v1124_v50  ;;  %v3007_v2 = vpack.c.bf16 %v2988_v7, %v2985_v27 }
 0x144   : > { %v932_v23 = vpop.f32.mrf.mxu2 }
 0x145   : > { %v662_v0 = vpop.f32.mrf.mxu1  ;;  %v993_v13 = vadd.f32 %v932_v23, %v660_v36  ;;  %v1064_v17 = vpop.f32.mrf.mxu3 }
 0x146   : > { %v663_v33 = vadd.f32 %v662_v0, %v2779_v51 }
 0x147   : > { %v1125_v50 = vadd.f32 %v1064_v17, %v993_v13 }
 0x148   : > { %2004 = vmatmul.msk.bf16.gmra.mxu1 %vm432_vm1, %v2968_v57  ;;  %v1209_v21 = vpop.f32.mrf.mxu0 }
 0x149   : > { %2024 = vmatmul.msk.bf16.gmra.mxu2 %vm432_vm1, %v3001_v29  ;;  %v3015_v60 = vadd.f32 %v1206_v14, %v1125_v50 }
 0x14a   : > { %2044 = vmatmul.msk.bf16.gmra.mxu3 %vm432_vm1, %v3007_v2 }
 0x14b   : > { %2064 = vmatmul.msk.bf16.gmra.mxu0 %vm432_vm1, %v3011_v1 }
 0x14c   : > { %v935_v17 = vpop.f32.mrf.mxu2 }
 0x14d   : > { %v664_v13 = vpop.f32.mrf.mxu1  ;;  %v994_v8 = vadd.f32 %v935_v17, %v663_v33  ;;  %v1067_v25 = vpop.f32.mrf.mxu3 }
 0x14e   : > { %v665_v28 = vadd.f32 %v664_v13, %v2801_v42 }
 0x14f   : > { %v1126_v47 = vadd.f32 %v1067_v25, %v994_v8 }
 0x150   : > { %v1211_v20 = vpop.f32.mrf.mxu0 }
 0x151   : > { %v3022_v16 = vadd.f32 %v1209_v21, %v1126_v47 }
 0x154   : > { %v937_v14 = vpop.f32.mrf.mxu2 }
 0x155   : > { %v667_v34 = vpop.f32.mrf.mxu1  ;;  %v995_v36 = vadd.f32 %v937_v14, %v665_v28  ;;  %v1069_v23 = vpop.f32.mrf.mxu3 }
 0x156   : > { %v668_v50 = vadd.f32 %v667_v34, %v2670_v19 }
 0x157   : > { %v1127_v3 = vadd.f32 %v1069_v23, %v995_v36 }
 0x158   : > { %2069 = vmatmul.msk.bf16.vlgmr.msra.gmra.mxu1 %vm432_vm1, %v2596_v9  ;;  %v1214_v51 = vpop.f32.mrf.mxu0 }
 0x159   : > { %2089 = vmatmul.msk.bf16.vlgmr.msra.gmra.mxu2 %vm432_vm1, %v2600_v4  ;;  %v3029_v0 = vadd.f32 %v1211_v20, %v1127_v3 }
 0x15a   : > { %2109 = vmatmul.msk.bf16.vlgmr.msra.gmra.mxu3 %vm432_vm1, %v2473_v10 }
 0x15b   : > { %2129 = vmatmul.msk.bf16.vlgmr.msra.gmra.mxu0 %vm432_vm1, %v2614_v12 }
 0x15c   : > { %v940_v42 = vpop.f32.mrf.mxu2 }
 0x15d   : > { %v669_v21 = vpop.f32.mrf.mxu1  ;;  %v996_v33 = vadd.f32 %v940_v42, %v668_v50  ;;  %v1072_v17 = vpop.f32.mrf.mxu3 }
 0x15e   : > { %v670_v4 = vadd.f32 %v669_v21, %v2683_v6 }
 0x15f   : > { %v1128_v13 = vadd.f32 %v1072_v17, %v996_v33 }
 0x160   : > { %v1216_v9 = vpop.f32.mrf.mxu0 }
 0x161   : > { %v3036_v8 = vadd.f32 %v1214_v51, %v1128_v13 }
 0x164   : > { %v942_v25 = vpop.f32.mrf.mxu2 }
 0x165   : > { %v672_v47 = vpop.f32.mrf.mxu1  ;;  %v997_v20 = vadd.f32 %v942_v25, %v670_v4  ;;  %v1074_v28 = vpop.f32.mrf.mxu3 }
 0x166   : > { %v673_v34 = vadd.f32 %v672_v47, %v2705_v55 }
 0x167   : > { %v1129_v10 = vadd.f32 %v1074_v28, %v997_v20 }
 0x168   : > { %2070 = vmatmul.msk.bf16.gmra.mxu1 %vm432_vm1, %v2614_v12  ;;  %v1219_v19 = vpop.f32.mrf.mxu0 }
 0x169   : > { %2090 = vmatmul.msk.bf16.gmra.mxu2 %vm432_vm1, %v2618_v43  ;;  %v3043_v14 = vadd.f32 %v1216_v9, %v1129_v10 }
 0x16a   : > { %2110 = vmatmul.msk.bf16.gmra.mxu3 %vm432_vm1, %v2569_v31 }
 0x16b   : > { %2130 = vmatmul.msk.bf16.gmra.mxu0 %vm432_vm1, %v2633_v26 }
 0x16c   : > { %v945_v6 = vpop.f32.mrf.mxu2 }
 0x16d   : > { %v674_v36 = vpop.f32.mrf.mxu1  ;;  %v998_v23 = vadd.f32 %v945_v6, %v673_v34  ;;  %v1077_v3 = vpop.f32.mrf.mxu3 }
 0x16e   : > { %v675_v43 = vadd.f32 %v674_v36, %v2718_v35 }
 0x16f   : > { %v1130_v51 = vadd.f32 %v1077_v3, %v998_v23 }
 0x170   : > { %v1221_v12 = vpop.f32.mrf.mxu0 }
 0x171   : > { %v3050_v50 = vadd.f32 %v1219_v19, %v1130_v51 }
 0x174   : > { %v947_v42 = vpop.f32.mrf.mxu2 }
 0x175   : > { %v677_v21 = vpop.f32.mrf.mxu1  ;;  %v999_v33 = vadd.f32 %v947_v42, %v675_v43  ;;  %v1079_v17 = vpop.f32.mrf.mxu3 }
 0x176   : > { %v678_v9 = vadd.f32 %v677_v21, %v2746_v5  ;;  %v3466_v21 = vld [vmem:[#allocation35_spill] sm:$0xff] }
 0x177   : > { %v1131_v31 = vadd.f32 %v1079_v17, %v999_v33 }
 0x178   : > { %2071 = vmatmul.msk.bf16.gmra.mxu1 %vm432_vm1, %v2633_v26  ;;  %v1224_v55 = vpop.f32.mrf.mxu0 }
 0x179   : > { %2091 = vmatmul.msk.bf16.gmra.mxu2 %vm432_vm1, %v2637_v30  ;;  %v3057_v13 = vadd.f32 %v1221_v12, %v1131_v31 }
 0x17a   : > { %2111 = vmatmul.msk.bf16.gmra.mxu3 %vm432_vm1, %v2286_v38 }
 0x17b   : > { %2131 = vmatmul.msk.bf16.gmra.mxu0 %vm432_vm1, %v2654_v49 }
 0x17c   : > { %v950_v35 = vpop.f32.mrf.mxu2 }
 0x17d   : > { %v679_v4 = vpop.f32.mrf.mxu1  ;;  %v1000_v25 = vadd.f32 %v950_v35, %v678_v9  ;;  %v1082_v47 = vpop.f32.mrf.mxu3  ;;  %v3467_v9 = vld [vmem:[#allocation25_spill] sm:$0xff] }
 0x17e   : > { %v680_v30 = vadd.f32 %v679_v4, %v2777_v45  ;;  %v3468_v4 = vld [vmem:[#allocation15_spill] sm:$0xff] }
 0x17f   : > { %v1132_v20 = vadd.f32 %v1082_v47, %v1000_v25  ;;  %v3469_v25 = vld [vmem:[#allocation23_spill] sm:$0xff] }
 0x180   : > { %v1226_v26 = vpop.f32.mrf.mxu0 }
 0x181   : > { %v3064_v28 = vadd.f32 %v1224_v55, %v1132_v20  ;;  %v3470_v20 = vld [vmem:[#allocation28_spill] sm:$0xff] }
 0x184   : > { %v952_v10 = vpop.f32.mrf.mxu2 }
 0x185   : > { %v682_v19 = vpop.f32.mrf.mxu1  ;;  %v1001_v34 = vadd.f32 %v952_v10, %v680_v30  ;;  %v1084_v6 = vpop.f32.mrf.mxu3 }
 0x186   : > { %v683_v23 = vadd.f32 %v682_v19, %v2799_v54 }
 0x187   : > { %v1133_v38 = vadd.f32 %v1084_v6, %v1001_v34 }
 0x188   : > { %2072 = vmatmul.msk.bf16.gmra.mxu1 %vm432_vm1, %v2654_v49  ;;  %v1229_v5 = vpop.f32.mrf.mxu0 }
 0x189   : > { %2092 = vmatmul.msk.bf16.gmra.mxu2 %vm432_vm1, %v2658_v22  ;;  %v3071_v36 = vadd.f32 %v1226_v26, %v1133_v38  ;;  %v3471_v38 = vld [vmem:[#allocation24_spill] sm:$0xff] }
 0x18a   : > { %2112 = vmatmul.msk.bf16.gmra.mxu3 %vm432_vm1, %v2383_v32 }
 0x18b   : > { %2132 = vmatmul.msk.bf16.gmra.mxu0 %vm432_vm1, %v2689_v11 }
 0x18c   : > { %v955_v45 = vpop.f32.mrf.mxu2 }
 0x18d   : > { %v684_v3 = vpop.f32.mrf.mxu1  ;;  %v1002_v51 = vadd.f32 %v955_v45, %v683_v23  ;;  %v1087_v12 = vpop.f32.mrf.mxu3 }
 0x18e   : > { %v685_v22 = vadd.f32 %v684_v3, %v3466_v21 }
 0x18f   : > { %v1134_v43 = vadd.f32 %v1087_v12, %v1002_v51 }
 0x190   : > { %v1231_v49 = vpop.f32.mrf.mxu0 }
 0x191   : > { %v3078_v42 = vadd.f32 %v1229_v5, %v1134_v43 }
 0x194   : > { %v957_v33 = vpop.f32.mrf.mxu2 }
 0x195   : > { %v687_v17 = vpop.f32.mrf.mxu1  ;;  %v1003_v31 = vadd.f32 %v957_v33, %v685_v22  ;;  %v1089_v55 = vpop.f32.mrf.mxu3  ;;  %v3473_v22 = vld [vmem:[#allocation21_spill] sm:$0xff]  ;;  %v3474_v33 = vld [vmem:[#allocation26_spill] sm:$0xff] }
 0x196   : > { %v688_v47 = vadd.f32 %v687_v17, %v3469_v25 }
 0x197   : > { %v1135_v32 = vadd.f32 %v1089_v55, %v1003_v31  ;;  %v3475_v31 = vld [vmem:[#allocation32_spill] sm:$0xff] }
 0x198   : > { %2073 = vmatmul.msk.bf16.gmra.mxu1 %vm432_vm1, %v2689_v11  ;;  %v1234_v54 = vpop.f32.mrf.mxu0 }
 0x199   : > { %2093 = vmatmul.msk.bf16.gmra.mxu2 %vm432_vm1, %v3467_v9  ;;  %v3085_v35 = vadd.f32 %v1231_v49, %v1135_v32  ;;  %v3472_v49 = vld [vmem:[#allocation29_spill] sm:$0xff] }
 0x19a   : > { %2113 = vmatmul.msk.bf16.gmra.mxu3 %vm432_vm1, %v3468_v4 }
 0x19b   : > { %2133 = vmatmul.msk.bf16.gmra.mxu0 %vm432_vm1, %v3470_v20 }
 0x19c   : > { %v960_v26 = vpop.f32.mrf.mxu2 }
 0x19d   : > { %v689_v30 = vpop.f32.mrf.mxu1  ;;  %v1004_v10 = vadd.f32 %v960_v26, %v688_v47  ;;  %v1092_v19 = vpop.f32.mrf.mxu3 }
 0x19e   : > { %v690_v5 = vadd.f32 %v689_v30, %v3471_v38 }
 0x19f   : > { %v1136_v34 = vadd.f32 %v1092_v19, %v1004_v10 }
 0x1a0   : > { %v1236_v11 = vpop.f32.mrf.mxu0 }
 0x1a1   : > { %v3092_v6 = vadd.f32 %v1234_v54, %v1136_v34 }
 0x1a4   : > { %v962_v23 = vpop.f32.mrf.mxu2 }
 0x1a5   : > { %v692_v45 = vpop.f32.mrf.mxu1  ;;  %v1005_v3 = vadd.f32 %v962_v23, %v690_v5  ;;  %v1094_v51 = vpop.f32.mrf.mxu3  ;;  %v3477_v5 = vld [vmem:[#allocation33_spill] sm:$0xff] }
 0x1a6   : > { %v693_v17 = vadd.f32 %v692_v45, %v3474_v33  ;;  %v3478_v45 = vld [vmem:[#allocation5_spill] sm:$0xff] }
 0x1a7   : > { %v1137_v12 = vadd.f32 %v1094_v51, %v1005_v3  ;;  %v3479_v3 = vld [vmem:[#allocation30_spill] sm:$0xff] }
 0x1a8   : > { %2074 = vmatmul.msk.bf16.gmra.mxu1 %vm432_vm1, %v3470_v20  ;;  %v1239_v43 = vpop.f32.mrf.mxu0  ;;  %v3476_v20 = vld [vmem:[#allocation27_spill] sm:$0xff] }
 0x1a9   : > { %2094 = vmatmul.msk.bf16.gmra.mxu2 %vm432_vm1, %v3472_v49  ;;  %v3099_v21 = vadd.f32 %v1236_v11, %v1137_v12  ;;  %v3480_v12 = vld [vmem:[#allocation37_spill] sm:$0xff] }
 0x1aa   : > { %2114 = vmatmul.msk.bf16.gmra.mxu3 %vm432_vm1, %v3473_v22 }
 0x1ab   : > { %2134 = vmatmul.msk.bf16.gmra.mxu0 %vm432_vm1, %v3475_v31 }
 0x1ac   : > { %v965_v55 = vpop.f32.mrf.mxu2 }
 0x1ad   : > { %v694_v32 = vpop.f32.mrf.mxu1  ;;  %v1006_v54 = vadd.f32 %v965_v55, %v693_v17  ;;  %v1097_v9 = vpop.f32.mrf.mxu3 }
 0x1ae   : > { %v695_v26 = vadd.f32 %v694_v32, %v3476_v20  ;;  %v3481_v32 = vld [vmem:[#allocation31_spill] sm:$0xff] }
 0x1af   : > { %v1138_v4 = vadd.f32 %v1097_v9, %v1006_v54 }
 0x1b0   : > { %v1241_v25 = vpop.f32.mrf.mxu0 }
 0x1b1   : > { %v3106_v47 = vadd.f32 %v1239_v43, %v1138_v4 }
 0x1b4   : > { %v967_v30 = vpop.f32.mrf.mxu2 }
 0x1b5   : > { %v697_v10 = vpop.f32.mrf.mxu1  ;;  %v1007_v19 = vadd.f32 %v967_v30, %v695_v26  ;;  %v1099_v34 = vpop.f32.mrf.mxu3 }
 0x1b6   : > { %v698_v51 = vadd.f32 %v697_v10, %v3479_v3 }
 0x1b7   : > { %v1139_v11 = vadd.f32 %v1099_v34, %v1007_v19  ;;  %v3482_v19 = vld [vmem:[#allocation10_spill] sm:$0xff] }
 0x1b8   : > { %2075 = vmatmul.msk.bf16.gmra.mxu1 %vm432_vm1, %v3475_v31  ;;  %v1244_v38 = vpop.f32.mrf.mxu0  ;;  %v3483_v34 = vld [vmem:[#allocation34_spill] sm:$0xff] }
 0x1b9   : > { %2095 = vmatmul.msk.bf16.gmra.mxu2 %vm432_vm1, %v3477_v5  ;;  %v3113_v23 = vadd.f32 %v1241_v25, %v1139_v11 }
 0x1ba   : > { %2115 = vmatmul.msk.bf16.gmra.mxu3 %vm432_vm1, %v3478_v45 }
 0x1bb   : > { %2135 = vmatmul.msk.bf16.gmra.mxu0 %vm432_vm1, %v3480_v12 }
 0x1bc   : > { %v970_v43 = vpop.f32.mrf.mxu2 }
 0x1bd   : > { %v699_v49 = vpop.f32.mrf.mxu1  ;;  %v1008_v22 = vadd.f32 %v970_v43, %v698_v51  ;;  %v1102_v33 = vpop.f32.mrf.mxu3 }
 0x1be   : > { %v700_v54 = vadd.f32 %v699_v49, %v3481_v32  ;;  %v3484_v49 = vld [vmem:[#allocation36_spill] sm:$0xff] }
 0x1bf   : > { %v1140_v17 = vadd.f32 %v1102_v33, %v1008_v22 }
 0x1c0   : > { %v1246_v31 = vpop.f32.mrf.mxu0 }
 0x1c1   : > { %v3120_v55 = vadd.f32 %v1244_v38, %v1140_v17 }
 0x1c4   : > { %v972_v9 = vpop.f32.mrf.mxu2 }
 0x1c5   : > { %v702_v4 = vpop.f32.mrf.mxu1  ;;  %v1009_v25 = vadd.f32 %v972_v9, %v700_v54  ;;  %v1104_v20 = vpop.f32.mrf.mxu3 }
 0x1c6   : > { %v703_v11 = vadd.f32 %v702_v4, %v3483_v34 }
 0x1c7   : > { %v1141_v26 = vadd.f32 %v1104_v20, %v1009_v25 }
 0x1c8   : > { %2076 = vmatmul.msk.bf16.gmra.mxu1 %vm432_vm1, %v3480_v12  ;;  %v1249_v30 = vpop.f32.mrf.mxu0 }
 0x1c9   : > { %2096 = vmatmul.msk.bf16.gmra.mxu2 %vm432_vm1, %v2821_v24  ;;  %v3127_v10 = vadd.f32 %v1246_v31, %v1141_v26 }
 0x1ca   : > { %2116 = vmatmul.msk.bf16.gmra.mxu3 %vm432_vm1, %v3482_v19 }
 0x1cb   : > { %2136 = vmatmul.msk.bf16.gmra.mxu0 %vm432_vm1, %v2840_v46 }
 0x1cc   : > { %v975_v38 = vpop.f32.mrf.mxu2 }
 0x1cd   : > { %v704_v5 = vpop.f32.mrf.mxu1  ;;  %v1010_v45 = vadd.f32 %v975_v38, %v703_v11  ;;  %v1107_v3 = vpop.f32.mrf.mxu3 }
 0x1ce   : > { %v705_v24 = vadd.f32 %v704_v5, %v3484_v49  ;;  %v3485_v49 = vld [vmem:[#allocation38_spill] sm:$0xff] }
 0x1cf   : > { %v1142_v51 = vadd.f32 %v1107_v3, %v1010_v45 }
 0x1d0   : > { %v1251_v12 = vpop.f32.mrf.mxu0 }
 0x1d1   : > { %v3134_v43 = vadd.f32 %v1249_v30, %v1142_v51 }
 0x1d4   : > { %v977_v22 = vpop.f32.mrf.mxu2 }
 0x1d5   : > { %v1313_v33 = vpop.f32.mrf.mxu1  ;;  %v1011_v17 = vadd.f32 %v977_v22, %v705_v24  ;;  %v1109_v31 = vpop.f32.mrf.mxu3 }
 0x1d6   : > { %v1393_v4 = vadd.f32 %v1313_v33, %v2835_v40 }
 0x1d7   : > { %v1143_v32 = vadd.f32 %v1109_v31, %v1011_v17 }
 0x1d8   : > { %2077 = vmatmul.msk.bf16.gmra.mxu1 %vm432_vm1, %v2840_v46  ;;  %v1726_v54 = vpop.f32.mrf.mxu0 }
 0x1d9   : > { %2097 = vmatmul.msk.bf16.gmra.mxu2 %vm432_vm1, %v2844_v56  ;;  %v3141_v9 = vadd.f32 %v1251_v12, %v1143_v32  ;;  %v3152_v56 = vld [vmem:[%s3358_s2] ss:$0 sm:$0xff] }
 0x1da   : > { %2117 = vmatmul.msk.bf16.gmra.mxu3 %vm432_vm1, %v2465_v48 }
 0x1db   : > { %2137 = vmatmul.msk.bf16.gmra.mxu0 %vm432_vm1, %v2865_v41 }
 0x1dc   : > { %v1445_v25 = vpop.f32.mrf.mxu2 }
 0x1dd   : > { %v1315_v20 = vpop.f32.mrf.mxu1  ;;  %v1525_v26 = vadd.f32 %v1445_v25, %v1393_v4  ;;  %v1587_v30 = vpop.f32.mrf.mxu3 }
 0x1de   : > { %v1394_v40 = vadd.f32 %v1315_v20, %v2850_v58 }
 0x1df   : > { %v1667_v46 = vadd.f32 %v1587_v30, %v1525_v26 }
 0x1e0   : > { %v1728_v34 = vpop.f32.mrf.mxu0 }
 0x1e1   : > { %v1806_v19 = vadd.f32 %v1726_v54, %v1667_v46 }
 0x1e3   : > { %v1842_v48 = vadd.f32 %v3152_v56, %v1806_v19 }
 0x1e4   : > { %v1447_v11 = vpop.f32.mrf.mxu2 }
 0x1e5   : > { %v1318_v38 = vpop.f32.mrf.mxu1  ;;  %1874 = vst.msk [vmem:[%s3157_s22] sm:$0xff] %vm432_vm1, %v1842_v48  ;;  %v1526_v5 = vadd.f32 %v1447_v11, %v1394_v40  ;;  %v1589_v45 = vpop.f32.mrf.mxu3  ;;  %v3487_v48 = vld [vmem:[#allocation6_spill] sm:$0xff] }
 0x1e6   : > { %v1395_v24 = vadd.f32 %v1318_v38, %v3485_v49  ;;  %v3488_v11 = vld [vmem:[#allocation18_spill] sm:$0xff] }
 0x1e7   : > { %v1668_v3 = vadd.f32 %v1589_v45, %v1526_v5  ;;  %v3489_v5 = vld [vmem:[#allocation3_spill] sm:$0xff] }
 0x1e8   : > { %2078 = vmatmul.msk.bf16.gmra.mxu1 %vm432_vm1, %v2865_v41  ;;  %v1731_v12 = vpop.f32.mrf.mxu0 }
 0x1e9   : > { %v1807_v51 = vadd.f32 %v1728_v34, %v1668_v3  ;;  %2098 = vmatmul.msk.bf16.gmra.mxu2 %vm432_vm1, %v2869_v44 }
 0x1ea   : > { %2118 = vmatmul.msk.bf16.gmra.mxu3 %vm432_vm1, %v2561_v39  ;;  %v3486_v39 = vld [vmem:[#allocation17_spill] sm:$0xff] }
 0x1eb   : > { %v1843_v58 = vadd.f32 %v3152_v56, %v1807_v51  ;;  %2138 = vmatmul.msk.bf16.gmra.mxu0 %vm432_vm1, %v2890_v53 }
 0x1ec   : > { %v1450_v22 = vpop.f32.mrf.mxu2 }
 0x1ed   : > { %v1320_v33 = vpop.f32.mrf.mxu1  ;;  %1875 = vst.msk [vmem:[%s3157_s22 + $0x8] sm:$0xff] %vm432_vm1, %v1843_v58  ;;  %v1527_v41 = vadd.f32 %v1450_v22, %v1395_v24  ;;  %v1592_v17 = vpop.f32.mrf.mxu3  ;;  %v3490_v24 = vld [vmem:[#allocation19_spill] sm:$0xff] }
 0x1ee   : > { %v1396_v4 = vadd.f32 %v1320_v33, %v3486_v39  ;;  %v3491_v39 = vld [vmem:[#allocation11_spill] sm:$0xff] }
 0x1ef   : > { %v1669_v31 = vadd.f32 %v1592_v17, %v1527_v41 }
 0x1f0   : > { %v1733_v44 = vpop.f32.mrf.mxu0 }
 0x1f1   : > { %v1808_v32 = vadd.f32 %v1731_v12, %v1669_v31 }
 0x1f3   : > { %v1844_v54 = vadd.f32 %v3152_v56, %v1808_v32 }
 0x1f4   : > { %v1452_v25 = vpop.f32.mrf.mxu2 }
 0x1f5   : > { %v1323_v20 = vpop.f32.mrf.mxu1  ;;  %1876 = vst.msk [vmem:[%s3157_s22 + $0x10] sm:$0xff] %vm432_vm1, %v1844_v54  ;;  %v1528_v26 = vadd.f32 %v1452_v25, %v1396_v4  ;;  %v1594_v30 = vpop.f32.mrf.mxu3  ;;  %v3492_v25 = vld [vmem:[#allocation2_spill] sm:$0xff] }
 0x1f6   : > { %v1397_v38 = vadd.f32 %v1323_v20, %v3488_v11  ;;  %v3493_v11 = vld [vmem:[#allocation4_spill] sm:$0xff] }
 0x1f7   : > { %v1670_v46 = vadd.f32 %v1594_v30, %v1528_v26 }
 0x1f8   : > { %2079 = vmatmul.msk.bf16.gmra.mxu1 %vm432_vm1, %v2890_v53  ;;  %v1736_v34 = vpop.f32.mrf.mxu0 }
 0x1f9   : > { %v1809_v19 = vadd.f32 %v1733_v44, %v1670_v46  ;;  %2099 = vmatmul.msk.bf16.gmra.mxu2 %vm432_vm1, %v2894_v15 }
 0x1fa   : > { %2119 = vmatmul.msk.bf16.gmra.mxu3 %vm432_vm1, %v3487_v48 }
 0x1fb   : > { %v1845_v40 = vadd.f32 %v3152_v56, %v1809_v19  ;;  %2139 = vmatmul.msk.bf16.gmra.mxu0 %vm432_vm1, %v3489_v5 }
 0x1fc   : > { %v1455_v45 = vpop.f32.mrf.mxu2 }
 0x1fd   : > { %v1325_v3 = vpop.f32.mrf.mxu1  ;;  %1877 = vst.msk [vmem:[%s3157_s22 + $0x18] sm:$0xff] %vm432_vm1, %v1845_v40  ;;  %v1529_v53 = vadd.f32 %v1455_v45, %v1397_v38  ;;  %v1597_v51 = vpop.f32.mrf.mxu3 }
 0x1fe   : > { %v1398_v22 = vadd.f32 %v1325_v3, %v3490_v24  ;;  %v1286_v3 = vrot.slane %v2985_v27, 2 }
 0x1ff   : > { %v1671_v12 = vadd.f32 %v1597_v51, %v1529_v53  ;;  %v1287_v53 = vrot.slane %v2988_v7, 2 }
 0x200   : > { %v1738_v15 = vpop.f32.mrf.mxu0 }
 0x201   : > { %v1810_v58 = vadd.f32 %v1736_v34, %v1671_v12  ;;  %v1288_v27 = vsel %vm707_vm2, %v1286_v3, %v1287_v53 }
 0x203   : > { %v1846_v49 = vadd.f32 %v3152_v56, %v1810_v58 }
 0x204   : > { %v1457_v33 = vpop.f32.mrf.mxu2 }
 0x205   : > { %v1328_v41 = vpop.f32.mrf.mxu1  ;;  %1878 = vst.msk [vmem:[%s3157_s22 + $0x20] sm:$0xff] %vm432_vm1, %v1846_v49  ;;  %v1530_v17 = vadd.f32 %v1457_v33, %v1398_v22  ;;  %v1599_v31 = vpop.f32.mrf.mxu3 }
 0x206   : > { %v1399_v20 = vadd.f32 %v1328_v41, %v3492_v25 }
 0x207   : > { %v1672_v32 = vadd.f32 %v1599_v31, %v1530_v17 }
 0x208   : > { %2080 = vmatmul.msk.bf16.gmra.mxu1 %vm432_vm1, %v3489_v5  ;;  %v1741_v54 = vpop.f32.mrf.mxu0 }
 0x209   : > { %v1811_v44 = vadd.f32 %v1738_v15, %v1672_v32  ;;  %2100 = vmatmul.msk.bf16.gmra.mxu2 %vm432_vm1, %v2918_v61  ;;  %v1289_v15 = vrot.slane %v2991_v62, 2 }
 0x20a   : > { %2120 = vmatmul.msk.bf16.gmra.mxu3 %vm432_vm1, %v3491_v39  ;;  %v3495_v39 = vld [vmem:[#allocation8_spill] sm:$0xff] }
 0x20b   : > { %v1847_v4 = vadd.f32 %v3152_v56, %v1811_v44  ;;  %2140 = vmatmul.msk.bf16.gmra.mxu0 %vm432_vm1, %v2939_v18  ;;  %v1290_v7 = vsel %vm707_vm2, %v1287_v53, %v1289_v15 }
 0x20c   : > { %v1460_v26 = vpop.f32.mrf.mxu2  ;;  %v3222_v22 = vpack.c.bf16 %v1290_v7, %v1288_v27 }
 0x20d   : > { %v1330_v30 = vpop.f32.mrf.mxu1  ;;  %1879 = vst.msk [vmem:[%s3157_s22 + $0x28] sm:$0xff] %vm432_vm1, %v1847_v4  ;;  %v1531_v46 = vadd.f32 %v1460_v26, %v1399_v20  ;;  %v1602_v19 = vpop.f32.mrf.mxu3 }
 0x20e   : > { %v1400_v38 = vadd.f32 %v1330_v30, %v3493_v11 }
 0x20f   : > { %v1673_v34 = vadd.f32 %v1602_v19, %v1531_v46 }
 0x210   : > { %v1743_v61 = vpop.f32.mrf.mxu0 }
 0x211   : > { %v1812_v48 = vadd.f32 %v1741_v54, %v1673_v34 }
 0x213   : > { %v1848_v40 = vadd.f32 %v3152_v56, %v1812_v48  ;;  %v3496_v48 = vld [vmem:[#allocation22_spill] sm:$0xff] }
 0x214   : > { %v1462_v5 = vpop.f32.mrf.mxu2 }
 0x215   : > { %v1333_v45 = vpop.f32.mrf.mxu1  ;;  %1880 = vst.msk [vmem:[%s3157_s22 + $0x30] sm:$0xff] %vm432_vm1, %v1848_v40  ;;  %v1532_v51 = vadd.f32 %v1462_v5, %v1400_v38  ;;  %v1604_v12 = vpop.f32.mrf.mxu3  ;;  %v3497_v40 = vld [vmem:[#allocation9_spill] sm:$0xff] }
 0x217   : > { %v1674_v58 = vadd.f32 %v1604_v12, %v1532_v51  ;;  %v3498_v12 = vld [vmem:[#allocation12_spill] sm:$0xff] }
 0x218   : > { %2081 = vmatmul.msk.bf16.gmra.mxu1 %vm432_vm1, %v2939_v18  ;;  %v1746_v24 = vpop.f32.mrf.mxu0  ;;  %v3494_v18 = vld [vmem:[#allocation7_spill] sm:$0xff] }
 0x219   : > { %v1813_v49 = vadd.f32 %v1743_v61, %v1674_v58  ;;  %2101 = vmatmul.msk.bf16.gmra.mxu2 %vm432_vm1, %v2943_v63  ;;  %v1401_v41 = vadd.f32 %v1333_v45, %v3494_v18 }
 0x21a   : > { %2121 = vmatmul.msk.bf16.gmra.mxu3 %vm432_vm1, %v3461_v59 }
 0x21b   : > { %v1849_v33 = vadd.f32 %v3152_v56, %v1813_v49  ;;  %2141 = vmatmul.msk.bf16.gmra.mxu0 %vm432_vm1, %v2964_v52 }
 0x21c   : > { %v1465_v62 = vpop.f32.mrf.mxu2 }
 0x21d   : > { %v1335_v17 = vpop.f32.mrf.mxu1  ;;  %1881 = vst.msk [vmem:[%s3157_s22 + $0x38] sm:$0xff] %vm432_vm1, %v1849_v33  ;;  %v1533_v63 = vadd.f32 %v1465_v62, %v1401_v41  ;;  %v1607_v31 = vpop.f32.mrf.mxu3 }
 0x21e   : > { %v1402_v4 = vadd.f32 %v1335_v17, %v3495_v39 }
 0x21f   : > { %v1675_v32 = vadd.f32 %v1607_v31, %v1533_v63  ;;  %v223_v31 = vld [vmem:[%s2242_s16 + $0x198] sm:$0xff] }
 0x220   : > { %v1748_v54 = vpop.f32.mrf.mxu0 }
 0x221   : > { %v1814_v44 = vadd.f32 %v1746_v24, %v1675_v32  ;;  %v224_v32 = vld [vmem:[%s2242_s16 + $0x1a0] sm:$0xff] }
 0x223   : > { %v1850_v59 = vadd.f32 %v3152_v56, %v1814_v44 }
 0x224   : > { %v1467_v25 = vpop.f32.mrf.mxu2 }
 0x225   : > { %v1338_v20 = vpop.f32.mrf.mxu1  ;;  %1882 = vst.msk [vmem:[%s3157_s22 + $0x40] sm:$0xff] %vm432_vm1, %v1850_v59  ;;  %v1534_v26 = vadd.f32 %v1467_v25, %v1402_v4  ;;  %v1609_v30 = vpop.f32.mrf.mxu3  ;;  %v1560_v59 = vrot.slane %v223_v31, 1 }
 0x226   : > { %v1403_v11 = vadd.f32 %v1338_v20, %v3497_v40  ;;  %v1700_v20 = vrot.slane %v224_v32, 2 }
 0x227   : > { %v1676_v46 = vadd.f32 %v1609_v30, %v1534_v26 }
 0x228   : > { %2082 = vmatmul.msk.bf16.gmra.mxu1 %vm432_vm1, %v2964_v52  ;;  %v1751_v34 = vpop.f32.mrf.mxu0 }
 0x229   : > { %v1815_v19 = vadd.f32 %v1748_v54, %v1676_v46  ;;  %2102 = vmatmul.msk.bf16.gmra.mxu2 %vm432_vm1, %v2968_v57 }
 0x22a   : > { %2122 = vmatmul.msk.bf16.gmra.mxu3 %vm432_vm1, %v3496_v48 }
 0x22b   : > { %v1851_v61 = vadd.f32 %v3152_v56, %v1815_v19  ;;  %2142 = vmatmul.msk.bf16.gmra.mxu0 %vm432_vm1, %v3001_v29 }
 0x22c   : > { %v1470_v38 = vpop.f32.mrf.mxu2 }
 0x22d   : > { %v1340_v5 = vpop.f32.mrf.mxu1  ;;  %1883 = vst.msk [vmem:[%s3157_s22 + $0x48] sm:$0xff] %vm432_vm1, %v1851_v61  ;;  %v1535_v52 = vadd.f32 %v1470_v38, %v1403_v11  ;;  %v1612_v45 = vpop.f32.mrf.mxu3  ;;  %v1430_v38 = vpack.c.bf16 %v224_v32, %v223_v31 }
 0x22e   : > { %v1404_v58 = vadd.f32 %v1340_v5, %v3498_v12 }
 0x22f   : > { %v1677_v3 = vadd.f32 %v1612_v45, %v1535_v52 }
 0x230   : > { %v1753_v57 = vpop.f32.mrf.mxu0 }
 0x231   : > { %v1816_v53 = vadd.f32 %v1751_v34, %v1677_v3 }
 0x233   : > { %v1852_v51 = vadd.f32 %v3152_v56, %v1816_v53 }
 0x234   : > { %v1472_v15 = vpop.f32.mrf.mxu2 }
 0x235   : > { %v1343_v49 = vpop.f32.mrf.mxu1  ;;  %1884 = vst.msk [vmem:[%s3157_s22 + $0x50] sm:$0xff] %vm432_vm1, %v1852_v51  ;;  %v1536_v24 = vadd.f32 %v1472_v15, %v1404_v58  ;;  %v1614_v27 = vpop.f32.mrf.mxu3 }
 0x236   : > { %v1405_v62 = vadd.f32 %v1343_v49, %v2996_v37  ;;  %v1699_v37 = vrot.slane %v223_v31, 2 }
 0x237   : > { %v1678_v7 = vadd.f32 %v1614_v27, %v1536_v24 }
 0x238   : > { %2083 = vmatmul.msk.bf16.gmra.mxu1 %vm432_vm1, %v3001_v29  ;;  %v1756_v18 = vpop.f32.mrf.mxu0  ;;  %v225_v29 = vld [vmem:[%s2242_s16 + $0x1a8] sm:$0x3]  ;;  %v1701_v5 = vsel %vm707_vm2, %v1699_v37, %v1700_v20 }
 0x239   : > { %v1817_v33 = vadd.f32 %v1753_v57, %v1678_v7  ;;  %2103 = vmatmul.msk.bf16.gmra.mxu2 %vm432_vm1, %v3007_v2  ;;  %v1563_v39 = vrot.slane %v225_v29, 1  ;;  %v1702_v26 = vrot.slane %v225_v29, 2 }
 0x23a   : > { %2123 = vmatmul.msk.bf16.gmra.mxu3 %vm432_vm1, %v3011_v1  ;;  %v1561_v1 = vrot.slane %v224_v32, 1 }
 0x23b   : > { %v1853_v41 = vadd.f32 %v3152_v56, %v1817_v33  ;;  %2143 = vmatmul.msk.bf16.gmra.mxu0 %vm432_vm1, %v3222_v22  ;;  %v1703_v52 = vsel %vm707_vm2, %v1700_v20, %v1702_v26 }
 0x23c   : > { %v1475_v17 = vpop.f32.mrf.mxu2  ;;  %v1562_v19 = vsel %vm296_vm0, %v1560_v59, %v1561_v1  ;;  %v1564_v34 = vsel %vm296_vm0, %v1561_v1, %v1563_v39 }
 0x23d   : > { %v1345_v63 = vpop.f32.mrf.mxu1  ;;  %1885 = vst.msk [vmem:[%s3157_s22 + $0x58] sm:$0xff] %vm432_vm1, %v1853_v41  ;;  %v1537_v44 = vadd.f32 %v1475_v17, %v1405_v62  ;;  %v1617_v54 = vpop.f32.mrf.mxu3  ;;  %v1572_v45 = vpack.c.bf16 %v1564_v34, %v1562_v19 }
 0x23e   : > { %v1406_v46 = vadd.f32 %v1345_v63, %v3015_v60  ;;  %v1711_v60 = vpack.c.bf16 %v1703_v52, %v1701_v5 }
 0x23f   : > { %v1679_v2 = vadd.f32 %v1617_v54, %v1537_v44 }
 0x240   : > { %v1758_v25 = vpop.f32.mrf.mxu0 }
 0x241   : > { %v1818_v4 = vadd.f32 %v1756_v18, %v1679_v2 }
 0x243   : > { %v1854_v30 = vadd.f32 %v3152_v56, %v1818_v4 }
 0x244   : > { %v1477_v48 = vpop.f32.mrf.mxu2 }
 0x245   : > { %v1348_v61 = vpop.f32.mrf.mxu1  ;;  %1886 = vst.msk [vmem:[%s3157_s22 + $0x60] sm:$0xff] %vm432_vm1, %v1854_v30  ;;  %v1538_v40 = vadd.f32 %v1477_v48, %v1406_v46  ;;  %v1619_v11 = vpop.f32.mrf.mxu3 }
 0x246   : > { %v1407_v12 = vadd.f32 %v1348_v61, %v3022_v16 }
 0x247   : > { %v1680_v3 = vadd.f32 %v1619_v11, %v1538_v40 }
 0x248   : > { %2084 = vmatmul.msk.bf16.gmra.mxu1 %vm432_vm1, %v3222_v22  ;;  %v1761_v57 = vpop.f32.mrf.mxu0 }
 0x249   : > { %v1819_v53 = vadd.f32 %v1758_v25, %v1680_v3  ;;  %2104 = vmatmul.msk.bf16.gmra.mxu2 %vm432_vm1, %v1430_v38 }
 0x24a   : > { %2124 = vmatmul.msk.bf16.gmra.mxu3 %vm432_vm1, %v1572_v45 }
 0x24b   : > { %v1855_v51 = vadd.f32 %v3152_v56, %v1819_v53  ;;  %2144 = vmatmul.msk.bf16.gmra.mxu0 %vm432_vm1, %v1711_v60 }
 0x24c   : > { %v1480_v58 = vpop.f32.mrf.mxu2 }
 0x24d   : > { %v1350_v15 = vpop.f32.mrf.mxu1  ;;  %1887 = vst.msk [vmem:[%s3157_s22 + $0x68] sm:$0xff] %vm432_vm1, %v1855_v51  ;;  %v1539_v49 = vadd.f32 %v1480_v58, %v1407_v12  ;;  %v1622_v22 = vpop.f32.mrf.mxu3 }
 0x24e   : > { %v1408_v18 = vadd.f32 %v1350_v15, %v3029_v0 }
 0x24f   : > { %v1681_v24 = vadd.f32 %v1622_v22, %v1539_v49 }
 0x250   : > { %v1763_v7 = vpop.f32.mrf.mxu0 }
 0x251   : > { %v1820_v27 = vadd.f32 %v1761_v57, %v1681_v24 }
 0x253   : > { %v1856_v33 = vadd.f32 %v3152_v56, %v1820_v27 }
 0x254   : > { %v1482_v41 = vpop.f32.mrf.mxu2 }
 0x255   : > { %v1353_v62 = vpop.f32.mrf.mxu1  ;;  %1888 = vst.msk [vmem:[%s3157_s22 + $0x70] sm:$0xff] %vm432_vm1, %v1856_v33  ;;  %v1540_v16 = vadd.f32 %v1482_v41, %v1408_v18  ;;  %v1624_v17 = vpop.f32.mrf.mxu3 }
 0x256   : > { %v1409_v44 = vadd.f32 %v1353_v62, %v3036_v8 }
 0x257   : > { %v1682_v63 = vadd.f32 %v1624_v17, %v1540_v16 }
 0x258   : > { %v1766_v32 = vpop.f32.mrf.mxu0 }
 0x259   : > { %v1821_v31 = vadd.f32 %v1763_v7, %v1682_v63 }
 0x25b   : > { %v1857_v29 = vadd.f32 %v3152_v56, %v1821_v31 }
 0x25c   : > { %v1485_v54 = vpop.f32.mrf.mxu2 }
 0x25d   : > { %v1355_v2 = vpop.f32.mrf.mxu1  ;;  %1889 = vst.msk [vmem:[%s3157_s22 + $0x78] sm:$0xff] %vm432_vm1, %v1857_v29  ;;  %v1541_v59 = vadd.f32 %v1485_v54, %v1409_v44  ;;  %v1627_v0 = vpop.f32.mrf.mxu3 }
 0x25e   : > { %v1410_v37 = vadd.f32 %v1355_v2, %v3043_v14 }
 0x25f   : > { %v1683_v1 = vadd.f32 %v1627_v0, %v1541_v59 }
 0x260   : > { %v1768_v4 = vpop.f32.mrf.mxu0 }
 0x261   : > { %v1822_v39 = vadd.f32 %v1766_v32, %v1683_v1 }
 0x263   : > { %v1858_v25 = vadd.f32 %v3152_v56, %v1822_v39 }
 0x264   : > { %v1487_v20 = vpop.f32.mrf.mxu2 }
 0x265   : > { %v1358_v26 = vpop.f32.mrf.mxu1  ;;  %1890 = vst.msk [vmem:[%s3157_s22 + $0x80] sm:$0xff] %vm432_vm1, %v1858_v25  ;;  %v1542_v30 = vadd.f32 %v1487_v20, %v1410_v37  ;;  %v1629_v8 = vpop.f32.mrf.mxu3 }
 0x266   : > { %v1411_v61 = vadd.f32 %v1358_v26, %v3050_v50 }
 0x267   : > { %v1684_v46 = vadd.f32 %v1629_v8, %v1542_v30 }
 0x268   : > { %v1771_v34 = vpop.f32.mrf.mxu0 }
 0x269   : > { %v1823_v19 = vadd.f32 %v1768_v4, %v1684_v46 }
 0x26b   : > { %v1859_v48 = vadd.f32 %v3152_v56, %v1823_v19 }
 0x26c   : > { %v1490_v40 = vpop.f32.mrf.mxu2 }
 0x26d   : > { %v1360_v11 = vpop.f32.mrf.mxu1  ;;  %1891 = vst.msk [vmem:[%s3157_s22 + $0x88] sm:$0xff] %vm432_vm1, %v1859_v48  ;;  %v1543_v38 = vadd.f32 %v1490_v40, %v1411_v61  ;;  %v1632_v14 = vpop.f32.mrf.mxu3 }
 0x26e   : > { %v1412_v60 = vadd.f32 %v1360_v11, %v3057_v13 }
 0x26f   : > { %v1685_v5 = vadd.f32 %v1632_v14, %v1543_v38 }
 0x270   : > { %v1773_v45 = vpop.f32.mrf.mxu0 }
 0x271   : > { %v1824_v52 = vadd.f32 %v1771_v34, %v1685_v5 }
 0x273   : > { %v1860_v3 = vadd.f32 %v3152_v56, %v1824_v52 }
 0x274   : > { %v1492_v53 = vpop.f32.mrf.mxu2 }
 0x275   : > { %v1363_v57 = vpop.f32.mrf.mxu1  ;;  %1892 = vst.msk [vmem:[%s3157_s22 + $0x90] sm:$0xff] %vm432_vm1, %v1860_v3  ;;  %v1544_v51 = vadd.f32 %v1492_v53, %v1412_v60  ;;  %v1634_v50 = vpop.f32.mrf.mxu3 }
 0x276   : > { %v1413_v22 = vadd.f32 %v1363_v57, %v3064_v28 }
 0x277   : > { %v1686_v12 = vadd.f32 %v1634_v50, %v1544_v51 }
 0x278   : > { %v1776_v15 = vpop.f32.mrf.mxu0 }
 0x279   : > { %v1825_v58 = vadd.f32 %v1773_v45, %v1686_v12 }
 0x27b   : > { %v1861_v49 = vadd.f32 %v3152_v56, %v1825_v58 }
 0x27c   : > { %v1495_v24 = vpop.f32.mrf.mxu2 }
 0x27d   : > { %v1365_v27 = vpop.f32.mrf.mxu1  ;;  %1893 = vst.msk [vmem:[%s3157_s22 + $0x98] sm:$0xff] %vm432_vm1, %v1861_v49  ;;  %v1545_v7 = vadd.f32 %v1495_v24, %v1413_v22  ;;  %v1637_v13 = vpop.f32.mrf.mxu3 }
 0x27e   : > { %v1414_v16 = vadd.f32 %v1365_v27, %v3071_v36 }
 0x27f   : > { %v1687_v33 = vadd.f32 %v1637_v13, %v1545_v7 }
 0x280   : > { %v1778_v41 = vpop.f32.mrf.mxu0 }
 0x281   : > { %v1826_v18 = vadd.f32 %v1776_v15, %v1687_v33 }
 0x283   : > { %v1862_v62 = vadd.f32 %v3152_v56, %v1826_v18 }
 0x284   : > { %v1497_v17 = vpop.f32.mrf.mxu2 }
 0x285   : > { %v1368_v63 = vpop.f32.mrf.mxu1  ;;  %1894 = vst.msk [vmem:[%s3157_s22 + $0xa0] sm:$0xff] %vm432_vm1, %v1862_v62  ;;  %v1546_v31 = vadd.f32 %v1497_v17, %v1414_v16  ;;  %v1639_v28 = vpop.f32.mrf.mxu3 }
 0x286   : > { %v1415_v2 = vadd.f32 %v1368_v63, %v3078_v42 }
 0x287   : > { %v1688_v32 = vadd.f32 %v1639_v28, %v1546_v31 }
 0x288   : > { %v1781_v44 = vpop.f32.mrf.mxu0 }
 0x289   : > { %v1827_v29 = vadd.f32 %v1778_v41, %v1688_v32 }
 0x28b   : > { %v1863_v54 = vadd.f32 %v3152_v56, %v1827_v29 }
 0x28c   : > { %v1500_v59 = vpop.f32.mrf.mxu2 }
 0x28d   : > { %v1370_v0 = vpop.f32.mrf.mxu1  ;;  %1895 = vst.msk [vmem:[%s3157_s22 + $0xa8] sm:$0xff] %vm432_vm1, %v1863_v54  ;;  %v1547_v1 = vadd.f32 %v1500_v59, %v1415_v2  ;;  %v1642_v36 = vpop.f32.mrf.mxu3 }
 0x28e   : > { %v1416_v20 = vadd.f32 %v1370_v0, %v3085_v35 }
 0x28f   : > { %v1689_v39 = vadd.f32 %v1642_v36, %v1547_v1 }
 0x290   : > { %v1783_v25 = vpop.f32.mrf.mxu0 }
 0x291   : > { %v1828_v4 = vadd.f32 %v1781_v44, %v1689_v39 }
 0x293   : > { %v1864_v37 = vadd.f32 %v3152_v56, %v1828_v4 }
 0x294   : > { %v1502_v26 = vpop.f32.mrf.mxu2 }
 0x295   : > { %v1373_v30 = vpop.f32.mrf.mxu1  ;;  %1896 = vst.msk [vmem:[%s3157_s22 + $0xb0] sm:$0xff] %vm432_vm1, %v1864_v37  ;;  %v1548_v8 = vadd.f32 %v1502_v26, %v1416_v20  ;;  %v1644_v42 = vpop.f32.mrf.mxu3 }
 0x296   : > { %v1417_v61 = vadd.f32 %v1373_v30, %v3092_v6 }
 0x297   : > { %v1690_v46 = vadd.f32 %v1644_v42, %v1548_v8 }
 0x298   : > { %v1786_v34 = vpop.f32.mrf.mxu0 }
 0x299   : > { %v1829_v19 = vadd.f32 %v1783_v25, %v1690_v46 }
 0x29b   : > { %v1865_v48 = vadd.f32 %v3152_v56, %v1829_v19 }
 0x29c   : > { %v1505_v40 = vpop.f32.mrf.mxu2 }
 0x29d   : > { %v1375_v11 = vpop.f32.mrf.mxu1  ;;  %1897 = vst.msk [vmem:[%s3157_s22 + $0xb8] sm:$0xff] %vm432_vm1, %v1865_v48  ;;  %v1549_v38 = vadd.f32 %v1505_v40, %v1417_v61  ;;  %v1647_v35 = vpop.f32.mrf.mxu3 }
 0x29e   : > { %v1418_v3 = vadd.f32 %v1375_v11, %v3099_v21 }
 0x29f   : > { %v1691_v14 = vadd.f32 %v1647_v35, %v1549_v38 }
 0x2a0   : > { %v1788_v52 = vpop.f32.mrf.mxu0 }
 0x2a1   : > { %v1830_v5 = vadd.f32 %v1786_v34, %v1691_v14 }
 0x2a3   : > { %v1866_v45 = vadd.f32 %v3152_v56, %v1830_v5 }
 0x2a4   : > { %v1507_v60 = vpop.f32.mrf.mxu2 }
 0x2a5   : > { %v1378_v53 = vpop.f32.mrf.mxu1  ;;  %1898 = vst.msk [vmem:[%s3157_s22 + $0xc0] sm:$0xff] %vm432_vm1, %v1866_v45  ;;  %v1550_v57 = vadd.f32 %v1507_v60, %v1418_v3  ;;  %v1649_v6 = vpop.f32.mrf.mxu3 }
 0x2a6   : > { %v1419_v15 = vadd.f32 %v1378_v53, %v3106_v47 }
 0x2a7   : > { %v1692_v51 = vadd.f32 %v1649_v6, %v1550_v57 }
 0x2a8   : > { %v1791_v12 = vpop.f32.mrf.mxu0 }
 0x2a9   : > { %v1831_v50 = vadd.f32 %v1788_v52, %v1692_v51 }
 0x2ab   : > { %v1867_v58 = vadd.f32 %v3152_v56, %v1831_v50 }
 0x2ac   : > { %v1510_v49 = vpop.f32.mrf.mxu2 }
 0x2ad   : > { %v1380_v22 = vpop.f32.mrf.mxu1  ;;  %1899 = vst.msk [vmem:[%s3157_s22 + $0xc8] sm:$0xff] %vm432_vm1, %v1867_v58  ;;  %v1551_v24 = vadd.f32 %v1510_v49, %v1419_v15  ;;  %v1652_v21 = vpop.f32.mrf.mxu3 }
 0x2ae   : > { %v1420_v18 = vadd.f32 %v1380_v22, %v3113_v23 }
 0x2af   : > { %v1693_v27 = vadd.f32 %v1652_v21, %v1551_v24 }
 0x2b0   : > { %v1793_v13 = vpop.f32.mrf.mxu0 }
 0x2b1   : > { %v1832_v7 = vadd.f32 %v1791_v12, %v1693_v27 }
 0x2b3   : > { %v1868_v33 = vadd.f32 %v3152_v56, %v1832_v7 }
 0x2b4   : > { %v1512_v41 = vpop.f32.mrf.mxu2 }
 0x2b5   : > { %v1383_v62 = vpop.f32.mrf.mxu1  ;;  %1900 = vst.msk [vmem:[%s3157_s22 + $0xd0] sm:$0xff] %vm432_vm1, %v1868_v33  ;;  %v1552_v16 = vadd.f32 %v1512_v41, %v1420_v18  ;;  %v1654_v47 = vpop.f32.mrf.mxu3 }
 0x2b6   : > { %v1421_v32 = vadd.f32 %v1383_v62, %v3120_v55 }
 0x2b7   : > { %v1694_v17 = vadd.f32 %v1654_v47, %v1552_v16 }
 0x2b8   : > { %v1796_v31 = vpop.f32.mrf.mxu0 }
 0x2b9   : > { %v1833_v63 = vadd.f32 %v1793_v13, %v1694_v17 }
 0x2bb   : > { %v1869_v28 = vadd.f32 %v3152_v56, %v1833_v63 }
 0x2bc   : > { %v1515_v29 = vpop.f32.mrf.mxu2 }
 0x2bd   : > { %v1385_v44 = vpop.f32.mrf.mxu1  ;;  %1901 = vst.msk [vmem:[%s3157_s22 + $0xd8] sm:$0xff] %vm432_vm1, %v1869_v28  ;;  %v1553_v54 = vadd.f32 %v1515_v29, %v1421_v32  ;;  %v1657_v23 = vpop.f32.mrf.mxu3 }
 0x2be   : > { %v1422_v1 = vadd.f32 %v1385_v44, %v3127_v10 }
 0x2bf   : > { %v1695_v2 = vadd.f32 %v1657_v23, %v1553_v54 }
 0x2c0   : > { %v1798_v36 = vpop.f32.mrf.mxu0 }
 0x2c1   : > { %v1834_v59 = vadd.f32 %v1796_v31, %v1695_v2 }
 0x2c3   : > { %v1870_v0 = vadd.f32 %v3152_v56, %v1834_v59 }
 0x2c4   : > { %v1517_v39 = vpop.f32.mrf.mxu2 }
 0x2c5   : > { %1902 = vst.msk [vmem:[%s3157_s22 + $0xe0] sm:$0xff] %vm432_vm1, %v1870_v0  ;;  %v1554_v4 = vadd.f32 %v1517_v39, %v1422_v1  ;;  %v1659_v25 = vpop.f32.mrf.mxu3  ;;  %v1388_v55 = vpop.f32.mrf.mxu1 }
 0x2c6   : > { %v1423_v30 = vadd.f32 %v1388_v55, %v3134_v43 }
 0x2c7   : > { %v1696_v37 = vadd.f32 %v1659_v25, %v1554_v4 }
 0x2c8   : > { %v1801_v46 = vpop.f32.mrf.mxu0 }
 0x2c9   : > { %v1835_v20 = vadd.f32 %v1798_v36, %v1696_v37 }
 0x2cb   : > { %v1871_v26 = vadd.f32 %v3152_v56, %v1835_v20 }
 0x2cc   : > { %v1520_v8 = vpop.f32.mrf.mxu2 }
 0x2cd   : > { %1903 = vst.msk [vmem:[%s3157_s22 + $0xe8] sm:$0xff] %vm432_vm1, %v1871_v26  ;;  %v1555_v42 = vadd.f32 %v1520_v8, %v1423_v30  ;;  %v1662_v10 = vpop.f32.mrf.mxu3  ;;  %v1390_v34 = vpop.f32.mrf.mxu1 }
 0x2ce   : > { %v1424_v40 = vadd.f32 %v1390_v34, %v3141_v9 }
 0x2cf   : > { %v1697_v19 = vadd.f32 %v1662_v10, %v1555_v42 }
 0x2d0   : > { %v1803_v14 = vpop.f32.mrf.mxu0 }
 0x2d1   : > { %v1836_v48 = vadd.f32 %v1801_v46, %v1697_v19 }
 0x2d3   : > { %v1872_v61 = vadd.f32 %v3152_v56, %v1836_v48 }
 0x2d4   : > { %v1522_v11 = vpop.f32.mrf.mxu2 }
 0x2d5   : > { %1904 = vst.msk [vmem:[%s3157_s22 + $0xf0] sm:$0xff] %vm432_vm1, %v1872_v61  ;;  %v1556_v38 = vadd.f32 %v1522_v11, %v1424_v40  ;;  %v1664_v35 = vpop.f32.mrf.mxu3 }
 0x2d7   : > { %v1698_v43 = vadd.f32 %v1664_v35, %v1556_v38 }
 0x2d9   : > { %v1837_v5 = vadd.f32 %v1803_v14, %v1698_v43 }
 0x2db   : > { %v1873_v52 = vadd.f32 %v3152_v56, %v1837_v5 }
 0x2dd   : > { %1905 = vst.msk [vmem:[%s3157_s22 + $0xf8] sm:$0xff] %vm432_vm1, %v1873_v52 }
 0x2de PF: > { %s13_s12 = sadd.s32 1, %s2170_s12  }
 0x2df   : > { %p10_p4 = scmp.ge.s32.totalorder %s13_s12, 4  }
 0x2e1   :  { %12 = sbr.rel (!%p10_p4) target bundleno = 1 (0x1), region = 70 }

// kernel: attention_zbw_forward.7
= control target key start
LH: loop header
LB: loop body
LE: loop exit
PB: predicated region body
PF: predicated region fallthrough
CT: control target
= control target key end

     0   :  { %s2198_s14 = smov 0   ;;  %s3359_s0 = inlined_call_operand.vmem [shape: f32[2,18,18,32], index: 0, kind: input, shape index: {}]   ;;  %s3360_s1 = inlined_call_operand.vmem [shape: f32[3,3,32,1], index: 1, kind: input, shape index: {}]   ;;  %s3361_s2 = inlined_call_operand.<no memory space> [shape: f32[1,1], index: 2, kind: input, shape index: {}]   ;;  %s3362_s3 = inlined_call_operand.vmem [shape: f32[2,256,1], index: 3, kind: output, shape index: {}]  }
   0x1   :  { %v8_v0 = vstv %s3361_s2 }
   0x2   :  { %9 = vst [vmem:[#allocation2] sm:$0x1] %v8_v0 }
   0x3 LB: > { %s1964_s15 = sadd.s32 4294967295, %s2173_s14   ;;  %p1968_p0 = scmp.ge.s32.totalorder %s2173_s14, 1  ;;  %s2173_s14 = sphi %s2198_s14, %s15_s14  }
   0x4   : > { %p139_p1 = scmp.lt.s32.totalorder %s2173_s14, 3 }
   0x6   : > { %p140_p2 = pnand %p1968_p0, %p139_p1 }
   0x8   : > { %143 = sbr.rel (%p140_p2) target bundleno = 736 (0x2e0), region = 32 }
   0xd   : > { %v1974_v1 = vld [vmem:[%s3360_s1 + $0x30] sm:$0xff]  ;;  %v1975_v2 = vld [vmem:[%s3360_s1 + $0x38] sm:$0xff]  ;;  %v1972_v3 = vld [vmem:[%s3360_s1 + $0x20] sm:$0xff]  ;;  %p163_p3 = scmp.lt.s32.totalorder %s1964_s15, 1  ;;  %vm298_vm0 = vcmask 1046528   ;;  %vm434_vm1 = vcmask 261120  }
   0xe   : > { %v433_v4 = vpack.c.bf16 %v1975_v2, %v1974_v1  ;;  %v1973_v5 = vld [vmem:[%s3360_s1 + $0x28] sm:$0xff]  ;;  %v2010_v6 = vld [vmem:[%s3360_s1 + $0x50] sm:$0xff]  ;;  %v2011_v7 = vld [vmem:[%s3360_s1 + $0x58] sm:$0xff]  ;;  %vm709_vm2 = vcmask 1045504   ;;  %vm1876_vm3 = vcmask 7168  }
   0xf   : > { %s3503_s15 = smov (!%p163_p3, %s1964_s15), 1  ;;  %v2030_v8 = vld [vmem:[%s3360_s1 + $0x70] sm:$0xff]  ;;  %v2031_v9 = vld [vmem:[%s3360_s1 + $0x78] sm:$0xff]  ;;  %v432_v11 = vpack.c.bf16 %v1973_v5, %v1972_v3  ;;  %v844_v15 = vpack.c.bf16 %v2011_v7, %v2010_v6 }
  0x10   : > { %v230_v10 = vld [vmem:[%s3360_s1 + $0x10] sm:$0xff]  ;;  %2151 = vmatpush.bf16.msra.mxu1 %v433_v4  ;;  %2152 = vmatpush.bf16.msra.mxu2 %v433_v4  ;;  %v231_v12 = vld [vmem:[%s3360_s1 + $0x18] sm:$0xff]  ;;  %s2157_s12 = smul.u32 432, %s3503_s15  ;;  %v1021_v16 = vpack.c.bf16 %v2031_v9, %v2030_v8  ;;  %s2150_s13 = sshll.u32 %s3503_s15, 8 }
  0x11   : > { %v2050_v13 = vld [vmem:[%s3360_s1 + $0x90] sm:$0xff]  ;;  %v2051_v14 = vld [vmem:[%s3360_s1 + $0x98] sm:$0xff]  ;;  %2153 = vmatpush.bf16.msra.mxu3 %v433_v4  ;;  %489 = vmatpush.bf16.msra.mxu0 %v433_v4  ;;  %v249_v17 = vpack.c.bf16 %v231_v12, %v230_v10  ;;  %s3160_s18 = scalar_lea.vmem %s3362_s3, %s2150_s13 }
  0x12   : > { %s2248_s17 = scalar_lea.vmem %s3359_s0, %s2157_s12  ;;  %v1163_v18 = vpack.c.bf16 %v2051_v14, %v2050_v13 }
  0x13   : > { %v2251_v19 = vld [vmem:[%s2248_s17 + $0x60] sm:$0xff]  ;;  %v2254_v20 = vld [vmem:[%s2248_s17 + $0x68] sm:$0xff]  ;;  %v2257_v21 = vld [vmem:[%s2248_s17 + $0x70] sm:$0x3] }
  0x14   : > { %2154 = vmatpush.bf16.msra.mxu1 %v432_v11  ;;  %2155 = vmatpush.bf16.msra.mxu2 %v432_v11  ;;  %v319_v22 = vrot.slane %v2251_v19, 1  ;;  %v320_v23 = vrot.slane %v2254_v20, 1  ;;  %v322_v24 = vrot.slane %v2257_v21, 1  ;;  %v2263_v25 = vld [vmem:[%s2248_s17 + $0xc0] sm:$0xff]  ;;  %v2266_v26 = vld [vmem:[%s2248_s17 + $0xc8] sm:$0xff]  ;;  %v2314_v53 = vld [vmem:[%s2248_s17 + $0x78] sm:$0xff] }
  0x15   : > { %2156 = vmatpush.bf16.msra.mxu3 %v432_v11  ;;  %490 = vmatpush.bf16.msra.mxu0 %v432_v11  ;;  %v2269_v27 = vld [vmem:[%s2248_s17 + $0x120] sm:$0xff]  ;;  %v2272_v28 = vld [vmem:[%s2248_s17 + $0xd0] sm:$0x3]  ;;  %v339_v29 = vrot.slane %v2263_v25, 1  ;;  %v340_v30 = vrot.slane %v2266_v26, 1  ;;  %v2277_v31 = vld [vmem:[%s2248_s17 + $0x128] sm:$0xff] }
  0x16   : > { %3406 = vst [vmem:[#allocation3_spill] sm:$0xff] %v2269_v27  ;;  %v359_v32 = vrot.slane %v2269_v27, 1  ;;  %v321_v33 = vsel %vm298_vm0, %v319_v22, %v320_v23  ;;  %v323_v34 = vsel %vm298_vm0, %v320_v23, %v322_v24  ;;  %v342_v35 = vrot.slane %v2272_v28, 1  ;;  %v2284_v36 = vld [vmem:[%s2248_s17 + $0x130] sm:$0x3]  ;;  %v2287_v37 = vld [vmem:[%s2248_s17] sm:$0xff] }
  0x17   : > { %3407 = vst [vmem:[#allocation4_spill] sm:$0xff] %v2277_v31  ;;  %v2290_v38 = vld [vmem:[%s2248_s17 + $0x8] sm:$0xff]  ;;  %v2292_v39 = vpack.c.bf16 %v323_v34, %v321_v33  ;;  %v341_v40 = vsel %vm298_vm0, %v339_v29, %v340_v30  ;;  %v360_v41 = vrot.slane %v2277_v31, 1  ;;  %v362_v42 = vrot.slane %v2284_v36, 1  ;;  %v2298_v43 = vld [vmem:[%s2248_s17 + $0x10] sm:$0x3] }
  0x18   : > { %899 = vmatpush.bf16.msrb.mxu2 %v844_v15  ;;  %3408 = vst [vmem:[#allocation5_spill] sm:$0xff] %v2284_v36  ;;  %626 = vmatpush.bf16.msrb.mxu1 %v249_v17  ;;  %v343_v44 = vsel %vm298_vm0, %v340_v30, %v342_v35  ;;  %v299_v45 = vrot.slane %v2287_v37, 1  ;;  %v300_v46 = vrot.slane %v2290_v38, 1  ;;  %v302_v50 = vrot.slane %v2298_v43, 1  ;;  %v2317_v54 = vld [vmem:[%s2248_s17 + $0x80] sm:$0xff]  ;;  %v2326_v57 = vld [vmem:[%s2248_s17 + $0xd8] sm:$0xff] }
  0x19   : > { %1031 = vmatpush.bf16.msrb.mxu3 %v1021_v16  ;;  %1173 = vmatpush.bf16.msrb.mxu0 %v1163_v18  ;;  %v2305_v47 = vpack.c.bf16 %v343_v44, %v341_v40  ;;  %v361_v48 = vsel %vm298_vm0, %v359_v32, %v360_v41  ;;  %v363_v49 = vsel %vm298_vm0, %v360_v41, %v362_v42  ;;  %v2323_v56 = vld [vmem:[%s2248_s17 + $0x88] sm:$0x3]  ;;  %v2329_v58 = vld [vmem:[%s2248_s17 + $0xe0] sm:$0xff]  ;;  %v324_v61 = vrot.slane %v2314_v53, 1  ;;  %v2338_v62 = vld [vmem:[%s2248_s17 + $0x138] sm:$0xff] }
  0x1a   : > { %1980 = vmatmul.msk.bf16.vlgmr.msra.gmra.mxu1 %vm434_vm1, %v2292_v39  ;;  %v2310_v51 = vpack.c.bf16 %v363_v49, %v361_v48  ;;  %v301_v52 = vsel %vm298_vm0, %v299_v45, %v300_v46  ;;  %v303_v55 = vsel %vm298_vm0, %v300_v46, %v302_v50  ;;  %v2334_v60 = vld [vmem:[%s2248_s17 + $0xe8] sm:$0x3]  ;;  %3411 = vst [vmem:[#allocation8_spill] sm:$0xff] %v2338_v62  ;;  %v2341_v63 = vld [vmem:[%s2248_s17 + $0x140] sm:$0xff]  ;;  %v325_v0 = vrot.slane %v2317_v54, 1  ;;  %v2353_v6 = vld [vmem:[%s2248_s17 + $0x18] sm:$0xff] }
  0x1b   : > { %3409 = vst [vmem:[#allocation6_spill] sm:$0xff] %v2305_v47  ;;  %1984 = vmatmul.msk.bf16.vlgmr.msra.gmra.mxu2 %vm434_vm1, %v2305_v47  ;;  %v416_v59 = vpack.c.bf16 %v303_v55, %v301_v52  ;;  %v327_v1 = vrot.slane %v2323_v56, 1  ;;  %v344_v2 = vrot.slane %v2326_v57, 1  ;;  %v345_v3 = vrot.slane %v2329_v58, 1  ;;  %v2349_v4 = vld [vmem:[%s2248_s17 + $0x148] sm:$0x3] }
  0x1c   : > { %3410 = vst [vmem:[#allocation7_spill] sm:$0xff] %v2310_v51  ;;  %1988 = vmatmul.msk.bf16.vlgmr.msra.gmra.mxu3 %vm434_vm1, %v2310_v51  ;;  %v347_v5 = vrot.slane %v2334_v60, 1  ;;  %v2356_v7 = vld [vmem:[%s2248_s17 + $0x20] sm:$0xff]  ;;  %v2359_v8 = vld [vmem:[%s2248_s17 + $0x28] sm:$0x3]  ;;  %v364_v9 = vrot.slane %v2338_v62, 1  ;;  %v326_v12 = vsel %vm298_vm0, %v324_v61, %v325_v0 }
  0x1d   : > { %3412 = vst [vmem:[#allocation9_spill] sm:$0xff] %v2341_v63  ;;  %1976 = vmatmul.msk.bf16.vlgmr.msra.gmra.mxu0 %vm434_vm1, %v416_v59  ;;  %v365_v10 = vrot.slane %v2341_v63, 1  ;;  %v367_v11 = vrot.slane %v2349_v4, 1  ;;  %v328_v13 = vsel %vm298_vm0, %v325_v0, %v327_v1  ;;  %v346_v14 = vsel %vm298_vm0, %v344_v2, %v345_v3  ;;  %v2008_v22 = vld [vmem:[%s3360_s1 + $0x40] sm:$0xff]  ;;  %v2009_v23 = vld [vmem:[%s3360_s1 + $0x48] sm:$0xff]  ;;  %v2412_v59 = vld [vmem:[%s2248_s17 + $0x90] sm:$0xff] }
  0x1e   : > { %3413 = vst [vmem:[#allocation10_spill] sm:$0xff] %v2349_v4  ;;  %v348_v15 = vsel %vm298_vm0, %v345_v3, %v347_v5  ;;  %v304_v16 = vrot.slane %v2353_v6, 1  ;;  %v305_v17 = vrot.slane %v2356_v7, 1  ;;  %v307_v18 = vrot.slane %v2359_v8, 1  ;;  %v2028_v24 = vld [vmem:[%s3360_s1 + $0x60] sm:$0xff]  ;;  %v2029_v29 = vld [vmem:[%s3360_s1 + $0x68] sm:$0xff] }
  0x1f   : > { %v228_v30 = vld [vmem:[%s3360_s1] sm:$0xff]  ;;  %v229_v32 = vld [vmem:[%s3360_s1 + $0x8] sm:$0xff]  ;;  %v2389_v33 = vpack.c.bf16 %v328_v13, %v326_v12  ;;  %v366_v34 = vsel %vm298_vm0, %v364_v9, %v365_v10  ;;  %v368_v35 = vsel %vm298_vm0, %v365_v10, %v367_v11  ;;  %v2399_v42 = vpack.c.bf16 %v348_v15, %v346_v14  ;;  %v2415_v61 = vld [vmem:[%s2248_s17 + $0x98] sm:$0xff] }
  0x20   : > { %v2048_v40 = vld [vmem:[%s3360_s1 + $0x80] sm:$0xff]  ;;  %v2049_v41 = vld [vmem:[%s3360_s1 + $0x88] sm:$0xff]  ;;  %v843_v44 = vpack.c.bf16 %v2009_v23, %v2008_v22  ;;  %v306_v45 = vsel %vm298_vm0, %v304_v16, %v305_v17  ;;  %v308_v46 = vsel %vm298_vm0, %v305_v17, %v307_v18  ;;  %v1020_v48 = vpack.c.bf16 %v2029_v29, %v2028_v24  ;;  %v2423_v1 = vld [vmem:[%s2248_s17 + $0xf0] sm:$0xff] }
  0x21   : > { %3414 = vst [vmem:[#allocation11_spill] sm:$0xff] %v2399_v42  ;;  %v248_v49 = vpack.c.bf16 %v229_v32, %v228_v30  ;;  %v2403_v50 = vpack.c.bf16 %v368_v35, %v366_v34  ;;  %v1162_v52 = vpack.c.bf16 %v2049_v41, %v2048_v40  ;;  %v2407_v55 = vpack.c.bf16 %v308_v46, %v306_v45  ;;  %v2418_v0 = vld [vmem:[%s2248_s17 + $0xa0] sm:$0x3]  ;;  %v2426_v2 = vld [vmem:[%s2248_s17 + $0xf8] sm:$0xff]  ;;  %v2432_v5 = vld [vmem:[%s2248_s17 + $0x150] sm:$0xff] }
  0x22   : > { %900 = vmatpush.bf16.msrb.mxu2 %v843_v44  ;;  %1032 = vmatpush.bf16.msrb.mxu3 %v1020_v48  ;;  %v2429_v3 = vld [vmem:[%s2248_s17 + $0x100] sm:$0x3]  ;;  %3416 = vst [vmem:[#allocation13_spill] sm:$0xff] %v2432_v5  ;;  %v329_v9 = vrot.slane %v2412_v59, 1  ;;  %v330_v10 = vrot.slane %v2415_v61, 1  ;;  %v332_v11 = vrot.slane %v2418_v0, 1 }
  0x23   : > { %3415 = vst [vmem:[#allocation12_spill] sm:$0xff] %v2403_v50  ;;  %627 = vmatpush.bf16.msrb.mxu1 %v248_v49  ;;  %1174 = vmatpush.bf16.msrb.mxu0 %v1162_v52  ;;  %v2440_v12 = vld [vmem:[%s2248_s17 + $0x158] sm:$0xff]  ;;  %v2443_v13 = vld [vmem:[%s2248_s17 + $0x160] sm:$0x3]  ;;  %v2446_v14 = vld [vmem:[%s2248_s17 + $0x30] sm:$0xff]  ;;  %v349_v15 = vrot.slane %v2423_v1, 1 }
  0x24   : > { %3417 = vst [vmem:[#allocation14_spill] sm:$0xff] %v2440_v12  ;;  %v350_v16 = vrot.slane %v2426_v2, 1  ;;  %v352_v17 = vrot.slane %v2429_v3, 1  ;;  %v2452_v18 = vld [vmem:[%s2248_s17 + $0x38] sm:$0xff]  ;;  %v2455_v22 = vld [vmem:[%s2248_s17 + $0x40] sm:$0x3]  ;;  %v331_v30 = vsel %vm298_vm0, %v329_v9, %v330_v10  ;;  %v333_v32 = vsel %vm298_vm0, %v330_v10, %v332_v11 }
  0x25   : > { %3418 = vst [vmem:[#allocation15_spill] sm:$0xff] %v2443_v13  ;;  %v369_v23 = vrot.slane %v2432_v5, 1  ;;  %v370_v24 = vrot.slane %v2440_v12, 1  ;;  %v372_v29 = vrot.slane %v2443_v13, 1  ;;  %v309_v34 = vrot.slane %v2446_v14, 1  ;;  %v2130_v12 = vld [vmem:[%s3360_s1 + $0x110] sm:$0xff] }
  0x26   : > { %v310_v35 = vrot.slane %v2452_v18, 1  ;;  %v312_v40 = vrot.slane %v2455_v22, 1  ;;  %v351_v41 = vsel %vm298_vm0, %v349_v15, %v350_v16  ;;  %v353_v44 = vsel %vm298_vm0, %v350_v16, %v352_v17  ;;  %v2482_v15 = vld [vmem:[%s2248_s17 + $0xa8] sm:$0xff]  ;;  %v2485_v16 = vld [vmem:[%s2248_s17 + $0xb0] sm:$0xff]  ;;  %v2490_v17 = vld [vmem:[%s2248_s17 + $0xb8] sm:$0x3] }
  0x27   : > { %v2467_v45 = vpack.c.bf16 %v333_v32, %v331_v30  ;;  %v371_v46 = vsel %vm298_vm0, %v369_v23, %v370_v24  ;;  %v373_v48 = vsel %vm298_vm0, %v370_v24, %v372_v29  ;;  %v2471_v49 = vpack.c.bf16 %v353_v44, %v351_v41  ;;  %v2493_v23 = vld [vmem:[%s2248_s17 + $0x108] sm:$0xff]  ;;  %v2496_v24 = vld [vmem:[%s2248_s17 + $0x110] sm:$0xff]  ;;  %v2091_v32 = vld [vmem:[%s3360_s1 + $0xd8] sm:$0xff] }
  0x28   : > { %v311_v52 = vsel %vm298_vm0, %v309_v34, %v310_v35  ;;  %v313_v9 = vsel %vm298_vm0, %v310_v35, %v312_v40  ;;  %v2475_v10 = vpack.c.bf16 %v373_v48, %v371_v46  ;;  %3421 = vst [vmem:[#allocation18_spill] sm:$0xff] %v2493_v23  ;;  %v2501_v29 = vld [vmem:[%s2248_s17 + $0x168] sm:$0xff]  ;;  %v2090_v30 = vld [vmem:[%s3360_s1 + $0xd0] sm:$0xff]  ;;  %v2510_v34 = vld [vmem:[%s2248_s17 + $0x118] sm:$0x3]  ;;  %v334_v44 = vrot.slane %v2482_v15, 1 }
  0x29   : > { %3419 = vst [vmem:[#allocation16_spill] sm:$0xff] %v2467_v45  ;;  %v2479_v11 = vpack.c.bf16 %v313_v9, %v311_v52  ;;  %v2513_v35 = vld [vmem:[%s2248_s17 + $0x170] sm:$0xff]  ;;  %v2516_v40 = vld [vmem:[%s2248_s17 + $0x178] sm:$0x3]  ;;  %v1434_v41 = vpack.c.bf16 %v2091_v32, %v2090_v30  ;;  %v335_v46 = vrot.slane %v2485_v16, 1  ;;  %v337_v48 = vrot.slane %v2490_v17, 1 }
  0x2a   : > { %1981 = vmatmul.msk.bf16.gmra.mxu1 %vm434_vm1, %v2389_v33  ;;  %3420 = vst [vmem:[#allocation17_spill] sm:$0xff] %v2475_v10  ;;  %v2110_v52 = vld [vmem:[%s3360_s1 + $0xf0] sm:$0xff]  ;;  %v2111_v9 = vld [vmem:[%s3360_s1 + $0xf8] sm:$0xff]  ;;  %v354_v32 = vrot.slane %v2493_v23, 1  ;;  %v355_v4 = vrot.slane %v2496_v24, 1  ;;  %v2545_v63 = vld [vmem:[%s2248_s17 + $0x48] sm:$0xff] }
  0x2b   : > { %1985 = vmatmul.msk.bf16.gmra.mxu2 %vm434_vm1, %v2399_v42  ;;  %3422 = vst [vmem:[#allocation19_spill] sm:$0xff] %v2496_v24  ;;  %v2070_v30 = vld [vmem:[%s3360_s1 + $0xb0] sm:$0xff]  ;;  %v1576_v13 = vpack.c.bf16 %v2111_v9, %v2110_v52  ;;  %v2131_v5 = vld [vmem:[%s3360_s1 + $0x118] sm:$0xff]  ;;  %v374_v36 = vrot.slane %v2501_v29, 1  ;;  %v375_v51 = vrot.slane %v2513_v35, 1  ;;  %v377_v31 = vrot.slane %v2516_v40, 1 }
  0x2c   : > { %1989 = vmatmul.msk.bf16.gmra.mxu3 %vm434_vm1, %v2403_v50  ;;  %3423 = vst [vmem:[#allocation20_spill] sm:$0xff] %v2510_v34  ;;  %1444 = vmatpush.bf16.msra.mxu2 %v1434_v41  ;;  %v357_v50 = vrot.slane %v2510_v34, 1  ;;  %v2548_v41 = vld [vmem:[%s2248_s17 + $0x50] sm:$0xff]  ;;  %v2551_v52 = vld [vmem:[%s2248_s17 + $0x58] sm:$0x3]  ;;  %v1715_v62 = vpack.c.bf16 %v2131_v5, %v2130_v12  ;;  %v336_v27 = vsel %vm298_vm0, %v334_v44, %v335_v46  ;;  %v314_v34 = vrot.slane %v2545_v63, 1 }
  0x2d   : > { %1977 = vmatmul.msk.bf16.gmra.mxu0 %vm434_vm1, %v2407_v55  ;;  %3424 = vst [vmem:[#allocation21_spill] sm:$0xff] %v2516_v40  ;;  %1586 = vmatpush.bf16.msra.mxu3 %v1576_v13  ;;  %v338_v24 = vsel %vm298_vm0, %v335_v46, %v337_v48  ;;  %v315_v23 = vrot.slane %v2548_v41, 1  ;;  %v356_v5 = vsel %vm298_vm0, %v354_v32, %v355_v4 }
  0x2e   : > { %1725 = vmatpush.bf16.msra.mxu0 %v1715_v62  ;;  %v358_v12 = vsel %vm298_vm0, %v355_v4, %v357_v50  ;;  %v376_v13 = vsel %vm298_vm0, %v374_v36, %v375_v51  ;;  %v378_v44 = vsel %vm298_vm0, %v375_v51, %v377_v31  ;;  %v710_v31 = vrot.slane %v2287_v37, 2 }
  0x2f   : > { %v2567_v40 = vpack.c.bf16 %v358_v12, %v356_v5  ;;  %v316_v62 = vsel %vm298_vm0, %v314_v34, %v315_v23  ;;  %v2571_v48 = vpack.c.bf16 %v378_v44, %v376_v13  ;;  %v711_v36 = vrot.slane %v2290_v38, 2 }
  0x30   : > { %v232_v50 = vpack.c.bf16 %v2290_v38, %v2287_v37  ;;  %v716_v34 = vrot.slane %v2356_v7, 2  ;;  %v2606_v5 = vpack.c.bf16 %v2452_v18, %v2446_v14  ;;  %v2624_v44 = vpack.c.bf16 %v2548_v41, %v2545_v63 }
  0x31   : > { %3426 = vst [vmem:[#allocation23_spill] sm:$0xff] %v2571_v48  ;;  %v712_v51 = vsel %vm709_vm2, %v710_v31, %v711_v36  ;;  %v2643_v31 = vpack.c.bf16 %v2254_v20, %v2251_v19 }
  0x3a   : > { %1982 = vmatmul.msk.bf16.gmra.mxu1 %vm434_vm1, %v2467_v45 }
  0x3b   : > { %1986 = vmatmul.msk.bf16.gmra.mxu2 %vm434_vm1, %v2471_v49 }
  0x3c   : > { %1990 = vmatmul.msk.bf16.gmra.mxu3 %vm434_vm1, %v2475_v10  ;;  %v2071_v10 = vld [vmem:[%s3360_s1 + $0xb8] sm:$0xff] }
  0x3d   : > { %1978 = vmatmul.msk.bf16.gmra.mxu0 %vm434_vm1, %v2479_v11  ;;  %v1302_v9 = vpack.c.bf16 %v2071_v10, %v2070_v30  ;;  %v317_v10 = vrot.slane %v2551_v52, 1  ;;  %v2563_v30 = vpack.c.bf16 %v338_v24, %v336_v27  ;;  %v713_v27 = vrot.slane %v2298_v43, 2 }
  0x3e   : > { %v233_v24 = vpack.c.bf16 %v2356_v7, %v2353_v6  ;;  %v715_v43 = vrot.slane %v2353_v6, 2  ;;  %v720_v6 = vrot.slane %v2446_v14, 2  ;;  %v721_v7 = vrot.slane %v2452_v18, 2 }
  0x3f   : > { %1312 = vmatpush.bf16.msra.mxu1 %v1302_v9  ;;  %3425 = vst [vmem:[#allocation22_spill] sm:$0xff] %v2563_v30  ;;  %v318_v46 = vsel %vm298_vm0, %v315_v23, %v317_v10  ;;  %v714_v4 = vsel %vm709_vm2, %v711_v36, %v713_v27  ;;  %v718_v9 = vrot.slane %v2359_v8, 2  ;;  %v723_v8 = vrot.slane %v2455_v22, 2 }
  0x40   : > { %v2575_v32 = vpack.c.bf16 %v318_v46, %v316_v62  ;;  %v827_v23 = vpack.c.bf16 %v714_v4, %v712_v51  ;;  %v717_v37 = vsel %vm709_vm2, %v715_v43, %v716_v34  ;;  %v725_v14 = vrot.slane %v2545_v63, 2 }
  0x41   : > { %v719_v38 = vsel %vm709_vm2, %v716_v34, %v718_v9  ;;  %v724_v12 = vsel %vm709_vm2, %v721_v7, %v723_v8  ;;  %v726_v18 = vrot.slane %v2548_v41, 2  ;;  %v728_v22 = vrot.slane %v2551_v52, 2 }
  0x42   : > { %v2602_v10 = vpack.c.bf16 %v719_v38, %v717_v37  ;;  %v730_v63 = vrot.slane %v2251_v19, 2  ;;  %v731_v41 = vrot.slane %v2254_v20, 2  ;;  %v733_v52 = vrot.slane %v2257_v21, 2 }
  0x43   : > { %v727_v62 = vsel %vm709_vm2, %v725_v14, %v726_v18  ;;  %v729_v46 = vsel %vm709_vm2, %v726_v18, %v728_v22  ;;  %v735_v43 = vrot.slane %v2314_v53, 2  ;;  %v736_v34 = vrot.slane %v2317_v54, 2 }
  0x44   : > { %v2639_v27 = vpack.c.bf16 %v729_v46, %v727_v62  ;;  %v732_v36 = vsel %vm709_vm2, %v730_v63, %v731_v41  ;;  %v734_v51 = vsel %vm709_vm2, %v731_v41, %v733_v52  ;;  %v738_v9 = vrot.slane %v2323_v56, 2 }
  0x45   : > { %v737_v38 = vsel %vm709_vm2, %v735_v43, %v736_v34  ;;  %v740_v22 = vrot.slane %v2412_v59, 2  ;;  %v741_v62 = vrot.slane %v2415_v61, 2  ;;  %v743_v46 = vrot.slane %v2418_v0, 2  ;;  %v2088_v0 = vld [vmem:[%s3360_s1 + $0xc0] sm:$0xff] }
  0x47   : > { %v742_v41 = vsel %vm709_vm2, %v740_v22, %v741_v62  ;;  %v744_v52 = vsel %vm709_vm2, %v741_v62, %v743_v46  ;;  %v2108_v62 = vld [vmem:[%s3360_s1 + $0xe0] sm:$0xff]  ;;  %v2109_v46 = vld [vmem:[%s3360_s1 + $0xe8] sm:$0xff] }
  0x4a   : > { %1983 = vmatmul.msk.bf16.gmra.mxu1 %vm434_vm1, %v2563_v30 }
  0x4b   : > { %1987 = vmatmul.msk.bf16.gmra.mxu2 %vm434_vm1, %v2567_v40 }
  0x4c   : > { %1991 = vmatmul.msk.bf16.gmra.mxu3 %vm434_vm1, %v2571_v48 }
  0x4d   : > { %1979 = vmatmul.msk.bf16.gmra.mxu0 %vm434_vm1, %v2575_v32 }
  0x5a   : > { %1992 = vmatmul.msk.bf16.vlgmr.msrb.gmra.mxu1 %vm434_vm1, %v232_v50  ;;  %v2660_v50 = vpack.c.bf16 %v734_v51, %v732_v36 }
  0x5b   : > { %2012 = vmatmul.msk.bf16.vlgmr.msrb.gmra.mxu2 %vm434_vm1, %v827_v23  ;;  %v2664_v23 = vpack.c.bf16 %v2317_v54, %v2314_v53  ;;  %v2699_v53 = vpack.c.bf16 %v2415_v61, %v2412_v59  ;;  %v2734_v59 = vpack.c.bf16 %v2485_v16, %v2482_v15 }
  0x5c   : > { %2032 = vmatmul.msk.bf16.vlgmr.msrb.gmra.mxu3 %vm434_vm1, %v233_v24 }
  0x5d   : > { %2052 = vmatmul.msk.bf16.vlgmr.msrb.gmra.mxu0 %vm434_vm1, %v2407_v55  ;;  %v722_v55 = vsel %vm709_vm2, %v720_v6, %v721_v7  ;;  %v739_v6 = vsel %vm709_vm2, %v736_v34, %v738_v9  ;;  %3429 = vst [vmem:[#allocation26_spill] sm:$0xff] %v2699_v53  ;;  %v2730_v34 = vpack.c.bf16 %v744_v52, %v742_v41  ;;  %v2089_v9 = vld [vmem:[%s3360_s1 + $0xc8] sm:$0xff] }
  0x5e   : > { %v2620_v13 = vpack.c.bf16 %v724_v12, %v722_v55  ;;  %v2695_v12 = vpack.c.bf16 %v739_v6, %v737_v38  ;;  %3433 = vst [vmem:[#allocation30_spill] sm:$0xff] %v2734_v59  ;;  %v1433_v38 = vpack.c.bf16 %v2089_v9, %v2088_v0  ;;  %v1575_v52 = vpack.c.bf16 %v2109_v46, %v2108_v62 }
  0x5f   : > { %3432 = vst [vmem:[#allocation29_spill] sm:$0xff] %v2730_v34  ;;  %v745_v0 = vrot.slane %v2482_v15, 2  ;;  %v746_v9 = vrot.slane %v2485_v16, 2  ;;  %v2128_v15 = vld [vmem:[%s3360_s1 + $0x100] sm:$0xff]  ;;  %v2129_v16 = vld [vmem:[%s3360_s1 + $0x108] sm:$0xff] }
  0x60   : > { %1445 = vmatpush.bf16.msra.mxu2 %v1433_v38  ;;  %1587 = vmatpush.bf16.msra.mxu3 %v1575_v52  ;;  %v1714_v62 = vpack.c.bf16 %v2129_v16, %v2128_v15  ;;  %v753_v15 = vrot.slane %v2272_v28, 2  ;;  %v750_v16 = vrot.slane %v2263_v25, 2 }
  0x62   : > { %1726 = vmatpush.bf16.msra.mxu0 %v1714_v62 }
  0x6a   : > { %1993 = vmatmul.msk.bf16.gmra.mxu1 %vm434_vm1, %v233_v24 }
  0x6b   : > { %2013 = vmatmul.msk.bf16.gmra.mxu2 %vm434_vm1, %v2602_v10 }
  0x6c   : > { %2033 = vmatmul.msk.bf16.gmra.mxu3 %vm434_vm1, %v2606_v5 }
  0x6d   : > { %2053 = vmatmul.msk.bf16.gmra.mxu0 %vm434_vm1, %v2479_v11 }
  0x7a   : > { %1994 = vmatmul.msk.bf16.gmra.mxu1 %vm434_vm1, %v2606_v5 }
  0x7b   : > { %2014 = vmatmul.msk.bf16.gmra.mxu2 %vm434_vm1, %v2620_v13 }
  0x7c   : > { %2034 = vmatmul.msk.bf16.gmra.mxu3 %vm434_vm1, %v2624_v44 }
  0x7d   : > { %2054 = vmatmul.msk.bf16.gmra.mxu0 %vm434_vm1, %v2575_v32 }
  0x8a   : > { %1995 = vmatmul.msk.bf16.gmra.mxu1 %vm434_vm1, %v2624_v44 }
  0x8b   : > { %2015 = vmatmul.msk.bf16.gmra.mxu2 %vm434_vm1, %v2639_v27 }
  0x8c   : > { %2035 = vmatmul.msk.bf16.gmra.mxu3 %vm434_vm1, %v2643_v31 }
  0x8d   : > { %2055 = vmatmul.msk.bf16.gmra.mxu0 %vm434_vm1, %v2292_v39 }
  0x97   : > { %v2658_v4 = vpop.f32.mrf.mxu1 }
  0x9a   : > { %1996 = vmatmul.msk.bf16.gmra.mxu1 %vm434_vm1, %v2643_v31  ;;  %v2668_v19 = vpop.f32.mrf.mxu0 }
  0x9b   : > { %2016 = vmatmul.msk.bf16.gmra.mxu2 %vm434_vm1, %v2660_v50 }
  0x9c   : > { %2036 = vmatmul.msk.bf16.gmra.mxu3 %vm434_vm1, %v2664_v23 }
  0x9d   : > { %2056 = vmatmul.msk.bf16.gmra.mxu0 %vm434_vm1, %v2389_v33 }
  0x9e   : > { %v2676_v20 = vpop.f32.mrf.mxu2 }
  0x9f   : > { %v2678_v21 = vpop.f32.mrf.mxu1  ;;  %v2680_v24 = vpop.f32.mrf.mxu3 }
  0xa0   : > { %3427 = vst [vmem:[#allocation24_spill] sm:$0xff] %v2680_v24 }
  0xa2   : > { %v2685_v37 = vpop.f32.mrf.mxu0 }
  0xa6   : > { %v2689_v7 = vpop.f32.mrf.mxu2 }
  0xa7   : > { %v2691_v8 = vpop.f32.mrf.mxu1  ;;  %v2693_v55 = vpop.f32.mrf.mxu3 }
  0xa8   : > { %3428 = vst [vmem:[#allocation25_spill] sm:$0xff] %v2693_v55 }
  0xaa   : > { %1997 = vmatmul.msk.bf16.gmra.mxu1 %vm434_vm1, %v2664_v23  ;;  %v2703_v54 = vpop.f32.mrf.mxu0 }
  0xab   : > { %2017 = vmatmul.msk.bf16.gmra.mxu2 %vm434_vm1, %v2695_v12 }
  0xac   : > { %2037 = vmatmul.msk.bf16.gmra.mxu3 %vm434_vm1, %v2699_v53 }
  0xad   : > { %2057 = vmatmul.msk.bf16.gmra.mxu0 %vm434_vm1, %v2467_v45 }
  0xae   : > { %v2711_v56 = vpop.f32.mrf.mxu2 }
  0xaf   : > { %v2713_v14 = vpop.f32.mrf.mxu1  ;;  %v2715_v18 = vpop.f32.mrf.mxu3 }
  0xb0   : > { %3430 = vst [vmem:[#allocation27_spill] sm:$0xff] %v2715_v18  ;;  %v2068_v18 = vld [vmem:[%s3360_s1 + $0xa0] sm:$0xff] }
  0xb2   : > { %v2720_v63 = vpop.f32.mrf.mxu0 }
  0xb6   : > { %v2724_v36 = vpop.f32.mrf.mxu2 }
  0xb7   : > { %v2726_v51 = vpop.f32.mrf.mxu1  ;;  %v2728_v43 = vpop.f32.mrf.mxu3 }
  0xb8   : > { %3431 = vst [vmem:[#allocation28_spill] sm:$0xff] %v2728_v43  ;;  %v748_v43 = vrot.slane %v2490_v17, 2  ;;  %v747_v17 = vsel %vm709_vm2, %v745_v0, %v746_v9 }
  0xba   : > { %1998 = vmatmul.msk.bf16.gmra.mxu1 %vm434_vm1, %v2699_v53  ;;  %v2738_v61 = vpop.f32.mrf.mxu0  ;;  %v749_v38 = vsel %vm709_vm2, %v746_v9, %v748_v43 }
  0xbb   : > { %2018 = vmatmul.msk.bf16.gmra.mxu2 %vm434_vm1, %v2730_v34 }
  0xbc   : > { %2038 = vmatmul.msk.bf16.gmra.mxu3 %vm434_vm1, %v2734_v59 }
  0xbd   : > { %2058 = vmatmul.msk.bf16.gmra.mxu0 %vm434_vm1, %v2563_v30  ;;  %v2069_v30 = vld [vmem:[%s3360_s1 + $0xa8] sm:$0xff] }
  0xbe   : > { %v2752_v6 = vpop.f32.mrf.mxu2  ;;  %v1301_v55 = vpack.c.bf16 %v2069_v30, %v2068_v18  ;;  %v2789_v18 = vpack.c.bf16 %v749_v38, %v747_v17  ;;  %v751_v17 = vrot.slane %v2266_v26, 2 }
  0xbf   : > { %v2754_v22 = vpop.f32.mrf.mxu1  ;;  %v2762_v41 = vpop.f32.mrf.mxu3 }
  0xc0   : > { %3434 = vst [vmem:[#allocation31_spill] sm:$0xff] %v2762_v41  ;;  %1313 = vmatpush.bf16.msra.mxu1 %v1301_v55  ;;  %v2793_v41 = vpack.c.bf16 %v2266_v26, %v2263_v25  ;;  %v752_v62 = vsel %vm709_vm2, %v750_v16, %v751_v17  ;;  %v2827_v25 = vpack.c.bf16 %v2329_v58, %v2326_v57  ;;  %v758_v16 = vrot.slane %v2334_v60, 2 }
  0xc1   : > { %3436 = vst [vmem:[#allocation33_spill] sm:$0xff] %v2789_v18 }
  0xc2   : > { %v2773_v34 = vpop.f32.mrf.mxu0  ;;  %3437 = vst [vmem:[#allocation34_spill] sm:$0xff] %v2793_v41 }
  0xc6   : > { %v2783_v46 = vpop.f32.mrf.mxu2 }
  0xc7   : > { %v2785_v52 = vpop.f32.mrf.mxu1  ;;  %v2787_v30 = vpop.f32.mrf.mxu3 }
  0xc8   : > { %3435 = vst [vmem:[#allocation32_spill] sm:$0xff] %v2787_v30  ;;  %v754_v30 = vsel %vm709_vm2, %v751_v17, %v753_v15  ;;  %v755_v17 = vrot.slane %v2326_v57, 2  ;;  %v2850_v57 = vpack.c.bf16 %v2426_v2, %v2423_v1 }
  0xca   : > { %1999 = vmatmul.msk.bf16.gmra.mxu1 %vm434_vm1, %v2734_v59  ;;  %v2797_v0 = vpop.f32.mrf.mxu0 }
  0xcb   : > { %2019 = vmatmul.msk.bf16.gmra.mxu2 %vm434_vm1, %v2789_v18 }
  0xcc   : > { %2039 = vmatmul.msk.bf16.gmra.mxu3 %vm434_vm1, %v2793_v41 }
  0xcd   : > { %2059 = vmatmul.msk.bf16.gmra.mxu0 %vm434_vm1, %v2305_v47 }
  0xce   : > { %v2805_v55 = vpop.f32.mrf.mxu2 }
  0xcf   : > { %v2807_v43 = vpop.f32.mrf.mxu1  ;;  %v2809_v9 = vpop.f32.mrf.mxu3 }
  0xd0   : > { %3438 = vst [vmem:[#allocation35_spill] sm:$0xff] %v2809_v9  ;;  %v2823_v9 = vpack.c.bf16 %v754_v30, %v752_v62  ;;  %v756_v62 = vrot.slane %v2329_v58, 2 }
  0xd2   : > { %v2814_v38 = vpop.f32.mrf.mxu0  ;;  %3441 = vst [vmem:[#allocation38_spill] sm:$0xff] %v2823_v9  ;;  %v757_v45 = vsel %vm709_vm2, %v755_v17, %v756_v62 }
  0xd6   : > { %v2818_v18 = vpop.f32.mrf.mxu2 }
  0xd7   : > { %3439 = vst [vmem:[#allocation36_spill] sm:$0xff] %v2818_v18  ;;  %v629_v47 = vpop.f32.mrf.mxu1  ;;  %v2820_v59 = vpop.f32.mrf.mxu3 }
  0xd8   : > { %3440 = vst [vmem:[#allocation37_spill] sm:$0xff] %v2820_v59  ;;  %v630_v24 = vadd.f32 %v629_v47, %v2668_v19 }
  0xda   : > { %2000 = vmatmul.msk.bf16.gmra.mxu1 %vm434_vm1, %v2793_v41  ;;  %v1176_v26 = vpop.f32.mrf.mxu0 }
  0xdb   : > { %2020 = vmatmul.msk.bf16.gmra.mxu2 %vm434_vm1, %v2823_v9 }
  0xdc   : > { %2040 = vmatmul.msk.bf16.gmra.mxu3 %vm434_vm1, %v2827_v25 }
  0xdd   : > { %2060 = vmatmul.msk.bf16.gmra.mxu0 %vm434_vm1, %v2399_v42  ;;  %v759_v42 = vsel %vm709_vm2, %v756_v62, %v758_v16 }
  0xde   : > { %v902_v28 = vpop.f32.mrf.mxu2 }
  0xdf   : > { %v631_v47 = vpop.f32.mrf.mxu1  ;;  %v982_v19 = vadd.f32 %v902_v28, %v630_v24  ;;  %v1034_v30 = vpop.f32.mrf.mxu3 }
  0xe0   : > { %v632_v15 = vadd.f32 %v631_v47, %v2685_v37  ;;  %v2846_v47 = vpack.c.bf16 %v759_v42, %v757_v45 }
  0xe1   : > { %v1114_v59 = vadd.f32 %v1034_v30, %v982_v19  ;;  %v760_v19 = vrot.slane %v2423_v1, 2  ;;  %v761_v30 = vrot.slane %v2426_v2, 2  ;;  %v3444_v1 = vld [vmem:[#allocation19_spill] sm:$0xff] }
  0xe2   : > { %v1178_v9 = vpop.f32.mrf.mxu0 }
  0xe3   : > { %v2841_v41 = vadd.f32 %v1176_v26, %v1114_v59  ;;  %v763_v26 = vrot.slane %v2429_v3, 2  ;;  %v762_v17 = vsel %vm709_vm2, %v760_v19, %v761_v30  ;;  %v3443_v3 = vld [vmem:[#allocation18_spill] sm:$0xff] }
  0xe5   : > { %v764_v62 = vsel %vm709_vm2, %v761_v30, %v763_v26  ;;  %v3446_v30 = vld [vmem:[#allocation20_spill] sm:$0xff] }
  0xe6   : > { %v904_v53 = vpop.f32.mrf.mxu2 }
  0xe7   : > { %v634_v18 = vpop.f32.mrf.mxu1  ;;  %v983_v24 = vadd.f32 %v904_v53, %v632_v15  ;;  %v1036_v28 = vpop.f32.mrf.mxu3 }
  0xe8   : > { %v635_v37 = vadd.f32 %v634_v18, %v2703_v54 }
  0xe9   : > { %v1115_v58 = vadd.f32 %v1036_v28, %v983_v24 }
  0xea   : > { %2001 = vmatmul.msk.bf16.gmra.mxu1 %vm434_vm1, %v2827_v25  ;;  %v1181_v60 = vpop.f32.mrf.mxu0 }
  0xeb   : > { %2021 = vmatmul.msk.bf16.gmra.mxu2 %vm434_vm1, %v2846_v47  ;;  %v2856_v59 = vadd.f32 %v1178_v9, %v1115_v58 }
  0xec   : > { %2041 = vmatmul.msk.bf16.gmra.mxu3 %vm434_vm1, %v2850_v57 }
  0xed   : > { %2061 = vmatmul.msk.bf16.gmra.mxu0 %vm434_vm1, %v2471_v49 }
  0xee   : > { %v907_v42 = vpop.f32.mrf.mxu2 }
  0xef   : > { %v636_v45 = vpop.f32.mrf.mxu1  ;;  %v984_v53 = vadd.f32 %v907_v42, %v635_v37  ;;  %v1039_v54 = vpop.f32.mrf.mxu3  ;;  %v2871_v42 = vpack.c.bf16 %v764_v62, %v762_v17  ;;  %v765_v17 = vrot.slane %v3443_v3, 2  ;;  %v766_v62 = vrot.slane %v3444_v1, 2 }
  0xf0   : > { %v637_v18 = vadd.f32 %v636_v45, %v2720_v63  ;;  %v2875_v45 = vpack.c.bf16 %v3444_v1, %v3443_v3  ;;  %v3449_v3 = vld [vmem:[#allocation4_spill] sm:$0xff] }
  0xf1   : > { %v1116_v9 = vadd.f32 %v1039_v54, %v984_v53 }
  0xf2   : > { %v1183_v15 = vpop.f32.mrf.mxu0 }
  0xf3   : > { %v2866_v16 = vadd.f32 %v1181_v60, %v1116_v9  ;;  %v768_v9 = vrot.slane %v3446_v30, 2  ;;  %v3448_v30 = vld [vmem:[#allocation3_spill] sm:$0xff] }
  0xf5   : > { %3442 = vst [vmem:[#allocation39_spill] sm:$0xff] %v2866_v16  ;;  %v2900_v16 = vpack.c.bf16 %v3449_v3, %v3448_v30 }
  0xf6   : > { %v909_v24 = vpop.f32.mrf.mxu2 }
  0xf7   : > { %v639_v28 = vpop.f32.mrf.mxu1  ;;  %v985_v37 = vadd.f32 %v909_v24, %v637_v18  ;;  %v1041_v58 = vpop.f32.mrf.mxu3 }
  0xf8   : > { %v640_v63 = vadd.f32 %v639_v28, %v2738_v61 }
  0xf9   : > { %v1117_v2 = vadd.f32 %v1041_v58, %v985_v37  ;;  %v767_v37 = vsel %vm709_vm2, %v765_v17, %v766_v62  ;;  %v769_v58 = vsel %vm709_vm2, %v766_v62, %v768_v9  ;;  %v3452_v62 = vld [vmem:[#allocation5_spill] sm:$0xff] }
  0xfa   : > { %2002 = vmatmul.msk.bf16.gmra.mxu1 %vm434_vm1, %v2850_v57  ;;  %v1186_v60 = vpop.f32.mrf.mxu0 }
  0xfb   : > { %2022 = vmatmul.msk.bf16.gmra.mxu2 %vm434_vm1, %v2871_v42  ;;  %v2881_v53 = vadd.f32 %v1183_v15, %v1117_v2 }
  0xfc   : > { %2042 = vmatmul.msk.bf16.gmra.mxu3 %vm434_vm1, %v2875_v45 }
  0xfd   : > { %3445 = vst [vmem:[#allocation18_spill] sm:$0xff] %v2881_v53  ;;  %2062 = vmatmul.msk.bf16.gmra.mxu0 %vm434_vm1, %v2567_v40 }
  0xfe   : > { %v912_v61 = vpop.f32.mrf.mxu2 }
  0xff   : > { %v641_v54 = vpop.f32.mrf.mxu1  ;;  %v986_v18 = vadd.f32 %v912_v61, %v640_v63  ;;  %v1044_v26 = vpop.f32.mrf.mxu3 }
 0x100   : > { %v642_v19 = vadd.f32 %v641_v54, %v2773_v34  ;;  %v2896_v54 = vpack.c.bf16 %v769_v58, %v767_v37  ;;  %v770_v37 = vrot.slane %v3448_v30, 2  ;;  %v771_v58 = vrot.slane %v3449_v3, 2 }
 0x101   : > { %v1118_v15 = vadd.f32 %v1044_v26, %v986_v18 }
 0x102   : > { %v1188_v24 = vpop.f32.mrf.mxu0 }
 0x103   : > { %v2891_v28 = vadd.f32 %v1186_v60, %v1118_v15  ;;  %v773_v15 = vrot.slane %v3452_v62, 2 }
 0x105   : > { %3447 = vst [vmem:[#allocation19_spill] sm:$0xff] %v2891_v28 }
 0x106   : > { %v914_v2 = vpop.f32.mrf.mxu2 }
 0x107   : > { %v644_v53 = vpop.f32.mrf.mxu1  ;;  %v987_v63 = vadd.f32 %v914_v2, %v642_v19  ;;  %v1046_v61 = vpop.f32.mrf.mxu3 }
 0x108   : > { %v645_v34 = vadd.f32 %v644_v53, %v2797_v0  ;;  %v3451_v0 = vld [vmem:[#allocation7_spill] sm:$0xff] }
 0x109   : > { %v1119_v1 = vadd.f32 %v1046_v61, %v987_v63  ;;  %v772_v61 = vsel %vm709_vm2, %v770_v37, %v771_v58 }
 0x10a   : > { %2003 = vmatmul.msk.bf16.gmra.mxu1 %vm434_vm1, %v2875_v45  ;;  %v1191_v60 = vpop.f32.mrf.mxu0 }
 0x10b   : > { %2023 = vmatmul.msk.bf16.gmra.mxu2 %vm434_vm1, %v2896_v54  ;;  %v2906_v18 = vadd.f32 %v1188_v24, %v1119_v1  ;;  %v774_v1 = vsel %vm709_vm2, %v771_v58, %v773_v15  ;;  %v3459_v58 = vld [vmem:[#allocation10_spill] sm:$0xff] }
 0x10c   : > { %2043 = vmatmul.msk.bf16.gmra.mxu3 %vm434_vm1, %v2900_v16 }
 0x10d   : > { %3450 = vst [vmem:[#allocation20_spill] sm:$0xff] %v2906_v18  ;;  %2063 = vmatmul.msk.bf16.gmra.mxu0 %vm434_vm1, %v3451_v0  ;;  %v2920_v0 = vpack.c.bf16 %v774_v1, %v772_v61 }
 0x10e   : > { %v917_v53 = vpop.f32.mrf.mxu2 }
 0x10f   : > { %v646_v26 = vpop.f32.mrf.mxu1  ;;  %v988_v19 = vadd.f32 %v917_v53, %v645_v34  ;;  %v1049_v9 = vpop.f32.mrf.mxu3  ;;  %3454 = vst [vmem:[#allocation4_spill] sm:$0xff] %v2920_v0 }
 0x110   : > { %v647_v17 = vadd.f32 %v646_v26, %v2814_v38  ;;  %v3455_v38 = vld [vmem:[#allocation8_spill] sm:$0xff]  ;;  %v3456_v26 = vld [vmem:[#allocation9_spill] sm:$0xff] }
 0x111   : > { %v1120_v24 = vadd.f32 %v1049_v9, %v988_v19  ;;  %v2924_v62 = vpack.c.bf16 %v3456_v26, %v3455_v38  ;;  %v3458_v19 = vld [vmem:[#allocation12_spill] sm:$0xff]  ;;  %v775_v61 = vrot.slane %v3455_v38, 2  ;;  %v776_v1 = vrot.slane %v3456_v26, 2  ;;  %v3462_v38 = vld [vmem:[#allocation14_spill] sm:$0xff] }
 0x112   : > { %v1193_v2 = vpop.f32.mrf.mxu0 }
 0x113   : > { %v2916_v63 = vadd.f32 %v1191_v60, %v1120_v24  ;;  %v778_v24 = vrot.slane %v3459_v58, 2  ;;  %v3461_v58 = vld [vmem:[#allocation13_spill] sm:$0xff] }
 0x115   : > { %3453 = vst [vmem:[#allocation3_spill] sm:$0xff] %v2916_v63 }
 0x116   : > { %v919_v18 = vpop.f32.mrf.mxu2 }
 0x117   : > { %v649_v28 = vpop.f32.mrf.mxu1  ;;  %v989_v34 = vadd.f32 %v919_v18, %v647_v17  ;;  %v1051_v53 = vpop.f32.mrf.mxu3 }
 0x118   : > { %v650_v18 = vadd.f32 %v649_v28, %v2658_v4  ;;  %v779_v4 = vsel %vm709_vm2, %v776_v1, %v778_v24 }
 0x119   : > { %v1121_v30 = vadd.f32 %v1051_v53, %v989_v34 }
 0x11a   : > { %2004 = vmatmul.msk.bf16.gmra.mxu1 %vm434_vm1, %v2900_v16  ;;  %v1196_v3 = vpop.f32.mrf.mxu0 }
 0x11b   : > { %2024 = vmatmul.msk.bf16.gmra.mxu2 %vm434_vm1, %v2920_v0  ;;  %v2930_v60 = vadd.f32 %v1193_v2, %v1121_v30  ;;  %v777_v30 = vsel %vm709_vm2, %v775_v61, %v776_v1  ;;  %v2949_v0 = vpack.c.bf16 %v3462_v38, %v3461_v58  ;;  %v3465_v1 = vld [vmem:[#allocation15_spill] sm:$0xff] }
 0x11c   : > { %2044 = vmatmul.msk.bf16.gmra.mxu3 %vm434_vm1, %v2924_v62 }
 0x11d   : > { %3457 = vst [vmem:[#allocation5_spill] sm:$0xff] %v2930_v60  ;;  %2064 = vmatmul.msk.bf16.gmra.mxu0 %vm434_vm1, %v3458_v19  ;;  %v2945_v19 = vpack.c.bf16 %v779_v4, %v777_v30  ;;  %v780_v30 = vrot.slane %v3461_v58, 2  ;;  %v781_v4 = vrot.slane %v3462_v38, 2  ;;  %v2974_v58 = vpack.c.bf16 %v2513_v35, %v2501_v29 }
 0x11e   : > { %v922_v9 = vpop.f32.mrf.mxu2 }
 0x11f   : > { %v651_v17 = vpop.f32.mrf.mxu1  ;;  %v990_v15 = vadd.f32 %v922_v9, %v650_v18  ;;  %v1054_v37 = vpop.f32.mrf.mxu3 }
 0x120   : > { %v652_v28 = vadd.f32 %v651_v17, %v2678_v21 }
 0x121   : > { %v1122_v2 = vadd.f32 %v1054_v37, %v990_v15 }
 0x122   : > { %v1198_v34 = vpop.f32.mrf.mxu0 }
 0x123   : > { %v2940_v53 = vadd.f32 %v1196_v3, %v1122_v2  ;;  %v783_v2 = vrot.slane %v3465_v1, 2  ;;  %v3468_v1 = vld [vmem:[#allocation21_spill] sm:$0xff] }
 0x125   : > { %3460 = vst [vmem:[#allocation8_spill] sm:$0xff] %v2940_v53 }
 0x126   : > { %v924_v60 = vpop.f32.mrf.mxu2 }
 0x127   : > { %v654_v63 = vpop.f32.mrf.mxu1  ;;  %v991_v18 = vadd.f32 %v924_v60, %v652_v28  ;;  %v1056_v9 = vpop.f32.mrf.mxu3  ;;  %v3464_v60 = vld [vmem:[#allocation17_spill] sm:$0xff] }
 0x128   : > { %v655_v21 = vadd.f32 %v654_v63, %v2691_v8  ;;  %v784_v8 = vsel %vm709_vm2, %v781_v4, %v783_v2  ;;  %v788_v2 = vrot.slane %v3468_v1, 2 }
 0x129   : > { %v1123_v26 = vadd.f32 %v1056_v9, %v991_v18  ;;  %v782_v9 = vsel %vm709_vm2, %v780_v30, %v781_v4 }
 0x12a   : > { %2005 = vmatmul.msk.bf16.gmra.mxu1 %vm434_vm1, %v2924_v62  ;;  %v1201_v3 = vpop.f32.mrf.mxu0  ;;  %v2970_v53 = vpack.c.bf16 %v784_v8, %v782_v9  ;;  %v786_v9 = vrot.slane %v2513_v35, 2  ;;  %v2994_v8 = vld [vmem:[%s2248_s17 + $0x188] sm:$0xff] }
 0x12b   : > { %2025 = vmatmul.msk.bf16.gmra.mxu2 %vm434_vm1, %v2945_v19  ;;  %v2955_v15 = vadd.f32 %v1198_v34, %v1123_v26 }
 0x12c   : > { %2045 = vmatmul.msk.bf16.gmra.mxu3 %vm434_vm1, %v2949_v0  ;;  %v789_v35 = vsel %vm709_vm2, %v786_v9, %v788_v2 }
 0x12d   : > { %3463 = vst [vmem:[#allocation9_spill] sm:$0xff] %v2955_v15  ;;  %2065 = vmatmul.msk.bf16.gmra.mxu0 %vm434_vm1, %v3464_v60 }
 0x12e   : > { %v927_v17 = vpop.f32.mrf.mxu2 }
 0x12f   : > { %v656_v37 = vpop.f32.mrf.mxu1  ;;  %v992_v24 = vadd.f32 %v927_v17, %v655_v21  ;;  %v1059_v61 = vpop.f32.mrf.mxu3 }
 0x130   : > { %v657_v63 = vadd.f32 %v656_v37, %v2713_v14 }
 0x131   : > { %v1124_v34 = vadd.f32 %v1059_v61, %v992_v24 }
 0x132   : > { %v1203_v28 = vpop.f32.mrf.mxu0 }
 0x133   : > { %v2965_v18 = vadd.f32 %v1201_v3, %v1124_v34  ;;  %v785_v34 = vrot.slane %v2501_v29, 2 }
 0x135   : > { %3466 = vst [vmem:[#allocation10_spill] sm:$0xff] %v2965_v18  ;;  %v787_v29 = vsel %vm709_vm2, %v785_v34, %v786_v9 }
 0x136   : > { %v929_v26 = vpop.f32.mrf.mxu2 }
 0x137   : > { %v659_v15 = vpop.f32.mrf.mxu1  ;;  %v993_v21 = vadd.f32 %v929_v26, %v657_v63  ;;  %v1061_v17 = vpop.f32.mrf.mxu3  ;;  %v2997_v63 = vld [vmem:[%s2248_s17 + $0x190] sm:$0x3] }
 0x138   : > { %v660_v37 = vadd.f32 %v659_v15, %v2726_v51 }
 0x139   : > { %v1125_v38 = vadd.f32 %v1061_v17, %v993_v21  ;;  %v1150_v21 = vrot.slane %v2994_v8, 1  ;;  %v1152_v17 = vrot.slane %v2997_v63, 1 }
 0x13a   : > { %2006 = vmatmul.msk.bf16.gmra.mxu1 %vm434_vm1, %v2949_v0  ;;  %v1206_v3 = vpop.f32.mrf.mxu0 }
 0x13b   : > { %2026 = vmatmul.msk.bf16.gmra.mxu2 %vm434_vm1, %v2970_v53  ;;  %v2980_v14 = vadd.f32 %v1203_v28, %v1125_v38  ;;  %v2991_v28 = vld [vmem:[%s2248_s17 + $0x180] sm:$0xff] }
 0x13c   : > { %2046 = vmatmul.msk.bf16.gmra.mxu3 %vm434_vm1, %v2974_v58  ;;  %v1149_v26 = vrot.slane %v2991_v28, 1 }
 0x13d   : > { %3467 = vst [vmem:[#allocation13_spill] sm:$0xff] %v2980_v14  ;;  %2066 = vmatmul.msk.bf16.gmra.mxu0 %vm434_vm1, %v2571_v48  ;;  %v1153_v48 = vsel %vm298_vm0, %v1150_v21, %v1152_v17 }
 0x13e   : > { %v932_v24 = vpop.f32.mrf.mxu2 }
 0x13f   : > { %v661_v61 = vpop.f32.mrf.mxu1  ;;  %v994_v30 = vadd.f32 %v932_v24, %v660_v37  ;;  %v1064_v4 = vpop.f32.mrf.mxu3 }
 0x140   : > { %v662_v37 = vadd.f32 %v661_v61, %v2754_v22 }
 0x141   : > { %v1126_v51 = vadd.f32 %v1064_v4, %v994_v30  ;;  %v3007_v30 = vpack.c.bf16 %v789_v35, %v787_v29  ;;  %v1151_v4 = vsel %vm298_vm0, %v1149_v26, %v1150_v21 }
 0x142   : > { %v1208_v15 = vpop.f32.mrf.mxu0  ;;  %v3017_v2 = vpack.c.bf16 %v1153_v48, %v1151_v4 }
 0x143   : > { %v3002_v38 = vadd.f32 %v1206_v3, %v1126_v51  ;;  %v3013_v3 = vpack.c.bf16 %v2994_v8, %v2991_v28 }
 0x146   : > { %v934_v24 = vpop.f32.mrf.mxu2 }
 0x147   : > { %v664_v1 = vpop.f32.mrf.mxu1  ;;  %v995_v14 = vadd.f32 %v934_v24, %v662_v37  ;;  %v1066_v18 = vpop.f32.mrf.mxu3 }
 0x148   : > { %v665_v34 = vadd.f32 %v664_v1, %v2785_v52 }
 0x149   : > { %v1127_v51 = vadd.f32 %v1066_v18, %v995_v14 }
 0x14a   : > { %2007 = vmatmul.msk.bf16.gmra.mxu1 %vm434_vm1, %v2974_v58  ;;  %v1211_v22 = vpop.f32.mrf.mxu0 }
 0x14b   : > { %2027 = vmatmul.msk.bf16.gmra.mxu2 %vm434_vm1, %v3007_v30  ;;  %v3021_v61 = vadd.f32 %v1208_v15, %v1127_v51 }
 0x14c   : > { %2047 = vmatmul.msk.bf16.gmra.mxu3 %vm434_vm1, %v3013_v3 }
 0x14d   : > { %2067 = vmatmul.msk.bf16.gmra.mxu0 %vm434_vm1, %v3017_v2 }
 0x14e   : > { %v937_v18 = vpop.f32.mrf.mxu2 }
 0x14f   : > { %v666_v14 = vpop.f32.mrf.mxu1  ;;  %v996_v9 = vadd.f32 %v937_v18, %v665_v34  ;;  %v1069_v26 = vpop.f32.mrf.mxu3 }
 0x150   : > { %v667_v29 = vadd.f32 %v666_v14, %v2807_v43 }
 0x151   : > { %v1128_v48 = vadd.f32 %v1069_v26, %v996_v9 }
 0x152   : > { %v1213_v21 = vpop.f32.mrf.mxu0 }
 0x153   : > { %v3028_v17 = vadd.f32 %v1211_v22, %v1128_v48 }
 0x156   : > { %v939_v15 = vpop.f32.mrf.mxu2 }
 0x157   : > { %v669_v35 = vpop.f32.mrf.mxu1  ;;  %v997_v37 = vadd.f32 %v939_v15, %v667_v29  ;;  %v1071_v24 = vpop.f32.mrf.mxu3 }
 0x158   : > { %v670_v51 = vadd.f32 %v669_v35, %v2676_v20 }
 0x159   : > { %v1129_v4 = vadd.f32 %v1071_v24, %v997_v37 }
 0x15a   : > { %2072 = vmatmul.msk.bf16.vlgmr.msra.gmra.mxu1 %vm434_vm1, %v2602_v10  ;;  %v1216_v52 = vpop.f32.mrf.mxu0 }
 0x15b   : > { %2092 = vmatmul.msk.bf16.vlgmr.msra.gmra.mxu2 %vm434_vm1, %v2606_v5  ;;  %v3035_v1 = vadd.f32 %v1213_v21, %v1129_v4 }
 0x15c   : > { %2112 = vmatmul.msk.bf16.vlgmr.msra.gmra.mxu3 %vm434_vm1, %v2479_v11 }
 0x15d   : > { %2132 = vmatmul.msk.bf16.vlgmr.msra.gmra.mxu0 %vm434_vm1, %v2620_v13 }
 0x15e   : > { %v942_v43 = vpop.f32.mrf.mxu2 }
 0x15f   : > { %v671_v22 = vpop.f32.mrf.mxu1  ;;  %v998_v34 = vadd.f32 %v942_v43, %v670_v51  ;;  %v1074_v18 = vpop.f32.mrf.mxu3 }
 0x160   : > { %v672_v5 = vadd.f32 %v671_v22, %v2689_v7 }
 0x161   : > { %v1130_v14 = vadd.f32 %v1074_v18, %v998_v34 }
 0x162   : > { %v1218_v10 = vpop.f32.mrf.mxu0 }
 0x163   : > { %v3042_v9 = vadd.f32 %v1216_v52, %v1130_v14 }
 0x166   : > { %v944_v26 = vpop.f32.mrf.mxu2 }
 0x167   : > { %v674_v48 = vpop.f32.mrf.mxu1  ;;  %v999_v21 = vadd.f32 %v944_v26, %v672_v5  ;;  %v1076_v29 = vpop.f32.mrf.mxu3 }
 0x168   : > { %v675_v35 = vadd.f32 %v674_v48, %v2711_v56 }
 0x169   : > { %v1131_v11 = vadd.f32 %v1076_v29, %v999_v21 }
 0x16a   : > { %2073 = vmatmul.msk.bf16.gmra.mxu1 %vm434_vm1, %v2620_v13  ;;  %v1221_v20 = vpop.f32.mrf.mxu0 }
 0x16b   : > { %2093 = vmatmul.msk.bf16.gmra.mxu2 %vm434_vm1, %v2624_v44  ;;  %v3049_v15 = vadd.f32 %v1218_v10, %v1131_v11 }
 0x16c   : > { %2113 = vmatmul.msk.bf16.gmra.mxu3 %vm434_vm1, %v2575_v32 }
 0x16d   : > { %2133 = vmatmul.msk.bf16.gmra.mxu0 %vm434_vm1, %v2639_v27 }
 0x16e   : > { %v947_v7 = vpop.f32.mrf.mxu2 }
 0x16f   : > { %v676_v37 = vpop.f32.mrf.mxu1  ;;  %v1000_v24 = vadd.f32 %v947_v7, %v675_v35  ;;  %v1079_v4 = vpop.f32.mrf.mxu3 }
 0x170   : > { %v677_v44 = vadd.f32 %v676_v37, %v2724_v36 }
 0x171   : > { %v1132_v52 = vadd.f32 %v1079_v4, %v1000_v24 }
 0x172   : > { %v1223_v13 = vpop.f32.mrf.mxu0 }
 0x173   : > { %v3056_v51 = vadd.f32 %v1221_v20, %v1132_v52 }
 0x176   : > { %v949_v43 = vpop.f32.mrf.mxu2 }
 0x177   : > { %v679_v22 = vpop.f32.mrf.mxu1  ;;  %v1001_v34 = vadd.f32 %v949_v43, %v677_v44  ;;  %v1081_v18 = vpop.f32.mrf.mxu3 }
 0x178   : > { %v680_v10 = vadd.f32 %v679_v22, %v2752_v6  ;;  %v3469_v22 = vld [vmem:[#allocation36_spill] sm:$0xff] }
 0x179   : > { %v1133_v32 = vadd.f32 %v1081_v18, %v1001_v34 }
 0x17a   : > { %2074 = vmatmul.msk.bf16.gmra.mxu1 %vm434_vm1, %v2639_v27  ;;  %v1226_v56 = vpop.f32.mrf.mxu0 }
 0x17b   : > { %2094 = vmatmul.msk.bf16.gmra.mxu2 %vm434_vm1, %v2643_v31  ;;  %v3063_v14 = vadd.f32 %v1223_v13, %v1133_v32 }
 0x17c   : > { %2114 = vmatmul.msk.bf16.gmra.mxu3 %vm434_vm1, %v2292_v39 }
 0x17d   : > { %2134 = vmatmul.msk.bf16.gmra.mxu0 %vm434_vm1, %v2660_v50 }
 0x17e   : > { %v952_v36 = vpop.f32.mrf.mxu2 }
 0x17f   : > { %v681_v5 = vpop.f32.mrf.mxu1  ;;  %v1002_v26 = vadd.f32 %v952_v36, %v680_v10  ;;  %v1084_v48 = vpop.f32.mrf.mxu3  ;;  %v3470_v10 = vld [vmem:[#allocation26_spill] sm:$0xff] }
 0x180   : > { %v682_v31 = vadd.f32 %v681_v5, %v2783_v46  ;;  %v3471_v5 = vld [vmem:[#allocation16_spill] sm:$0xff] }
 0x181   : > { %v1134_v21 = vadd.f32 %v1084_v48, %v1002_v26  ;;  %v3472_v26 = vld [vmem:[#allocation24_spill] sm:$0xff] }
 0x182   : > { %v1228_v27 = vpop.f32.mrf.mxu0 }
 0x183   : > { %v3070_v29 = vadd.f32 %v1226_v56, %v1134_v21  ;;  %v3473_v21 = vld [vmem:[#allocation29_spill] sm:$0xff] }
 0x186   : > { %v954_v11 = vpop.f32.mrf.mxu2 }
 0x187   : > { %v684_v20 = vpop.f32.mrf.mxu1  ;;  %v1003_v35 = vadd.f32 %v954_v11, %v682_v31  ;;  %v1086_v7 = vpop.f32.mrf.mxu3 }
 0x188   : > { %v685_v24 = vadd.f32 %v684_v20, %v2805_v55 }
 0x189   : > { %v1135_v39 = vadd.f32 %v1086_v7, %v1003_v35 }
 0x18a   : > { %2075 = vmatmul.msk.bf16.gmra.mxu1 %vm434_vm1, %v2660_v50  ;;  %v1231_v6 = vpop.f32.mrf.mxu0 }
 0x18b   : > { %2095 = vmatmul.msk.bf16.gmra.mxu2 %vm434_vm1, %v2664_v23  ;;  %v3077_v37 = vadd.f32 %v1228_v27, %v1135_v39  ;;  %v3474_v39 = vld [vmem:[#allocation25_spill] sm:$0xff] }
 0x18c   : > { %2115 = vmatmul.msk.bf16.gmra.mxu3 %vm434_vm1, %v2389_v33 }
 0x18d   : > { %2135 = vmatmul.msk.bf16.gmra.mxu0 %vm434_vm1, %v2695_v12 }
 0x18e   : > { %v957_v46 = vpop.f32.mrf.mxu2 }
 0x18f   : > { %v686_v4 = vpop.f32.mrf.mxu1  ;;  %v1004_v52 = vadd.f32 %v957_v46, %v685_v24  ;;  %v1089_v13 = vpop.f32.mrf.mxu3 }
 0x190   : > { %v687_v23 = vadd.f32 %v686_v4, %v3469_v22 }
 0x191   : > { %v1136_v44 = vadd.f32 %v1089_v13, %v1004_v52 }
 0x192   : > { %v1233_v50 = vpop.f32.mrf.mxu0 }
 0x193   : > { %v3084_v43 = vadd.f32 %v1231_v6, %v1136_v44 }
 0x196   : > { %v959_v34 = vpop.f32.mrf.mxu2 }
 0x197   : > { %v689_v18 = vpop.f32.mrf.mxu1  ;;  %v1005_v32 = vadd.f32 %v959_v34, %v687_v23  ;;  %v1091_v56 = vpop.f32.mrf.mxu3  ;;  %v3476_v23 = vld [vmem:[#allocation22_spill] sm:$0xff]  ;;  %v3477_v34 = vld [vmem:[#allocation27_spill] sm:$0xff] }
 0x198   : > { %v690_v48 = vadd.f32 %v689_v18, %v3472_v26 }
 0x199   : > { %v1137_v33 = vadd.f32 %v1091_v56, %v1005_v32  ;;  %v3478_v32 = vld [vmem:[#allocation33_spill] sm:$0xff] }
 0x19a   : > { %2076 = vmatmul.msk.bf16.gmra.mxu1 %vm434_vm1, %v2695_v12  ;;  %v1236_v55 = vpop.f32.mrf.mxu0 }
 0x19b   : > { %2096 = vmatmul.msk.bf16.gmra.mxu2 %vm434_vm1, %v3470_v10  ;;  %v3091_v36 = vadd.f32 %v1233_v50, %v1137_v33  ;;  %v3475_v50 = vld [vmem:[#allocation30_spill] sm:$0xff] }
 0x19c   : > { %2116 = vmatmul.msk.bf16.gmra.mxu3 %vm434_vm1, %v3471_v5 }
 0x19d   : > { %2136 = vmatmul.msk.bf16.gmra.mxu0 %vm434_vm1, %v3473_v21 }
 0x19e   : > { %v962_v27 = vpop.f32.mrf.mxu2 }
 0x19f   : > { %v691_v31 = vpop.f32.mrf.mxu1  ;;  %v1006_v11 = vadd.f32 %v962_v27, %v690_v48  ;;  %v1094_v20 = vpop.f32.mrf.mxu3 }
 0x1a0   : > { %v692_v6 = vadd.f32 %v691_v31, %v3474_v39 }
 0x1a1   : > { %v1138_v35 = vadd.f32 %v1094_v20, %v1006_v11 }
 0x1a2   : > { %v1238_v12 = vpop.f32.mrf.mxu0 }
 0x1a3   : > { %v3098_v7 = vadd.f32 %v1236_v55, %v1138_v35 }
 0x1a6   : > { %v964_v24 = vpop.f32.mrf.mxu2 }
 0x1a7   : > { %v694_v46 = vpop.f32.mrf.mxu1  ;;  %v1007_v4 = vadd.f32 %v964_v24, %v692_v6  ;;  %v1096_v52 = vpop.f32.mrf.mxu3  ;;  %v3480_v6 = vld [vmem:[#allocation34_spill] sm:$0xff] }
 0x1a8   : > { %v695_v18 = vadd.f32 %v694_v46, %v3477_v34  ;;  %v3481_v46 = vld [vmem:[#allocation6_spill] sm:$0xff] }
 0x1a9   : > { %v1139_v13 = vadd.f32 %v1096_v52, %v1007_v4  ;;  %v3482_v4 = vld [vmem:[#allocation31_spill] sm:$0xff] }
 0x1aa   : > { %2077 = vmatmul.msk.bf16.gmra.mxu1 %vm434_vm1, %v3473_v21  ;;  %v1241_v44 = vpop.f32.mrf.mxu0  ;;  %v3479_v21 = vld [vmem:[#allocation28_spill] sm:$0xff] }
 0x1ab   : > { %2097 = vmatmul.msk.bf16.gmra.mxu2 %vm434_vm1, %v3475_v50  ;;  %v3105_v22 = vadd.f32 %v1238_v12, %v1139_v13  ;;  %v3483_v13 = vld [vmem:[#allocation38_spill] sm:$0xff] }
 0x1ac   : > { %2117 = vmatmul.msk.bf16.gmra.mxu3 %vm434_vm1, %v3476_v23 }
 0x1ad   : > { %2137 = vmatmul.msk.bf16.gmra.mxu0 %vm434_vm1, %v3478_v32 }
 0x1ae   : > { %v967_v56 = vpop.f32.mrf.mxu2 }
 0x1af   : > { %v696_v33 = vpop.f32.mrf.mxu1  ;;  %v1008_v55 = vadd.f32 %v967_v56, %v695_v18  ;;  %v1099_v10 = vpop.f32.mrf.mxu3 }
 0x1b0   : > { %v697_v27 = vadd.f32 %v696_v33, %v3479_v21  ;;  %v3484_v33 = vld [vmem:[#allocation32_spill] sm:$0xff] }
 0x1b1   : > { %v1140_v5 = vadd.f32 %v1099_v10, %v1008_v55 }
 0x1b2   : > { %v1243_v26 = vpop.f32.mrf.mxu0 }
 0x1b3   : > { %v3112_v48 = vadd.f32 %v1241_v44, %v1140_v5 }
 0x1b6   : > { %v969_v31 = vpop.f32.mrf.mxu2 }
 0x1b7   : > { %v699_v11 = vpop.f32.mrf.mxu1  ;;  %v1009_v20 = vadd.f32 %v969_v31, %v697_v27  ;;  %v1101_v35 = vpop.f32.mrf.mxu3 }
 0x1b8   : > { %v700_v52 = vadd.f32 %v699_v11, %v3482_v4 }
 0x1b9   : > { %v1141_v12 = vadd.f32 %v1101_v35, %v1009_v20  ;;  %v3485_v20 = vld [vmem:[#allocation11_spill] sm:$0xff] }
 0x1ba   : > { %2078 = vmatmul.msk.bf16.gmra.mxu1 %vm434_vm1, %v3478_v32  ;;  %v1246_v39 = vpop.f32.mrf.mxu0  ;;  %v3486_v35 = vld [vmem:[#allocation35_spill] sm:$0xff] }
 0x1bb   : > { %2098 = vmatmul.msk.bf16.gmra.mxu2 %vm434_vm1, %v3480_v6  ;;  %v3119_v24 = vadd.f32 %v1243_v26, %v1141_v12 }
 0x1bc   : > { %2118 = vmatmul.msk.bf16.gmra.mxu3 %vm434_vm1, %v3481_v46 }
 0x1bd   : > { %2138 = vmatmul.msk.bf16.gmra.mxu0 %vm434_vm1, %v3483_v13 }
 0x1be   : > { %v972_v44 = vpop.f32.mrf.mxu2 }
 0x1bf   : > { %v701_v50 = vpop.f32.mrf.mxu1  ;;  %v1010_v23 = vadd.f32 %v972_v44, %v700_v52  ;;  %v1104_v34 = vpop.f32.mrf.mxu3 }
 0x1c0   : > { %v702_v55 = vadd.f32 %v701_v50, %v3484_v33  ;;  %v3487_v50 = vld [vmem:[#allocation37_spill] sm:$0xff] }
 0x1c1   : > { %v1142_v18 = vadd.f32 %v1104_v34, %v1010_v23 }
 0x1c2   : > { %v1248_v32 = vpop.f32.mrf.mxu0 }
 0x1c3   : > { %v3126_v56 = vadd.f32 %v1246_v39, %v1142_v18 }
 0x1c6   : > { %v974_v10 = vpop.f32.mrf.mxu2 }
 0x1c7   : > { %v704_v5 = vpop.f32.mrf.mxu1  ;;  %v1011_v26 = vadd.f32 %v974_v10, %v702_v55  ;;  %v1106_v21 = vpop.f32.mrf.mxu3 }
 0x1c8   : > { %v705_v12 = vadd.f32 %v704_v5, %v3486_v35 }
 0x1c9   : > { %v1143_v27 = vadd.f32 %v1106_v21, %v1011_v26 }
 0x1ca   : > { %2079 = vmatmul.msk.bf16.gmra.mxu1 %vm434_vm1, %v3483_v13  ;;  %v1251_v31 = vpop.f32.mrf.mxu0 }
 0x1cb   : > { %2099 = vmatmul.msk.bf16.gmra.mxu2 %vm434_vm1, %v2827_v25  ;;  %v3133_v11 = vadd.f32 %v1248_v32, %v1143_v27 }
 0x1cc   : > { %2119 = vmatmul.msk.bf16.gmra.mxu3 %vm434_vm1, %v3485_v20  ;;  %v3155_v20 = vld [vmem:[#allocation2] ss:$0 sm:$0xff] }
 0x1cd   : > { %2139 = vmatmul.msk.bf16.gmra.mxu0 %vm434_vm1, %v2846_v47 }
 0x1ce   : > { %v977_v39 = vpop.f32.mrf.mxu2 }
 0x1cf   : > { %v706_v6 = vpop.f32.mrf.mxu1  ;;  %v1012_v46 = vadd.f32 %v977_v39, %v705_v12  ;;  %v1109_v4 = vpop.f32.mrf.mxu3 }
 0x1d0   : > { %v707_v25 = vadd.f32 %v706_v6, %v3487_v50  ;;  %v3488_v50 = vld [vmem:[#allocation39_spill] sm:$0xff] }
 0x1d1   : > { %v1144_v52 = vadd.f32 %v1109_v4, %v1012_v46 }
 0x1d2   : > { %v1253_v13 = vpop.f32.mrf.mxu0 }
 0x1d3   : > { %v3140_v44 = vadd.f32 %v1251_v31, %v1144_v52 }
 0x1d6   : > { %v979_v23 = vpop.f32.mrf.mxu2 }
 0x1d7   : > { %v1315_v34 = vpop.f32.mrf.mxu1  ;;  %v1013_v18 = vadd.f32 %v979_v23, %v707_v25  ;;  %v1111_v32 = vpop.f32.mrf.mxu3 }
 0x1d8   : > { %v1395_v5 = vadd.f32 %v1315_v34, %v2841_v41 }
 0x1d9   : > { %v1145_v33 = vadd.f32 %v1111_v32, %v1013_v18 }
 0x1da   : > { %2080 = vmatmul.msk.bf16.gmra.mxu1 %vm434_vm1, %v2846_v47  ;;  %v1728_v55 = vpop.f32.mrf.mxu0 }
 0x1db   : > { %2100 = vmatmul.msk.bf16.gmra.mxu2 %vm434_vm1, %v2850_v57  ;;  %v3147_v10 = vadd.f32 %v1253_v13, %v1145_v33 }
 0x1dc   : > { %2120 = vmatmul.msk.bf16.gmra.mxu3 %vm434_vm1, %v2471_v49 }
 0x1dd   : > { %2140 = vmatmul.msk.bf16.gmra.mxu0 %vm434_vm1, %v2871_v42 }
 0x1de   : > { %v1447_v26 = vpop.f32.mrf.mxu2 }
 0x1df   : > { %v1317_v21 = vpop.f32.mrf.mxu1  ;;  %v1527_v27 = vadd.f32 %v1447_v26, %v1395_v5  ;;  %v1589_v31 = vpop.f32.mrf.mxu3 }
 0x1e0   : > { %v1396_v41 = vadd.f32 %v1317_v21, %v2856_v59 }
 0x1e1   : > { %v1669_v47 = vadd.f32 %v1589_v31, %v1527_v27 }
 0x1e2   : > { %v1730_v57 = vpop.f32.mrf.mxu0 }
 0x1e3   : > { %v1808_v35 = vadd.f32 %v1728_v55, %v1669_v47 }
 0x1e5   : > { %v1844_v49 = vadd.f32 %v3155_v20, %v1808_v35 }
 0x1e6   : > { %v1449_v12 = vpop.f32.mrf.mxu2 }
 0x1e7   : > { %v1320_v39 = vpop.f32.mrf.mxu1  ;;  %1877 = vst.msk [vmem:[%s3160_s18] sm:$0xff] %vm1876_vm3, %v1844_v49  ;;  %v1528_v6 = vadd.f32 %v1449_v12, %v1396_v41  ;;  %v1591_v46 = vpop.f32.mrf.mxu3  ;;  %v3490_v49 = vld [vmem:[#allocation7_spill] sm:$0xff] }
 0x1e8   : > { %v1397_v25 = vadd.f32 %v1320_v39, %v3488_v50  ;;  %v3491_v12 = vld [vmem:[#allocation19_spill] sm:$0xff] }
 0x1e9   : > { %v1670_v4 = vadd.f32 %v1591_v46, %v1528_v6  ;;  %v3492_v6 = vld [vmem:[#allocation4_spill] sm:$0xff] }
 0x1ea   : > { %2081 = vmatmul.msk.bf16.gmra.mxu1 %vm434_vm1, %v2871_v42  ;;  %v1733_v13 = vpop.f32.mrf.mxu0 }
 0x1eb   : > { %v1809_v52 = vadd.f32 %v1730_v57, %v1670_v4  ;;  %2101 = vmatmul.msk.bf16.gmra.mxu2 %vm434_vm1, %v2875_v45 }
 0x1ec   : > { %2121 = vmatmul.msk.bf16.gmra.mxu3 %vm434_vm1, %v2567_v40  ;;  %v3489_v40 = vld [vmem:[#allocation18_spill] sm:$0xff] }
 0x1ed   : > { %v1845_v59 = vadd.f32 %v3155_v20, %v1809_v52  ;;  %2141 = vmatmul.msk.bf16.gmra.mxu0 %vm434_vm1, %v2896_v54 }
 0x1ee   : > { %v1452_v23 = vpop.f32.mrf.mxu2 }
 0x1ef   : > { %v1322_v34 = vpop.f32.mrf.mxu1  ;;  %1878 = vst.msk [vmem:[%s3160_s18 + $0x8] sm:$0xff] %vm1876_vm3, %v1845_v59  ;;  %v1529_v42 = vadd.f32 %v1452_v23, %v1397_v25  ;;  %v1594_v18 = vpop.f32.mrf.mxu3  ;;  %v3493_v25 = vld [vmem:[#allocation20_spill] sm:$0xff] }
 0x1f0   : > { %v1398_v5 = vadd.f32 %v1322_v34, %v3489_v40  ;;  %v3494_v40 = vld [vmem:[#allocation12_spill] sm:$0xff] }
 0x1f1   : > { %v1671_v32 = vadd.f32 %v1594_v18, %v1529_v42 }
 0x1f2   : > { %v1735_v45 = vpop.f32.mrf.mxu0 }
 0x1f3   : > { %v1810_v33 = vadd.f32 %v1733_v13, %v1671_v32 }
 0x1f5   : > { %v1846_v55 = vadd.f32 %v3155_v20, %v1810_v33 }
 0x1f6   : > { %v1454_v26 = vpop.f32.mrf.mxu2 }
 0x1f7   : > { %v1325_v21 = vpop.f32.mrf.mxu1  ;;  %1879 = vst.msk [vmem:[%s3160_s18 + $0x10] sm:$0xff] %vm1876_vm3, %v1846_v55  ;;  %v1530_v27 = vadd.f32 %v1454_v26, %v1398_v5  ;;  %v1596_v31 = vpop.f32.mrf.mxu3  ;;  %v3495_v26 = vld [vmem:[#allocation3_spill] sm:$0xff] }
 0x1f8   : > { %v1399_v39 = vadd.f32 %v1325_v21, %v3491_v12  ;;  %v3496_v12 = vld [vmem:[#allocation5_spill] sm:$0xff] }
 0x1f9   : > { %v1672_v47 = vadd.f32 %v1596_v31, %v1530_v27 }
 0x1fa   : > { %2082 = vmatmul.msk.bf16.gmra.mxu1 %vm434_vm1, %v2896_v54  ;;  %v1738_v57 = vpop.f32.mrf.mxu0 }
 0x1fb   : > { %v1811_v35 = vadd.f32 %v1735_v45, %v1672_v47  ;;  %2102 = vmatmul.msk.bf16.gmra.mxu2 %vm434_vm1, %v2900_v16 }
 0x1fc   : > { %2122 = vmatmul.msk.bf16.gmra.mxu3 %vm434_vm1, %v3490_v49 }
 0x1fd   : > { %v1847_v41 = vadd.f32 %v3155_v20, %v1811_v35  ;;  %2142 = vmatmul.msk.bf16.gmra.mxu0 %vm434_vm1, %v3492_v6 }
 0x1fe   : > { %v1457_v46 = vpop.f32.mrf.mxu2 }
 0x1ff   : > { %v1327_v4 = vpop.f32.mrf.mxu1  ;;  %1880 = vst.msk [vmem:[%s3160_s18 + $0x18] sm:$0xff] %vm1876_vm3, %v1847_v41  ;;  %v1531_v54 = vadd.f32 %v1457_v46, %v1399_v39  ;;  %v1599_v52 = vpop.f32.mrf.mxu3 }
 0x200   : > { %v1400_v23 = vadd.f32 %v1327_v4, %v3493_v25  ;;  %v1288_v4 = vrot.slane %v2991_v28, 2 }
 0x201   : > { %v1673_v13 = vadd.f32 %v1599_v52, %v1531_v54  ;;  %v1289_v54 = vrot.slane %v2994_v8, 2 }
 0x202   : > { %v1740_v16 = vpop.f32.mrf.mxu0 }
 0x203   : > { %v1812_v59 = vadd.f32 %v1738_v57, %v1673_v13  ;;  %v1290_v28 = vsel %vm709_vm2, %v1288_v4, %v1289_v54 }
 0x205   : > { %v1848_v50 = vadd.f32 %v3155_v20, %v1812_v59 }
 0x206   : > { %v1459_v34 = vpop.f32.mrf.mxu2 }
 0x207   : > { %v1330_v42 = vpop.f32.mrf.mxu1  ;;  %1881 = vst.msk [vmem:[%s3160_s18 + $0x20] sm:$0xff] %vm1876_vm3, %v1848_v50  ;;  %v1532_v18 = vadd.f32 %v1459_v34, %v1400_v23  ;;  %v1601_v32 = vpop.f32.mrf.mxu3 }
 0x208   : > { %v1401_v21 = vadd.f32 %v1330_v42, %v3495_v26 }
 0x209   : > { %v1674_v33 = vadd.f32 %v1601_v32, %v1532_v18 }
 0x20a   : > { %2083 = vmatmul.msk.bf16.gmra.mxu1 %vm434_vm1, %v3492_v6  ;;  %v1743_v55 = vpop.f32.mrf.mxu0 }
 0x20b   : > { %v1813_v45 = vadd.f32 %v1740_v16, %v1674_v33  ;;  %2103 = vmatmul.msk.bf16.gmra.mxu2 %vm434_vm1, %v2924_v62  ;;  %v1291_v16 = vrot.slane %v2997_v63, 2 }
 0x20c   : > { %2123 = vmatmul.msk.bf16.gmra.mxu3 %vm434_vm1, %v3494_v40  ;;  %v3498_v40 = vld [vmem:[#allocation9_spill] sm:$0xff] }
 0x20d   : > { %v1849_v5 = vadd.f32 %v3155_v20, %v1813_v45  ;;  %2143 = vmatmul.msk.bf16.gmra.mxu0 %vm434_vm1, %v2945_v19  ;;  %v1292_v8 = vsel %vm709_vm2, %v1289_v54, %v1291_v16 }
 0x20e   : > { %v1462_v27 = vpop.f32.mrf.mxu2  ;;  %v3225_v23 = vpack.c.bf16 %v1292_v8, %v1290_v28 }
 0x20f   : > { %v1332_v31 = vpop.f32.mrf.mxu1  ;;  %1882 = vst.msk [vmem:[%s3160_s18 + $0x28] sm:$0xff] %vm1876_vm3, %v1849_v5  ;;  %v1533_v47 = vadd.f32 %v1462_v27, %v1401_v21  ;;  %v1604_v35 = vpop.f32.mrf.mxu3 }
 0x210   : > { %v1402_v39 = vadd.f32 %v1332_v31, %v3496_v12 }
 0x211   : > { %v1675_v57 = vadd.f32 %v1604_v35, %v1533_v47 }
 0x212   : > { %v1745_v62 = vpop.f32.mrf.mxu0 }
 0x213   : > { %v1814_v49 = vadd.f32 %v1743_v55, %v1675_v57 }
 0x215   : > { %v1850_v41 = vadd.f32 %v3155_v20, %v1814_v49  ;;  %v3499_v49 = vld [vmem:[#allocation23_spill] sm:$0xff] }
 0x216   : > { %v1464_v6 = vpop.f32.mrf.mxu2 }
 0x217   : > { %v1335_v46 = vpop.f32.mrf.mxu1  ;;  %1883 = vst.msk [vmem:[%s3160_s18 + $0x30] sm:$0xff] %vm1876_vm3, %v1850_v41  ;;  %v1534_v52 = vadd.f32 %v1464_v6, %v1402_v39  ;;  %v1606_v13 = vpop.f32.mrf.mxu3  ;;  %v3500_v41 = vld [vmem:[#allocation10_spill] sm:$0xff] }
 0x219   : > { %v1676_v59 = vadd.f32 %v1606_v13, %v1534_v52  ;;  %v3501_v13 = vld [vmem:[#allocation13_spill] sm:$0xff] }
 0x21a   : > { %2084 = vmatmul.msk.bf16.gmra.mxu1 %vm434_vm1, %v2945_v19  ;;  %v1748_v25 = vpop.f32.mrf.mxu0  ;;  %v3497_v19 = vld [vmem:[#allocation8_spill] sm:$0xff] }
 0x21b   : > { %v1815_v50 = vadd.f32 %v1745_v62, %v1676_v59  ;;  %2104 = vmatmul.msk.bf16.gmra.mxu2 %vm434_vm1, %v2949_v0  ;;  %v1403_v42 = vadd.f32 %v1335_v46, %v3497_v19 }
 0x21c   : > { %2124 = vmatmul.msk.bf16.gmra.mxu3 %vm434_vm1, %v3464_v60 }
 0x21d   : > { %v1851_v34 = vadd.f32 %v3155_v20, %v1815_v50  ;;  %2144 = vmatmul.msk.bf16.gmra.mxu0 %vm434_vm1, %v2970_v53 }
 0x21e   : > { %v1467_v63 = vpop.f32.mrf.mxu2 }
 0x21f   : > { %v1337_v18 = vpop.f32.mrf.mxu1  ;;  %1884 = vst.msk [vmem:[%s3160_s18 + $0x38] sm:$0xff] %vm1876_vm3, %v1851_v34  ;;  %v1535_v0 = vadd.f32 %v1467_v63, %v1403_v42  ;;  %v1609_v32 = vpop.f32.mrf.mxu3 }
 0x220   : > { %v1404_v5 = vadd.f32 %v1337_v18, %v3498_v40 }
 0x221   : > { %v1677_v33 = vadd.f32 %v1609_v32, %v1535_v0  ;;  %v225_v32 = vld [vmem:[%s2248_s17 + $0x198] sm:$0xff] }
 0x222   : > { %v1750_v55 = vpop.f32.mrf.mxu0 }
 0x223   : > { %v1816_v45 = vadd.f32 %v1748_v25, %v1677_v33  ;;  %v226_v33 = vld [vmem:[%s2248_s17 + $0x1a0] sm:$0xff] }
 0x225   : > { %v1852_v60 = vadd.f32 %v3155_v20, %v1816_v45 }
 0x226   : > { %v1469_v26 = vpop.f32.mrf.mxu2 }
 0x227   : > { %v1340_v21 = vpop.f32.mrf.mxu1  ;;  %1885 = vst.msk [vmem:[%s3160_s18 + $0x40] sm:$0xff] %vm1876_vm3, %v1852_v60  ;;  %v1536_v27 = vadd.f32 %v1469_v26, %v1404_v5  ;;  %v1611_v31 = vpop.f32.mrf.mxu3  ;;  %v1562_v60 = vrot.slane %v225_v32, 1 }
 0x228   : > { %v1405_v12 = vadd.f32 %v1340_v21, %v3500_v41  ;;  %v1702_v21 = vrot.slane %v226_v33, 2 }
 0x229   : > { %v1678_v47 = vadd.f32 %v1611_v31, %v1536_v27 }
 0x22a   : > { %2085 = vmatmul.msk.bf16.gmra.mxu1 %vm434_vm1, %v2970_v53  ;;  %v1753_v57 = vpop.f32.mrf.mxu0 }
 0x22b   : > { %v1817_v35 = vadd.f32 %v1750_v55, %v1678_v47  ;;  %2105 = vmatmul.msk.bf16.gmra.mxu2 %vm434_vm1, %v2974_v58 }
 0x22c   : > { %2125 = vmatmul.msk.bf16.gmra.mxu3 %vm434_vm1, %v3499_v49 }
 0x22d   : > { %v1853_v62 = vadd.f32 %v3155_v20, %v1817_v35  ;;  %2145 = vmatmul.msk.bf16.gmra.mxu0 %vm434_vm1, %v3007_v30 }
 0x22e   : > { %v1472_v39 = vpop.f32.mrf.mxu2 }
 0x22f   : > { %v1342_v6 = vpop.f32.mrf.mxu1  ;;  %1886 = vst.msk [vmem:[%s3160_s18 + $0x48] sm:$0xff] %vm1876_vm3, %v1853_v62  ;;  %v1537_v53 = vadd.f32 %v1472_v39, %v1405_v12  ;;  %v1614_v46 = vpop.f32.mrf.mxu3  ;;  %v1432_v39 = vpack.c.bf16 %v226_v33, %v225_v32 }
 0x230   : > { %v1406_v59 = vadd.f32 %v1342_v6, %v3501_v13 }
 0x231   : > { %v1679_v4 = vadd.f32 %v1614_v46, %v1537_v53 }
 0x232   : > { %v1755_v58 = vpop.f32.mrf.mxu0 }
 0x233   : > { %v1818_v54 = vadd.f32 %v1753_v57, %v1679_v4 }
 0x235   : > { %v1854_v52 = vadd.f32 %v3155_v20, %v1818_v54 }
 0x236   : > { %v1474_v16 = vpop.f32.mrf.mxu2 }
 0x237   : > { %v1345_v50 = vpop.f32.mrf.mxu1  ;;  %1887 = vst.msk [vmem:[%s3160_s18 + $0x50] sm:$0xff] %vm1876_vm3, %v1854_v52  ;;  %v1538_v25 = vadd.f32 %v1474_v16, %v1406_v59  ;;  %v1616_v28 = vpop.f32.mrf.mxu3 }
 0x238   : > { %v1407_v63 = vadd.f32 %v1345_v50, %v3002_v38  ;;  %v1701_v38 = vrot.slane %v225_v32, 2 }
 0x239   : > { %v1680_v8 = vadd.f32 %v1616_v28, %v1538_v25 }
 0x23a   : > { %2086 = vmatmul.msk.bf16.gmra.mxu1 %vm434_vm1, %v3007_v30  ;;  %v1758_v19 = vpop.f32.mrf.mxu0  ;;  %v227_v30 = vld [vmem:[%s2248_s17 + $0x1a8] sm:$0x3]  ;;  %v1703_v6 = vsel %vm709_vm2, %v1701_v38, %v1702_v21 }
 0x23b   : > { %v1819_v34 = vadd.f32 %v1755_v58, %v1680_v8  ;;  %2106 = vmatmul.msk.bf16.gmra.mxu2 %vm434_vm1, %v3013_v3  ;;  %v1565_v40 = vrot.slane %v227_v30, 1  ;;  %v1704_v27 = vrot.slane %v227_v30, 2 }
 0x23c   : > { %2126 = vmatmul.msk.bf16.gmra.mxu3 %vm434_vm1, %v3017_v2  ;;  %v1563_v2 = vrot.slane %v226_v33, 1 }
 0x23d   : > { %v1855_v42 = vadd.f32 %v3155_v20, %v1819_v34  ;;  %2146 = vmatmul.msk.bf16.gmra.mxu0 %vm434_vm1, %v3225_v23  ;;  %v1705_v53 = vsel %vm709_vm2, %v1702_v21, %v1704_v27 }
 0x23e   : > { %v1477_v18 = vpop.f32.mrf.mxu2  ;;  %v1564_v35 = vsel %vm298_vm0, %v1562_v60, %v1563_v2  ;;  %v1566_v57 = vsel %vm298_vm0, %v1563_v2, %v1565_v40 }
 0x23f   : > { %v1347_v0 = vpop.f32.mrf.mxu1  ;;  %1888 = vst.msk [vmem:[%s3160_s18 + $0x58] sm:$0xff] %vm1876_vm3, %v1855_v42  ;;  %v1539_v45 = vadd.f32 %v1477_v18, %v1407_v63  ;;  %v1619_v55 = vpop.f32.mrf.mxu3  ;;  %v1574_v46 = vpack.c.bf16 %v1566_v57, %v1564_v35 }
 0x240   : > { %v1408_v47 = vadd.f32 %v1347_v0, %v3021_v61  ;;  %v1713_v61 = vpack.c.bf16 %v1705_v53, %v1703_v6 }
 0x241   : > { %v1681_v3 = vadd.f32 %v1619_v55, %v1539_v45 }
 0x242   : > { %v1760_v26 = vpop.f32.mrf.mxu0 }
 0x243   : > { %v1820_v5 = vadd.f32 %v1758_v19, %v1681_v3 }
 0x245   : > { %v1856_v31 = vadd.f32 %v3155_v20, %v1820_v5 }
 0x246   : > { %v1479_v49 = vpop.f32.mrf.mxu2 }
 0x247   : > { %v1350_v62 = vpop.f32.mrf.mxu1  ;;  %1889 = vst.msk [vmem:[%s3160_s18 + $0x60] sm:$0xff] %vm1876_vm3, %v1856_v31  ;;  %v1540_v41 = vadd.f32 %v1479_v49, %v1408_v47  ;;  %v1621_v12 = vpop.f32.mrf.mxu3 }
 0x248   : > { %v1409_v13 = vadd.f32 %v1350_v62, %v3028_v17 }
 0x249   : > { %v1682_v4 = vadd.f32 %v1621_v12, %v1540_v41 }
 0x24a   : > { %2087 = vmatmul.msk.bf16.gmra.mxu1 %vm434_vm1, %v3225_v23  ;;  %v1763_v58 = vpop.f32.mrf.mxu0 }
 0x24b   : > { %v1821_v54 = vadd.f32 %v1760_v26, %v1682_v4  ;;  %2107 = vmatmul.msk.bf16.gmra.mxu2 %vm434_vm1, %v1432_v39 }
 0x24c   : > { %2127 = vmatmul.msk.bf16.gmra.mxu3 %vm434_vm1, %v1574_v46 }
 0x24d   : > { %v1857_v52 = vadd.f32 %v3155_v20, %v1821_v54  ;;  %2147 = vmatmul.msk.bf16.gmra.mxu0 %vm434_vm1, %v1713_v61 }
 0x24e   : > { %v1482_v59 = vpop.f32.mrf.mxu2 }
 0x24f   : > { %v1352_v16 = vpop.f32.mrf.mxu1  ;;  %1890 = vst.msk [vmem:[%s3160_s18 + $0x68] sm:$0xff] %vm1876_vm3, %v1857_v52  ;;  %v1541_v50 = vadd.f32 %v1482_v59, %v1409_v13  ;;  %v1624_v23 = vpop.f32.mrf.mxu3 }
 0x250   : > { %v1410_v19 = vadd.f32 %v1352_v16, %v3035_v1 }
 0x251   : > { %v1683_v25 = vadd.f32 %v1624_v23, %v1541_v50 }
 0x252   : > { %v1765_v8 = vpop.f32.mrf.mxu0 }
 0x253   : > { %v1822_v28 = vadd.f32 %v1763_v58, %v1683_v25 }
 0x255   : > { %v1858_v34 = vadd.f32 %v3155_v20, %v1822_v28 }
 0x256   : > { %v1484_v42 = vpop.f32.mrf.mxu2 }
 0x257   : > { %v1355_v63 = vpop.f32.mrf.mxu1  ;;  %1891 = vst.msk [vmem:[%s3160_s18 + $0x70] sm:$0xff] %vm1876_vm3, %v1858_v34  ;;  %v1542_v17 = vadd.f32 %v1484_v42, %v1410_v19  ;;  %v1626_v18 = vpop.f32.mrf.mxu3 }
 0x258   : > { %v1411_v45 = vadd.f32 %v1355_v63, %v3042_v9 }
 0x259   : > { %v1684_v0 = vadd.f32 %v1626_v18, %v1542_v17 }
 0x25a   : > { %v1768_v33 = vpop.f32.mrf.mxu0 }
 0x25b   : > { %v1823_v32 = vadd.f32 %v1765_v8, %v1684_v0 }
 0x25d   : > { %v1859_v30 = vadd.f32 %v3155_v20, %v1823_v32 }
 0x25e   : > { %v1487_v55 = vpop.f32.mrf.mxu2 }
 0x25f   : > { %v1357_v3 = vpop.f32.mrf.mxu1  ;;  %1892 = vst.msk [vmem:[%s3160_s18 + $0x78] sm:$0xff] %vm1876_vm3, %v1859_v30  ;;  %v1543_v60 = vadd.f32 %v1487_v55, %v1411_v45  ;;  %v1629_v1 = vpop.f32.mrf.mxu3 }
 0x260   : > { %v1412_v38 = vadd.f32 %v1357_v3, %v3049_v15 }
 0x261   : > { %v1685_v2 = vadd.f32 %v1629_v1, %v1543_v60 }
 0x262   : > { %v1770_v5 = vpop.f32.mrf.mxu0 }
 0x263   : > { %v1824_v40 = vadd.f32 %v1768_v33, %v1685_v2 }
 0x265   : > { %v1860_v26 = vadd.f32 %v3155_v20, %v1824_v40 }
 0x266   : > { %v1489_v21 = vpop.f32.mrf.mxu2 }
 0x267   : > { %v1360_v27 = vpop.f32.mrf.mxu1  ;;  %1893 = vst.msk [vmem:[%s3160_s18 + $0x80] sm:$0xff] %vm1876_vm3, %v1860_v26  ;;  %v1544_v31 = vadd.f32 %v1489_v21, %v1412_v38  ;;  %v1631_v9 = vpop.f32.mrf.mxu3 }
 0x268   : > { %v1413_v62 = vadd.f32 %v1360_v27, %v3056_v51 }
 0x269   : > { %v1686_v47 = vadd.f32 %v1631_v9, %v1544_v31 }
 0x26a   : > { %v1773_v57 = vpop.f32.mrf.mxu0 }
 0x26b   : > { %v1825_v35 = vadd.f32 %v1770_v5, %v1686_v47 }
 0x26d   : > { %v1861_v49 = vadd.f32 %v3155_v20, %v1825_v35 }
 0x26e   : > { %v1492_v41 = vpop.f32.mrf.mxu2 }
 0x26f   : > { %v1362_v12 = vpop.f32.mrf.mxu1  ;;  %1894 = vst.msk [vmem:[%s3160_s18 + $0x88] sm:$0xff] %vm1876_vm3, %v1861_v49  ;;  %v1545_v39 = vadd.f32 %v1492_v41, %v1413_v62  ;;  %v1634_v15 = vpop.f32.mrf.mxu3 }
 0x270   : > { %v1414_v61 = vadd.f32 %v1362_v12, %v3063_v14 }
 0x271   : > { %v1687_v6 = vadd.f32 %v1634_v15, %v1545_v39 }
 0x272   : > { %v1775_v46 = vpop.f32.mrf.mxu0 }
 0x273   : > { %v1826_v53 = vadd.f32 %v1773_v57, %v1687_v6 }
 0x275   : > { %v1862_v4 = vadd.f32 %v3155_v20, %v1826_v53 }
 0x276   : > { %v1494_v54 = vpop.f32.mrf.mxu2 }
 0x277   : > { %v1365_v58 = vpop.f32.mrf.mxu1  ;;  %1895 = vst.msk [vmem:[%s3160_s18 + $0x90] sm:$0xff] %vm1876_vm3, %v1862_v4  ;;  %v1546_v52 = vadd.f32 %v1494_v54, %v1414_v61  ;;  %v1636_v51 = vpop.f32.mrf.mxu3 }
 0x278   : > { %v1415_v23 = vadd.f32 %v1365_v58, %v3070_v29 }
 0x279   : > { %v1688_v13 = vadd.f32 %v1636_v51, %v1546_v52 }
 0x27a   : > { %v1778_v16 = vpop.f32.mrf.mxu0 }
 0x27b   : > { %v1827_v59 = vadd.f32 %v1775_v46, %v1688_v13 }
 0x27d   : > { %v1863_v50 = vadd.f32 %v3155_v20, %v1827_v59 }
 0x27e   : > { %v1497_v25 = vpop.f32.mrf.mxu2 }
 0x27f   : > { %v1367_v28 = vpop.f32.mrf.mxu1  ;;  %1896 = vst.msk [vmem:[%s3160_s18 + $0x98] sm:$0xff] %vm1876_vm3, %v1863_v50  ;;  %v1547_v8 = vadd.f32 %v1497_v25, %v1415_v23  ;;  %v1639_v14 = vpop.f32.mrf.mxu3 }
 0x280   : > { %v1416_v17 = vadd.f32 %v1367_v28, %v3077_v37 }
 0x281   : > { %v1689_v34 = vadd.f32 %v1639_v14, %v1547_v8 }
 0x282   : > { %v1780_v42 = vpop.f32.mrf.mxu0 }
 0x283   : > { %v1828_v19 = vadd.f32 %v1778_v16, %v1689_v34 }
 0x285   : > { %v1864_v63 = vadd.f32 %v3155_v20, %v1828_v19 }
 0x286   : > { %v1499_v18 = vpop.f32.mrf.mxu2 }
 0x287   : > { %v1370_v0 = vpop.f32.mrf.mxu1  ;;  %1897 = vst.msk [vmem:[%s3160_s18 + $0xa0] sm:$0xff] %vm1876_vm3, %v1864_v63  ;;  %v1548_v32 = vadd.f32 %v1499_v18, %v1416_v17  ;;  %v1641_v29 = vpop.f32.mrf.mxu3 }
 0x288   : > { %v1417_v3 = vadd.f32 %v1370_v0, %v3084_v43 }
 0x289   : > { %v1690_v33 = vadd.f32 %v1641_v29, %v1548_v32 }
 0x28a   : > { %v1783_v45 = vpop.f32.mrf.mxu0 }
 0x28b   : > { %v1829_v30 = vadd.f32 %v1780_v42, %v1690_v33 }
 0x28d   : > { %v1865_v55 = vadd.f32 %v3155_v20, %v1829_v30 }
 0x28e   : > { %v1502_v60 = vpop.f32.mrf.mxu2 }
 0x28f   : > { %v1372_v1 = vpop.f32.mrf.mxu1  ;;  %1898 = vst.msk [vmem:[%s3160_s18 + $0xa8] sm:$0xff] %vm1876_vm3, %v1865_v55  ;;  %v1549_v2 = vadd.f32 %v1502_v60, %v1417_v3  ;;  %v1644_v37 = vpop.f32.mrf.mxu3 }
 0x290   : > { %v1418_v21 = vadd.f32 %v1372_v1, %v3091_v36 }
 0x291   : > { %v1691_v40 = vadd.f32 %v1644_v37, %v1549_v2 }
 0x292   : > { %v1785_v26 = vpop.f32.mrf.mxu0 }
 0x293   : > { %v1830_v5 = vadd.f32 %v1783_v45, %v1691_v40 }
 0x295   : > { %v1866_v38 = vadd.f32 %v3155_v20, %v1830_v5 }
 0x296   : > { %v1504_v27 = vpop.f32.mrf.mxu2 }
 0x297   : > { %v1375_v31 = vpop.f32.mrf.mxu1  ;;  %1899 = vst.msk [vmem:[%s3160_s18 + $0xb0] sm:$0xff] %vm1876_vm3, %v1866_v38  ;;  %v1550_v9 = vadd.f32 %v1504_v27, %v1418_v21  ;;  %v1646_v43 = vpop.f32.mrf.mxu3 }
 0x298   : > { %v1419_v62 = vadd.f32 %v1375_v31, %v3098_v7 }
 0x299   : > { %v1692_v47 = vadd.f32 %v1646_v43, %v1550_v9 }
 0x29a   : > { %v1788_v57 = vpop.f32.mrf.mxu0 }
 0x29b   : > { %v1831_v35 = vadd.f32 %v1785_v26, %v1692_v47 }
 0x29d   : > { %v1867_v49 = vadd.f32 %v3155_v20, %v1831_v35 }
 0x29e   : > { %v1507_v41 = vpop.f32.mrf.mxu2 }
 0x29f   : > { %v1377_v12 = vpop.f32.mrf.mxu1  ;;  %1900 = vst.msk [vmem:[%s3160_s18 + $0xb8] sm:$0xff] %vm1876_vm3, %v1867_v49  ;;  %v1551_v39 = vadd.f32 %v1507_v41, %v1419_v62  ;;  %v1649_v36 = vpop.f32.mrf.mxu3 }
 0x2a0   : > { %v1420_v4 = vadd.f32 %v1377_v12, %v3105_v22 }
 0x2a1   : > { %v1693_v15 = vadd.f32 %v1649_v36, %v1551_v39 }
 0x2a2   : > { %v1790_v53 = vpop.f32.mrf.mxu0 }
 0x2a3   : > { %v1832_v6 = vadd.f32 %v1788_v57, %v1693_v15 }
 0x2a5   : > { %v1868_v46 = vadd.f32 %v3155_v20, %v1832_v6 }
 0x2a6   : > { %v1509_v61 = vpop.f32.mrf.mxu2 }
 0x2a7   : > { %v1380_v54 = vpop.f32.mrf.mxu1  ;;  %1901 = vst.msk [vmem:[%s3160_s18 + $0xc0] sm:$0xff] %vm1876_vm3, %v1868_v46  ;;  %v1552_v58 = vadd.f32 %v1509_v61, %v1420_v4  ;;  %v1651_v7 = vpop.f32.mrf.mxu3 }
 0x2a8   : > { %v1421_v16 = vadd.f32 %v1380_v54, %v3112_v48 }
 0x2a9   : > { %v1694_v52 = vadd.f32 %v1651_v7, %v1552_v58 }
 0x2aa   : > { %v1793_v13 = vpop.f32.mrf.mxu0 }
 0x2ab   : > { %v1833_v51 = vadd.f32 %v1790_v53, %v1694_v52 }
 0x2ad   : > { %v1869_v59 = vadd.f32 %v3155_v20, %v1833_v51 }
 0x2ae   : > { %v1512_v50 = vpop.f32.mrf.mxu2 }
 0x2af   : > { %v1382_v23 = vpop.f32.mrf.mxu1  ;;  %1902 = vst.msk [vmem:[%s3160_s18 + $0xc8] sm:$0xff] %vm1876_vm3, %v1869_v59  ;;  %v1553_v25 = vadd.f32 %v1512_v50, %v1421_v16  ;;  %v1654_v22 = vpop.f32.mrf.mxu3 }
 0x2b0   : > { %v1422_v19 = vadd.f32 %v1382_v23, %v3119_v24 }
 0x2b1   : > { %v1695_v28 = vadd.f32 %v1654_v22, %v1553_v25 }
 0x2b2   : > { %v1795_v14 = vpop.f32.mrf.mxu0 }
 0x2b3   : > { %v1834_v8 = vadd.f32 %v1793_v13, %v1695_v28 }
 0x2b5   : > { %v1870_v34 = vadd.f32 %v3155_v20, %v1834_v8 }
 0x2b6   : > { %v1514_v42 = vpop.f32.mrf.mxu2 }
 0x2b7   : > { %v1385_v63 = vpop.f32.mrf.mxu1  ;;  %1903 = vst.msk [vmem:[%s3160_s18 + $0xd0] sm:$0xff] %vm1876_vm3, %v1870_v34  ;;  %v1554_v17 = vadd.f32 %v1514_v42, %v1422_v19  ;;  %v1656_v48 = vpop.f32.mrf.mxu3 }
 0x2b8   : > { %v1423_v33 = vadd.f32 %v1385_v63, %v3126_v56 }
 0x2b9   : > { %v1696_v18 = vadd.f32 %v1656_v48, %v1554_v17 }
 0x2ba   : > { %v1798_v32 = vpop.f32.mrf.mxu0 }
 0x2bb   : > { %v1835_v0 = vadd.f32 %v1795_v14, %v1696_v18 }
 0x2bd   : > { %v1871_v29 = vadd.f32 %v3155_v20, %v1835_v0 }
 0x2be   : > { %v1517_v30 = vpop.f32.mrf.mxu2 }
 0x2bf   : > { %v1387_v45 = vpop.f32.mrf.mxu1  ;;  %1904 = vst.msk [vmem:[%s3160_s18 + $0xd8] sm:$0xff] %vm1876_vm3, %v1871_v29  ;;  %v1555_v55 = vadd.f32 %v1517_v30, %v1423_v33  ;;  %v1659_v24 = vpop.f32.mrf.mxu3 }
 0x2c0   : > { %v1424_v2 = vadd.f32 %v1387_v45, %v3133_v11 }
 0x2c1   : > { %v1697_v3 = vadd.f32 %v1659_v24, %v1555_v55 }
 0x2c2   : > { %v1800_v37 = vpop.f32.mrf.mxu0 }
 0x2c3   : > { %v1836_v60 = vadd.f32 %v1798_v32, %v1697_v3 }
 0x2c5   : > { %v1872_v1 = vadd.f32 %v3155_v20, %v1836_v60 }
 0x2c6   : > { %v1519_v40 = vpop.f32.mrf.mxu2 }
 0x2c7   : > { %1905 = vst.msk [vmem:[%s3160_s18 + $0xe0] sm:$0xff] %vm1876_vm3, %v1872_v1  ;;  %v1556_v5 = vadd.f32 %v1519_v40, %v1424_v2  ;;  %v1661_v26 = vpop.f32.mrf.mxu3  ;;  %v1390_v56 = vpop.f32.mrf.mxu1 }
 0x2c8   : > { %v1425_v31 = vadd.f32 %v1390_v56, %v3140_v44 }
 0x2c9   : > { %v1698_v38 = vadd.f32 %v1661_v26, %v1556_v5 }
 0x2ca   : > { %v1803_v47 = vpop.f32.mrf.mxu0 }
 0x2cb   : > { %v1837_v21 = vadd.f32 %v1800_v37, %v1698_v38 }
 0x2cd   : > { %v1873_v27 = vadd.f32 %v3155_v20, %v1837_v21 }
 0x2ce   : > { %v1522_v9 = vpop.f32.mrf.mxu2 }
 0x2cf   : > { %1906 = vst.msk [vmem:[%s3160_s18 + $0xe8] sm:$0xff] %vm1876_vm3, %v1873_v27  ;;  %v1557_v43 = vadd.f32 %v1522_v9, %v1425_v31  ;;  %v1664_v11 = vpop.f32.mrf.mxu3  ;;  %v1392_v57 = vpop.f32.mrf.mxu1 }
 0x2d0   : > { %v1426_v41 = vadd.f32 %v1392_v57, %v3147_v10 }
 0x2d1   : > { %v1699_v35 = vadd.f32 %v1664_v11, %v1557_v43 }
 0x2d2   : > { %v1805_v15 = vpop.f32.mrf.mxu0 }
 0x2d3   : > { %v1838_v49 = vadd.f32 %v1803_v47, %v1699_v35 }
 0x2d5   : > { %v1874_v62 = vadd.f32 %v3155_v20, %v1838_v49 }
 0x2d6   : > { %v1524_v12 = vpop.f32.mrf.mxu2 }
 0x2d7   : > { %1907 = vst.msk [vmem:[%s3160_s18 + $0xf0] sm:$0xff] %vm1876_vm3, %v1874_v62  ;;  %v1558_v39 = vadd.f32 %v1524_v12, %v1426_v41  ;;  %v1666_v36 = vpop.f32.mrf.mxu3 }
 0x2d9   : > { %v1700_v44 = vadd.f32 %v1666_v36, %v1558_v39 }
 0x2db   : > { %v1839_v6 = vadd.f32 %v1805_v15, %v1700_v44 }
 0x2dd   : > { %v1875_v53 = vadd.f32 %v3155_v20, %v1839_v6 }
 0x2df   : > { %1908 = vst.msk [vmem:[%s3160_s18 + $0xf8] sm:$0xff] %vm1876_vm3, %v1875_v53 }
 0x2e0 PF: > { %s15_s14 = sadd.s32 1, %s2173_s14  }
 0x2e1   : > { %p12_p4 = scmp.ge.s32.totalorder %s15_s14, 4  }
 0x2e3   :  { %14 = sbr.rel (!%p12_p4) target bundleno = 3 (0x3), region = 70 }

</bundles_post_ra>
